<compile_context>
chip_gen: v6e
topology: v6e:2x2x1
jax: 0.10.0
libtpu: 0.0.40
codegen_flags: <defaults>
</compile_context>

<pallas_src>
import functools

import jax
import jax.numpy as jnp
from jax.experimental import pallas as pl
from jax.experimental.pallas import tpu as pltpu


_NEG_SLOPE = -0.2  # nn.LeakyReLU(-0.2), exactly as written in the reference.


def _leaky_relu(x):
    return jnp.where(x >= 0, x, _NEG_SLOPE * x)


# --------------------------------------------------------------------------
# In-kernel building block: 3x3 "same" conv over a (Cin, B*H*W) activation
# --------------------------------------------------------------------------

def _conv3x3_im2col(x, w9_ref, mask_ref, pad_ref, xcol_ref, H, W, data_off):
    """One MXU matmul (Cout, 9*Cin) @ (9*Cin, B*H*W).

    x        : (Cin, B*H*W) bf16 value; channels on sublanes, (b, h, w) on lanes
    w9_ref   : (Cout, 9*Cin) bf16 ref, contraction rows ordered (kh, kw, cin)
    mask_ref : (8, B*H*W) bf16 ref, {0,1} validity mask per non-center tap
    pad_ref  : (C_max, pad_width) bf16 scratch; halos around this layer's
               data slot [data_off, data_off+B*H*W) stay zero for the whole call
    xcol_ref : (9*C_max, B*HW_max) bf16 scratch holding the im2col matrix
    returns  : (Cout, B*H*W) f32 accumulator (bias / activation applied by caller)
    """
    Cin, BHW = x.shape

    # Activation into the pre-zero-haloed scratch (data_off is 128-aligned).
    pad_ref[0:Cin, data_off:data_off + BHW] = x

    # 9 shifted taps -> rows of the im2col scratch.  Shift = dh*W + dw over the
    # flat (b, h, w) lane order; the zero halos absorb top/bottom over-runs of
    # the first/last sample and the precomputed masks zero left/right column
    # wrap plus cross-sample leakage of the dh=+-1 taps.
    k = 0
    m = 0
    for dh in (-1, 0, 1):
        for dw in (-1, 0, 1):
            start = data_off + dh * W + dw
            piece = pad_ref[0:Cin, start:start + BHW]
            if not (dh == 0 and dw == 0):
                piece = piece * mask_ref[m:m + 1, :]
                m += 1
            xcol_ref[k * Cin:(k + 1) * Cin, 0:BHW] = piece
            k += 1

    return jnp.dot(w9_ref[...], xcol_ref[0:9 * Cin, 0:BHW],
                   preferred_element_type=jnp.float32)


def _unet_kernel(*refs, n_conv, n_res, n_sizes, program, B, HW0):
    """Fused VerySimpleUnet forward for the whole (batch-folded) input.

    refs layout:
      [0] x_ref      (cin0, B*HW0)  bf16   input image, channels zero-padded
      [1] bias0_ref  (base, B*HW0)  f32    input-conv bias + per-sample t-embed
      [2] ball_ref   (C_max, n_conv-1) f32 all other conv biases (one column each)
      [3 : 3+n_conv]            conv weights (Cout, 9*Cin)        bf16
      [.. : +n_res]             block-diag 0/1 resample matrices  bf16
      [.. : +n_sizes]           per-size edge masks (8, B*H*W)    bf16
      next                      o_ref (B, base, HW0)              f32
      last two                  pad_ref / xcol_ref VMEM scratch   bf16
    """
    x_ref, bias0_ref, ball_ref = refs[0], refs[1], refs[2]
    w_refs = refs[3:3 + n_conv]
    r_refs = refs[3 + n_conv:3 + n_conv + n_res]
    m_refs = refs[3 + n_conv + n_res:3 + n_conv + n_res + n_sizes]
    o_ref = refs[3 + n_conv + n_res + n_sizes]
    pad_ref, xcol_ref = refs[-2], refs[-1]

    # Zero the halo scratch ONCE; each spatial size has its own fixed column
    # slot, so the halos are never overwritten and need no per-conv re-zero.
    pad_ref[...] = jnp.zeros_like(pad_ref)

    x = x_ref[...]                                         # (cin0, B*HW0) bf16
    for op in program:
        if op[0] == "conv":
            _, idx, H, W, act, size_idx, data_off = op
            acc = _conv3x3_im2col(x, w_refs[idx], m_refs[size_idx],
                                  pad_ref, xcol_ref, H, W, data_off)
            if idx == 0:
                acc = acc + bias0_ref[...]       # conv0 bias + time embedding
            else:
                acc = acc + ball_ref[0:acc.shape[0], idx - 1:idx]
            if act:
                acc = _leaky_relu(acc)
            x = acc.astype(jnp.bfloat16)
        else:  # ("resample", ridx): nearest down/up-sample as a bf16 matmul
            x = jnp.dot(x, r_refs[op[1]][...],
                        preferred_element_type=jnp.float32).astype(jnp.bfloat16)

    for b in range(B):                           # lane-aligned per-sample slabs
        o_ref[b] = x[:, b * HW0:(b + 1) * HW0].astype(o_ref.dtype)


# --------------------------------------------------------------------------
# Wrapper-side helpers (layout plumbing, all static / tiny)
# --------------------------------------------------------------------------

def _w9(w, cin_pad=None):
    """(3,3,Cin,Cout) HWIO -> (Cout, 9*Cin) bf16, rows ordered (kh, kw, cin)."""
    if cin_pad is not None and cin_pad != w.shape[2]:
        w = jnp.pad(w, ((0, 0), (0, 0), (0, cin_pad - w.shape[2]), (0, 0)))
    cout = w.shape[3]
    return jnp.transpose(w, (3, 0, 1, 2)).reshape(cout, -1).astype(jnp.bfloat16)


def _downsample_matrix(S):
    """(S*S, (S//2)^2) 0/1 matrix: nearest-neighbour downsample by 2."""
    So = S // 2
    p = jnp.arange(S * S)[:, None]
    q = jnp.arange(So * So)[None, :]
    src = (q // So) * 2 * S + (q % So) * 2
    return (p == src).astype(jnp.float32)


def _upsample_matrix(S):
    """(S*S, (2S)^2) 0/1 matrix: nearest-neighbour upsample by 2."""
    So = 2 * S
    p = jnp.arange(S * S)[:, None]
    q = jnp.arange(So * So)[None, :]
    src = (q // So // 2) * S + (q % So) // 2
    return (p == src).astype(jnp.float32)


def _edge_masks(H, W, B):
    """{0,1} validity masks, shape (8, B*H*W), one row per non-center 3x3 tap.

    A tap (dh, dw) is invalid where its source pixel falls outside its own
    sample: left/right column wrap within a row, or top/bottom row (which,
    with the batch folded into the lane axis, also covers cross-sample
    leakage of the dh=+-1 shifts)."""
    HW = H * W
    c = jnp.arange(B * HW)
    row = (c % HW) // W
    col = c % W
    rows = []
    for dh in (-1, 0, 1):
        for dw in (-1, 0, 1):
            if dh == 0 and dw == 0:
                continue
            ok = jnp.ones_like(c, dtype=bool)
            if dh == -1:
                ok = ok & (row >= 1)
            elif dh == 1:
                ok = ok & (row <= H - 2)
            if dw == -1:
                ok = ok & (col >= 1)
            elif dw == 1:
                ok = ok & (col <= W - 2)
            rows.append(ok)
    return jnp.stack(rows, axis=0).astype(jnp.bfloat16)


# --------------------------------------------------------------------------
# Forward pass (matches VerySimpleUnet.forward)
# --------------------------------------------------------------------------

def very_simple_unet_forward(params, x_nchw, t):
    """x_nchw: (B, 3, S, S) f32, t: (B,) int32 -> (B, base_hidden, S, S)."""
    B, c_img, H0, W0 = x_nchw.shape
    assert H0 == W0, "square inputs expected (reference uses x.size(-1))"
    base = params["input_conv"][0].shape[-1]
    blocks_num = len(params["down"])
    cin0 = -(-c_img // 8) * 8           # pad image channels to a sublane multiple
    HW0 = H0 * W0
    c_max = max(base * 2 ** blocks_num, cin0)

    # ---- per-spatial-size registry: mask operand + fixed aligned scratch slot
    sizes = {}
    masks = []
    pad_cursor = 0

    def register(S):
        nonlocal pad_cursor
        if S not in sizes:
            halo = S + 1                               # covers |dh*W + dw| <= W+1
            data_off = -(-(pad_cursor + halo) // 128) * 128   # 128-lane aligned
            pad_cursor = data_off + B * S * S + halo
            sizes[S] = (len(masks), data_off)
            masks.append(_edge_masks(S, S, B))
        return sizes[S]

    # ---- static program + constant kernel operands ----
    conv_ws, conv_bs, res_mats, program = [], [], [], []
    si, off = register(H0)
    conv_ws.append(_w9(params["input_conv"][0], cin_pad=cin0))
    program.append(("conv", 0, H0, W0, 0, si, off))       # input conv: no act
    idx, S = 1, H0
    for i in range(blocks_num):                           # down path
        for w, b in params["down"][i]:
            si, off = register(S)
            conv_ws.append(_w9(w))
            conv_bs.append(jnp.asarray(b, jnp.float32))
            program.append(("conv", idx, S, S, 1, si, off))
            idx += 1
        res_mats.append(jnp.kron(jnp.eye(B, dtype=jnp.float32),
                                 _downsample_matrix(S)).astype(jnp.bfloat16))
        program.append(("resample", len(res_mats) - 1))
        S //= 2
    for i in reversed(range(blocks_num)):                 # up path (reversed)
        for w, b in params["up"][i]:
            si, off = register(S)
            conv_ws.append(_w9(w))
            conv_bs.append(jnp.asarray(b, jnp.float32))
            program.append(("conv", idx, S, S, 1, si, off))
            idx += 1
        res_mats.append(jnp.kron(jnp.eye(B, dtype=jnp.float32),
                                 _upsample_matrix(S)).astype(jnp.bfloat16))
        program.append(("resample", len(res_mats) - 1))
        S *= 2

    n_conv, n_res, n_sizes = len(conv_ws), len(res_mats), len(masks)
    pad_width = -(-pad_cursor // 128) * 128

    # All non-input-conv biases consolidated into a single small operand.
    ball = jnp.zeros((c_max, max(1, n_conv - 1)), jnp.float32)
    for j, b in enumerate(conv_bs):
        ball = ball.at[:b.shape[0], j].set(b)

    # ---- batch-dependent operands ----
    # NCHW -> (C, B*H*W): channels on sublanes, (batch, flat spatial) on lanes.
    xf = jnp.transpose(x_nchw.astype(jnp.float32), (1, 0, 2, 3))
    xf = xf.reshape(c_img, B * HW0)
    if cin0 != c_img:
        xf = jnp.pad(xf, ((0, cin0 - c_img), (0, 0)))
    x_op = xf.astype(jnp.bfloat16)
    # Time embedding is fused with the input conv's bias as a per-sample map.
    temb = params["time_embed"][t]                                   # (B, base)
    b0 = (params["input_conv"][1][None, :] + temb).T                 # (base, B)
    bias0 = jnp.broadcast_to(b0[:, :, None], (base, B, HW0))
    bias0 = bias0.reshape(base, B * HW0).astype(jnp.float32)

    operands = [x_op, bias0, ball] + conv_ws + res_mats + masks
    in_specs = [pl.BlockSpec(a.shape, lambda i: (0, 0)) for a in operands]

    out = pl.pallas_call(
        functools.partial(_unet_kernel, n_conv=n_conv, n_res=n_res,
                          n_sizes=n_sizes, program=tuple(program),
                          B=B, HW0=HW0),
        out_shape=jax.ShapeDtypeStruct((B, base, HW0), jnp.float32),
        grid=(1,),
        in_specs=in_specs,
        out_specs=pl.BlockSpec((B, base, HW0), lambda i: (0, 0, 0)),
        scratch_shapes=[pltpu.VMEM((c_max, pad_width), jnp.bfloat16),
                        pltpu.VMEM((9 * c_max, B * HW0), jnp.bfloat16)],
        compiler_params=pltpu.CompilerParams(
            dimension_semantics=("arbitrary",)),
    )(*operands)

    return out.reshape(B, base, H0, W0)     # (C, H*W) slabs are NCHW already


# --------------------------------------------------------------------------
# Parameter init (deterministic, synthetic) + plain-XLA reference
# --------------------------------------------------------------------------

def _conv_params(key, cin, cout):
    kw, kb = jax.random.split(key)
    fan_in = cin * 9
    w = jax.random.normal(kw, (3, 3, cin, cout), jnp.float32) / jnp.sqrt(
        jnp.float32(fan_in))
    # Keep weights bf16-representable: the kernel feeds the MXU in bf16
    # (f32 accumulation), so this makes that cast lossless.
    w = w.astype(jnp.bfloat16).astype(jnp.float32)
    b = jax.random.normal(kb, (cout,), jnp.float32) * 0.01
    return w, b


def init_unet_params(key, num_steps, base_hidden_dim, blocks_num):
    keys = iter(jax.random.split(key, 2 + 4 * blocks_num))
    params = {
        "input_conv": _conv_params(next(keys), 3, base_hidden_dim),
        "time_embed": jax.random.normal(
            next(keys), (num_steps, base_hidden_dim), jnp.float32),
    }
    down, up = [], []
    for i in range(blocks_num):
        lower = base_hidden_dim * (2 ** i)
        higher = lower * 2
        down.append((_conv_params(next(keys), lower, higher),
                     _conv_params(next(keys), higher, higher)))
        up.append((_conv_params(next(keys), higher, lower),
                   _conv_params(next(keys), lower, lower)))
    params["down"] = down
    params["up"] = up
    return params


def unet_reference(params, x_nchw, t):
    """Plain-XLA reference of VerySimpleUnet.forward (for verification)."""
    dn = ("NCHW", "HWIO", "NCHW")

    def conv(x, wb):
        w, b = wb
        y = jax.lax.conv_general_dilated(
            x, w, (1, 1), "SAME", dimension_numbers=dn,
            precision=jax.lax.Precision.HIGHEST)
        return y + b[None, :, None, None]

    x = conv(x_nchw.astype(jnp.float32), params["input_conv"])
    x = x + params["time_embed"][t][:, :, None, None]
    for blk in params["down"]:
        x = _leaky_relu(conv(x, blk[0]))
        x = _leaky_relu(conv(x, blk[1]))
        x = x[:, :, ::2, ::2]
    for blk in reversed(params["up"]):
        x = _leaky_relu(conv(x, blk[0]))
        x = _leaky_relu(conv(x, blk[1]))
        x = jnp.repeat(jnp.repeat(x, 2, axis=2), 2, axis=3)
    return x


if __name__ == "__main__":
    # model config
    num_steps = 10
    base_hidden_dim = 8
    blocks_num = 2
    # input shapes
    B, S = 2, 16

    key = jax.random.PRNGKey(0)
    kp, kx, kt = jax.random.split(key, 3)
    params = init_unet_params(kp, num_steps, base_hidden_dim, blocks_num)
    x = jax.random.normal(kx, (B, 3, S, S), jnp.float32)
    t = jax.random.randint(kt, (B,), 0, num_steps)

    fwd = jax.jit(very_simple_unet_forward)
    out = jax.block_until_ready(fwd(params, x, t))

    assert out.shape == (B, base_hidden_dim, S, S), out.shape
    assert bool(jnp.all(jnp.isfinite(out)))

    # Cross-check against the plain-XLA reference (loose tolerance: the kernel
    # carries activations in bf16 with f32 MXU accumulation).
    ref = unet_reference(params, x, t)
    assert bool(jnp.allclose(out, ref, rtol=1e-1, atol=1e-1)), float(
        jnp.max(jnp.abs(out - ref)))

    print("KERNEL_OK")
</pallas_src>

<mosaic_0001>
module attributes {stable_mosaic.version = 11 : i64} {
  func.func @_unet_kernel(%arg0: i32, %arg1: memref<8x512xbf16, #tpu.memory_space<vmem>>, %arg2: memref<8x512xf32, #tpu.memory_space<vmem>>, %arg3: memref<32x8xf32, #tpu.memory_space<vmem>>, %arg4: memref<8x72xbf16, #tpu.memory_space<vmem>>, %arg5: memref<16x72xbf16, #tpu.memory_space<vmem>>, %arg6: memref<16x144xbf16, #tpu.memory_space<vmem>>, %arg7: memref<32x144xbf16, #tpu.memory_space<vmem>>, %arg8: memref<32x288xbf16, #tpu.memory_space<vmem>>, %arg9: memref<16x288xbf16, #tpu.memory_space<vmem>>, %arg10: memref<16x144xbf16, #tpu.memory_space<vmem>>, %arg11: memref<8x144xbf16, #tpu.memory_space<vmem>>, %arg12: memref<8x72xbf16, #tpu.memory_space<vmem>>, %arg13: memref<512x128xbf16, #tpu.memory_space<vmem>>, %arg14: memref<128x32xbf16, #tpu.memory_space<vmem>>, %arg15: memref<32x128xbf16, #tpu.memory_space<vmem>>, %arg16: memref<128x512xbf16, #tpu.memory_space<vmem>>, %arg17: memref<8x512xbf16, #tpu.memory_space<vmem>>, %arg18: memref<8x128xbf16, #tpu.memory_space<vmem>>, %arg19: memref<8x32xbf16, #tpu.memory_space<vmem>>, %arg20: memref<2x8x256xf32, #tpu.memory_space<vmem>>, %arg21: memref<32x1152xbf16, #tpu.memory_space<vmem>>, %arg22: memref<288x512xbf16, #tpu.memory_space<vmem>>) attributes {dimension_semantics = [#tpu.dimension_semantics<arbitrary>], iteration_bounds = array<i64: 1>, scalar_prefetch = 0 : i64, scratch_operands = 2 : i64, tpu.core_type = #tpu.core_type<tc>, window_params = [{pipeline_mode = #tpu.pipeline_mode<synchronous>, transform_indices = @transform_0, window_bounds = array<i64: 8, 512>}, {pipeline_mode = #tpu.pipeline_mode<synchronous>, transform_indices = @transform_1, window_bounds = array<i64: 8, 512>}, {pipeline_mode = #tpu.pipeline_mode<synchronous>, transform_indices = @transform_2, window_bounds = array<i64: 32, 8>}, {pipeline_mode = #tpu.pipeline_mode<synchronous>, transform_indices = @transform_3, window_bounds = array<i64: 8, 72>}, {pipeline_mode = #tpu.pipeline_mode<synchronous>, transform_indices = @transform_4, window_bounds = array<i64: 16, 72>}, {pipeline_mode = #tpu.pipeline_mode<synchronous>, transform_indices = @transform_5, window_bounds = array<i64: 16, 144>}, {pipeline_mode = #tpu.pipeline_mode<synchronous>, transform_indices = @transform_6, window_bounds = array<i64: 32, 144>}, {pipeline_mode = #tpu.pipeline_mode<synchronous>, transform_indices = @transform_7, window_bounds = array<i64: 32, 288>}, {pipeline_mode = #tpu.pipeline_mode<synchronous>, transform_indices = @transform_8, window_bounds = array<i64: 16, 288>}, {pipeline_mode = #tpu.pipeline_mode<synchronous>, transform_indices = @transform_9, window_bounds = array<i64: 16, 144>}, {pipeline_mode = #tpu.pipeline_mode<synchronous>, transform_indices = @transform_10, window_bounds = array<i64: 8, 144>}, {pipeline_mode = #tpu.pipeline_mode<synchronous>, transform_indices = @transform_11, window_bounds = array<i64: 8, 72>}, {pipeline_mode = #tpu.pipeline_mode<synchronous>, transform_indices = @transform_12, window_bounds = array<i64: 512, 128>}, {pipeline_mode = #tpu.pipeline_mode<synchronous>, transform_indices = @transform_13, window_bounds = array<i64: 128, 32>}, {pipeline_mode = #tpu.pipeline_mode<synchronous>, transform_indices = @transform_14, window_bounds = array<i64: 32, 128>}, {pipeline_mode = #tpu.pipeline_mode<synchronous>, transform_indices = @transform_15, window_bounds = array<i64: 128, 512>}, {pipeline_mode = #tpu.pipeline_mode<synchronous>, transform_indices = @transform_16, window_bounds = array<i64: 8, 512>}, {pipeline_mode = #tpu.pipeline_mode<synchronous>, transform_indices = @transform_17, window_bounds = array<i64: 8, 128>}, {pipeline_mode = #tpu.pipeline_mode<synchronous>, transform_indices = @transform_18, window_bounds = array<i64: 8, 32>}, {pipeline_mode = #tpu.pipeline_mode<synchronous>, transform_indices = @transform_19, window_bounds = array<i64: 2, 8, 256>}]} {
    %cst = arith.constant 0.000000e+00 : bf16
    %0 = vector.broadcast %cst : bf16 to vector<32x1152xbf16>
    %c0 = arith.constant 0 : index
    %c0_0 = arith.constant 0 : index
    %1 = vector.load %arg21[%c0, %c0_0] : memref<32x1152xbf16, #tpu.memory_space<vmem>>, vector<32x1152xbf16>
    tpu.vector_store %arg21[%c0, %c0_0], %0 {strides = array<i32>} : memref<32x1152xbf16, #tpu.memory_space<vmem>>, vector<32x1152xbf16>,
    %c0_1 = arith.constant 0 : index
    %c0_2 = arith.constant 0 : index
    %2 = vector.load %arg1[%c0_1, %c0_2] : memref<8x512xbf16, #tpu.memory_space<vmem>>, vector<8x512xbf16>
    %c0_3 = arith.constant 0 : index
    %c128 = arith.constant 128 : index
    %3 = vector.load %arg21[%c0_3, %c128] : memref<32x1152xbf16, #tpu.memory_space<vmem>>, vector<8x512xbf16>
    tpu.vector_store %arg21[%c0_3, %c128], %2 {strides = array<i32>} : memref<32x1152xbf16, #tpu.memory_space<vmem>>, vector<8x512xbf16>,
    %c0_4 = arith.constant 0 : index
    %c111 = arith.constant 111 : index
    %4 = vector.load %arg21[%c0_4, %c111] : memref<32x1152xbf16, #tpu.memory_space<vmem>>, vector<8x512xbf16>
    %c0_5 = arith.constant 0 : index
    %c0_6 = arith.constant 0 : index
    %5 = vector.load %arg17[%c0_5, %c0_6] : memref<8x512xbf16, #tpu.memory_space<vmem>>, vector<1x512xbf16>
    %6 = vector.broadcast %5 : vector<1x512xbf16> to vector<8x512xbf16>
    %7 = arith.mulf %4, %6 : vector<8x512xbf16>
    %c0_7 = arith.constant 0 : index
    %c0_8 = arith.constant 0 : index
    %8 = vector.load %arg22[%c0_7, %c0_8] : memref<288x512xbf16, #tpu.memory_space<vmem>>, vector<8x512xbf16>
    tpu.vector_store %arg22[%c0_7, %c0_8], %7 {strides = array<i32>} : memref<288x512xbf16, #tpu.memory_space<vmem>>, vector<8x512xbf16>,
    %c0_9 = arith.constant 0 : index
    %c112 = arith.constant 112 : index
    %9 = vector.load %arg21[%c0_9, %c112] : memref<32x1152xbf16, #tpu.memory_space<vmem>>, vector<8x512xbf16>
    %c1 = arith.constant 1 : index
    %c0_10 = arith.constant 0 : index
    %10 = vector.load %arg17[%c1, %c0_10] : memref<8x512xbf16, #tpu.memory_space<vmem>>, vector<1x512xbf16>
    %11 = vector.broadcast %10 : vector<1x512xbf16> to vector<8x512xbf16>
    %12 = arith.mulf %9, %11 : vector<8x512xbf16>
    %c8 = arith.constant 8 : index
    %c0_11 = arith.constant 0 : index
    %13 = vector.load %arg22[%c8, %c0_11] : memref<288x512xbf16, #tpu.memory_space<vmem>>, vector<8x512xbf16>
    tpu.vector_store %arg22[%c8, %c0_11], %12 {strides = array<i32>} : memref<288x512xbf16, #tpu.memory_space<vmem>>, vector<8x512xbf16>,
    %c0_12 = arith.constant 0 : index
    %c113 = arith.constant 113 : index
    %14 = vector.load %arg21[%c0_12, %c113] : memref<32x1152xbf16, #tpu.memory_space<vmem>>, vector<8x512xbf16>
    %c2 = arith.constant 2 : index
    %c0_13 = arith.constant 0 : index
    %15 = vector.load %arg17[%c2, %c0_13] : memref<8x512xbf16, #tpu.memory_space<vmem>>, vector<1x512xbf16>
    %16 = vector.broadcast %15 : vector<1x512xbf16> to vector<8x512xbf16>
    %17 = arith.mulf %14, %16 : vector<8x512xbf16>
    %c16 = arith.constant 16 : index
    %c0_14 = arith.constant 0 : index
    %18 = vector.load %arg22[%c16, %c0_14] : memref<288x512xbf16, #tpu.memory_space<vmem>>, vector<8x512xbf16>
    tpu.vector_store %arg22[%c16, %c0_14], %17 {strides = array<i32>} : memref<288x512xbf16, #tpu.memory_space<vmem>>, vector<8x512xbf16>,
    %c0_15 = arith.constant 0 : index
    %c127 = arith.constant 127 : index
    %19 = vector.load %arg21[%c0_15, %c127] : memref<32x1152xbf16, #tpu.memory_space<vmem>>, vector<8x512xbf16>
    %c3 = arith.constant 3 : index
    %c0_16 = arith.constant 0 : index
    %20 = vector.load %arg17[%c3, %c0_16] : memref<8x512xbf16, #tpu.memory_space<vmem>>, vector<1x512xbf16>
    %21 = vector.broadcast %20 : vector<1x512xbf16> to vector<8x512xbf16>
    %22 = arith.mulf %19, %21 : vector<8x512xbf16>
    %c24 = arith.constant 24 : index
    %c0_17 = arith.constant 0 : index
    %23 = vector.load %arg22[%c24, %c0_17] : memref<288x512xbf16, #tpu.memory_space<vmem>>, vector<8x512xbf16>
    tpu.vector_store %arg22[%c24, %c0_17], %22 {strides = array<i32>} : memref<288x512xbf16, #tpu.memory_space<vmem>>, vector<8x512xbf16>,
    %c0_18 = arith.constant 0 : index
    %c128_19 = arith.constant 128 : index
    %24 = vector.load %arg21[%c0_18, %c128_19] : memref<32x1152xbf16, #tpu.memory_space<vmem>>, vector<8x512xbf16>
    %c32 = arith.constant 32 : index
    %c0_20 = arith.constant 0 : index
    %25 = vector.load %arg22[%c32, %c0_20] : memref<288x512xbf16, #tpu.memory_space<vmem>>, vector<8x512xbf16>
    tpu.vector_store %arg22[%c32, %c0_20], %24 {strides = array<i32>} : memref<288x512xbf16, #tpu.memory_space<vmem>>, vector<8x512xbf16>,
    %c0_21 = arith.constant 0 : index
    %c129 = arith.constant 129 : index
    %26 = vector.load %arg21[%c0_21, %c129] : memref<32x1152xbf16, #tpu.memory_space<vmem>>, vector<8x512xbf16>
    %c4 = arith.constant 4 : index
    %c0_22 = arith.constant 0 : index
    %27 = vector.load %arg17[%c4, %c0_22] : memref<8x512xbf16, #tpu.memory_space<vmem>>, vector<1x512xbf16>
    %28 = vector.broadcast %27 : vector<1x512xbf16> to vector<8x512xbf16>
    %29 = arith.mulf %26, %28 : vector<8x512xbf16>
    %c40 = arith.constant 40 : index
    %c0_23 = arith.constant 0 : index
    %30 = vector.load %arg22[%c40, %c0_23] : memref<288x512xbf16, #tpu.memory_space<vmem>>, vector<8x512xbf16>
    tpu.vector_store %arg22[%c40, %c0_23], %29 {strides = array<i32>} : memref<288x512xbf16, #tpu.memory_space<vmem>>, vector<8x512xbf16>,
    %c0_24 = arith.constant 0 : index
    %c143 = arith.constant 143 : index
    %31 = vector.load %arg21[%c0_24, %c143] : memref<32x1152xbf16, #tpu.memory_space<vmem>>, vector<8x512xbf16>
    %c5 = arith.constant 5 : index
    %c0_25 = arith.constant 0 : index
    %32 = vector.load %arg17[%c5, %c0_25] : memref<8x512xbf16, #tpu.memory_space<vmem>>, vector<1x512xbf16>
    %33 = vector.broadcast %32 : vector<1x512xbf16> to vector<8x512xbf16>
    %34 = arith.mulf %31, %33 : vector<8x512xbf16>
    %c48 = arith.constant 48 : index
    %c0_26 = arith.constant 0 : index
    %35 = vector.load %arg22[%c48, %c0_26] : memref<288x512xbf16, #tpu.memory_space<vmem>>, vector<8x512xbf16>
    tpu.vector_store %arg22[%c48, %c0_26], %34 {strides = array<i32>} : memref<288x512xbf16, #tpu.memory_space<vmem>>, vector<8x512xbf16>,
    %c0_27 = arith.constant 0 : index
    %c144 = arith.constant 144 : index
    %36 = vector.load %arg21[%c0_27, %c144] : memref<32x1152xbf16, #tpu.memory_space<vmem>>, vector<8x512xbf16>
    %c6 = arith.constant 6 : index
    %c0_28 = arith.constant 0 : index
    %37 = vector.load %arg17[%c6, %c0_28] : memref<8x512xbf16, #tpu.memory_space<vmem>>, vector<1x512xbf16>
    %38 = vector.broadcast %37 : vector<1x512xbf16> to vector<8x512xbf16>
    %39 = arith.mulf %36, %38 : vector<8x512xbf16>
    %c56 = arith.constant 56 : index
    %c0_29 = arith.constant 0 : index
    %40 = vector.load %arg22[%c56, %c0_29] : memref<288x512xbf16, #tpu.memory_space<vmem>>, vector<8x512xbf16>
    tpu.vector_store %arg22[%c56, %c0_29], %39 {strides = array<i32>} : memref<288x512xbf16, #tpu.memory_space<vmem>>, vector<8x512xbf16>,
    %c0_30 = arith.constant 0 : index
    %c145 = arith.constant 145 : index
    %41 = vector.load %arg21[%c0_30, %c145] : memref<32x1152xbf16, #tpu.memory_space<vmem>>, vector<8x512xbf16>
    %c7 = arith.constant 7 : index
    %c0_31 = arith.constant 0 : index
    %42 = vector.load %arg17[%c7, %c0_31] : memref<8x512xbf16, #tpu.memory_space<vmem>>, vector<1x512xbf16>
    %43 = vector.broadcast %42 : vector<1x512xbf16> to vector<8x512xbf16>
    %44 = arith.mulf %41, %43 : vector<8x512xbf16>
    %c64 = arith.constant 64 : index
    %c0_32 = arith.constant 0 : index
    %45 = vector.load %arg22[%c64, %c0_32] : memref<288x512xbf16, #tpu.memory_space<vmem>>, vector<8x512xbf16>
    tpu.vector_store %arg22[%c64, %c0_32], %44 {strides = array<i32>} : memref<288x512xbf16, #tpu.memory_space<vmem>>, vector<8x512xbf16>,
    %c0_33 = arith.constant 0 : index
    %c0_34 = arith.constant 0 : index
    %46 = vector.load %arg4[%c0_33, %c0_34] : memref<8x72xbf16, #tpu.memory_space<vmem>>, vector<8x72xbf16>
    %c0_35 = arith.constant 0 : index
    %c0_36 = arith.constant 0 : index
    %47 = vector.load %arg22[%c0_35, %c0_36] : memref<288x512xbf16, #tpu.memory_space<vmem>>, vector<72x512xbf16>
    %cst_37 = arith.constant dense<0.000000e+00> : vector<8x512xf32>
    %48 = tpu.matmul %46, %47, %cst_37 {dimension_numbers = #tpu.dot_dimension_numbers<[1], [0], [0], [1], [0, 0, 1, 1], [], []>} : vector<8x72xbf16>, vector<72x512xbf16>, vector<8x512xf32> -> vector<8x512xf32>
    %c0_38 = arith.constant 0 : index
    %c0_39 = arith.constant 0 : index
    %49 = vector.load %arg2[%c0_38, %c0_39] : memref<8x512xf32, #tpu.memory_space<vmem>>, vector<8x512xf32>
    %50 = arith.addf %48, %49 : vector<8x512xf32>
    %51 = arith.truncf %50 : vector<8x512xf32> to vector<8x512xbf16>
    %c0_40 = arith.constant 0 : index
    %c128_41 = arith.constant 128 : index
    %52 = vector.load %arg21[%c0_40, %c128_41] : memref<32x1152xbf16, #tpu.memory_space<vmem>>, vector<8x512xbf16>
    tpu.vector_store %arg21[%c0_40, %c128_41], %51 {strides = array<i32>} : memref<32x1152xbf16, #tpu.memory_space<vmem>>, vector<8x512xbf16>,
    %c0_42 = arith.constant 0 : index
    %c111_43 = arith.constant 111 : index
    %53 = vector.load %arg21[%c0_42, %c111_43] : memref<32x1152xbf16, #tpu.memory_space<vmem>>, vector<8x512xbf16>
    %c0_44 = arith.constant 0 : index
    %c0_45 = arith.constant 0 : index
    %54 = vector.load %arg17[%c0_44, %c0_45] : memref<8x512xbf16, #tpu.memory_space<vmem>>, vector<1x512xbf16>
    %55 = vector.broadcast %54 : vector<1x512xbf16> to vector<8x512xbf16>
    %56 = arith.mulf %53, %55 : vector<8x512xbf16>
    %c0_46 = arith.constant 0 : index
    %c0_47 = arith.constant 0 : index
    %57 = vector.load %arg22[%c0_46, %c0_47] : memref<288x512xbf16, #tpu.memory_space<vmem>>, vector<8x512xbf16>
    tpu.vector_store %arg22[%c0_46, %c0_47], %56 {strides = array<i32>} : memref<288x512xbf16, #tpu.memory_space<vmem>>, vector<8x512xbf16>,
    %c0_48 = arith.constant 0 : index
    %c112_49 = arith.constant 112 : index
    %58 = vector.load %arg21[%c0_48, %c112_49] : memref<32x1152xbf16, #tpu.memory_space<vmem>>, vector<8x512xbf16>
    %c1_50 = arith.constant 1 : index
    %c0_51 = arith.constant 0 : index
    %59 = vector.load %arg17[%c1_50, %c0_51] : memref<8x512xbf16, #tpu.memory_space<vmem>>, vector<1x512xbf16>
    %60 = vector.broadcast %59 : vector<1x512xbf16> to vector<8x512xbf16>
    %61 = arith.mulf %58, %60 : vector<8x512xbf16>
    %c8_52 = arith.constant 8 : index
    %c0_53 = arith.constant 0 : index
    %62 = vector.load %arg22[%c8_52, %c0_53] : memref<288x512xbf16, #tpu.memory_space<vmem>>, vector<8x512xbf16>
    tpu.vector_store %arg22[%c8_52, %c0_53], %61 {strides = array<i32>} : memref<288x512xbf16, #tpu.memory_space<vmem>>, vector<8x512xbf16>,
    %c0_54 = arith.constant 0 : index
    %c113_55 = arith.constant 113 : index
    %63 = vector.load %arg21[%c0_54, %c113_55] : memref<32x1152xbf16, #tpu.memory_space<vmem>>, vector<8x512xbf16>
    %c2_56 = arith.constant 2 : index
    %c0_57 = arith.constant 0 : index
    %64 = vector.load %arg17[%c2_56, %c0_57] : memref<8x512xbf16, #tpu.memory_space<vmem>>, vector<1x512xbf16>
    %65 = vector.broadcast %64 : vector<1x512xbf16> to vector<8x512xbf16>
    %66 = arith.mulf %63, %65 : vector<8x512xbf16>
    %c16_58 = arith.constant 16 : index
    %c0_59 = arith.constant 0 : index
    %67 = vector.load %arg22[%c16_58, %c0_59] : memref<288x512xbf16, #tpu.memory_space<vmem>>, vector<8x512xbf16>
    tpu.vector_store %arg22[%c16_58, %c0_59], %66 {strides = array<i32>} : memref<288x512xbf16, #tpu.memory_space<vmem>>, vector<8x512xbf16>,
    %c0_60 = arith.constant 0 : index
    %c127_61 = arith.constant 127 : index
    %68 = vector.load %arg21[%c0_60, %c127_61] : memref<32x1152xbf16, #tpu.memory_space<vmem>>, vector<8x512xbf16>
    %c3_62 = arith.constant 3 : index
    %c0_63 = arith.constant 0 : index
    %69 = vector.load %arg17[%c3_62, %c0_63] : memref<8x512xbf16, #tpu.memory_space<vmem>>, vector<1x512xbf16>
    %70 = vector.broadcast %69 : vector<1x512xbf16> to vector<8x512xbf16>
    %71 = arith.mulf %68, %70 : vector<8x512xbf16>
    %c24_64 = arith.constant 24 : index
    %c0_65 = arith.constant 0 : index
    %72 = vector.load %arg22[%c24_64, %c0_65] : memref<288x512xbf16, #tpu.memory_space<vmem>>, vector<8x512xbf16>
    tpu.vector_store %arg22[%c24_64, %c0_65], %71 {strides = array<i32>} : memref<288x512xbf16, #tpu.memory_space<vmem>>, vector<8x512xbf16>,
    %c0_66 = arith.constant 0 : index
    %c128_67 = arith.constant 128 : index
    %73 = vector.load %arg21[%c0_66, %c128_67] : memref<32x1152xbf16, #tpu.memory_space<vmem>>, vector<8x512xbf16>
    %c32_68 = arith.constant 32 : index
    %c0_69 = arith.constant 0 : index
    %74 = vector.load %arg22[%c32_68, %c0_69] : memref<288x512xbf16, #tpu.memory_space<vmem>>, vector<8x512xbf16>
    tpu.vector_store %arg22[%c32_68, %c0_69], %73 {strides = array<i32>} : memref<288x512xbf16, #tpu.memory_space<vmem>>, vector<8x512xbf16>,
    %c0_70 = arith.constant 0 : index
    %c129_71 = arith.constant 129 : index
    %75 = vector.load %arg21[%c0_70, %c129_71] : memref<32x1152xbf16, #tpu.memory_space<vmem>>, vector<8x512xbf16>
    %c4_72 = arith.constant 4 : index
    %c0_73 = arith.constant 0 : index
    %76 = vector.load %arg17[%c4_72, %c0_73] : memref<8x512xbf16, #tpu.memory_space<vmem>>, vector<1x512xbf16>
    %77 = vector.broadcast %76 : vector<1x512xbf16> to vector<8x512xbf16>
    %78 = arith.mulf %75, %77 : vector<8x512xbf16>
    %c40_74 = arith.constant 40 : index
    %c0_75 = arith.constant 0 : index
    %79 = vector.load %arg22[%c40_74, %c0_75] : memref<288x512xbf16, #tpu.memory_space<vmem>>, vector<8x512xbf16>
    tpu.vector_store %arg22[%c40_74, %c0_75], %78 {strides = array<i32>} : memref<288x512xbf16, #tpu.memory_space<vmem>>, vector<8x512xbf16>,
    %c0_76 = arith.constant 0 : index
    %c143_77 = arith.constant 143 : index
    %80 = vector.load %arg21[%c0_76, %c143_77] : memref<32x1152xbf16, #tpu.memory_space<vmem>>, vector<8x512xbf16>
    %c5_78 = arith.constant 5 : index
    %c0_79 = arith.constant 0 : index
    %81 = vector.load %arg17[%c5_78, %c0_79] : memref<8x512xbf16, #tpu.memory_space<vmem>>, vector<1x512xbf16>
    %82 = vector.broadcast %81 : vector<1x512xbf16> to vector<8x512xbf16>
    %83 = arith.mulf %80, %82 : vector<8x512xbf16>
    %c48_80 = arith.constant 48 : index
    %c0_81 = arith.constant 0 : index
    %84 = vector.load %arg22[%c48_80, %c0_81] : memref<288x512xbf16, #tpu.memory_space<vmem>>, vector<8x512xbf16>
    tpu.vector_store %arg22[%c48_80, %c0_81], %83 {strides = array<i32>} : memref<288x512xbf16, #tpu.memory_space<vmem>>, vector<8x512xbf16>,
    %c0_82 = arith.constant 0 : index
    %c144_83 = arith.constant 144 : index
    %85 = vector.load %arg21[%c0_82, %c144_83] : memref<32x1152xbf16, #tpu.memory_space<vmem>>, vector<8x512xbf16>
    %c6_84 = arith.constant 6 : index
    %c0_85 = arith.constant 0 : index
    %86 = vector.load %arg17[%c6_84, %c0_85] : memref<8x512xbf16, #tpu.memory_space<vmem>>, vector<1x512xbf16>
    %87 = vector.broadcast %86 : vector<1x512xbf16> to vector<8x512xbf16>
    %88 = arith.mulf %85, %87 : vector<8x512xbf16>
    %c56_86 = arith.constant 56 : index
    %c0_87 = arith.constant 0 : index
    %89 = vector.load %arg22[%c56_86, %c0_87] : memref<288x512xbf16, #tpu.memory_space<vmem>>, vector<8x512xbf16>
    tpu.vector_store %arg22[%c56_86, %c0_87], %88 {strides = array<i32>} : memref<288x512xbf16, #tpu.memory_space<vmem>>, vector<8x512xbf16>,
    %c0_88 = arith.constant 0 : index
    %c145_89 = arith.constant 145 : index
    %90 = vector.load %arg21[%c0_88, %c145_89] : memref<32x1152xbf16, #tpu.memory_space<vmem>>, vector<8x512xbf16>
    %c7_90 = arith.constant 7 : index
    %c0_91 = arith.constant 0 : index
    %91 = vector.load %arg17[%c7_90, %c0_91] : memref<8x512xbf16, #tpu.memory_space<vmem>>, vector<1x512xbf16>
    %92 = vector.broadcast %91 : vector<1x512xbf16> to vector<8x512xbf16>
    %93 = arith.mulf %90, %92 : vector<8x512xbf16>
    %c64_92 = arith.constant 64 : index
    %c0_93 = arith.constant 0 : index
    %94 = vector.load %arg22[%c64_92, %c0_93] : memref<288x512xbf16, #tpu.memory_space<vmem>>, vector<8x512xbf16>
    tpu.vector_store %arg22[%c64_92, %c0_93], %93 {strides = array<i32>} : memref<288x512xbf16, #tpu.memory_space<vmem>>, vector<8x512xbf16>,
    %c0_94 = arith.constant 0 : index
    %c0_95 = arith.constant 0 : index
    %95 = vector.load %arg5[%c0_94, %c0_95] : memref<16x72xbf16, #tpu.memory_space<vmem>>, vector<16x72xbf16>
    %c0_96 = arith.constant 0 : index
    %c0_97 = arith.constant 0 : index
    %96 = vector.load %arg22[%c0_96, %c0_97] : memref<288x512xbf16, #tpu.memory_space<vmem>>, vector<72x512xbf16>
    %cst_98 = arith.constant dense<0.000000e+00> : vector<16x512xf32>
    %97 = tpu.matmul %95, %96, %cst_98 {dimension_numbers = #tpu.dot_dimension_numbers<[1], [0], [0], [1], [0, 0, 1, 1], [], []>} : vector<16x72xbf16>, vector<72x512xbf16>, vector<16x512xf32> -> vector<16x512xf32>
    %c0_99 = arith.constant 0 : index
    %c0_100 = arith.constant 0 : index
    %98 = vector.load %arg3[%c0_99, %c0_100] : memref<32x8xf32, #tpu.memory_space<vmem>>, vector<16x1xf32>
    %99 = vector.broadcast %98 : vector<16x1xf32> to vector<16x512xf32>
    %100 = arith.addf %97, %99 : vector<16x512xf32>
    %cst_101 = arith.constant 0.000000e+00 : f32
    %101 = vector.broadcast %cst_101 : f32 to vector<16x512xf32>
    %102 = arith.cmpf oge, %100, %101 : vector<16x512xf32>
    %cst_102 = arith.constant -2.000000e-01 : f32
    %103 = vector.broadcast %cst_102 : f32 to vector<16x512xf32>
    %104 = arith.mulf %103, %100 : vector<16x512xf32>
    %105 = arith.select %102, %100, %104 : vector<16x512xi1>, vector<16x512xf32>
    %106 = arith.truncf %105 : vector<16x512xf32> to vector<16x512xbf16>
    %c0_103 = arith.constant 0 : index
    %c128_104 = arith.constant 128 : index
    %107 = vector.load %arg21[%c0_103, %c128_104] : memref<32x1152xbf16, #tpu.memory_space<vmem>>, vector<16x512xbf16>
    tpu.vector_store %arg21[%c0_103, %c128_104], %106 {strides = array<i32>} : memref<32x1152xbf16, #tpu.memory_space<vmem>>, vector<16x512xbf16>,
    %c0_105 = arith.constant 0 : index
    %c111_106 = arith.constant 111 : index
    %108 = vector.load %arg21[%c0_105, %c111_106] : memref<32x1152xbf16, #tpu.memory_space<vmem>>, vector<16x512xbf16>
    %c0_107 = arith.constant 0 : index
    %c0_108 = arith.constant 0 : index
    %109 = vector.load %arg17[%c0_107, %c0_108] : memref<8x512xbf16, #tpu.memory_space<vmem>>, vector<1x512xbf16>
    %110 = vector.broadcast %109 : vector<1x512xbf16> to vector<16x512xbf16>
    %111 = arith.mulf %108, %110 : vector<16x512xbf16>
    %c0_109 = arith.constant 0 : index
    %c0_110 = arith.constant 0 : index
    %112 = vector.load %arg22[%c0_109, %c0_110] : memref<288x512xbf16, #tpu.memory_space<vmem>>, vector<16x512xbf16>
    tpu.vector_store %arg22[%c0_109, %c0_110], %111 {strides = array<i32>} : memref<288x512xbf16, #tpu.memory_space<vmem>>, vector<16x512xbf16>,
    %c0_111 = arith.constant 0 : index
    %c112_112 = arith.constant 112 : index
    %113 = vector.load %arg21[%c0_111, %c112_112] : memref<32x1152xbf16, #tpu.memory_space<vmem>>, vector<16x512xbf16>
    %c1_113 = arith.constant 1 : index
    %c0_114 = arith.constant 0 : index
    %114 = vector.load %arg17[%c1_113, %c0_114] : memref<8x512xbf16, #tpu.memory_space<vmem>>, vector<1x512xbf16>
    %115 = vector.broadcast %114 : vector<1x512xbf16> to vector<16x512xbf16>
    %116 = arith.mulf %113, %115 : vector<16x512xbf16>
    %c16_115 = arith.constant 16 : index
    %c0_116 = arith.constant 0 : index
    %117 = vector.load %arg22[%c16_115, %c0_116] : memref<288x512xbf16, #tpu.memory_space<vmem>>, vector<16x512xbf16>
    tpu.vector_store %arg22[%c16_115, %c0_116], %116 {strides = array<i32>} : memref<288x512xbf16, #tpu.memory_space<vmem>>, vector<16x512xbf16>,
    %c0_117 = arith.constant 0 : index
    %c113_118 = arith.constant 113 : index
    %118 = vector.load %arg21[%c0_117, %c113_118] : memref<32x1152xbf16, #tpu.memory_space<vmem>>, vector<16x512xbf16>
    %c2_119 = arith.constant 2 : index
    %c0_120 = arith.constant 0 : index
    %119 = vector.load %arg17[%c2_119, %c0_120] : memref<8x512xbf16, #tpu.memory_space<vmem>>, vector<1x512xbf16>
    %120 = vector.broadcast %119 : vector<1x512xbf16> to vector<16x512xbf16>
    %121 = arith.mulf %118, %120 : vector<16x512xbf16>
    %c32_121 = arith.constant 32 : index
    %c0_122 = arith.constant 0 : index
    %122 = vector.load %arg22[%c32_121, %c0_122] : memref<288x512xbf16, #tpu.memory_space<vmem>>, vector<16x512xbf16>
    tpu.vector_store %arg22[%c32_121, %c0_122], %121 {strides = array<i32>} : memref<288x512xbf16, #tpu.memory_space<vmem>>, vector<16x512xbf16>,
    %c0_123 = arith.constant 0 : index
    %c127_124 = arith.constant 127 : index
    %123 = vector.load %arg21[%c0_123, %c127_124] : memref<32x1152xbf16, #tpu.memory_space<vmem>>, vector<16x512xbf16>
    %c3_125 = arith.constant 3 : index
    %c0_126 = arith.constant 0 : index
    %124 = vector.load %arg17[%c3_125, %c0_126] : memref<8x512xbf16, #tpu.memory_space<vmem>>, vector<1x512xbf16>
    %125 = vector.broadcast %124 : vector<1x512xbf16> to vector<16x512xbf16>
    %126 = arith.mulf %123, %125 : vector<16x512xbf16>
    %c48_127 = arith.constant 48 : index
    %c0_128 = arith.constant 0 : index
    %127 = vector.load %arg22[%c48_127, %c0_128] : memref<288x512xbf16, #tpu.memory_space<vmem>>, vector<16x512xbf16>
    tpu.vector_store %arg22[%c48_127, %c0_128], %126 {strides = array<i32>} : memref<288x512xbf16, #tpu.memory_space<vmem>>, vector<16x512xbf16>,
    %c0_129 = arith.constant 0 : index
    %c128_130 = arith.constant 128 : index
    %128 = vector.load %arg21[%c0_129, %c128_130] : memref<32x1152xbf16, #tpu.memory_space<vmem>>, vector<16x512xbf16>
    %c64_131 = arith.constant 64 : index
    %c0_132 = arith.constant 0 : index
    %129 = vector.load %arg22[%c64_131, %c0_132] : memref<288x512xbf16, #tpu.memory_space<vmem>>, vector<16x512xbf16>
    tpu.vector_store %arg22[%c64_131, %c0_132], %128 {strides = array<i32>} : memref<288x512xbf16, #tpu.memory_space<vmem>>, vector<16x512xbf16>,
    %c0_133 = arith.constant 0 : index
    %c129_134 = arith.constant 129 : index
    %130 = vector.load %arg21[%c0_133, %c129_134] : memref<32x1152xbf16, #tpu.memory_space<vmem>>, vector<16x512xbf16>
    %c4_135 = arith.constant 4 : index
    %c0_136 = arith.constant 0 : index
    %131 = vector.load %arg17[%c4_135, %c0_136] : memref<8x512xbf16, #tpu.memory_space<vmem>>, vector<1x512xbf16>
    %132 = vector.broadcast %131 : vector<1x512xbf16> to vector<16x512xbf16>
    %133 = arith.mulf %130, %132 : vector<16x512xbf16>
    %c80 = arith.constant 80 : index
    %c0_137 = arith.constant 0 : index
    %134 = vector.load %arg22[%c80, %c0_137] : memref<288x512xbf16, #tpu.memory_space<vmem>>, vector<16x512xbf16>
    tpu.vector_store %arg22[%c80, %c0_137], %133 {strides = array<i32>} : memref<288x512xbf16, #tpu.memory_space<vmem>>, vector<16x512xbf16>,
    %c0_138 = arith.constant 0 : index
    %c143_139 = arith.constant 143 : index
    %135 = vector.load %arg21[%c0_138, %c143_139] : memref<32x1152xbf16, #tpu.memory_space<vmem>>, vector<16x512xbf16>
    %c5_140 = arith.constant 5 : index
    %c0_141 = arith.constant 0 : index
    %136 = vector.load %arg17[%c5_140, %c0_141] : memref<8x512xbf16, #tpu.memory_space<vmem>>, vector<1x512xbf16>
    %137 = vector.broadcast %136 : vector<1x512xbf16> to vector<16x512xbf16>
    %138 = arith.mulf %135, %137 : vector<16x512xbf16>
    %c96 = arith.constant 96 : index
    %c0_142 = arith.constant 0 : index
    %139 = vector.load %arg22[%c96, %c0_142] : memref<288x512xbf16, #tpu.memory_space<vmem>>, vector<16x512xbf16>
    tpu.vector_store %arg22[%c96, %c0_142], %138 {strides = array<i32>} : memref<288x512xbf16, #tpu.memory_space<vmem>>, vector<16x512xbf16>,
    %c0_143 = arith.constant 0 : index
    %c144_144 = arith.constant 144 : index
    %140 = vector.load %arg21[%c0_143, %c144_144] : memref<32x1152xbf16, #tpu.memory_space<vmem>>, vector<16x512xbf16>
    %c6_145 = arith.constant 6 : index
    %c0_146 = arith.constant 0 : index
    %141 = vector.load %arg17[%c6_145, %c0_146] : memref<8x512xbf16, #tpu.memory_space<vmem>>, vector<1x512xbf16>
    %142 = vector.broadcast %141 : vector<1x512xbf16> to vector<16x512xbf16>
    %143 = arith.mulf %140, %142 : vector<16x512xbf16>
    %c112_147 = arith.constant 112 : index
    %c0_148 = arith.constant 0 : index
    %144 = vector.load %arg22[%c112_147, %c0_148] : memref<288x512xbf16, #tpu.memory_space<vmem>>, vector<16x512xbf16>
    tpu.vector_store %arg22[%c112_147, %c0_148], %143 {strides = array<i32>} : memref<288x512xbf16, #tpu.memory_space<vmem>>, vector<16x512xbf16>,
    %c0_149 = arith.constant 0 : index
    %c145_150 = arith.constant 145 : index
    %145 = vector.load %arg21[%c0_149, %c145_150] : memref<32x1152xbf16, #tpu.memory_space<vmem>>, vector<16x512xbf16>
    %c7_151 = arith.constant 7 : index
    %c0_152 = arith.constant 0 : index
    %146 = vector.load %arg17[%c7_151, %c0_152] : memref<8x512xbf16, #tpu.memory_space<vmem>>, vector<1x512xbf16>
    %147 = vector.broadcast %146 : vector<1x512xbf16> to vector<16x512xbf16>
    %148 = arith.mulf %145, %147 : vector<16x512xbf16>
    %c128_153 = arith.constant 128 : index
    %c0_154 = arith.constant 0 : index
    %149 = vector.load %arg22[%c128_153, %c0_154] : memref<288x512xbf16, #tpu.memory_space<vmem>>, vector<16x512xbf16>
    tpu.vector_store %arg22[%c128_153, %c0_154], %148 {strides = array<i32>} : memref<288x512xbf16, #tpu.memory_space<vmem>>, vector<16x512xbf16>,
    %c0_155 = arith.constant 0 : index
    %c0_156 = arith.constant 0 : index
    %150 = vector.load %arg6[%c0_155, %c0_156] : memref<16x144xbf16, #tpu.memory_space<vmem>>, vector<16x144xbf16>
    %c0_157 = arith.constant 0 : index
    %c0_158 = arith.constant 0 : index
    %151 = vector.load %arg22[%c0_157, %c0_158] : memref<288x512xbf16, #tpu.memory_space<vmem>>, vector<144x512xbf16>
    %cst_159 = arith.constant dense<0.000000e+00> : vector<16x512xf32>
    %152 = tpu.matmul %150, %151, %cst_159 {dimension_numbers = #tpu.dot_dimension_numbers<[1], [0], [0], [1], [0, 0, 1, 1], [], []>} : vector<16x144xbf16>, vector<144x512xbf16>, vector<16x512xf32> -> vector<16x512xf32>
    %c0_160 = arith.constant 0 : index
    %c1_161 = arith.constant 1 : index
    %153 = vector.load %arg3[%c0_160, %c1_161] : memref<32x8xf32, #tpu.memory_space<vmem>>, vector<16x1xf32>
    %154 = vector.broadcast %153 : vector<16x1xf32> to vector<16x512xf32>
    %155 = arith.addf %152, %154 : vector<16x512xf32>
    %cst_162 = arith.constant 0.000000e+00 : f32
    %156 = vector.broadcast %cst_162 : f32 to vector<16x512xf32>
    %157 = arith.cmpf oge, %155, %156 : vector<16x512xf32>
    %cst_163 = arith.constant -2.000000e-01 : f32
    %158 = vector.broadcast %cst_163 : f32 to vector<16x512xf32>
    %159 = arith.mulf %158, %155 : vector<16x512xf32>
    %160 = arith.select %157, %155, %159 : vector<16x512xi1>, vector<16x512xf32>
    %161 = arith.truncf %160 : vector<16x512xf32> to vector<16x512xbf16>
    %c0_164 = arith.constant 0 : index
    %c0_165 = arith.constant 0 : index
    %162 = vector.load %arg13[%c0_164, %c0_165] : memref<512x128xbf16, #tpu.memory_space<vmem>>, vector<512x128xbf16>
    %cst_166 = arith.constant dense<0.000000e+00> : vector<16x128xf32>
    %163 = tpu.matmul %161, %162, %cst_166 {dimension_numbers = #tpu.dot_dimension_numbers<[1], [0], [0], [1], [0, 0, 1, 1], [], []>} : vector<16x512xbf16>, vector<512x128xbf16>, vector<16x128xf32> -> vector<16x128xf32>
    %164 = arith.truncf %163 : vector<16x128xf32> to vector<16x128xbf16>
    %c0_167 = arith.constant 0 : index
    %c768 = arith.constant 768 : index
    %165 = vector.load %arg21[%c0_167, %c768] : memref<32x1152xbf16, #tpu.memory_space<vmem>>, vector<16x128xbf16>
    tpu.vector_store %arg21[%c0_167, %c768], %164 {strides = array<i32>} : memref<32x1152xbf16, #tpu.memory_space<vmem>>, vector<16x128xbf16>,
    %c0_168 = arith.constant 0 : index
    %c759 = arith.constant 759 : index
    %166 = vector.load %arg21[%c0_168, %c759] : memref<32x1152xbf16, #tpu.memory_space<vmem>>, vector<16x128xbf16>
    %c0_169 = arith.constant 0 : index
    %c0_170 = arith.constant 0 : index
    %167 = vector.load %arg18[%c0_169, %c0_170] : memref<8x128xbf16, #tpu.memory_space<vmem>>, vector<1x128xbf16>
    %168 = vector.broadcast %167 : vector<1x128xbf16> to vector<16x128xbf16>
    %169 = arith.mulf %166, %168 : vector<16x128xbf16>
    %c0_171 = arith.constant 0 : index
    %c0_172 = arith.constant 0 : index
    %170 = vector.load %arg22[%c0_171, %c0_172] : memref<288x512xbf16, #tpu.memory_space<vmem>>, vector<16x128xbf16>
    tpu.vector_store %arg22[%c0_171, %c0_172], %169 {strides = array<i32>} : memref<288x512xbf16, #tpu.memory_space<vmem>>, vector<16x128xbf16>,
    %c0_173 = arith.constant 0 : index
    %c760 = arith.constant 760 : index
    %171 = vector.load %arg21[%c0_173, %c760] : memref<32x1152xbf16, #tpu.memory_space<vmem>>, vector<16x128xbf16>
    %c1_174 = arith.constant 1 : index
    %c0_175 = arith.constant 0 : index
    %172 = vector.load %arg18[%c1_174, %c0_175] : memref<8x128xbf16, #tpu.memory_space<vmem>>, vector<1x128xbf16>
    %173 = vector.broadcast %172 : vector<1x128xbf16> to vector<16x128xbf16>
    %174 = arith.mulf %171, %173 : vector<16x128xbf16>
    %c16_176 = arith.constant 16 : index
    %c0_177 = arith.constant 0 : index
    %175 = vector.load %arg22[%c16_176, %c0_177] : memref<288x512xbf16, #tpu.memory_space<vmem>>, vector<16x128xbf16>
    tpu.vector_store %arg22[%c16_176, %c0_177], %174 {strides = array<i32>} : memref<288x512xbf16, #tpu.memory_space<vmem>>, vector<16x128xbf16>,
    %c0_178 = arith.constant 0 : index
    %c761 = arith.constant 761 : index
    %176 = vector.load %arg21[%c0_178, %c761] : memref<32x1152xbf16, #tpu.memory_space<vmem>>, vector<16x128xbf16>
    %c2_179 = arith.constant 2 : index
    %c0_180 = arith.constant 0 : index
    %177 = vector.load %arg18[%c2_179, %c0_180] : memref<8x128xbf16, #tpu.memory_space<vmem>>, vector<1x128xbf16>
    %178 = vector.broadcast %177 : vector<1x128xbf16> to vector<16x128xbf16>
    %179 = arith.mulf %176, %178 : vector<16x128xbf16>
    %c32_181 = arith.constant 32 : index
    %c0_182 = arith.constant 0 : index
    %180 = vector.load %arg22[%c32_181, %c0_182] : memref<288x512xbf16, #tpu.memory_space<vmem>>, vector<16x128xbf16>
    tpu.vector_store %arg22[%c32_181, %c0_182], %179 {strides = array<i32>} : memref<288x512xbf16, #tpu.memory_space<vmem>>, vector<16x128xbf16>,
    %c0_183 = arith.constant 0 : index
    %c767 = arith.constant 767 : index
    %181 = vector.load %arg21[%c0_183, %c767] : memref<32x1152xbf16, #tpu.memory_space<vmem>>, vector<16x128xbf16>
    %c3_184 = arith.constant 3 : index
    %c0_185 = arith.constant 0 : index
    %182 = vector.load %arg18[%c3_184, %c0_185] : memref<8x128xbf16, #tpu.memory_space<vmem>>, vector<1x128xbf16>
    %183 = vector.broadcast %182 : vector<1x128xbf16> to vector<16x128xbf16>
    %184 = arith.mulf %181, %183 : vector<16x128xbf16>
    %c48_186 = arith.constant 48 : index
    %c0_187 = arith.constant 0 : index
    %185 = vector.load %arg22[%c48_186, %c0_187] : memref<288x512xbf16, #tpu.memory_space<vmem>>, vector<16x128xbf16>
    tpu.vector_store %arg22[%c48_186, %c0_187], %184 {strides = array<i32>} : memref<288x512xbf16, #tpu.memory_space<vmem>>, vector<16x128xbf16>,
    %c0_188 = arith.constant 0 : index
    %c768_189 = arith.constant 768 : index
    %186 = vector.load %arg21[%c0_188, %c768_189] : memref<32x1152xbf16, #tpu.memory_space<vmem>>, vector<16x128xbf16>
    %c64_190 = arith.constant 64 : index
    %c0_191 = arith.constant 0 : index
    %187 = vector.load %arg22[%c64_190, %c0_191] : memref<288x512xbf16, #tpu.memory_space<vmem>>, vector<16x128xbf16>
    tpu.vector_store %arg22[%c64_190, %c0_191], %186 {strides = array<i32>} : memref<288x512xbf16, #tpu.memory_space<vmem>>, vector<16x128xbf16>,
    %c0_192 = arith.constant 0 : index
    %c769 = arith.constant 769 : index
    %188 = vector.load %arg21[%c0_192, %c769] : memref<32x1152xbf16, #tpu.memory_space<vmem>>, vector<16x128xbf16>
    %c4_193 = arith.constant 4 : index
    %c0_194 = arith.constant 0 : index
    %189 = vector.load %arg18[%c4_193, %c0_194] : memref<8x128xbf16, #tpu.memory_space<vmem>>, vector<1x128xbf16>
    %190 = vector.broadcast %189 : vector<1x128xbf16> to vector<16x128xbf16>
    %191 = arith.mulf %188, %190 : vector<16x128xbf16>
    %c80_195 = arith.constant 80 : index
    %c0_196 = arith.constant 0 : index
    %192 = vector.load %arg22[%c80_195, %c0_196] : memref<288x512xbf16, #tpu.memory_space<vmem>>, vector<16x128xbf16>
    tpu.vector_store %arg22[%c80_195, %c0_196], %191 {strides = array<i32>} : memref<288x512xbf16, #tpu.memory_space<vmem>>, vector<16x128xbf16>,
    %c0_197 = arith.constant 0 : index
    %c775 = arith.constant 775 : index
    %193 = vector.load %arg21[%c0_197, %c775] : memref<32x1152xbf16, #tpu.memory_space<vmem>>, vector<16x128xbf16>
    %c5_198 = arith.constant 5 : index
    %c0_199 = arith.constant 0 : index
    %194 = vector.load %arg18[%c5_198, %c0_199] : memref<8x128xbf16, #tpu.memory_space<vmem>>, vector<1x128xbf16>
    %195 = vector.broadcast %194 : vector<1x128xbf16> to vector<16x128xbf16>
    %196 = arith.mulf %193, %195 : vector<16x128xbf16>
    %c96_200 = arith.constant 96 : index
    %c0_201 = arith.constant 0 : index
    %197 = vector.load %arg22[%c96_200, %c0_201] : memref<288x512xbf16, #tpu.memory_space<vmem>>, vector<16x128xbf16>
    tpu.vector_store %arg22[%c96_200, %c0_201], %196 {strides = array<i32>} : memref<288x512xbf16, #tpu.memory_space<vmem>>, vector<16x128xbf16>,
    %c0_202 = arith.constant 0 : index
    %c776 = arith.constant 776 : index
    %198 = vector.load %arg21[%c0_202, %c776] : memref<32x1152xbf16, #tpu.memory_space<vmem>>, vector<16x128xbf16>
    %c6_203 = arith.constant 6 : index
    %c0_204 = arith.constant 0 : index
    %199 = vector.load %arg18[%c6_203, %c0_204] : memref<8x128xbf16, #tpu.memory_space<vmem>>, vector<1x128xbf16>
    %200 = vector.broadcast %199 : vector<1x128xbf16> to vector<16x128xbf16>
    %201 = arith.mulf %198, %200 : vector<16x128xbf16>
    %c112_205 = arith.constant 112 : index
    %c0_206 = arith.constant 0 : index
    %202 = vector.load %arg22[%c112_205, %c0_206] : memref<288x512xbf16, #tpu.memory_space<vmem>>, vector<16x128xbf16>
    tpu.vector_store %arg22[%c112_205, %c0_206], %201 {strides = array<i32>} : memref<288x512xbf16, #tpu.memory_space<vmem>>, vector<16x128xbf16>,
    %c0_207 = arith.constant 0 : index
    %c777 = arith.constant 777 : index
    %203 = vector.load %arg21[%c0_207, %c777] : memref<32x1152xbf16, #tpu.memory_space<vmem>>, vector<16x128xbf16>
    %c7_208 = arith.constant 7 : index
    %c0_209 = arith.constant 0 : index
    %204 = vector.load %arg18[%c7_208, %c0_209] : memref<8x128xbf16, #tpu.memory_space<vmem>>, vector<1x128xbf16>
    %205 = vector.broadcast %204 : vector<1x128xbf16> to vector<16x128xbf16>
    %206 = arith.mulf %203, %205 : vector<16x128xbf16>
    %c128_210 = arith.constant 128 : index
    %c0_211 = arith.constant 0 : index
    %207 = vector.load %arg22[%c128_210, %c0_211] : memref<288x512xbf16, #tpu.memory_space<vmem>>, vector<16x128xbf16>
    tpu.vector_store %arg22[%c128_210, %c0_211], %206 {strides = array<i32>} : memref<288x512xbf16, #tpu.memory_space<vmem>>, vector<16x128xbf16>,
    %c0_212 = arith.constant 0 : index
    %c0_213 = arith.constant 0 : index
    %208 = vector.load %arg7[%c0_212, %c0_213] : memref<32x144xbf16, #tpu.memory_space<vmem>>, vector<32x144xbf16>
    %c0_214 = arith.constant 0 : index
    %c0_215 = arith.constant 0 : index
    %209 = vector.load %arg22[%c0_214, %c0_215] : memref<288x512xbf16, #tpu.memory_space<vmem>>, vector<144x128xbf16>
    %cst_216 = arith.constant dense<0.000000e+00> : vector<32x128xf32>
    %210 = tpu.matmul %208, %209, %cst_216 {dimension_numbers = #tpu.dot_dimension_numbers<[1], [0], [0], [1], [0, 0, 1, 1], [], []>} : vector<32x144xbf16>, vector<144x128xbf16>, vector<32x128xf32> -> vector<32x128xf32>
    %c0_217 = arith.constant 0 : index
    %c2_218 = arith.constant 2 : index
    %211 = vector.load %arg3[%c0_217, %c2_218] : memref<32x8xf32, #tpu.memory_space<vmem>>, vector<32x1xf32>
    %212 = vector.broadcast %211 : vector<32x1xf32> to vector<32x128xf32>
    %213 = arith.addf %210, %212 : vector<32x128xf32>
    %cst_219 = arith.constant 0.000000e+00 : f32
    %214 = vector.broadcast %cst_219 : f32 to vector<32x128xf32>
    %215 = arith.cmpf oge, %213, %214 : vector<32x128xf32>
    %cst_220 = arith.constant -2.000000e-01 : f32
    %216 = vector.broadcast %cst_220 : f32 to vector<32x128xf32>
    %217 = arith.mulf %216, %213 : vector<32x128xf32>
    %218 = arith.select %215, %213, %217 : vector<32x128xi1>, vector<32x128xf32>
    %219 = arith.truncf %218 : vector<32x128xf32> to vector<32x128xbf16>
    %c0_221 = arith.constant 0 : index
    %c768_222 = arith.constant 768 : index
    %220 = vector.load %arg21[%c0_221, %c768_222] : memref<32x1152xbf16, #tpu.memory_space<vmem>>, vector<32x128xbf16>
    tpu.vector_store %arg21[%c0_221, %c768_222], %219 {strides = array<i32>} : memref<32x1152xbf16, #tpu.memory_space<vmem>>, vector<32x128xbf16>,
    %c0_223 = arith.constant 0 : index
    %c759_224 = arith.constant 759 : index
    %221 = vector.load %arg21[%c0_223, %c759_224] : memref<32x1152xbf16, #tpu.memory_space<vmem>>, vector<32x128xbf16>
    %c0_225 = arith.constant 0 : index
    %c0_226 = arith.constant 0 : index
    %222 = vector.load %arg18[%c0_225, %c0_226] : memref<8x128xbf16, #tpu.memory_space<vmem>>, vector<1x128xbf16>
    %223 = vector.broadcast %222 : vector<1x128xbf16> to vector<32x128xbf16>
    %224 = arith.mulf %221, %223 : vector<32x128xbf16>
    %c0_227 = arith.constant 0 : index
    %c0_228 = arith.constant 0 : index
    %225 = vector.load %arg22[%c0_227, %c0_228] : memref<288x512xbf16, #tpu.memory_space<vmem>>, vector<32x128xbf16>
    tpu.vector_store %arg22[%c0_227, %c0_228], %224 {strides = array<i32>} : memref<288x512xbf16, #tpu.memory_space<vmem>>, vector<32x128xbf16>,
    %c0_229 = arith.constant 0 : index
    %c760_230 = arith.constant 760 : index
    %226 = vector.load %arg21[%c0_229, %c760_230] : memref<32x1152xbf16, #tpu.memory_space<vmem>>, vector<32x128xbf16>
    %c1_231 = arith.constant 1 : index
    %c0_232 = arith.constant 0 : index
    %227 = vector.load %arg18[%c1_231, %c0_232] : memref<8x128xbf16, #tpu.memory_space<vmem>>, vector<1x128xbf16>
    %228 = vector.broadcast %227 : vector<1x128xbf16> to vector<32x128xbf16>
    %229 = arith.mulf %226, %228 : vector<32x128xbf16>
    %c32_233 = arith.constant 32 : index
    %c0_234 = arith.constant 0 : index
    %230 = vector.load %arg22[%c32_233, %c0_234] : memref<288x512xbf16, #tpu.memory_space<vmem>>, vector<32x128xbf16>
    tpu.vector_store %arg22[%c32_233, %c0_234], %229 {strides = array<i32>} : memref<288x512xbf16, #tpu.memory_space<vmem>>, vector<32x128xbf16>,
    %c0_235 = arith.constant 0 : index
    %c761_236 = arith.constant 761 : index
    %231 = vector.load %arg21[%c0_235, %c761_236] : memref<32x1152xbf16, #tpu.memory_space<vmem>>, vector<32x128xbf16>
    %c2_237 = arith.constant 2 : index
    %c0_238 = arith.constant 0 : index
    %232 = vector.load %arg18[%c2_237, %c0_238] : memref<8x128xbf16, #tpu.memory_space<vmem>>, vector<1x128xbf16>
    %233 = vector.broadcast %232 : vector<1x128xbf16> to vector<32x128xbf16>
    %234 = arith.mulf %231, %233 : vector<32x128xbf16>
    %c64_239 = arith.constant 64 : index
    %c0_240 = arith.constant 0 : index
    %235 = vector.load %arg22[%c64_239, %c0_240] : memref<288x512xbf16, #tpu.memory_space<vmem>>, vector<32x128xbf16>
    tpu.vector_store %arg22[%c64_239, %c0_240], %234 {strides = array<i32>} : memref<288x512xbf16, #tpu.memory_space<vmem>>, vector<32x128xbf16>,
    %c0_241 = arith.constant 0 : index
    %c767_242 = arith.constant 767 : index
    %236 = vector.load %arg21[%c0_241, %c767_242] : memref<32x1152xbf16, #tpu.memory_space<vmem>>, vector<32x128xbf16>
    %c3_243 = arith.constant 3 : index
    %c0_244 = arith.constant 0 : index
    %237 = vector.load %arg18[%c3_243, %c0_244] : memref<8x128xbf16, #tpu.memory_space<vmem>>, vector<1x128xbf16>
    %238 = vector.broadcast %237 : vector<1x128xbf16> to vector<32x128xbf16>
    %239 = arith.mulf %236, %238 : vector<32x128xbf16>
    %c96_245 = arith.constant 96 : index
    %c0_246 = arith.constant 0 : index
    %240 = vector.load %arg22[%c96_245, %c0_246] : memref<288x512xbf16, #tpu.memory_space<vmem>>, vector<32x128xbf16>
    tpu.vector_store %arg22[%c96_245, %c0_246], %239 {strides = array<i32>} : memref<288x512xbf16, #tpu.memory_space<vmem>>, vector<32x128xbf16>,
    %c0_247 = arith.constant 0 : index
    %c768_248 = arith.constant 768 : index
    %241 = vector.load %arg21[%c0_247, %c768_248] : memref<32x1152xbf16, #tpu.memory_space<vmem>>, vector<32x128xbf16>
    %c128_249 = arith.constant 128 : index
    %c0_250 = arith.constant 0 : index
    %242 = vector.load %arg22[%c128_249, %c0_250] : memref<288x512xbf16, #tpu.memory_space<vmem>>, vector<32x128xbf16>
    tpu.vector_store %arg22[%c128_249, %c0_250], %241 {strides = array<i32>} : memref<288x512xbf16, #tpu.memory_space<vmem>>, vector<32x128xbf16>,
    %c0_251 = arith.constant 0 : index
    %c769_252 = arith.constant 769 : index
    %243 = vector.load %arg21[%c0_251, %c769_252] : memref<32x1152xbf16, #tpu.memory_space<vmem>>, vector<32x128xbf16>
    %c4_253 = arith.constant 4 : index
    %c0_254 = arith.constant 0 : index
    %244 = vector.load %arg18[%c4_253, %c0_254] : memref<8x128xbf16, #tpu.memory_space<vmem>>, vector<1x128xbf16>
    %245 = vector.broadcast %244 : vector<1x128xbf16> to vector<32x128xbf16>
    %246 = arith.mulf %243, %245 : vector<32x128xbf16>
    %c160 = arith.constant 160 : index
    %c0_255 = arith.constant 0 : index
    %247 = vector.load %arg22[%c160, %c0_255] : memref<288x512xbf16, #tpu.memory_space<vmem>>, vector<32x128xbf16>
    tpu.vector_store %arg22[%c160, %c0_255], %246 {strides = array<i32>} : memref<288x512xbf16, #tpu.memory_space<vmem>>, vector<32x128xbf16>,
    %c0_256 = arith.constant 0 : index
    %c775_257 = arith.constant 775 : index
    %248 = vector.load %arg21[%c0_256, %c775_257] : memref<32x1152xbf16, #tpu.memory_space<vmem>>, vector<32x128xbf16>
    %c5_258 = arith.constant 5 : index
    %c0_259 = arith.constant 0 : index
    %249 = vector.load %arg18[%c5_258, %c0_259] : memref<8x128xbf16, #tpu.memory_space<vmem>>, vector<1x128xbf16>
    %250 = vector.broadcast %249 : vector<1x128xbf16> to vector<32x128xbf16>
    %251 = arith.mulf %248, %250 : vector<32x128xbf16>
    %c192 = arith.constant 192 : index
    %c0_260 = arith.constant 0 : index
    %252 = vector.load %arg22[%c192, %c0_260] : memref<288x512xbf16, #tpu.memory_space<vmem>>, vector<32x128xbf16>
    tpu.vector_store %arg22[%c192, %c0_260], %251 {strides = array<i32>} : memref<288x512xbf16, #tpu.memory_space<vmem>>, vector<32x128xbf16>,
    %c0_261 = arith.constant 0 : index
    %c776_262 = arith.constant 776 : index
    %253 = vector.load %arg21[%c0_261, %c776_262] : memref<32x1152xbf16, #tpu.memory_space<vmem>>, vector<32x128xbf16>
    %c6_263 = arith.constant 6 : index
    %c0_264 = arith.constant 0 : index
    %254 = vector.load %arg18[%c6_263, %c0_264] : memref<8x128xbf16, #tpu.memory_space<vmem>>, vector<1x128xbf16>
    %255 = vector.broadcast %254 : vector<1x128xbf16> to vector<32x128xbf16>
    %256 = arith.mulf %253, %255 : vector<32x128xbf16>
    %c224 = arith.constant 224 : index
    %c0_265 = arith.constant 0 : index
    %257 = vector.load %arg22[%c224, %c0_265] : memref<288x512xbf16, #tpu.memory_space<vmem>>, vector<32x128xbf16>
    tpu.vector_store %arg22[%c224, %c0_265], %256 {strides = array<i32>} : memref<288x512xbf16, #tpu.memory_space<vmem>>, vector<32x128xbf16>,
    %c0_266 = arith.constant 0 : index
    %c777_267 = arith.constant 777 : index
    %258 = vector.load %arg21[%c0_266, %c777_267] : memref<32x1152xbf16, #tpu.memory_space<vmem>>, vector<32x128xbf16>
    %c7_268 = arith.constant 7 : index
    %c0_269 = arith.constant 0 : index
    %259 = vector.load %arg18[%c7_268, %c0_269] : memref<8x128xbf16, #tpu.memory_space<vmem>>, vector<1x128xbf16>
    %260 = vector.broadcast %259 : vector<1x128xbf16> to vector<32x128xbf16>
    %261 = arith.mulf %258, %260 : vector<32x128xbf16>
    %c256 = arith.constant 256 : index
    %c0_270 = arith.constant 0 : index
    %262 = vector.load %arg22[%c256, %c0_270] : memref<288x512xbf16, #tpu.memory_space<vmem>>, vector<32x128xbf16>
    tpu.vector_store %arg22[%c256, %c0_270], %261 {strides = array<i32>} : memref<288x512xbf16, #tpu.memory_space<vmem>>, vector<32x128xbf16>,
    %c0_271 = arith.constant 0 : index
    %c0_272 = arith.constant 0 : index
    %263 = vector.load %arg8[%c0_271, %c0_272] : memref<32x288xbf16, #tpu.memory_space<vmem>>, vector<32x288xbf16>
    %c0_273 = arith.constant 0 : index
    %c0_274 = arith.constant 0 : index
    %264 = vector.load %arg22[%c0_273, %c0_274] : memref<288x512xbf16, #tpu.memory_space<vmem>>, vector<288x128xbf16>
    %cst_275 = arith.constant dense<0.000000e+00> : vector<32x128xf32>
    %265 = tpu.matmul %263, %264, %cst_275 {dimension_numbers = #tpu.dot_dimension_numbers<[1], [0], [0], [1], [0, 0, 1, 1], [], []>} : vector<32x288xbf16>, vector<288x128xbf16>, vector<32x128xf32> -> vector<32x128xf32>
    %c0_276 = arith.constant 0 : index
    %c3_277 = arith.constant 3 : index
    %266 = vector.load %arg3[%c0_276, %c3_277] : memref<32x8xf32, #tpu.memory_space<vmem>>, vector<32x1xf32>
    %267 = vector.broadcast %266 : vector<32x1xf32> to vector<32x128xf32>
    %268 = arith.addf %265, %267 : vector<32x128xf32>
    %cst_278 = arith.constant 0.000000e+00 : f32
    %269 = vector.broadcast %cst_278 : f32 to vector<32x128xf32>
    %270 = arith.cmpf oge, %268, %269 : vector<32x128xf32>
    %cst_279 = arith.constant -2.000000e-01 : f32
    %271 = vector.broadcast %cst_279 : f32 to vector<32x128xf32>
    %272 = arith.mulf %271, %268 : vector<32x128xf32>
    %273 = arith.select %270, %268, %272 : vector<32x128xi1>, vector<32x128xf32>
    %274 = arith.truncf %273 : vector<32x128xf32> to vector<32x128xbf16>
    %c0_280 = arith.constant 0 : index
    %c0_281 = arith.constant 0 : index
    %275 = vector.load %arg14[%c0_280, %c0_281] : memref<128x32xbf16, #tpu.memory_space<vmem>>, vector<128x32xbf16>
    %cst_282 = arith.constant dense<0.000000e+00> : vector<32x32xf32>
    %276 = tpu.matmul %274, %275, %cst_282 {dimension_numbers = #tpu.dot_dimension_numbers<[1], [0], [0], [1], [0, 0, 1, 1], [], []>} : vector<32x128xbf16>, vector<128x32xbf16>, vector<32x32xf32> -> vector<32x32xf32>
    %277 = arith.truncf %276 : vector<32x32xf32> to vector<32x32xbf16>
    %c0_283 = arith.constant 0 : index
    %c1024 = arith.constant 1024 : index
    %278 = vector.load %arg21[%c0_283, %c1024] : memref<32x1152xbf16, #tpu.memory_space<vmem>>, vector<32x32xbf16>
    tpu.vector_store %arg21[%c0_283, %c1024], %277 {strides = array<i32>} : memref<32x1152xbf16, #tpu.memory_space<vmem>>, vector<32x32xbf16>,
    %c0_284 = arith.constant 0 : index
    %c1019 = arith.constant 1019 : index
    %279 = vector.load %arg21[%c0_284, %c1019] : memref<32x1152xbf16, #tpu.memory_space<vmem>>, vector<32x32xbf16>
    %c0_285 = arith.constant 0 : index
    %c0_286 = arith.constant 0 : index
    %280 = vector.load %arg19[%c0_285, %c0_286] : memref<8x32xbf16, #tpu.memory_space<vmem>>, vector<1x32xbf16>
    %281 = vector.broadcast %280 : vector<1x32xbf16> to vector<32x32xbf16>
    %282 = arith.mulf %279, %281 : vector<32x32xbf16>
    %c0_287 = arith.constant 0 : index
    %c0_288 = arith.constant 0 : index
    %283 = vector.load %arg22[%c0_287, %c0_288] : memref<288x512xbf16, #tpu.memory_space<vmem>>, vector<32x32xbf16>
    tpu.vector_store %arg22[%c0_287, %c0_288], %282 {strides = array<i32>} : memref<288x512xbf16, #tpu.memory_space<vmem>>, vector<32x32xbf16>,
    %c0_289 = arith.constant 0 : index
    %c1020 = arith.constant 1020 : index
    %284 = vector.load %arg21[%c0_289, %c1020] : memref<32x1152xbf16, #tpu.memory_space<vmem>>, vector<32x32xbf16>
    %c1_290 = arith.constant 1 : index
    %c0_291 = arith.constant 0 : index
    %285 = vector.load %arg19[%c1_290, %c0_291] : memref<8x32xbf16, #tpu.memory_space<vmem>>, vector<1x32xbf16>
    %286 = vector.broadcast %285 : vector<1x32xbf16> to vector<32x32xbf16>
    %287 = arith.mulf %284, %286 : vector<32x32xbf16>
    %c32_292 = arith.constant 32 : index
    %c0_293 = arith.constant 0 : index
    %288 = vector.load %arg22[%c32_292, %c0_293] : memref<288x512xbf16, #tpu.memory_space<vmem>>, vector<32x32xbf16>
    tpu.vector_store %arg22[%c32_292, %c0_293], %287 {strides = array<i32>} : memref<288x512xbf16, #tpu.memory_space<vmem>>, vector<32x32xbf16>,
    %c0_294 = arith.constant 0 : index
    %c1021 = arith.constant 1021 : index
    %289 = vector.load %arg21[%c0_294, %c1021] : memref<32x1152xbf16, #tpu.memory_space<vmem>>, vector<32x32xbf16>
    %c2_295 = arith.constant 2 : index
    %c0_296 = arith.constant 0 : index
    %290 = vector.load %arg19[%c2_295, %c0_296] : memref<8x32xbf16, #tpu.memory_space<vmem>>, vector<1x32xbf16>
    %291 = vector.broadcast %290 : vector<1x32xbf16> to vector<32x32xbf16>
    %292 = arith.mulf %289, %291 : vector<32x32xbf16>
    %c64_297 = arith.constant 64 : index
    %c0_298 = arith.constant 0 : index
    %293 = vector.load %arg22[%c64_297, %c0_298] : memref<288x512xbf16, #tpu.memory_space<vmem>>, vector<32x32xbf16>
    tpu.vector_store %arg22[%c64_297, %c0_298], %292 {strides = array<i32>} : memref<288x512xbf16, #tpu.memory_space<vmem>>, vector<32x32xbf16>,
    %c0_299 = arith.constant 0 : index
    %c1023 = arith.constant 1023 : index
    %294 = vector.load %arg21[%c0_299, %c1023] : memref<32x1152xbf16, #tpu.memory_space<vmem>>, vector<32x32xbf16>
    %c3_300 = arith.constant 3 : index
    %c0_301 = arith.constant 0 : index
    %295 = vector.load %arg19[%c3_300, %c0_301] : memref<8x32xbf16, #tpu.memory_space<vmem>>, vector<1x32xbf16>
    %296 = vector.broadcast %295 : vector<1x32xbf16> to vector<32x32xbf16>
    %297 = arith.mulf %294, %296 : vector<32x32xbf16>
    %c96_302 = arith.constant 96 : index
    %c0_303 = arith.constant 0 : index
    %298 = vector.load %arg22[%c96_302, %c0_303] : memref<288x512xbf16, #tpu.memory_space<vmem>>, vector<32x32xbf16>
    tpu.vector_store %arg22[%c96_302, %c0_303], %297 {strides = array<i32>} : memref<288x512xbf16, #tpu.memory_space<vmem>>, vector<32x32xbf16>,
    %c0_304 = arith.constant 0 : index
    %c1024_305 = arith.constant 1024 : index
    %299 = vector.load %arg21[%c0_304, %c1024_305] : memref<32x1152xbf16, #tpu.memory_space<vmem>>, vector<32x32xbf16>
    %c128_306 = arith.constant 128 : index
    %c0_307 = arith.constant 0 : index
    %300 = vector.load %arg22[%c128_306, %c0_307] : memref<288x512xbf16, #tpu.memory_space<vmem>>, vector<32x32xbf16>
    tpu.vector_store %arg22[%c128_306, %c0_307], %299 {strides = array<i32>} : memref<288x512xbf16, #tpu.memory_space<vmem>>, vector<32x32xbf16>,
    %c0_308 = arith.constant 0 : index
    %c1025 = arith.constant 1025 : index
    %301 = vector.load %arg21[%c0_308, %c1025] : memref<32x1152xbf16, #tpu.memory_space<vmem>>, vector<32x32xbf16>
    %c4_309 = arith.constant 4 : index
    %c0_310 = arith.constant 0 : index
    %302 = vector.load %arg19[%c4_309, %c0_310] : memref<8x32xbf16, #tpu.memory_space<vmem>>, vector<1x32xbf16>
    %303 = vector.broadcast %302 : vector<1x32xbf16> to vector<32x32xbf16>
    %304 = arith.mulf %301, %303 : vector<32x32xbf16>
    %c160_311 = arith.constant 160 : index
    %c0_312 = arith.constant 0 : index
    %305 = vector.load %arg22[%c160_311, %c0_312] : memref<288x512xbf16, #tpu.memory_space<vmem>>, vector<32x32xbf16>
    tpu.vector_store %arg22[%c160_311, %c0_312], %304 {strides = array<i32>} : memref<288x512xbf16, #tpu.memory_space<vmem>>, vector<32x32xbf16>,
    %c0_313 = arith.constant 0 : index
    %c1027 = arith.constant 1027 : index
    %306 = vector.load %arg21[%c0_313, %c1027] : memref<32x1152xbf16, #tpu.memory_space<vmem>>, vector<32x32xbf16>
    %c5_314 = arith.constant 5 : index
    %c0_315 = arith.constant 0 : index
    %307 = vector.load %arg19[%c5_314, %c0_315] : memref<8x32xbf16, #tpu.memory_space<vmem>>, vector<1x32xbf16>
    %308 = vector.broadcast %307 : vector<1x32xbf16> to vector<32x32xbf16>
    %309 = arith.mulf %306, %308 : vector<32x32xbf16>
    %c192_316 = arith.constant 192 : index
    %c0_317 = arith.constant 0 : index
    %310 = vector.load %arg22[%c192_316, %c0_317] : memref<288x512xbf16, #tpu.memory_space<vmem>>, vector<32x32xbf16>
    tpu.vector_store %arg22[%c192_316, %c0_317], %309 {strides = array<i32>} : memref<288x512xbf16, #tpu.memory_space<vmem>>, vector<32x32xbf16>,
    %c0_318 = arith.constant 0 : index
    %c1028 = arith.constant 1028 : index
    %311 = vector.load %arg21[%c0_318, %c1028] : memref<32x1152xbf16, #tpu.memory_space<vmem>>, vector<32x32xbf16>
    %c6_319 = arith.constant 6 : index
    %c0_320 = arith.constant 0 : index
    %312 = vector.load %arg19[%c6_319, %c0_320] : memref<8x32xbf16, #tpu.memory_space<vmem>>, vector<1x32xbf16>
    %313 = vector.broadcast %312 : vector<1x32xbf16> to vector<32x32xbf16>
    %314 = arith.mulf %311, %313 : vector<32x32xbf16>
    %c224_321 = arith.constant 224 : index
    %c0_322 = arith.constant 0 : index
    %315 = vector.load %arg22[%c224_321, %c0_322] : memref<288x512xbf16, #tpu.memory_space<vmem>>, vector<32x32xbf16>
    tpu.vector_store %arg22[%c224_321, %c0_322], %314 {strides = array<i32>} : memref<288x512xbf16, #tpu.memory_space<vmem>>, vector<32x32xbf16>,
    %c0_323 = arith.constant 0 : index
    %c1029 = arith.constant 1029 : index
    %316 = vector.load %arg21[%c0_323, %c1029] : memref<32x1152xbf16, #tpu.memory_space<vmem>>, vector<32x32xbf16>
    %c7_324 = arith.constant 7 : index
    %c0_325 = arith.constant 0 : index
    %317 = vector.load %arg19[%c7_324, %c0_325] : memref<8x32xbf16, #tpu.memory_space<vmem>>, vector<1x32xbf16>
    %318 = vector.broadcast %317 : vector<1x32xbf16> to vector<32x32xbf16>
    %319 = arith.mulf %316, %318 : vector<32x32xbf16>
    %c256_326 = arith.constant 256 : index
    %c0_327 = arith.constant 0 : index
    %320 = vector.load %arg22[%c256_326, %c0_327] : memref<288x512xbf16, #tpu.memory_space<vmem>>, vector<32x32xbf16>
    tpu.vector_store %arg22[%c256_326, %c0_327], %319 {strides = array<i32>} : memref<288x512xbf16, #tpu.memory_space<vmem>>, vector<32x32xbf16>,
    %c0_328 = arith.constant 0 : index
    %c0_329 = arith.constant 0 : index
    %321 = vector.load %arg9[%c0_328, %c0_329] : memref<16x288xbf16, #tpu.memory_space<vmem>>, vector<16x288xbf16>
    %c0_330 = arith.constant 0 : index
    %c0_331 = arith.constant 0 : index
    %322 = vector.load %arg22[%c0_330, %c0_331] : memref<288x512xbf16, #tpu.memory_space<vmem>>, vector<288x32xbf16>
    %cst_332 = arith.constant dense<0.000000e+00> : vector<16x32xf32>
    %323 = tpu.matmul %321, %322, %cst_332 {dimension_numbers = #tpu.dot_dimension_numbers<[1], [0], [0], [1], [0, 0, 1, 1], [], []>} : vector<16x288xbf16>, vector<288x32xbf16>, vector<16x32xf32> -> vector<16x32xf32>
    %c0_333 = arith.constant 0 : index
    %c4_334 = arith.constant 4 : index
    %324 = vector.load %arg3[%c0_333, %c4_334] : memref<32x8xf32, #tpu.memory_space<vmem>>, vector<16x1xf32>
    %325 = vector.broadcast %324 : vector<16x1xf32> to vector<16x32xf32>
    %326 = arith.addf %323, %325 : vector<16x32xf32>
    %cst_335 = arith.constant 0.000000e+00 : f32
    %327 = vector.broadcast %cst_335 : f32 to vector<16x32xf32>
    %328 = arith.cmpf oge, %326, %327 : vector<16x32xf32>
    %cst_336 = arith.constant -2.000000e-01 : f32
    %329 = vector.broadcast %cst_336 : f32 to vector<16x32xf32>
    %330 = arith.mulf %329, %326 : vector<16x32xf32>
    %331 = arith.select %328, %326, %330 : vector<16x32xi1>, vector<16x32xf32>
    %332 = arith.truncf %331 : vector<16x32xf32> to vector<16x32xbf16>
    %c0_337 = arith.constant 0 : index
    %c1024_338 = arith.constant 1024 : index
    %333 = vector.load %arg21[%c0_337, %c1024_338] : memref<32x1152xbf16, #tpu.memory_space<vmem>>, vector<16x32xbf16>
    tpu.vector_store %arg21[%c0_337, %c1024_338], %332 {strides = array<i32>} : memref<32x1152xbf16, #tpu.memory_space<vmem>>, vector<16x32xbf16>,
    %c0_339 = arith.constant 0 : index
    %c1019_340 = arith.constant 1019 : index
    %334 = vector.load %arg21[%c0_339, %c1019_340] : memref<32x1152xbf16, #tpu.memory_space<vmem>>, vector<16x32xbf16>
    %c0_341 = arith.constant 0 : index
    %c0_342 = arith.constant 0 : index
    %335 = vector.load %arg19[%c0_341, %c0_342] : memref<8x32xbf16, #tpu.memory_space<vmem>>, vector<1x32xbf16>
    %336 = vector.broadcast %335 : vector<1x32xbf16> to vector<16x32xbf16>
    %337 = arith.mulf %334, %336 : vector<16x32xbf16>
    %c0_343 = arith.constant 0 : index
    %c0_344 = arith.constant 0 : index
    %338 = vector.load %arg22[%c0_343, %c0_344] : memref<288x512xbf16, #tpu.memory_space<vmem>>, vector<16x32xbf16>
    tpu.vector_store %arg22[%c0_343, %c0_344], %337 {strides = array<i32>} : memref<288x512xbf16, #tpu.memory_space<vmem>>, vector<16x32xbf16>,
    %c0_345 = arith.constant 0 : index
    %c1020_346 = arith.constant 1020 : index
    %339 = vector.load %arg21[%c0_345, %c1020_346] : memref<32x1152xbf16, #tpu.memory_space<vmem>>, vector<16x32xbf16>
    %c1_347 = arith.constant 1 : index
    %c0_348 = arith.constant 0 : index
    %340 = vector.load %arg19[%c1_347, %c0_348] : memref<8x32xbf16, #tpu.memory_space<vmem>>, vector<1x32xbf16>
    %341 = vector.broadcast %340 : vector<1x32xbf16> to vector<16x32xbf16>
    %342 = arith.mulf %339, %341 : vector<16x32xbf16>
    %c16_349 = arith.constant 16 : index
    %c0_350 = arith.constant 0 : index
    %343 = vector.load %arg22[%c16_349, %c0_350] : memref<288x512xbf16, #tpu.memory_space<vmem>>, vector<16x32xbf16>
    tpu.vector_store %arg22[%c16_349, %c0_350], %342 {strides = array<i32>} : memref<288x512xbf16, #tpu.memory_space<vmem>>, vector<16x32xbf16>,
    %c0_351 = arith.constant 0 : index
    %c1021_352 = arith.constant 1021 : index
    %344 = vector.load %arg21[%c0_351, %c1021_352] : memref<32x1152xbf16, #tpu.memory_space<vmem>>, vector<16x32xbf16>
    %c2_353 = arith.constant 2 : index
    %c0_354 = arith.constant 0 : index
    %345 = vector.load %arg19[%c2_353, %c0_354] : memref<8x32xbf16, #tpu.memory_space<vmem>>, vector<1x32xbf16>
    %346 = vector.broadcast %345 : vector<1x32xbf16> to vector<16x32xbf16>
    %347 = arith.mulf %344, %346 : vector<16x32xbf16>
    %c32_355 = arith.constant 32 : index
    %c0_356 = arith.constant 0 : index
    %348 = vector.load %arg22[%c32_355, %c0_356] : memref<288x512xbf16, #tpu.memory_space<vmem>>, vector<16x32xbf16>
    tpu.vector_store %arg22[%c32_355, %c0_356], %347 {strides = array<i32>} : memref<288x512xbf16, #tpu.memory_space<vmem>>, vector<16x32xbf16>,
    %c0_357 = arith.constant 0 : index
    %c1023_358 = arith.constant 1023 : index
    %349 = vector.load %arg21[%c0_357, %c1023_358] : memref<32x1152xbf16, #tpu.memory_space<vmem>>, vector<16x32xbf16>
    %c3_359 = arith.constant 3 : index
    %c0_360 = arith.constant 0 : index
    %350 = vector.load %arg19[%c3_359, %c0_360] : memref<8x32xbf16, #tpu.memory_space<vmem>>, vector<1x32xbf16>
    %351 = vector.broadcast %350 : vector<1x32xbf16> to vector<16x32xbf16>
    %352 = arith.mulf %349, %351 : vector<16x32xbf16>
    %c48_361 = arith.constant 48 : index
    %c0_362 = arith.constant 0 : index
    %353 = vector.load %arg22[%c48_361, %c0_362] : memref<288x512xbf16, #tpu.memory_space<vmem>>, vector<16x32xbf16>
    tpu.vector_store %arg22[%c48_361, %c0_362], %352 {strides = array<i32>} : memref<288x512xbf16, #tpu.memory_space<vmem>>, vector<16x32xbf16>,
    %c0_363 = arith.constant 0 : index
    %c1024_364 = arith.constant 1024 : index
    %354 = vector.load %arg21[%c0_363, %c1024_364] : memref<32x1152xbf16, #tpu.memory_space<vmem>>, vector<16x32xbf16>
    %c64_365 = arith.constant 64 : index
    %c0_366 = arith.constant 0 : index
    %355 = vector.load %arg22[%c64_365, %c0_366] : memref<288x512xbf16, #tpu.memory_space<vmem>>, vector<16x32xbf16>
    tpu.vector_store %arg22[%c64_365, %c0_366], %354 {strides = array<i32>} : memref<288x512xbf16, #tpu.memory_space<vmem>>, vector<16x32xbf16>,
    %c0_367 = arith.constant 0 : index
    %c1025_368 = arith.constant 1025 : index
    %356 = vector.load %arg21[%c0_367, %c1025_368] : memref<32x1152xbf16, #tpu.memory_space<vmem>>, vector<16x32xbf16>
    %c4_369 = arith.constant 4 : index
    %c0_370 = arith.constant 0 : index
    %357 = vector.load %arg19[%c4_369, %c0_370] : memref<8x32xbf16, #tpu.memory_space<vmem>>, vector<1x32xbf16>
    %358 = vector.broadcast %357 : vector<1x32xbf16> to vector<16x32xbf16>
    %359 = arith.mulf %356, %358 : vector<16x32xbf16>
    %c80_371 = arith.constant 80 : index
    %c0_372 = arith.constant 0 : index
    %360 = vector.load %arg22[%c80_371, %c0_372] : memref<288x512xbf16, #tpu.memory_space<vmem>>, vector<16x32xbf16>
    tpu.vector_store %arg22[%c80_371, %c0_372], %359 {strides = array<i32>} : memref<288x512xbf16, #tpu.memory_space<vmem>>, vector<16x32xbf16>,
    %c0_373 = arith.constant 0 : index
    %c1027_374 = arith.constant 1027 : index
    %361 = vector.load %arg21[%c0_373, %c1027_374] : memref<32x1152xbf16, #tpu.memory_space<vmem>>, vector<16x32xbf16>
    %c5_375 = arith.constant 5 : index
    %c0_376 = arith.constant 0 : index
    %362 = vector.load %arg19[%c5_375, %c0_376] : memref<8x32xbf16, #tpu.memory_space<vmem>>, vector<1x32xbf16>
    %363 = vector.broadcast %362 : vector<1x32xbf16> to vector<16x32xbf16>
    %364 = arith.mulf %361, %363 : vector<16x32xbf16>
    %c96_377 = arith.constant 96 : index
    %c0_378 = arith.constant 0 : index
    %365 = vector.load %arg22[%c96_377, %c0_378] : memref<288x512xbf16, #tpu.memory_space<vmem>>, vector<16x32xbf16>
    tpu.vector_store %arg22[%c96_377, %c0_378], %364 {strides = array<i32>} : memref<288x512xbf16, #tpu.memory_space<vmem>>, vector<16x32xbf16>,
    %c0_379 = arith.constant 0 : index
    %c1028_380 = arith.constant 1028 : index
    %366 = vector.load %arg21[%c0_379, %c1028_380] : memref<32x1152xbf16, #tpu.memory_space<vmem>>, vector<16x32xbf16>
    %c6_381 = arith.constant 6 : index
    %c0_382 = arith.constant 0 : index
    %367 = vector.load %arg19[%c6_381, %c0_382] : memref<8x32xbf16, #tpu.memory_space<vmem>>, vector<1x32xbf16>
    %368 = vector.broadcast %367 : vector<1x32xbf16> to vector<16x32xbf16>
    %369 = arith.mulf %366, %368 : vector<16x32xbf16>
    %c112_383 = arith.constant 112 : index
    %c0_384 = arith.constant 0 : index
    %370 = vector.load %arg22[%c112_383, %c0_384] : memref<288x512xbf16, #tpu.memory_space<vmem>>, vector<16x32xbf16>
    tpu.vector_store %arg22[%c112_383, %c0_384], %369 {strides = array<i32>} : memref<288x512xbf16, #tpu.memory_space<vmem>>, vector<16x32xbf16>,
    %c0_385 = arith.constant 0 : index
    %c1029_386 = arith.constant 1029 : index
    %371 = vector.load %arg21[%c0_385, %c1029_386] : memref<32x1152xbf16, #tpu.memory_space<vmem>>, vector<16x32xbf16>
    %c7_387 = arith.constant 7 : index
    %c0_388 = arith.constant 0 : index
    %372 = vector.load %arg19[%c7_387, %c0_388] : memref<8x32xbf16, #tpu.memory_space<vmem>>, vector<1x32xbf16>
    %373 = vector.broadcast %372 : vector<1x32xbf16> to vector<16x32xbf16>
    %374 = arith.mulf %371, %373 : vector<16x32xbf16>
    %c128_389 = arith.constant 128 : index
    %c0_390 = arith.constant 0 : index
    %375 = vector.load %arg22[%c128_389, %c0_390] : memref<288x512xbf16, #tpu.memory_space<vmem>>, vector<16x32xbf16>
    tpu.vector_store %arg22[%c128_389, %c0_390], %374 {strides = array<i32>} : memref<288x512xbf16, #tpu.memory_space<vmem>>, vector<16x32xbf16>,
    %c0_391 = arith.constant 0 : index
    %c0_392 = arith.constant 0 : index
    %376 = vector.load %arg10[%c0_391, %c0_392] : memref<16x144xbf16, #tpu.memory_space<vmem>>, vector<16x144xbf16>
    %c0_393 = arith.constant 0 : index
    %c0_394 = arith.constant 0 : index
    %377 = vector.load %arg22[%c0_393, %c0_394] : memref<288x512xbf16, #tpu.memory_space<vmem>>, vector<144x32xbf16>
    %cst_395 = arith.constant dense<0.000000e+00> : vector<16x32xf32>
    %378 = tpu.matmul %376, %377, %cst_395 {dimension_numbers = #tpu.dot_dimension_numbers<[1], [0], [0], [1], [0, 0, 1, 1], [], []>} : vector<16x144xbf16>, vector<144x32xbf16>, vector<16x32xf32> -> vector<16x32xf32>
    %c0_396 = arith.constant 0 : index
    %c5_397 = arith.constant 5 : index
    %379 = vector.load %arg3[%c0_396, %c5_397] : memref<32x8xf32, #tpu.memory_space<vmem>>, vector<16x1xf32>
    %380 = vector.broadcast %379 : vector<16x1xf32> to vector<16x32xf32>
    %381 = arith.addf %378, %380 : vector<16x32xf32>
    %cst_398 = arith.constant 0.000000e+00 : f32
    %382 = vector.broadcast %cst_398 : f32 to vector<16x32xf32>
    %383 = arith.cmpf oge, %381, %382 : vector<16x32xf32>
    %cst_399 = arith.constant -2.000000e-01 : f32
    %384 = vector.broadcast %cst_399 : f32 to vector<16x32xf32>
    %385 = arith.mulf %384, %381 : vector<16x32xf32>
    %386 = arith.select %383, %381, %385 : vector<16x32xi1>, vector<16x32xf32>
    %387 = arith.truncf %386 : vector<16x32xf32> to vector<16x32xbf16>
    %c0_400 = arith.constant 0 : index
    %c0_401 = arith.constant 0 : index
    %388 = vector.load %arg15[%c0_400, %c0_401] : memref<32x128xbf16, #tpu.memory_space<vmem>>, vector<32x128xbf16>
    %cst_402 = arith.constant dense<0.000000e+00> : vector<16x128xf32>
    %389 = tpu.matmul %387, %388, %cst_402 {dimension_numbers = #tpu.dot_dimension_numbers<[1], [0], [0], [1], [0, 0, 1, 1], [], []>} : vector<16x32xbf16>, vector<32x128xbf16>, vector<16x128xf32> -> vector<16x128xf32>
    %390 = arith.truncf %389 : vector<16x128xf32> to vector<16x128xbf16>
    %c0_403 = arith.constant 0 : index
    %c768_404 = arith.constant 768 : index
    %391 = vector.load %arg21[%c0_403, %c768_404] : memref<32x1152xbf16, #tpu.memory_space<vmem>>, vector<16x128xbf16>
    tpu.vector_store %arg21[%c0_403, %c768_404], %390 {strides = array<i32>} : memref<32x1152xbf16, #tpu.memory_space<vmem>>, vector<16x128xbf16>,
    %c0_405 = arith.constant 0 : index
    %c759_406 = arith.constant 759 : index
    %392 = vector.load %arg21[%c0_405, %c759_406] : memref<32x1152xbf16, #tpu.memory_space<vmem>>, vector<16x128xbf16>
    %c0_407 = arith.constant 0 : index
    %c0_408 = arith.constant 0 : index
    %393 = vector.load %arg18[%c0_407, %c0_408] : memref<8x128xbf16, #tpu.memory_space<vmem>>, vector<1x128xbf16>
    %394 = vector.broadcast %393 : vector<1x128xbf16> to vector<16x128xbf16>
    %395 = arith.mulf %392, %394 : vector<16x128xbf16>
    %c0_409 = arith.constant 0 : index
    %c0_410 = arith.constant 0 : index
    %396 = vector.load %arg22[%c0_409, %c0_410] : memref<288x512xbf16, #tpu.memory_space<vmem>>, vector<16x128xbf16>
    tpu.vector_store %arg22[%c0_409, %c0_410], %395 {strides = array<i32>} : memref<288x512xbf16, #tpu.memory_space<vmem>>, vector<16x128xbf16>,
    %c0_411 = arith.constant 0 : index
    %c760_412 = arith.constant 760 : index
    %397 = vector.load %arg21[%c0_411, %c760_412] : memref<32x1152xbf16, #tpu.memory_space<vmem>>, vector<16x128xbf16>
    %c1_413 = arith.constant 1 : index
    %c0_414 = arith.constant 0 : index
    %398 = vector.load %arg18[%c1_413, %c0_414] : memref<8x128xbf16, #tpu.memory_space<vmem>>, vector<1x128xbf16>
    %399 = vector.broadcast %398 : vector<1x128xbf16> to vector<16x128xbf16>
    %400 = arith.mulf %397, %399 : vector<16x128xbf16>
    %c16_415 = arith.constant 16 : index
    %c0_416 = arith.constant 0 : index
    %401 = vector.load %arg22[%c16_415, %c0_416] : memref<288x512xbf16, #tpu.memory_space<vmem>>, vector<16x128xbf16>
    tpu.vector_store %arg22[%c16_415, %c0_416], %400 {strides = array<i32>} : memref<288x512xbf16, #tpu.memory_space<vmem>>, vector<16x128xbf16>,
    %c0_417 = arith.constant 0 : index
    %c761_418 = arith.constant 761 : index
    %402 = vector.load %arg21[%c0_417, %c761_418] : memref<32x1152xbf16, #tpu.memory_space<vmem>>, vector<16x128xbf16>
    %c2_419 = arith.constant 2 : index
    %c0_420 = arith.constant 0 : index
    %403 = vector.load %arg18[%c2_419, %c0_420] : memref<8x128xbf16, #tpu.memory_space<vmem>>, vector<1x128xbf16>
    %404 = vector.broadcast %403 : vector<1x128xbf16> to vector<16x128xbf16>
    %405 = arith.mulf %402, %404 : vector<16x128xbf16>
    %c32_421 = arith.constant 32 : index
    %c0_422 = arith.constant 0 : index
    %406 = vector.load %arg22[%c32_421, %c0_422] : memref<288x512xbf16, #tpu.memory_space<vmem>>, vector<16x128xbf16>
    tpu.vector_store %arg22[%c32_421, %c0_422], %405 {strides = array<i32>} : memref<288x512xbf16, #tpu.memory_space<vmem>>, vector<16x128xbf16>,
    %c0_423 = arith.constant 0 : index
    %c767_424 = arith.constant 767 : index
    %407 = vector.load %arg21[%c0_423, %c767_424] : memref<32x1152xbf16, #tpu.memory_space<vmem>>, vector<16x128xbf16>
    %c3_425 = arith.constant 3 : index
    %c0_426 = arith.constant 0 : index
    %408 = vector.load %arg18[%c3_425, %c0_426] : memref<8x128xbf16, #tpu.memory_space<vmem>>, vector<1x128xbf16>
    %409 = vector.broadcast %408 : vector<1x128xbf16> to vector<16x128xbf16>
    %410 = arith.mulf %407, %409 : vector<16x128xbf16>
    %c48_427 = arith.constant 48 : index
    %c0_428 = arith.constant 0 : index
    %411 = vector.load %arg22[%c48_427, %c0_428] : memref<288x512xbf16, #tpu.memory_space<vmem>>, vector<16x128xbf16>
    tpu.vector_store %arg22[%c48_427, %c0_428], %410 {strides = array<i32>} : memref<288x512xbf16, #tpu.memory_space<vmem>>, vector<16x128xbf16>,
    %c0_429 = arith.constant 0 : index
    %c768_430 = arith.constant 768 : index
    %412 = vector.load %arg21[%c0_429, %c768_430] : memref<32x1152xbf16, #tpu.memory_space<vmem>>, vector<16x128xbf16>
    %c64_431 = arith.constant 64 : index
    %c0_432 = arith.constant 0 : index
    %413 = vector.load %arg22[%c64_431, %c0_432] : memref<288x512xbf16, #tpu.memory_space<vmem>>, vector<16x128xbf16>
    tpu.vector_store %arg22[%c64_431, %c0_432], %412 {strides = array<i32>} : memref<288x512xbf16, #tpu.memory_space<vmem>>, vector<16x128xbf16>,
    %c0_433 = arith.constant 0 : index
    %c769_434 = arith.constant 769 : index
    %414 = vector.load %arg21[%c0_433, %c769_434] : memref<32x1152xbf16, #tpu.memory_space<vmem>>, vector<16x128xbf16>
    %c4_435 = arith.constant 4 : index
    %c0_436 = arith.constant 0 : index
    %415 = vector.load %arg18[%c4_435, %c0_436] : memref<8x128xbf16, #tpu.memory_space<vmem>>, vector<1x128xbf16>
    %416 = vector.broadcast %415 : vector<1x128xbf16> to vector<16x128xbf16>
    %417 = arith.mulf %414, %416 : vector<16x128xbf16>
    %c80_437 = arith.constant 80 : index
    %c0_438 = arith.constant 0 : index
    %418 = vector.load %arg22[%c80_437, %c0_438] : memref<288x512xbf16, #tpu.memory_space<vmem>>, vector<16x128xbf16>
    tpu.vector_store %arg22[%c80_437, %c0_438], %417 {strides = array<i32>} : memref<288x512xbf16, #tpu.memory_space<vmem>>, vector<16x128xbf16>,
    %c0_439 = arith.constant 0 : index
    %c775_440 = arith.constant 775 : index
    %419 = vector.load %arg21[%c0_439, %c775_440] : memref<32x1152xbf16, #tpu.memory_space<vmem>>, vector<16x128xbf16>
    %c5_441 = arith.constant 5 : index
    %c0_442 = arith.constant 0 : index
    %420 = vector.load %arg18[%c5_441, %c0_442] : memref<8x128xbf16, #tpu.memory_space<vmem>>, vector<1x128xbf16>
    %421 = vector.broadcast %420 : vector<1x128xbf16> to vector<16x128xbf16>
    %422 = arith.mulf %419, %421 : vector<16x128xbf16>
    %c96_443 = arith.constant 96 : index
    %c0_444 = arith.constant 0 : index
    %423 = vector.load %arg22[%c96_443, %c0_444] : memref<288x512xbf16, #tpu.memory_space<vmem>>, vector<16x128xbf16>
    tpu.vector_store %arg22[%c96_443, %c0_444], %422 {strides = array<i32>} : memref<288x512xbf16, #tpu.memory_space<vmem>>, vector<16x128xbf16>,
    %c0_445 = arith.constant 0 : index
    %c776_446 = arith.constant 776 : index
    %424 = vector.load %arg21[%c0_445, %c776_446] : memref<32x1152xbf16, #tpu.memory_space<vmem>>, vector<16x128xbf16>
    %c6_447 = arith.constant 6 : index
    %c0_448 = arith.constant 0 : index
    %425 = vector.load %arg18[%c6_447, %c0_448] : memref<8x128xbf16, #tpu.memory_space<vmem>>, vector<1x128xbf16>
    %426 = vector.broadcast %425 : vector<1x128xbf16> to vector<16x128xbf16>
    %427 = arith.mulf %424, %426 : vector<16x128xbf16>
    %c112_449 = arith.constant 112 : index
    %c0_450 = arith.constant 0 : index
    %428 = vector.load %arg22[%c112_449, %c0_450] : memref<288x512xbf16, #tpu.memory_space<vmem>>, vector<16x128xbf16>
    tpu.vector_store %arg22[%c112_449, %c0_450], %427 {strides = array<i32>} : memref<288x512xbf16, #tpu.memory_space<vmem>>, vector<16x128xbf16>,
    %c0_451 = arith.constant 0 : index
    %c777_452 = arith.constant 777 : index
    %429 = vector.load %arg21[%c0_451, %c777_452] : memref<32x1152xbf16, #tpu.memory_space<vmem>>, vector<16x128xbf16>
    %c7_453 = arith.constant 7 : index
    %c0_454 = arith.constant 0 : index
    %430 = vector.load %arg18[%c7_453, %c0_454] : memref<8x128xbf16, #tpu.memory_space<vmem>>, vector<1x128xbf16>
    %431 = vector.broadcast %430 : vector<1x128xbf16> to vector<16x128xbf16>
    %432 = arith.mulf %429, %431 : vector<16x128xbf16>
    %c128_455 = arith.constant 128 : index
    %c0_456 = arith.constant 0 : index
    %433 = vector.load %arg22[%c128_455, %c0_456] : memref<288x512xbf16, #tpu.memory_space<vmem>>, vector<16x128xbf16>
    tpu.vector_store %arg22[%c128_455, %c0_456], %432 {strides = array<i32>} : memref<288x512xbf16, #tpu.memory_space<vmem>>, vector<16x128xbf16>,
    %c0_457 = arith.constant 0 : index
    %c0_458 = arith.constant 0 : index
    %434 = vector.load %arg11[%c0_457, %c0_458] : memref<8x144xbf16, #tpu.memory_space<vmem>>, vector<8x144xbf16>
    %c0_459 = arith.constant 0 : index
    %c0_460 = arith.constant 0 : index
    %435 = vector.load %arg22[%c0_459, %c0_460] : memref<288x512xbf16, #tpu.memory_space<vmem>>, vector<144x128xbf16>
    %cst_461 = arith.constant dense<0.000000e+00> : vector<8x128xf32>
    %436 = tpu.matmul %434, %435, %cst_461 {dimension_numbers = #tpu.dot_dimension_numbers<[1], [0], [0], [1], [0, 0, 1, 1], [], []>} : vector<8x144xbf16>, vector<144x128xbf16>, vector<8x128xf32> -> vector<8x128xf32>
    %c0_462 = arith.constant 0 : index
    %c6_463 = arith.constant 6 : index
    %437 = vector.load %arg3[%c0_462, %c6_463] : memref<32x8xf32, #tpu.memory_space<vmem>>, vector<8x1xf32>
    %438 = vector.broadcast %437 : vector<8x1xf32> to vector<8x128xf32>
    %439 = arith.addf %436, %438 : vector<8x128xf32>
    %cst_464 = arith.constant 0.000000e+00 : f32
    %440 = vector.broadcast %cst_464 : f32 to vector<8x128xf32>
    %441 = arith.cmpf oge, %439, %440 : vector<8x128xf32>
    %cst_465 = arith.constant -2.000000e-01 : f32
    %442 = vector.broadcast %cst_465 : f32 to vector<8x128xf32>
    %443 = arith.mulf %442, %439 : vector<8x128xf32>
    %444 = arith.select %441, %439, %443 : vector<8x128xi1>, vector<8x128xf32>
    %445 = arith.truncf %444 : vector<8x128xf32> to vector<8x128xbf16>
    %c0_466 = arith.constant 0 : index
    %c768_467 = arith.constant 768 : index
    %446 = vector.load %arg21[%c0_466, %c768_467] : memref<32x1152xbf16, #tpu.memory_space<vmem>>, vector<8x128xbf16>
    tpu.vector_store %arg21[%c0_466, %c768_467], %445 {strides = array<i32>} : memref<32x1152xbf16, #tpu.memory_space<vmem>>, vector<8x128xbf16>,
    %c0_468 = arith.constant 0 : index
    %c759_469 = arith.constant 759 : index
    %447 = vector.load %arg21[%c0_468, %c759_469] : memref<32x1152xbf16, #tpu.memory_space<vmem>>, vector<8x128xbf16>
    %c0_470 = arith.constant 0 : index
    %c0_471 = arith.constant 0 : index
    %448 = vector.load %arg18[%c0_470, %c0_471] : memref<8x128xbf16, #tpu.memory_space<vmem>>, vector<1x128xbf16>
    %449 = vector.broadcast %448 : vector<1x128xbf16> to vector<8x128xbf16>
    %450 = arith.mulf %447, %449 : vector<8x128xbf16>
    %c0_472 = arith.constant 0 : index
    %c0_473 = arith.constant 0 : index
    %451 = vector.load %arg22[%c0_472, %c0_473] : memref<288x512xbf16, #tpu.memory_space<vmem>>, vector<8x128xbf16>
    tpu.vector_store %arg22[%c0_472, %c0_473], %450 {strides = array<i32>} : memref<288x512xbf16, #tpu.memory_space<vmem>>, vector<8x128xbf16>,
    %c0_474 = arith.constant 0 : index
    %c760_475 = arith.constant 760 : index
    %452 = vector.load %arg21[%c0_474, %c760_475] : memref<32x1152xbf16, #tpu.memory_space<vmem>>, vector<8x128xbf16>
    %c1_476 = arith.constant 1 : index
    %c0_477 = arith.constant 0 : index
    %453 = vector.load %arg18[%c1_476, %c0_477] : memref<8x128xbf16, #tpu.memory_space<vmem>>, vector<1x128xbf16>
    %454 = vector.broadcast %453 : vector<1x128xbf16> to vector<8x128xbf16>
    %455 = arith.mulf %452, %454 : vector<8x128xbf16>
    %c8_478 = arith.constant 8 : index
    %c0_479 = arith.constant 0 : index
    %456 = vector.load %arg22[%c8_478, %c0_479] : memref<288x512xbf16, #tpu.memory_space<vmem>>, vector<8x128xbf16>
    tpu.vector_store %arg22[%c8_478, %c0_479], %455 {strides = array<i32>} : memref<288x512xbf16, #tpu.memory_space<vmem>>, vector<8x128xbf16>,
    %c0_480 = arith.constant 0 : index
    %c761_481 = arith.constant 761 : index
    %457 = vector.load %arg21[%c0_480, %c761_481] : memref<32x1152xbf16, #tpu.memory_space<vmem>>, vector<8x128xbf16>
    %c2_482 = arith.constant 2 : index
    %c0_483 = arith.constant 0 : index
    %458 = vector.load %arg18[%c2_482, %c0_483] : memref<8x128xbf16, #tpu.memory_space<vmem>>, vector<1x128xbf16>
    %459 = vector.broadcast %458 : vector<1x128xbf16> to vector<8x128xbf16>
    %460 = arith.mulf %457, %459 : vector<8x128xbf16>
    %c16_484 = arith.constant 16 : index
    %c0_485 = arith.constant 0 : index
    %461 = vector.load %arg22[%c16_484, %c0_485] : memref<288x512xbf16, #tpu.memory_space<vmem>>, vector<8x128xbf16>
    tpu.vector_store %arg22[%c16_484, %c0_485], %460 {strides = array<i32>} : memref<288x512xbf16, #tpu.memory_space<vmem>>, vector<8x128xbf16>,
    %c0_486 = arith.constant 0 : index
    %c767_487 = arith.constant 767 : index
    %462 = vector.load %arg21[%c0_486, %c767_487] : memref<32x1152xbf16, #tpu.memory_space<vmem>>, vector<8x128xbf16>
    %c3_488 = arith.constant 3 : index
    %c0_489 = arith.constant 0 : index
    %463 = vector.load %arg18[%c3_488, %c0_489] : memref<8x128xbf16, #tpu.memory_space<vmem>>, vector<1x128xbf16>
    %464 = vector.broadcast %463 : vector<1x128xbf16> to vector<8x128xbf16>
    %465 = arith.mulf %462, %464 : vector<8x128xbf16>
    %c24_490 = arith.constant 24 : index
    %c0_491 = arith.constant 0 : index
    %466 = vector.load %arg22[%c24_490, %c0_491] : memref<288x512xbf16, #tpu.memory_space<vmem>>, vector<8x128xbf16>
    tpu.vector_store %arg22[%c24_490, %c0_491], %465 {strides = array<i32>} : memref<288x512xbf16, #tpu.memory_space<vmem>>, vector<8x128xbf16>,
    %c0_492 = arith.constant 0 : index
    %c768_493 = arith.constant 768 : index
    %467 = vector.load %arg21[%c0_492, %c768_493] : memref<32x1152xbf16, #tpu.memory_space<vmem>>, vector<8x128xbf16>
    %c32_494 = arith.constant 32 : index
    %c0_495 = arith.constant 0 : index
    %468 = vector.load %arg22[%c32_494, %c0_495] : memref<288x512xbf16, #tpu.memory_space<vmem>>, vector<8x128xbf16>
    tpu.vector_store %arg22[%c32_494, %c0_495], %467 {strides = array<i32>} : memref<288x512xbf16, #tpu.memory_space<vmem>>, vector<8x128xbf16>,
    %c0_496 = arith.constant 0 : index
    %c769_497 = arith.constant 769 : index
    %469 = vector.load %arg21[%c0_496, %c769_497] : memref<32x1152xbf16, #tpu.memory_space<vmem>>, vector<8x128xbf16>
    %c4_498 = arith.constant 4 : index
    %c0_499 = arith.constant 0 : index
    %470 = vector.load %arg18[%c4_498, %c0_499] : memref<8x128xbf16, #tpu.memory_space<vmem>>, vector<1x128xbf16>
    %471 = vector.broadcast %470 : vector<1x128xbf16> to vector<8x128xbf16>
    %472 = arith.mulf %469, %471 : vector<8x128xbf16>
    %c40_500 = arith.constant 40 : index
    %c0_501 = arith.constant 0 : index
    %473 = vector.load %arg22[%c40_500, %c0_501] : memref<288x512xbf16, #tpu.memory_space<vmem>>, vector<8x128xbf16>
    tpu.vector_store %arg22[%c40_500, %c0_501], %472 {strides = array<i32>} : memref<288x512xbf16, #tpu.memory_space<vmem>>, vector<8x128xbf16>,
    %c0_502 = arith.constant 0 : index
    %c775_503 = arith.constant 775 : index
    %474 = vector.load %arg21[%c0_502, %c775_503] : memref<32x1152xbf16, #tpu.memory_space<vmem>>, vector<8x128xbf16>
    %c5_504 = arith.constant 5 : index
    %c0_505 = arith.constant 0 : index
    %475 = vector.load %arg18[%c5_504, %c0_505] : memref<8x128xbf16, #tpu.memory_space<vmem>>, vector<1x128xbf16>
    %476 = vector.broadcast %475 : vector<1x128xbf16> to vector<8x128xbf16>
    %477 = arith.mulf %474, %476 : vector<8x128xbf16>
    %c48_506 = arith.constant 48 : index
    %c0_507 = arith.constant 0 : index
    %478 = vector.load %arg22[%c48_506, %c0_507] : memref<288x512xbf16, #tpu.memory_space<vmem>>, vector<8x128xbf16>
    tpu.vector_store %arg22[%c48_506, %c0_507], %477 {strides = array<i32>} : memref<288x512xbf16, #tpu.memory_space<vmem>>, vector<8x128xbf16>,
    %c0_508 = arith.constant 0 : index
    %c776_509 = arith.constant 776 : index
    %479 = vector.load %arg21[%c0_508, %c776_509] : memref<32x1152xbf16, #tpu.memory_space<vmem>>, vector<8x128xbf16>
    %c6_510 = arith.constant 6 : index
    %c0_511 = arith.constant 0 : index
    %480 = vector.load %arg18[%c6_510, %c0_511] : memref<8x128xbf16, #tpu.memory_space<vmem>>, vector<1x128xbf16>
    %481 = vector.broadcast %480 : vector<1x128xbf16> to vector<8x128xbf16>
    %482 = arith.mulf %479, %481 : vector<8x128xbf16>
    %c56_512 = arith.constant 56 : index
    %c0_513 = arith.constant 0 : index
    %483 = vector.load %arg22[%c56_512, %c0_513] : memref<288x512xbf16, #tpu.memory_space<vmem>>, vector<8x128xbf16>
    tpu.vector_store %arg22[%c56_512, %c0_513], %482 {strides = array<i32>} : memref<288x512xbf16, #tpu.memory_space<vmem>>, vector<8x128xbf16>,
    %c0_514 = arith.constant 0 : index
    %c777_515 = arith.constant 777 : index
    %484 = vector.load %arg21[%c0_514, %c777_515] : memref<32x1152xbf16, #tpu.memory_space<vmem>>, vector<8x128xbf16>
    %c7_516 = arith.constant 7 : index
    %c0_517 = arith.constant 0 : index
    %485 = vector.load %arg18[%c7_516, %c0_517] : memref<8x128xbf16, #tpu.memory_space<vmem>>, vector<1x128xbf16>
    %486 = vector.broadcast %485 : vector<1x128xbf16> to vector<8x128xbf16>
    %487 = arith.mulf %484, %486 : vector<8x128xbf16>
    %c64_518 = arith.constant 64 : index
    %c0_519 = arith.constant 0 : index
    %488 = vector.load %arg22[%c64_518, %c0_519] : memref<288x512xbf16, #tpu.memory_space<vmem>>, vector<8x128xbf16>
    tpu.vector_store %arg22[%c64_518, %c0_519], %487 {strides = array<i32>} : memref<288x512xbf16, #tpu.memory_space<vmem>>, vector<8x128xbf16>,
    %c0_520 = arith.constant 0 : index
    %c0_521 = arith.constant 0 : index
    %489 = vector.load %arg12[%c0_520, %c0_521] : memref<8x72xbf16, #tpu.memory_space<vmem>>, vector<8x72xbf16>
    %c0_522 = arith.constant 0 : index
    %c0_523 = arith.constant 0 : index
    %490 = vector.load %arg22[%c0_522, %c0_523] : memref<288x512xbf16, #tpu.memory_space<vmem>>, vector<72x128xbf16>
    %cst_524 = arith.constant dense<0.000000e+00> : vector<8x128xf32>
    %491 = tpu.matmul %489, %490, %cst_524 {dimension_numbers = #tpu.dot_dimension_numbers<[1], [0], [0], [1], [0, 0, 1, 1], [], []>} : vector<8x72xbf16>, vector<72x128xbf16>, vector<8x128xf32> -> vector<8x128xf32>
    %c0_525 = arith.constant 0 : index
    %c7_526 = arith.constant 7 : index
    %492 = vector.load %arg3[%c0_525, %c7_526] : memref<32x8xf32, #tpu.memory_space<vmem>>, vector<8x1xf32>
    %493 = vector.broadcast %492 : vector<8x1xf32> to vector<8x128xf32>
    %494 = arith.addf %491, %493 : vector<8x128xf32>
    %cst_527 = arith.constant 0.000000e+00 : f32
    %495 = vector.broadcast %cst_527 : f32 to vector<8x128xf32>
    %496 = arith.cmpf oge, %494, %495 : vector<8x128xf32>
    %cst_528 = arith.constant -2.000000e-01 : f32
    %497 = vector.broadcast %cst_528 : f32 to vector<8x128xf32>
    %498 = arith.mulf %497, %494 : vector<8x128xf32>
    %499 = arith.select %496, %494, %498 : vector<8x128xi1>, vector<8x128xf32>
    %500 = arith.truncf %499 : vector<8x128xf32> to vector<8x128xbf16>
    %c0_529 = arith.constant 0 : index
    %c0_530 = arith.constant 0 : index
    %501 = vector.load %arg16[%c0_529, %c0_530] : memref<128x512xbf16, #tpu.memory_space<vmem>>, vector<128x512xbf16>
    %cst_531 = arith.constant dense<0.000000e+00> : vector<8x512xf32>
    %502 = tpu.matmul %500, %501, %cst_531 {dimension_numbers = #tpu.dot_dimension_numbers<[1], [0], [0], [1], [0, 0, 1, 1], [], []>} : vector<8x128xbf16>, vector<128x512xbf16>, vector<8x512xf32> -> vector<8x512xf32>
    %503 = arith.truncf %502 : vector<8x512xf32> to vector<8x512xbf16>
    %504 = vector.extract_strided_slice %503 {offsets = [0, 0], sizes = [8, 256], strides = [1, 1]} : vector<8x512xbf16> to vector<8x256xbf16>
    %505 = arith.extf %504 : vector<8x256xbf16> to vector<8x256xf32>
    %c0_532 = arith.constant 0 : index
    %c0_533 = arith.constant 0 : index
    %c0_534 = arith.constant 0 : index
    %506 = vector.load %arg20[%c0_532, %c0_533, %c0_534] : memref<2x8x256xf32, #tpu.memory_space<vmem>>, vector<1x8x256xf32>
    %507 = vector.shape_cast %506 : vector<1x8x256xf32> to vector<8x256xf32>
    %508 = vector.shape_cast %505 : vector<8x256xf32> to vector<1x8x256xf32>
    tpu.vector_store %arg20[%c0_532, %c0_533, %c0_534], %508 {strides = array<i32>} : memref<2x8x256xf32, #tpu.memory_space<vmem>>, vector<1x8x256xf32>,
    %509 = vector.extract_strided_slice %503 {offsets = [0, 256], sizes = [8, 256], strides = [1, 1]} : vector<8x512xbf16> to vector<8x256xbf16>
    %510 = arith.extf %509 : vector<8x256xbf16> to vector<8x256xf32>
    %c1_535 = arith.constant 1 : index
    %c0_536 = arith.constant 0 : index
    %c0_537 = arith.constant 0 : index
    %511 = vector.load %arg20[%c1_535, %c0_536, %c0_537] : memref<2x8x256xf32, #tpu.memory_space<vmem>>, vector<1x8x256xf32>
    %512 = vector.shape_cast %511 : vector<1x8x256xf32> to vector<8x256xf32>
    %513 = vector.shape_cast %510 : vector<8x256xf32> to vector<1x8x256xf32>
    tpu.vector_store %arg20[%c1_535, %c0_536, %c0_537], %513 {strides = array<i32>} : memref<2x8x256xf32, #tpu.memory_space<vmem>>, vector<1x8x256xf32>,
    return
  }
  func.func @transform_0(%arg0: i32) -> (i32, i32) {
    %c0_i32 = arith.constant 0 : i32
    %c0_i32_0 = arith.constant 0 : i32
    %c0_i32_1 = arith.constant 0 : i32
    return %c0_i32, %c0_i32_0 : i32, i32
  }
  func.func @transform_1(%arg0: i32) -> (i32, i32) {
    %c0_i32 = arith.constant 0 : i32
    %c0_i32_0 = arith.constant 0 : i32
    %c0_i32_1 = arith.constant 0 : i32
    return %c0_i32, %c0_i32_0 : i32, i32
  }
  func.func @transform_2(%arg0: i32) -> (i32, i32) {
    %c0_i32 = arith.constant 0 : i32
    %c0_i32_0 = arith.constant 0 : i32
    %c0_i32_1 = arith.constant 0 : i32
    return %c0_i32, %c0_i32_0 : i32, i32
  }
  func.func @transform_3(%arg0: i32) -> (i32, i32) {
    %c0_i32 = arith.constant 0 : i32
    %c0_i32_0 = arith.constant 0 : i32
    %c0_i32_1 = arith.constant 0 : i32
    return %c0_i32, %c0_i32_0 : i32, i32
  }
  func.func @transform_4(%arg0: i32) -> (i32, i32) {
    %c0_i32 = arith.constant 0 : i32
    %c0_i32_0 = arith.constant 0 : i32
    %c0_i32_1 = arith.constant 0 : i32
    return %c0_i32, %c0_i32_0 : i32, i32
  }
  func.func @transform_5(%arg0: i32) -> (i32, i32) {
    %c0_i32 = arith.constant 0 : i32
    %c0_i32_0 = arith.constant 0 : i32
    %c0_i32_1 = arith.constant 0 : i32
    return %c0_i32, %c0_i32_0 : i32, i32
  }
  func.func @transform_6(%arg0: i32) -> (i32, i32) {
    %c0_i32 = arith.constant 0 : i32
    %c0_i32_0 = arith.constant 0 : i32
    %c0_i32_1 = arith.constant 0 : i32
    return %c0_i32, %c0_i32_0 : i32, i32
  }
  func.func @transform_7(%arg0: i32) -> (i32, i32) {
    %c0_i32 = arith.constant 0 : i32
    %c0_i32_0 = arith.constant 0 : i32
    %c0_i32_1 = arith.constant 0 : i32
    return %c0_i32, %c0_i32_0 : i32, i32
  }
  func.func @transform_8(%arg0: i32) -> (i32, i32) {
    %c0_i32 = arith.constant 0 : i32
    %c0_i32_0 = arith.constant 0 : i32
    %c0_i32_1 = arith.constant 0 : i32
    return %c0_i32, %c0_i32_0 : i32, i32
  }
  func.func @transform_9(%arg0: i32) -> (i32, i32) {
    %c0_i32 = arith.constant 0 : i32
    %c0_i32_0 = arith.constant 0 : i32
    %c0_i32_1 = arith.constant 0 : i32
    return %c0_i32, %c0_i32_0 : i32, i32
  }
  func.func @transform_10(%arg0: i32) -> (i32, i32) {
    %c0_i32 = arith.constant 0 : i32
    %c0_i32_0 = arith.constant 0 : i32
    %c0_i32_1 = arith.constant 0 : i32
    return %c0_i32, %c0_i32_0 : i32, i32
  }
  func.func @transform_11(%arg0: i32) -> (i32, i32) {
    %c0_i32 = arith.constant 0 : i32
    %c0_i32_0 = arith.constant 0 : i32
    %c0_i32_1 = arith.constant 0 : i32
    return %c0_i32, %c0_i32_0 : i32, i32
  }
  func.func @transform_12(%arg0: i32) -> (i32, i32) {
    %c0_i32 = arith.constant 0 : i32
    %c0_i32_0 = arith.constant 0 : i32
    %c0_i32_1 = arith.constant 0 : i32
    return %c0_i32, %c0_i32_0 : i32, i32
  }
  func.func @transform_13(%arg0: i32) -> (i32, i32) {
    %c0_i32 = arith.constant 0 : i32
    %c0_i32_0 = arith.constant 0 : i32
    %c0_i32_1 = arith.constant 0 : i32
    return %c0_i32, %c0_i32_0 : i32, i32
  }
  func.func @transform_14(%arg0: i32) -> (i32, i32) {
    %c0_i32 = arith.constant 0 : i32
    %c0_i32_0 = arith.constant 0 : i32
    %c0_i32_1 = arith.constant 0 : i32
    return %c0_i32, %c0_i32_0 : i32, i32
  }
  func.func @transform_15(%arg0: i32) -> (i32, i32) {
    %c0_i32 = arith.constant 0 : i32
    %c0_i32_0 = arith.constant 0 : i32
    %c0_i32_1 = arith.constant 0 : i32
    return %c0_i32, %c0_i32_0 : i32, i32
  }
  func.func @transform_16(%arg0: i32) -> (i32, i32) {
    %c0_i32 = arith.constant 0 : i32
    %c0_i32_0 = arith.constant 0 : i32
    %c0_i32_1 = arith.constant 0 : i32
    return %c0_i32, %c0_i32_0 : i32, i32
  }
  func.func @transform_17(%arg0: i32) -> (i32, i32) {
    %c0_i32 = arith.constant 0 : i32
    %c0_i32_0 = arith.constant 0 : i32
    %c0_i32_1 = arith.constant 0 : i32
    return %c0_i32, %c0_i32_0 : i32, i32
  }
  func.func @transform_18(%arg0: i32) -> (i32, i32) {
    %c0_i32 = arith.constant 0 : i32
    %c0_i32_0 = arith.constant 0 : i32
    %c0_i32_1 = arith.constant 0 : i32
    return %c0_i32, %c0_i32_0 : i32, i32
  }
  func.func @transform_19(%arg0: i32) -> (i32, i32, i32) {
    %c0_i32 = arith.constant 0 : i32
    %c0_i32_0 = arith.constant 0 : i32
    %c0_i32_1 = arith.constant 0 : i32
    %c0_i32_2 = arith.constant 0 : i32
    return %c0_i32, %c0_i32_0, %c0_i32_1 : i32, i32, i32
  }
}

</mosaic_0001>

<bundles_post_ra>
// kernel: very_simple_unet_forward.1
= control target key start
LH: loop header
LB: loop body
LE: loop exit
PB: predicated region body
PF: predicated region fallthrough
CT: control target
= control target key end

     0   :  { %v105_v0 = vlaneseq  ;;  %v8223_v4 = vmov 0   ;;  %s10413_s24 = smov 16   ;;  %s10417_s26 = smov 1   ;;  %vm448_vm0 = vcmask 7168   ;;  %vm10426_vm1 = vcmask 1043456   ;;  %s10386_s16 = inlined_call_operand.vmem [shape: bf16[8,512], index: 16, kind: input, shape index: {}]   ;;  %s10387_s0 = inlined_call_operand.vmem [shape: bf16[8,512], index: 0, kind: input, shape index: {}]   ;;  %s10388_s3 = inlined_call_operand.vmem [shape: bf16[8,72], index: 3, kind: input, shape index: {}]   ;;  %s10389_s1 = inlined_call_operand.vmem [shape: f32[8,512], index: 1, kind: input, shape index: {}]   ;;  %s10390_s4 = inlined_call_operand.vmem [shape: bf16[16,72], index: 4, kind: input, shape index: {}]   ;;  %s10391_s2 = inlined_call_operand.vmem [shape: f32[32,8], index: 2, kind: input, shape index: {}]   ;;  %s10392_s5 = inlined_call_operand.vmem [shape: bf16[16,144], index: 5, kind: input, shape index: {}]   ;;  %s10393_s12 = inlined_call_operand.vmem [shape: bf16[512,128], index: 12, kind: input, shape index: {}]   ;;  %s10394_s17 = inlined_call_operand.vmem [shape: bf16[8,128], index: 17, kind: input, shape index: {}]   ;;  %s10395_s6 = inlined_call_operand.vmem [shape: bf16[32,144], index: 6, kind: input, shape index: {}]   ;;  %s10396_s7 = inlined_call_operand.vmem [shape: bf16[32,288], index: 7, kind: input, shape index: {}]   ;;  %s10397_s13 = inlined_call_operand.vmem [shape: bf16[128,32], index: 13, kind: input, shape index: {}]   ;;  %s10398_s18 = inlined_call_operand.vmem [shape: bf16[8,32], index: 18, kind: input, shape index: {}]   ;;  %s10399_s8 = inlined_call_operand.vmem [shape: bf16[16,288], index: 8, kind: input, shape index: {}]   ;;  %s10400_s9 = inlined_call_operand.vmem [shape: bf16[16,144], index: 9, kind: input, shape index: {}]   ;;  %s10401_s14 = inlined_call_operand.vmem [shape: bf16[32,128], index: 14, kind: input, shape index: {}]   ;;  %s10402_s10 = inlined_call_operand.vmem [shape: bf16[8,144], index: 10, kind: input, shape index: {}]   ;;  %s10403_s15 = inlined_call_operand.vmem [shape: bf16[128,512], index: 15, kind: input, shape index: {}]   ;;  %s10404_s11 = inlined_call_operand.vmem [shape: bf16[8,72], index: 11, kind: input, shape index: {}]   ;;  %s10405_s19 = inlined_call_operand.vmem [shape: f32[2,8,256], index: 19, kind: output, shape index: {}]  }
   0x1   :  { %10431 = sst [smem:[#allocation4_spill]] %s10386_s16  ;;  %65 = vst [vmem:[#allocation2 + $0x10] sm:$0xff] %v8223_v4  ;;  %63 = vst [vmem:[#allocation2] sm:$0xff] %v8223_v4  ;;  %982 = vmatprep.mubr.bf16.mxu0 %v8223_v4  ;;  %1023 = vmatprep.mubr.bf16.mxu1 %v8223_v4  ;;  %s8226_s30 = smov 15   ;;  %vm264_vm2 = vcmask 130048   ;;  %vm331_vm3 = vcmask 924672  }
   0x2   :  { %10432 = sst [smem:[#allocation5_spill]] %s10387_s0  ;;  %64 = vst [vmem:[#allocation2 + $0x8] sm:$0xff] %v8223_v4  ;;  %66 = vst [vmem:[#allocation2 + $0x18] sm:$0xff] %v8223_v4  ;;  %v8362_v5 = vshrl.u32 %v105_v0, 7  ;;  %7918 = vset.pattern.permute.xlu1 %v8223_v4  ;;  %7917 = vset.pattern.permute.xlu0 %v8223_v4  ;;  %s10415_s22 = smov 17   ;;  %vm354_vm4 = vcmask 121856  }
   0x3   :  { %10433 = sst [smem:[#allocation6_spill]] %s10388_s3  ;;  %67 = vst [vmem:[#allocation2 + $0x20] sm:$0xf] %v8223_v4  ;;  %68 = vst [vmem:[#allocation2 + $0x24] sm:$0xff] %v8223_v4  ;;  %s10419_s29 = smov 113   ;;  %vm425_vm5 = vcmask 1039360  }
   0x4   :  { %10434 = sst [smem:[#allocation7_spill]] %s10389_s1  ;;  %69 = vst [vmem:[#allocation2 + $0x2c] sm:$0xff] %v8223_v4  ;;  %70 = vst [vmem:[#allocation2 + $0x34] sm:$0xff] %v8223_v4  ;;  %v8368_v14 = vsub.s32 3, %v8362_v5  ;;  %v8371_v19 = vsub.s32 2, %v8362_v5  ;;  %s10421_s0 = smov 127  }
   0x5   :  { %s10435_s20 = sld [smem:[#allocation4_spill]]  ;;  %71 = vst [vmem:[#allocation2 + $0x3c] sm:$0xff] %v8223_v4  ;;  %72 = vst [vmem:[#allocation2 + $0x44] sm:$0xf] %v8223_v4  ;;  %s10411_s3 = smov 111   ;;  %vm170_vm6 = vcmask 138240  }
   0x6   :  { %73 = vst [vmem:[#allocation2 + $0x48] sm:$0xff] %v8223_v4  ;;  %75 = vst [vmem:[#allocation2 + $0x58] sm:$0xff] %v8223_v4  ;;  %s10436_s16 = sld [smem:[#allocation5_spill]]  ;;  %s10409_s23 = smov 112   ;;  %vm146_vm7 = vcmask 908288   ;;  %vm241_vm8 = vcmask 916480  }
   0x7   :  { %76 = vst [vmem:[#allocation2 + $0x60] sm:$0xff] %v8223_v4  ;;  %77 = vst [vmem:[#allocation2 + $0x68] sm:$0xf] %v8223_v4  ;;  %s10439_s27 = sld [smem:[#allocation6_spill]]  ;;  %vm10423_vm9 = vcmask 588800   ;;  %s10444_s28 = smov 127  }
   0x8   :  { %80 = vst [vmem:[#allocation2 + $0x7c] sm:$0xff] %v8223_v4  ;;  %81 = vst [vmem:[#allocation2 + $0x84] sm:$0xff] %v8223_v4  ;;  %s10440_s21 = sld [smem:[#allocation7_spill]]  ;;  %s8234_s1 = smov 7  }
   0x9   :  { %82 = vst [vmem:[#allocation2 + $0x8c] sm:$0xf] %v8223_v4 }
   0xb   :  { %v644_v1 = vld [vmem:[%s10435_s20 + $0x8] sm:$0x88]  ;;  %v643_v2 = vld [vmem:[%s10435_s20] sm:$0x88]  ;;  %v464_v3 = vld [vmem:[%s10435_s20 + $0x8] sm:$0x44] }
   0xc   :  { %v7256_v6 = vcombine.low %v644_v1, %v644_v1  ;;  %v7257_v7 = vcombine.high %v644_v1, %v644_v1  ;;  %v7254_v8 = vcombine.low %v643_v2, %v643_v2  ;;  %v463_v9 = vld [vmem:[%s10435_s20] sm:$0x44]  ;;  %v7255_v10 = vcombine.high %v643_v2, %v643_v2  ;;  %v731_v27 = vld [vmem:[%s10435_s20] sm:$0x88]  ;;  %v552_v37 = vld [vmem:[%s10435_s20 + $0x8] sm:$0x44] }
   0xd   :  { %v7244_v11 = vcombine.low %v464_v3, %v464_v3  ;;  %v7245_v12 = vcombine.high %v464_v3, %v464_v3  ;;  %v7242_v13 = vcombine.low %v463_v9, %v463_v9  ;;  %v551_v22 = vld [vmem:[%s10435_s20] sm:$0x44]  ;;  %v7243_v26 = vcombine.high %v463_v9, %v463_v9  ;;  %v732_v38 = vld [vmem:[%s10435_s20 + $0x8] sm:$0x88]  ;;  %v276_v60 = vld [vmem:[%s10435_s20 + $0x8] sm:$0x22] }
   0xe   :  { %v670_v15 = vpack.i.b16 %v7256_v6, %v7256_v6  ;;  %v677_v16 = vpack.i.b16 %v7257_v7, %v7257_v7  ;;  %v656_v17 = vpack.i.b16 %v7254_v8, %v7254_v8  ;;  %v663_v18 = vpack.i.b16 %v7255_v10, %v7255_v10  ;;  %v8388_v32 = vld [vmem:[%s10436_s16] sm:$0xff]  ;;  %v8400_v39 = vld [vmem:[%s10436_s16 + $0x8] sm:$0xff]  ;;  %s8245_s16 = smov 5  }
   0xf   :  { %v490_v20 = vpack.i.b16 %v7244_v11, %v7244_v11  ;;  %v497_v21 = vpack.i.b16 %v7245_v12, %v7245_v12  ;;  %v476_v31 = vpack.i.b16 %v7242_v13, %v7242_v13  ;;  %v483_v34 = vpack.i.b16 %v7243_v26, %v7243_v26  ;;  %85 = vst [vmem:[#allocation2 + $0x4] sm:$0xff] %v8388_v32  ;;  %v275_v10 = vld [vmem:[%s10435_s20] sm:$0x22] }
  0x10   :  { %v675_v23 = vrot.slane %v670_v15, %v8368_v14  ;;  %v682_v24 = vrot.slane %v677_v16, %v8368_v14  ;;  %v661_v25 = vrot.slane %v656_v17, %v8368_v14  ;;  %v668_v28 = vrot.slane %v663_v18, %v8368_v14  ;;  %86 = vst [vmem:[#allocation2 + $0xc] sm:$0xff] %v8400_v39  ;;  %v365_v16 = vld [vmem:[%s10435_s20] sm:$0x22] }
  0x11   :  { %v495_v29 = vrot.slane %v490_v20, %v8371_v19  ;;  %v502_v30 = vrot.slane %v497_v21, %v8371_v19  ;;  %v7248_v35 = vcombine.low %v551_v22, %v551_v22  ;;  %v7249_v36 = vcombine.high %v551_v22, %v551_v22  ;;  %v366_v22 = vld [vmem:[%s10435_s20 + $0x8] sm:$0x22] }
  0x12   :  { %v7259_v33 = vcombine.low %v675_v23, %v682_v24  ;;  %v7258_v40 = vcombine.low %v661_v25, %v668_v28  ;;  %v481_v42 = vrot.slane %v476_v31, %v8371_v19  ;;  %v7260_v43 = vcombine.low %v731_v27, %v731_v27  ;;  %v90_v31 = vld [vmem:[%s10435_s20] sm:$0x11] }
  0x13   :  { %v7247_v41 = vcombine.low %v495_v29, %v502_v30  ;;  %v488_v44 = vrot.slane %v483_v34, %v8371_v19  ;;  %v564_v45 = vshrl.u32 %v7248_v35, 16  ;;  %v572_v46 = vshrl.u32 %v7249_v36, 16 }
  0x14   :  { %695 = vrot.lane.b32.xlu1 %v7259_v33, %s10413_s24  ;;  %v7261_v47 = vcombine.high %v731_v27, %v731_v27  ;;  %693 = vrot.lane.b32.xlu0 %v7258_v40, %s10413_s24  ;;  %v744_v48 = vshrl.u32 %v7260_v43, 16  ;;  %v7250_v49 = vcombine.low %v552_v37, %v552_v37  ;;  %v7251_v50 = vcombine.high %v552_v37, %v552_v37 }
  0x15   :  { %v7262_v51 = vcombine.low %v732_v38, %v732_v38  ;;  %v7246_v52 = vcombine.low %v481_v42, %v488_v44  ;;  %v565_v53 = vpack.i.b16 %v564_v45, %v564_v45  ;;  %v573_v54 = vpack.i.b16 %v572_v46, %v572_v46 }
  0x16   :  { %v752_v55 = vshrl.u32 %v7261_v47, 16  ;;  %v745_v56 = vpack.i.b16 %v744_v48, %v744_v48  ;;  %v580_v57 = vshrl.u32 %v7250_v49, 16  ;;  %v588_v58 = vshrl.u32 %v7251_v50, 16  ;;  %v91_v50 = vld [vmem:[%s10435_s20 + $0x8] sm:$0x11] }
  0x17   :  { %v7263_v59 = vcombine.high %v732_v38, %v732_v38  ;;  %v570_v61 = vrot.slane %v565_v53, %v8371_v19  ;;  %v578_v62 = vrot.slane %v573_v54, %v8371_v19  ;;  %v760_v0 = vshrl.u32 %v7262_v51, 16 }
  0x18   :  { %515 = vrot.lane.b32.xlu1 %v7247_v41, %s10417_s26  ;;  %v753_v63 = vpack.i.b16 %v752_v55, %v752_v55  ;;  %513 = vrot.lane.b32.xlu0 %v7246_v52, %s10417_s26  ;;  %v750_v1 = vrot.slane %v745_v56, %v8368_v14  ;;  %v581_v2 = vpack.i.b16 %v580_v57, %v580_v57  ;;  %v8427_v20 = vsub.s32 1, %v8362_v5  ;;  %v181_v55 = vld [vmem:[%s10435_s20] sm:$0x11] }
  0x19   :  { %v589_v3 = vpack.i.b16 %v588_v58, %v588_v58  ;;  %v768_v4 = vshrl.u32 %v7263_v59, 16  ;;  %v7252_v6 = vcombine.low %v570_v61, %v578_v62  ;;  %v761_v8 = vpack.i.b16 %v760_v0, %v760_v0 }
  0x1a   :  { %v758_v7 = vrot.slane %v753_v63, %v8368_v14  ;;  %v7232_v9 = vcombine.low %v276_v60, %v276_v60  ;;  %v586_v11 = vrot.slane %v581_v2, %v8371_v19  ;;  %v7233_v15 = vcombine.high %v276_v60, %v276_v60  ;;  %v182_v60 = vld [vmem:[%s10435_s20 + $0x8] sm:$0x11] }
  0x1b   :  { %v594_v12 = vrot.slane %v589_v3, %v8371_v19  ;;  %v769_v13 = vpack.i.b16 %v768_v4, %v768_v4  ;;  %v766_v18 = vrot.slane %v761_v8, %v8368_v14  ;;  %v7230_v26 = vcombine.low %v275_v10, %v275_v10 }
  0x1c   :  { %605 = vrot.lane.b32.xlu1 %v7252_v6, %s8226_s30  ;;  %v7264_v17 = vcombine.low %v750_v1, %v758_v7  ;;  %v302_v21 = vpack.i.b16 %v7232_v9, %v7232_v9  ;;  %v309_v25 = vpack.i.b16 %v7233_v15, %v7233_v15  ;;  %v7231_v28 = vcombine.high %v275_v10, %v275_v10 }
  0x1d   :  { %v7253_v23 = vcombine.low %v586_v11, %v594_v12  ;;  %v774_v24 = vrot.slane %v769_v13, %v8368_v14  ;;  %v7236_v29 = vcombine.low %v365_v16, %v365_v16  ;;  %v7237_v30 = vcombine.high %v365_v16, %v365_v16 }
  0x1e   :  { %785 = vrot.lane.b32.xlu0 %v7264_v17, %s10415_s22  ;;  %v307_v27 = vrot.slane %v302_v21, %v8427_v20  ;;  %v314_v34 = vrot.slane %v309_v25, %v8427_v20  ;;  %v288_v35 = vpack.i.b16 %v7230_v26, %v7230_v26  ;;  %v7238_v36 = vcombine.low %v366_v22, %v366_v22 }
  0x1f   :  { %v7265_v33 = vcombine.low %v766_v18, %v774_v24  ;;  %v295_v37 = vpack.i.b16 %v7231_v28, %v7231_v28  ;;  %v378_v38 = vshrl.u32 %v7236_v29, 16  ;;  %v386_v40 = vshrl.u32 %v7237_v30, 16 }
  0x20   :  { %607 = vrot.lane.b32.xlu1 %v7253_v23, %s8226_s30  ;;  %v7239_v41 = vcombine.high %v366_v22, %v366_v22  ;;  %v7235_v42 = vcombine.low %v307_v27, %v314_v34  ;;  %v293_v43 = vrot.slane %v288_v35, %v8427_v20  ;;  %v394_v44 = vshrl.u32 %v7238_v36, 16  ;;  %v642_v35 = vld [vmem:[#allocation2 + $0x14] sm:$0xf] }
  0x21   :  { %v7218_v45 = vcombine.low %v90_v31, %v90_v31  ;;  %v300_v46 = vrot.slane %v295_v37, %v8427_v20  ;;  %v379_v47 = vpack.i.b16 %v378_v38, %v378_v38  ;;  %v387_v48 = vpack.i.b16 %v386_v40, %v386_v40 }
  0x22   :  { %787 = vrot.lane.b32.xlu0 %v7265_v33, %s10415_s22  ;;  %v402_v49 = vshrl.u32 %v7239_v41, 16  ;;  %v395_v51 = vpack.i.b16 %v394_v44, %v394_v44  ;;  %v7219_v52 = vcombine.high %v90_v31, %v90_v31  ;;  %v8447_v54 = vsub.s32 0, %v8362_v5  ;;  %v462_v41 = vld [vmem:[#allocation2 + $0x14] sm:$0xf] }
  0x23   :  { %v103_v53 = vpack.i.b16 %v7218_v45, %v7218_v45  ;;  %v7234_v56 = vcombine.low %v293_v43, %v300_v46  ;;  %v384_v57 = vrot.slane %v379_v47, %v8427_v20  ;;  %v392_v58 = vrot.slane %v387_v48, %v8427_v20 }
  0x24   :  { %327 = vrot.lane.b32.xlu1 %v7235_v42, %s10419_s29  ;;  %v403_v59 = vpack.i.b16 %v402_v49, %v402_v49  ;;  %v400_v5 = vrot.slane %v395_v51, %v8427_v20  ;;  %v110_v62 = vpack.i.b16 %v7219_v52, %v7219_v52  ;;  %v7220_v63 = vcombine.low %v91_v50, %v91_v50  ;;  %v550_v52 = vld [vmem:[#allocation2 + $0x14] sm:$0xf] }
  0x25   :  { %v108_v61 = vrot.slane %v103_v53, %v8447_v54  ;;  %v7240_v0 = vcombine.low %v384_v57, %v392_v58  ;;  %v7221_v2 = vcombine.high %v91_v50, %v91_v50  ;;  %v7224_v3 = vcombine.low %v181_v55, %v181_v55 }
  0x26   :  { %325 = vrot.lane.b32.xlu0 %v7234_v56, %s10419_s29  ;;  %v408_v1 = vrot.slane %v403_v59, %v8427_v20  ;;  %v115_v4 = vrot.slane %v110_v62, %v8447_v54  ;;  %v117_v6 = vpack.i.b16 %v7220_v63, %v7220_v63  ;;  %v7225_v7 = vcombine.high %v181_v55, %v181_v55  ;;  %v274_v59 = vld [vmem:[#allocation2 + $0x10] sm:$0xf] }
  0x27   :  { %v7226_v8 = vcombine.low %v182_v60, %v182_v60  ;;  %v124_v10 = vpack.i.b16 %v7221_v2, %v7221_v2  ;;  %v194_v11 = vshrl.u32 %v7224_v3, 16  ;;  %v7227_v12 = vcombine.high %v182_v60, %v182_v60  ;;  %v8504_v3 = vld [vmem:[#allocation2 + $0x8] sm:$0xff] }
  0x28   :  { %v7241_v9 = vcombine.low %v400_v5, %v408_v1  ;;  %v122_v13 = vrot.slane %v117_v6, %v8447_v54  ;;  %v202_v15 = vshrl.u32 %v7225_v7, 16  ;;  %v7222_v17 = vcombine.low %v108_v61, %v115_v4 }
  0x29   :  { %v210_v16 = vshrl.u32 %v7226_v8, 16  ;;  %v129_v18 = vrot.slane %v124_v10, %v8447_v54  ;;  %v195_v21 = vpack.i.b16 %v194_v11, %v194_v11  ;;  %v218_v22 = vshrl.u32 %v7227_v12, 16 }
  0x2a   :  { %419 = vrot.lane.b32.xlu0 %v7240_v0, %s10421_s0  ;;  %421 = vrot.lane.b32.xlu1 %v7241_v9, %s10421_s0  ;;  %v203_v23 = vpack.i.b16 %v202_v15, %v202_v15  ;;  %v272_v15 = vld [vmem:[#allocation2] sm:$0xff] }
  0x2b   :  { %v211_v24 = vpack.i.b16 %v210_v16, %v210_v16  ;;  %v7223_v25 = vcombine.low %v122_v13, %v129_v18  ;;  %v200_v26 = vrot.slane %v195_v21, %v8447_v54  ;;  %v219_v27 = vpack.i.b16 %v218_v22, %v218_v22 }
  0x2c   :  { %v208_v28 = vrot.slane %v203_v23, %v8447_v54  ;;  %v730_v23 = vld [vmem:[#allocation2 + $0x14] sm:$0xf] }
  0x2d   :  { %v216_v29 = vrot.slane %v211_v24, %v8447_v54  ;;  %v224_v30 = vrot.slane %v219_v27, %v8447_v54 }
  0x2e   :  { %140 = vrot.lane.b32.xlu0 %v7222_v17, %s10411_s3  ;;  %142 = vrot.lane.b32.xlu1 %v7223_v25, %s10411_s3  ;;  %v7228_v31 = vcombine.low %v200_v26, %v208_v28 }
  0x2f   :  { %v7229_v33 = vcombine.low %v216_v29, %v224_v30 }
  0x32   :  { %235 = vrot.lane.b32.xlu0 %v7228_v31, %s10409_s23  ;;  %237 = vrot.lane.b32.xlu1 %v7229_v33, %s10409_s23 }
  0x86   :  { %v696_v34 = vpop.permute.xlu1 %695  ;;  %v694_v37 = vpop.permute.xlu0 %693 }
  0x87   :  { %v698_v36 = vrot.slane %v696_v34, 4  ;;  %v697_v48 = vrot.slane %v694_v37, 4 }
  0x89   :  { %v707_v38 = vmul.bf16 %v698_v36, %v642_v35  ;;  %v700_v55 = vsel %vm10426_vm1, %v697_v48, %v698_v36  ;;  %v699_v1 = vsel %vm264_vm2, %v697_v48, %v694_v37  ;;  %v364_v36 = vld [vmem:[#allocation2 + $0x10] sm:$0xf] }
  0x8a   :  { %v8475_v40 = vpop.permute.xlu1 %515  ;;  %v8478_v43 = vpop.permute.xlu0 %513  ;;  %v701_v60 = vsel %vm264_vm2, %v700_v55, %v696_v34  ;;  %v705_v9 = vmul.bf16 %v699_v1, %v8388_v32 }
  0x8b   :  { %v518_v42 = vrot.slane %v8475_v40, 4  ;;  %715 = vrot.lane.b32.xlu0 %v707_v38, %s10409_s23  ;;  %v517_v44 = vrot.slane %v8478_v43, 4  ;;  %v706_v0 = vmul.bf16 %v701_v60, %v8400_v39  ;;  %v89_v60 = vld [vmem:[#allocation2 + $0x10] sm:$0xf] }
  0x8d   :  { %v527_v45 = vmul.bf16 %v518_v42, %v462_v41  ;;  %v519_v46 = vsel %vm448_vm0, %v517_v44, %v8478_v43  ;;  %v520_v28 = vsel %vm10426_vm1, %v517_v44, %v518_v42 }
  0x8e   :  { %v8486_v47 = vpop.permute.xlu1 %605  ;;  %v525_v49 = vmul.bf16 %v519_v46, %v8388_v32  ;;  %v521_v34 = vsel %vm448_vm0, %v520_v28, %v8475_v40 }
  0x8f   :  { %535 = vrot.lane.b32.xlu1 %v527_v45, %s10421_s0  ;;  %v609_v2 = vrot.slane %v8486_v47, 4  ;;  %v526_v38 = vmul.bf16 %v521_v34, %v8400_v39 }
  0x90   :  { %v8490_v50 = vpop.permute.xlu0 %785 }
  0x91   :  { %v611_v12 = vsel %vm354_vm4, %v609_v2, %v8486_v47  ;;  %v789_v18 = vrot.slane %v8490_v50, 4 }
  0x92   :  { %v8492_v51 = vpop.permute.xlu1 %607  ;;  %v617_v21 = vmul.bf16 %v611_v12, %v8388_v32 }
  0x93   :  { %v610_v53 = vrot.slane %v8492_v51, 4  ;;  %531 = vrot.lane.b32.xlu1 %v525_v49, %s10421_s0  ;;  %v791_v43 = vsel %vm170_vm6, %v789_v18, %v8490_v50 }
  0x94   :  { %v788_v56 = vpop.permute.xlu0 %787  ;;  %v797_v46 = vmul.bf16 %v791_v43, %v8388_v32  ;;  %v1597_v43 = vld [vmem:[%s10435_s20] sm:$0x88] }
  0x95   :  { %v619_v57 = vmul.bf16 %v610_v53, %v550_v52  ;;  %v790_v16 = vrot.slane %v788_v56, 4  ;;  %v612_v48 = vsel %vm10426_vm1, %v609_v2, %v610_v53 }
  0x96   :  { %v328_v58 = vpop.permute.xlu1 %327  ;;  %v613_v55 = vsel %vm354_vm4, %v612_v48, %v8492_v51 }
  0x97   :  { %v330_v5 = vrot.slane %v328_v58, 4  ;;  %627 = vrot.lane.b32.xlu1 %v619_v57, %s10419_s29  ;;  %v792_v26 = vsel %vm10426_vm1, %v789_v18, %v790_v16  ;;  %v799_v29 = vmul.bf16 %v790_v16, %v730_v23  ;;  %v618_v53 = vmul.bf16 %v613_v55, %v8400_v39  ;;  %v1417_v55 = vld [vmem:[%s10435_s20] sm:$0x44] }
  0x98   :  { %v326_v61 = vpop.permute.xlu0 %325  ;;  %v793_v33 = vsel %vm170_vm6, %v792_v26, %v788_v56 }
  0x99   :  { %v329_v62 = vrot.slane %v326_v61, 4  ;;  %v340_v63 = vmul.bf16 %v330_v5, %v274_v59  ;;  %v798_v37 = vmul.bf16 %v793_v33, %v8400_v39 }
  0x9b   :  { %348 = vrot.lane.b32.xlu0 %v340_v63, %s8226_s30  ;;  %713 = vrot.lane.b32.xlu1 %v706_v0, %s10409_s23  ;;  %v333_v4 = vsel %vm10426_vm1, %v329_v62, %v330_v5  ;;  %v332_v13 = vsel %vm331_vm3, %v329_v62, %v326_v61 }
  0x9c   :  { %v334_v6 = vsel %vm331_vm3, %v333_v4, %v328_v58  ;;  %v8510_v7 = vpop.permute.xlu0 %419  ;;  %v8512_v8 = vpop.permute.xlu1 %421  ;;  %v338_v22 = vmul.bf16 %v332_v13, %v272_v15  ;;  %v180_v58 = vld [vmem:[#allocation2 + $0x10] sm:$0xf]  ;;  %v1686_v4 = vld [vmem:[%s10435_s20 + $0x8] sm:$0x88] }
  0x9d   :  { %v339_v10 = vmul.bf16 %v334_v6, %v8504_v3  ;;  %v423_v11 = vrot.slane %v8510_v7, 4  ;;  %v424_v35 = vrot.slane %v8512_v8, 4  ;;  %v1685_v6 = vld [vmem:[%s10435_s20] sm:$0x88] }
  0x9f   :  { %711 = vrot.lane.b32.xlu0 %v705_v9, %s10409_s23  ;;  %346 = vrot.lane.b32.xlu1 %v339_v10, %s8226_s30  ;;  %v426_v17 = vsel %vm425_vm5, %v423_v11, %v8510_v7  ;;  %v434_v40 = vmul.bf16 %v424_v35, %v364_v36  ;;  %v427_v5 = vsel %vm10426_vm1, %v423_v11, %v424_v35  ;;  %v1506_v7 = vld [vmem:[%s10435_s20 + $0x8] sm:$0x44]  ;;  %v1598_v36 = vld [vmem:[%s10435_s20 + $0x8] sm:$0x88]  ;;  %s10438_s23 = smov 112  }
  0xa0   :  { %v141_v24 = vpop.permute.xlu0 %140  ;;  %v143_v25 = vpop.permute.xlu1 %142  ;;  %v432_v27 = vmul.bf16 %v426_v17, %v272_v15  ;;  %v428_v51 = vsel %vm425_vm5, %v427_v5, %v8512_v8  ;;  %v7336_v8 = vcombine.low %v1686_v4, %v1686_v4  ;;  %v7337_v9 = vcombine.high %v1686_v4, %v1686_v4 }
  0xa1   :  { %v144_v30 = vrot.slane %v141_v24, 4  ;;  %v145_v31 = vrot.slane %v143_v25, 4  ;;  %v433_v1 = vmul.bf16 %v428_v51, %v8504_v3  ;;  %v7334_v10 = vcombine.low %v1685_v6, %v1685_v6 }
  0xa2   :  { %v7335_v11 = vcombine.high %v1685_v6, %v1685_v6  ;;  %v7324_v12 = vcombine.low %v1506_v7, %v1506_v7  ;;  %v7325_v13 = vcombine.high %v1506_v7, %v1506_v7  ;;  %v1714_v17 = vshrl.u32 %v7336_v8, 16  ;;  %v1234_v6 = vld [vmem:[%s10435_s20 + $0x8] sm:$0x22] }
  0xa3   :  { %623 = vrot.lane.b32.xlu1 %v617_v21, %s10419_s29  ;;  %344 = vrot.lane.b32.xlu0 %v338_v22, %s8226_s30  ;;  %v149_v41 = vsel %vm10426_vm1, %v144_v30, %v145_v31  ;;  %v147_v47 = vsel %vm146_vm7, %v144_v30, %v141_v24  ;;  %v156_v62 = vmul.bf16 %v145_v31, %v89_v60  ;;  %v1722_v18 = vshrl.u32 %v7337_v9, 16 }
  0xa4   :  { %v236_v42 = vpop.permute.xlu0 %235  ;;  %v150_v44 = vsel %vm146_vm7, %v149_v41, %v143_v25  ;;  %v154_v52 = vmul.bf16 %v272_v15, %v147_v47  ;;  %v238_v56 = vpop.permute.xlu1 %237  ;;  %v1698_v21 = vshrl.u32 %v7334_v10, 16  ;;  %v1706_v22 = vshrl.u32 %v7335_v11, 16  ;;  %v1418_v47 = vld [vmem:[%s10435_s20 + $0x8] sm:$0x44]  ;;  %v1233_v11 = vld [vmem:[%s10435_s20] sm:$0x22] }
  0xa5   :  { %v239_v45 = vrot.slane %v236_v42, 4  ;;  %v155_v49 = vmul.bf16 %v8504_v3, %v150_v44  ;;  %v240_v59 = vrot.slane %v238_v56, 4  ;;  %v1534_v23 = vshrl.u32 %v7324_v12, 16 }
  0xa6   :  { %v1542_v24 = vshrl.u32 %v7325_v13, 16  ;;  %v1723_v28 = vpack.i.b16 %v1722_v18, %v1722_v18  ;;  %v1707_v30 = vpack.i.b16 %v1706_v22, %v1706_v22  ;;  %v7318_v5 = vcombine.low %v1418_v47, %v1418_v47 }
  0xa7   :  { %438 = vrot.lane.b32.xlu1 %v432_v27, %s10417_s26  ;;  %807 = vrot.lane.b32.xlu0 %v799_v29, %s10411_s3  ;;  %v242_v50 = vsel %vm241_vm8, %v239_v45, %v236_v42  ;;  %v250_v61 = vmul.bf16 %v240_v59, %v180_v58  ;;  %v243_v63 = vsel %vm10426_vm1, %v239_v45, %v240_v59 }
  0xa8   :  { %v248_v57 = vmul.bf16 %v272_v15, %v242_v50  ;;  %v244_v0 = vsel %vm241_vm8, %v243_v63, %v238_v56  ;;  %v1715_v27 = vpack.i.b16 %v1714_v17, %v1714_v17  ;;  %v1699_v29 = vpack.i.b16 %v1698_v21, %v1698_v21 }
  0xa9   :  { %v249_v2 = vmul.bf16 %v8504_v3, %v244_v0  ;;  %v1505_v3 = vld [vmem:[%s10435_s20] sm:$0x44]  ;;  %v1535_v31 = vpack.i.b16 %v1534_v23, %v1534_v23  ;;  %v1543_v33 = vpack.i.b16 %v1542_v24, %v1542_v24  ;;  %v1712_v42 = vrot.slane %v1707_v30, %v8368_v14  ;;  %v1321_v30 = vld [vmem:[%s10435_s20] sm:$0x22] }
  0xaa   :  { %v7322_v15 = vcombine.low %v1505_v3, %v1505_v3  ;;  %v7323_v16 = vcombine.high %v1505_v3, %v1505_v3  ;;  %v1704_v41 = vrot.slane %v1699_v29, %v8368_v14  ;;  %v7330_v50 = vcombine.low %v1598_v36, %v1598_v36 }
  0xab   :  { %805 = vrot.lane.b32.xlu1 %v798_v37, %s10411_s3  ;;  %533 = vrot.lane.b32.xlu0 %v526_v38, %s10421_s0  ;;  %v1720_v37 = vrot.slane %v1715_v27, %v8368_v14  ;;  %v1728_v38 = vrot.slane %v1723_v28, %v8368_v14  ;;  %v1548_v44 = vrot.slane %v1543_v33, %v8371_v19 }
  0xac   :  { %v1518_v25 = vshrl.u32 %v7322_v15, 16  ;;  %v1526_v26 = vshrl.u32 %v7323_v16, 16  ;;  %v7328_v58 = vcombine.low %v1597_v43, %v1597_v43  ;;  %v1624_v59 = vpack.i.b16 %v7330_v50, %v7330_v50  ;;  %v1322_v15 = vld [vmem:[%s10435_s20 + $0x8] sm:$0x22] }
  0xad   :  { %v7339_v48 = vcombine.low %v1720_v37, %v1728_v38  ;;  %v7319_v51 = vcombine.high %v1418_v47, %v1418_v47  ;;  %v7316_v63 = vcombine.low %v1417_v55, %v1417_v55  ;;  %v7317_v4 = vcombine.high %v1417_v55, %v1417_v55 }
  0xae   :  { %v1519_v34 = vpack.i.b16 %v1518_v25, %v1518_v25  ;;  %v1527_v35 = vpack.i.b16 %v1526_v26, %v1526_v26  ;;  %v1629_v0 = vrot.slane %v1624_v59, %v8368_v14  ;;  %v7306_v21 = vcombine.low %v1234_v6, %v1234_v6 }
  0xaf   :  { %442 = vrot.lane.b32.xlu1 %v434_v40, %s10417_s26  ;;  %803 = vrot.lane.b32.xlu0 %v797_v46, %s10411_s3  ;;  %v1540_v40 = vrot.slane %v1535_v31, %v8371_v19  ;;  %v1451_v9 = vpack.i.b16 %v7319_v51, %v7319_v51  ;;  %v1430_v10 = vpack.i.b16 %v7316_v63, %v7316_v63  ;;  %s10437_s3 = smov 111  }
  0xb0   :  { %v1524_v45 = vrot.slane %v1519_v34, %v8371_v19  ;;  %v1532_v46 = vrot.slane %v1527_v35, %v8371_v19  ;;  %v1437_v13 = vpack.i.b16 %v7317_v4, %v7317_v4  ;;  %v7307_v23 = vcombine.high %v1234_v6, %v1234_v6  ;;  %v1054_v35 = vld [vmem:[%s10435_s20 + $0x8] sm:$0x11]  ;;  %v1141_v4 = vld [vmem:[%s10435_s20] sm:$0x11] }
  0xb1   :  { %v7327_v56 = vcombine.low %v1540_v40, %v1548_v44  ;;  %v1456_v17 = vrot.slane %v1451_v9, %v8371_v19  ;;  %v1435_v18 = vrot.slane %v1430_v10, %v8371_v19  ;;  %v7304_v24 = vcombine.low %v1233_v11, %v1233_v11 }
  0xb2   :  { %v1442_v22 = vrot.slane %v1437_v13, %v8371_v19  ;;  %v7305_v25 = vcombine.high %v1233_v11, %v1233_v11  ;;  %v1260_v27 = vpack.i.b16 %v7306_v21, %v7306_v21  ;;  %v7312_v28 = vcombine.low %v1322_v15, %v1322_v15 }
  0xb3   :  { %162 = vrot.lane.b32.xlu1 %v155_v49, %s10415_s22  ;;  %160 = vrot.lane.b32.xlu0 %v154_v52, %s10415_s22  ;;  %v7338_v49 = vcombine.low %v1704_v41, %v1712_v42  ;;  %v7331_v52 = vcombine.high %v1598_v36, %v1598_v36  ;;  %v7313_v29 = vcombine.high %v1322_v15, %v1322_v15 }
  0xb4   :  { %v7320_v31 = vcombine.low %v1435_v18, %v1442_v22  ;;  %v1267_v33 = vpack.i.b16 %v7307_v23, %v7307_v23  ;;  %v1246_v34 = vpack.i.b16 %v7304_v24, %v7304_v24  ;;  %v1265_v36 = vrot.slane %v1260_v27, %v8427_v20 }
  0xb5   :  { %v1631_v60 = vpack.i.b16 %v7331_v52, %v7331_v52  ;;  %v1253_v37 = vpack.i.b16 %v7305_v25, %v7305_v25  ;;  %v1350_v38 = vshrl.u32 %v7312_v28, 16  ;;  %v1358_v41 = vshrl.u32 %v7313_v29, 16 }
  0xb6   :  { %v1272_v42 = vrot.slane %v1267_v33, %v8427_v20  ;;  %v7310_v40 = vcombine.low %v1321_v30, %v1321_v30  ;;  %v7311_v44 = vcombine.high %v1321_v30, %v1321_v30  ;;  %v7298_v13 = vcombine.low %v1141_v4, %v1141_v4 }
  0xb7   :  { %625 = vrot.lane.b32.xlu0 %v618_v53, %s10419_s29  ;;  %254 = vrot.lane.b32.xlu1 %v248_v57, %s10413_s24  ;;  %v7326_v57 = vcombine.low %v1524_v45, %v1532_v46  ;;  %v7329_v53 = vcombine.high %v1597_v43, %v1597_v43  ;;  %v1251_v43 = vrot.slane %v1246_v34, %v8427_v20 }
  0xb8   :  { %v1258_v45 = vrot.slane %v1253_v37, %v8427_v20  ;;  %v1351_v46 = vpack.i.b16 %v1350_v38, %v1350_v38  ;;  %v1359_v47 = vpack.i.b16 %v1358_v41, %v1358_v41  ;;  %v7309_v50 = vcombine.low %v1265_v36, %v1272_v42 }
  0xb9   :  { %v1334_v52 = vshrl.u32 %v7310_v40, 16  ;;  %v1342_v55 = vshrl.u32 %v7311_v44, 16  ;;  %v7299_v15 = vcombine.high %v1141_v4, %v1141_v4  ;;  %v1154_v23 = vshrl.u32 %v7298_v13, 16 }
  0xba   :  { %v1364_v59 = vrot.slane %v1359_v47, %v8427_v20 }
  0xbb   :  { %164 = vrot.lane.b32.xlu0 %v156_v62, %s10415_s22  ;;  %258 = vrot.lane.b32.xlu1 %v250_v61, %s10413_s24  ;;  %v1610_v61 = vpack.i.b16 %v7328_v58, %v7328_v58  ;;  %v1617_v62 = vpack.i.b16 %v7329_v53, %v7329_v53  ;;  %v7308_v58 = vcombine.low %v1251_v43, %v1258_v45  ;;  %v1162_v24 = vshrl.u32 %v7299_v15, 16 }
  0xbc   :  { %v1356_v53 = vrot.slane %v1351_v46, %v8427_v20  ;;  %v1155_v28 = vpack.i.b16 %v1154_v23, %v1154_v23 }
  0xbd   :  { %v1615_v7 = vrot.slane %v1610_v61, %v8368_v14  ;;  %v1622_v8 = vrot.slane %v1617_v62, %v8368_v14  ;;  %v1343_v61 = vpack.i.b16 %v1342_v55, %v1342_v55  ;;  %v1163_v29 = vpack.i.b16 %v1162_v24, %v1162_v24 }
  0xbe   :  { %v7315_v63 = vcombine.low %v1356_v53, %v1364_v59 }
  0xbf   :  { %440 = vrot.lane.b32.xlu0 %v433_v1, %s10417_s26  ;;  %1741 = vrot.lane.b32.xlu1 %v7339_v48, %s10415_s22  ;;  %v1636_v1 = vrot.slane %v1631_v60, %v8368_v14  ;;  %v7332_v16 = vcombine.low %v1615_v7, %v1622_v8  ;;  %v7294_v48 = vcombine.low %v1054_v35, %v1054_v35 }
  0xc0   :  { %v1348_v7 = vrot.slane %v1343_v61, %v8427_v20  ;;  %v1168_v33 = vrot.slane %v1163_v29, %v8447_v54 }
  0xc1   :  { %v7333_v3 = vcombine.low %v1629_v0, %v1636_v1  ;;  %v1080_v60 = vpack.i.b16 %v7294_v48, %v7294_v48 }
  0xc3   :  { %256 = vrot.lane.b32.xlu0 %v249_v2, %s10413_s24  ;;  %v1444_v2 = vpack.i.b16 %v7318_v5, %v7318_v5  ;;  %1561 = vrot.lane.b32.xlu1 %v7327_v56, %s8226_s30  ;;  %v7295_v56 = vcombine.high %v1054_v35, %v1054_v35  ;;  %v1335_v5 = vpack.i.b16 %v1334_v52, %v1334_v52 }
  0xc4   :  { %v1085_v0 = vrot.slane %v1080_v60, %v8447_v54 }
  0xc5   :  { %v1449_v12 = vrot.slane %v1444_v2, %v8371_v19  ;;  %v1087_v62 = vpack.i.b16 %v7295_v56, %v7295_v56  ;;  %v1340_v6 = vrot.slane %v1335_v5, %v8427_v20 }
  0xc7   :  { %1739 = vrot.lane.b32.xlu0 %v7338_v49, %s10415_s22  ;;  %v7321_v26 = vcombine.low %v1449_v12, %v1456_v17  ;;  %1649 = vrot.lane.b32.xlu1 %v7333_v3, %s10413_s24  ;;  %v1053_v49 = vld [vmem:[%s10435_s20] sm:$0x11]  ;;  %v1092_v8 = vrot.slane %v1087_v62, %v8447_v54  ;;  %v7314_v12 = vcombine.low %v1340_v6, %v1348_v7  ;;  %s10443_s22 = smov 16  }
  0xc8   :  { %v7292_v51 = vcombine.low %v1053_v49, %v1053_v49  ;;  %v7293_v1 = vcombine.high %v1053_v49, %v1053_v49 }
  0xc9   :  { %v7297_v22 = vcombine.low %v1085_v0, %v1092_v8 }
  0xca   :  { %v1066_v9 = vpack.i.b16 %v7292_v51, %v7292_v51  ;;  %v1073_v10 = vpack.i.b16 %v7293_v1, %v7293_v1 }
  0xcb   :  { %1559 = vrot.lane.b32.xlu0 %v7326_v57, %s8226_s30  ;;  %1469 = vrot.lane.b32.xlu1 %v7321_v26, %s10417_s26  ;;  %v1142_v57 = vld [vmem:[%s10435_s20 + $0x8] sm:$0x11] }
  0xcc   :  { %v7300_v2 = vcombine.low %v1142_v57, %v1142_v57  ;;  %v7301_v11 = vcombine.high %v1142_v57, %v1142_v57  ;;  %v1078_v17 = vrot.slane %v1073_v10, %v8447_v54 }
  0xce   :  { %v1170_v3 = vshrl.u32 %v7300_v2, 16  ;;  %v1178_v21 = vshrl.u32 %v7301_v11, 16 }
  0xcf   :  { %1647 = vrot.lane.b32.xlu0 %v7332_v16, %s10413_s24  ;;  %1285 = vrot.lane.b32.xlu1 %v7309_v50, %s10419_s29  ;;  %v1071_v16 = vrot.slane %v1066_v9, %v8447_v54  ;;  %s10441_s24 = smov 1  }
  0xd0   :  { %v1171_v18 = vpack.i.b16 %v1170_v3, %v1170_v3  ;;  %v1179_v27 = vpack.i.b16 %v1178_v21, %v1178_v21 }
  0xd1   :  { %v7296_v25 = vcombine.low %v1071_v16, %v1078_v17 }
  0xd2   :  { %v1176_v26 = vrot.slane %v1171_v18, %v8447_v54  ;;  %v1184_v30 = vrot.slane %v1179_v27, %v8447_v54 }
  0xd3   :  { %1467 = vrot.lane.b32.xlu0 %v7320_v31, %s10417_s26  ;;  %1377 = vrot.lane.b32.xlu1 %v7315_v63, %s10421_s0  ;;  %v1160_v31 = vrot.slane %v1155_v28, %v8447_v54  ;;  %s10442_s26 = smov 17  }
  0xd4   :  { %v7303_v34 = vcombine.low %v1176_v26, %v1184_v30 }
  0xd5   :  { %v7302_v35 = vcombine.low %v1160_v31, %v1168_v33 }
  0xd7   :  { %1283 = vrot.lane.b32.xlu0 %v7308_v58, %s10419_s29  ;;  %1105 = vrot.lane.b32.xlu1 %v7297_v22, %s10437_s3 }
  0xdb   :  { %1375 = vrot.lane.b32.xlu0 %v7314_v12, %s10421_s0  ;;  %1197 = vrot.lane.b32.xlu1 %v7303_v34, %s10438_s23 }
  0xdf   :  { %1103 = vrot.lane.b32.xlu0 %v7296_v25, %s10437_s3 }
  0xe3   :  { %1195 = vrot.lane.b32.xlu0 %v7302_v35, %s10438_s23 }
  0xfd   :  { %v716_v38 = vpop.permute.xlu0 %715 }
  0xfe   :  { %v719_v7 = vrot.slane %v716_v38, 4 }
 0x101   :  { %v536_v36 = vpop.permute.xlu1 %535 }
 0x102   :  { %v539_v8 = vrot.slane %v536_v36, 4 }
 0x105   :  { %v532_v37 = vpop.permute.xlu1 %531 }
 0x106   :  { %v537_v9 = vrot.slane %v532_v37, 4 }
 0x109   :  { %v628_v41 = vpop.permute.xlu1 %627 }
 0x10a   :  { %v631_v3 = vrot.slane %v628_v41, 4 }
 0x10d   :  { %v349_v42 = vpop.permute.xlu0 %348  ;;  %v714_v43 = vpop.permute.xlu1 %713 }
 0x10e   :  { %v718_v51 = vrot.slane %v714_v43, 4  ;;  %v352_v22 = vrot.slane %v349_v42, 4 }
 0x110   :  { %v722_v12 = vsel %vm10426_vm1, %v718_v51, %v719_v7 }
 0x111   :  { %v712_v40 = vpop.permute.xlu0 %711  ;;  %v8669_v44 = vpop.permute.xlu1 %346  ;;  %v723_v25 = vsel %vm241_vm8, %v714_v43, %v722_v12 }
 0x112   :  { %v717_v63 = vrot.slane %v712_v40, 4  ;;  %v351_v23 = vrot.slane %v8669_v44, 4 }
 0x114   :  { %v720_v13 = vsel %vm10426_vm1, %v717_v63, %v718_v51  ;;  %v356_v41 = vsel %vm10426_vm1, %v351_v23, %v352_v22 }
 0x115   :  { %v624_v45 = vpop.permute.xlu1 %623  ;;  %v8671_v46 = vpop.permute.xlu0 %344  ;;  %v721_v26 = vsel %vm241_vm8, %v712_v40, %v720_v13 }
 0x116   :  { %v629_v16 = vrot.slane %v624_v45, 4  ;;  %v350_v24 = vrot.slane %v8671_v46, 4 }
 0x118   :  { %v353_v42 = vsel %vm10426_vm1, %v350_v24, %v351_v23  ;;  %v1684_v24 = vld [vmem:[#allocation2 + $0x14] sm:$0xf] }
 0x119   :  { %v8673_v47 = vpop.permute.xlu1 %438  ;;  %v808_v48 = vpop.permute.xlu0 %807 }
 0x11a   :  { %v811_v52 = vrot.slane %v808_v48, 4 }
 0x11d   :  { %v806_v49 = vpop.permute.xlu1 %805  ;;  %v534_v50 = vpop.permute.xlu0 %533 }
 0x11e   :  { %v810_v55 = vrot.slane %v806_v49, 4  ;;  %v538_v2 = vrot.slane %v534_v50, 4 }
 0x120   :  { %v814_v56 = vsel %vm10426_vm1, %v810_v55, %v811_v52  ;;  %v540_v17 = vsel %vm10426_vm1, %v537_v9, %v538_v2  ;;  %v542_v18 = vsel %vm10426_vm1, %v538_v2, %v539_v8 }
 0x121   :  { %v815_v57 = vsel %vm146_vm7, %v806_v49, %v814_v56  ;;  %v804_v58 = vpop.permute.xlu0 %803  ;;  %v8677_v53 = vpop.permute.xlu1 %442  ;;  %v541_v30 = vsel %vm425_vm5, %v532_v37, %v540_v17  ;;  %v543_v31 = vsel %vm425_vm5, %v534_v50, %v542_v18 }
 0x122   :  { %v809_v59 = vrot.slane %v804_v58, 4  ;;  %v7285_v60 = vcombine.high %v815_v57, %v815_v57  ;;  %v7284_v5 = vcombine.low %v815_v57, %v815_v57  ;;  %v7275_v37 = vcombine.high %v8388_v32, %v541_v30 }
 0x123   :  { %v446_v56 = vrot.slane %v8677_v53, 4 }
 0x124   :  { %v812_v61 = vsel %vm10426_vm1, %v809_v59, %v810_v55  ;;  %7288 = vmatprep.subr.msk.bf16.mxu1 %vm10426_vm1, %v7285_v60  ;;  %v945_v62 = vsel %vm10426_vm1, %v7284_v5, 0  ;;  %v444_v55 = vrot.slane %v8673_v47, 4  ;;  %v357_v59 = vsel %vm354_vm4, %v8669_v44, %v356_v41 }
 0x125   :  { %v813_v0 = vsel %vm146_vm7, %v804_v58, %v812_v61  ;;  %v8683_v1 = vpop.permute.xlu0 %160  ;;  %998 = vmatpush1.bf16.msra.mxu1 %v945_v62  ;;  %v8685_v10 = vpop.permute.xlu1 %162  ;;  %v355_v60 = vsel %vm354_vm4, %v8671_v46, %v353_v42  ;;  %v7274_v5 = vcombine.low %v8388_v32, %v541_v30  ;;  %v7276_v61 = vcombine.low %v8400_v39, %v543_v31 }
 0x126   :  { %v7283_v4 = vcombine.high %v813_v0, %v813_v0  ;;  %v7282_v6 = vcombine.low %v813_v0, %v813_v0  ;;  %v167_v48 = vrot.slane %v8685_v10, 4  ;;  %v166_v49 = vrot.slane %v8683_v1, 4 }
 0x128   :  { %7286 = vmatprep.subr.msk.bf16.mxu0 %vm10426_vm1, %v7283_v4  ;;  %v939_v11 = vsel %vm10426_vm1, %v7282_v6, 0  ;;  %v169_v62 = vsel %vm10426_vm1, %v166_v49, %v167_v48 }
 0x129   :  { %v626_v15 = vpop.permute.xlu0 %625  ;;  %957 = vmatpush1.bf16.msra.mxu0 %v939_v11  ;;  %v255_v29 = vpop.permute.xlu1 %254  ;;  %v171_v9 = vsel %vm170_vm6, %v8683_v1, %v169_v62  ;;  %v820_v1 = vld [vmem:[%s10439_s27] sm:$0xf]  ;;  %s8241_s27 = smov 4  }
 0x12a   :  { %v630_v21 = vrot.slane %v626_v15, 4  ;;  %v260_v51 = vrot.slane %v255_v29, 4 }
 0x12c   :  { %v632_v27 = vsel %vm10426_vm1, %v629_v16, %v630_v21  ;;  %v634_v28 = vsel %vm10426_vm1, %v630_v21, %v631_v3 }
 0x12d   :  { %v633_v33 = vsel %vm331_vm3, %v624_v45, %v632_v27  ;;  %v635_v34 = vsel %vm331_vm3, %v626_v15, %v634_v28  ;;  %v165_v35 = vpop.permute.xlu0 %164  ;;  %v7277_v45 = vcombine.high %v8400_v39, %v543_v31  ;;  %v259_v58 = vpop.permute.xlu1 %258  ;;  %v1504_v28 = vld [vmem:[#allocation2 + $0x14] sm:$0xf] }
 0x12e   :  { %v7279_v36 = vcombine.high %v633_v33, %v721_v26  ;;  %v7281_v38 = vcombine.high %v635_v34, %v723_v25  ;;  %v7278_v43 = vcombine.low %v633_v33, %v721_v26  ;;  %v7280_v40 = vcombine.low %v635_v34, %v723_v25  ;;  %v1596_v31 = vld [vmem:[#allocation2 + $0x14] sm:$0xf] }
 0x12f   :  { %v168_v50 = vrot.slane %v165_v35, 4  ;;  %v262_v4 = vrot.slane %v259_v58, 4 }
 0x130   :  { %958 = vmatprep.subr.bf16.mxu0 %v7279_v36  ;;  %999 = vmatprep.subr.bf16.mxu1 %v7281_v38  ;;  %v1416_v36 = vld [vmem:[#allocation2 + $0x14] sm:$0xf] }
 0x131   :  { %v441_v52 = vpop.permute.xlu0 %440  ;;  %959 = vmatpush1.bf16.msra.mxu0 %v7278_v43  ;;  %1000 = vmatpush1.bf16.msra.mxu1 %v7280_v40  ;;  %v172_v0 = vsel %vm10426_vm1, %v167_v48, %v168_v50  ;;  %v1742_v21 = vpop.permute.xlu1 %1741  ;;  %v839_v48 = vld [vmem:[%s10440_s21] sm:$0xff]  ;;  %v840_v50 = vld [vmem:[%s10440_s21 + $0x8] sm:$0xff] }
 0x132   :  { %v445_v57 = vrot.slane %v441_v52, 4  ;;  %960 = vmatprep.subr.bf16.mxu0 %v7275_v37  ;;  %1001 = vmatprep.subr.bf16.mxu1 %v7277_v45  ;;  %v1744_v23 = vrot.slane %v1742_v21, 4  ;;  %v841_v37 = vld [vmem:[%s10440_s21 + $0x10] sm:$0xff] }
 0x134   :  { %v447_v63 = vsel %vm10426_vm1, %v444_v55, %v445_v57  ;;  %v450_v53 = vsel %vm10426_vm1, %v445_v57, %v446_v56  ;;  %v1753_v25 = vmul.bf16 %v1744_v23, %v1684_v24 }
 0x135   :  { %v449_v2 = vsel %vm448_vm0, %v8673_v47, %v447_v63  ;;  %v451_v44 = vsel %vm448_vm0, %v441_v52, %v450_v53  ;;  %v257_v46 = vpop.permute.xlu0 %256  ;;  %961 = vmatpush1.bf16.msra.mxu0 %v7274_v5  ;;  %1002 = vmatpush1.bf16.msra.mxu1 %v7276_v61  ;;  %v173_v47 = vsel %vm170_vm6, %v8685_v10, %v172_v0  ;;  %v8212_v10 = vld [vmem:[#allocation2 + $0x18] sm:$0xff]  ;;  %v1562_v22 = vpop.permute.xlu1 %1561 }
 0x136   :  { %v261_v32 = vrot.slane %v257_v46, 4  ;;  %v7271_v39 = vcombine.high %v355_v60, %v449_v2  ;;  %v7273_v6 = vcombine.high %v357_v59, %v451_v44  ;;  %v7270_v7 = vcombine.low %v355_v60, %v449_v2  ;;  %1761 = vrot.lane.b32.xlu0 %v1753_v25, %s10437_s3  ;;  %v842_v52 = vld [vmem:[%s10440_s21 + $0x18] sm:$0xff]  ;;  %s10446_s21 = smov 9  }
 0x137   :  { %v7272_v8 = vcombine.low %v357_v59, %v451_v44  ;;  %v1564_v26 = vrot.slane %v1562_v22, 4 }
 0x138   :  { %v263_v11 = vsel %vm10426_vm1, %v260_v51, %v261_v32  ;;  %v266_v3 = vsel %vm10426_vm1, %v261_v32, %v262_v4  ;;  %962 = vmatprep.subr.bf16.mxu0 %v7271_v39  ;;  %1003 = vmatprep.subr.bf16.mxu1 %v7273_v6 }
 0x139   :  { %v265_v12 = vsel %vm264_vm2, %v255_v29, %v263_v11  ;;  %v267_v13 = vsel %vm264_vm2, %v257_v46, %v266_v3  ;;  %963 = vmatpush1.bf16.msra.mxu0 %v7270_v7  ;;  %1004 = vmatpush1.bf16.msra.mxu1 %v7272_v8  ;;  %v8738_v27 = vpop.permute.xlu1 %1649  ;;  %v1573_v29 = vmul.bf16 %v1564_v26, %v1504_v28  ;;  %v1740_v41 = vpop.permute.xlu0 %1739 }
 0x13a   :  { %v7267_v15 = vcombine.high %v171_v9, %v265_v12  ;;  %v7269_v16 = vcombine.high %v173_v47, %v267_v13  ;;  %v7266_v17 = vcombine.low %v171_v9, %v265_v12  ;;  %v7268_v18 = vcombine.low %v173_v47, %v267_v13 }
 0x13b   :  { %v1652_v30 = vrot.slane %v8738_v27, 4  ;;  %1581 = vrot.lane.b32.xlu1 %v1573_v29, %s10419_s29  ;;  %v1743_v43 = vrot.slane %v1740_v41, 4 }
 0x13c   :  { %964 = vmatprep.subr.bf16.mxu0 %v7267_v15  ;;  %1005 = vmatprep.subr.bf16.mxu1 %v7269_v16 }
 0x13d   :  { %965 = vmatpush1.bf16.msra.mxu0 %v7266_v17  ;;  %1006 = vmatpush1.bf16.msra.mxu1 %v7268_v18  ;;  %v1661_v33 = vmul.bf16 %v1652_v30, %v1596_v31  ;;  %v8742_v34 = vpop.permute.xlu1 %1469  ;;  %v1560_v42 = vpop.permute.xlu0 %1559  ;;  %v1746_v58 = vsel %vm10426_vm1, %v1743_v43, %v1744_v23  ;;  %v1745_v2 = vsel %vm170_vm6, %v1743_v43, %v1740_v41 }
 0x13e   :  { %v1472_v35 = vrot.slane %v8742_v34, 4  ;;  %v1563_v55 = vrot.slane %v1560_v42, 4  ;;  %v1747_v46 = vsel %vm170_vm6, %v1746_v58, %v1742_v21 }
 0x13f   :  { %1669 = vrot.lane.b32.xlu0 %v1661_v33, %s10438_s23 }
 0x140   :  { %7287 = vmatmul.mubr.msk.bf16.vlgmr.msra.gmra.mxu0 %vm10423_vm9, %v820_v1  ;;  %7289 = vmatmul.mubr.msk.bf16.vlgmr.msra.gmra.mxu1 %vm10423_vm9, %v820_v1  ;;  %v1481_v38 = vmul.bf16 %v1472_v35, %v1416_v36  ;;  %v1566_v7 = vsel %vm10426_vm1, %v1563_v55, %v1564_v26  ;;  %v1565_v8 = vsel %vm354_vm4, %v1563_v55, %v1560_v42 }
 0x141   :  { %1948 = vmatprep.mubr.bf16.mxu0 %v8212_v10  ;;  %1991 = vmatprep.mubr.bf16.mxu1 %v8212_v10  ;;  %v1648_v40 = vpop.permute.xlu0 %1647  ;;  %v1567_v9 = vsel %vm354_vm4, %v1566_v7, %v1562_v22  ;;  %v1286_v3 = vpop.permute.xlu1 %1285 }
 0x142   :  { %1489 = vrot.lane.b32.xlu1 %v1481_v38, %s10421_s0  ;;  %v1651_v32 = vrot.slane %v1648_v40, 4  ;;  %v1288_v17 = vrot.slane %v1286_v3, 4 }
 0x144   :  { %v1654_v15 = vsel %vm10426_vm1, %v1651_v32, %v1652_v30  ;;  %v1653_v16 = vsel %vm264_vm2, %v1651_v32, %v1648_v40 }
 0x145   :  { %v1468_v63 = vpop.permute.xlu0 %1467  ;;  %v1655_v1 = vsel %vm264_vm2, %v1654_v15, %v8738_v27  ;;  %v1378_v24 = vpop.permute.xlu1 %1377 }
 0x146   :  { %v1471_v11 = vrot.slane %v1468_v63, 4  ;;  %v1380_v38 = vrot.slane %v1378_v24, 4 }
 0x148   :  { %v1474_v22 = vsel %vm10426_vm1, %v1471_v11, %v1472_v35  ;;  %v1473_v23 = vsel %vm448_vm0, %v1471_v11, %v1468_v63 }
 0x149   :  { %v1284_v47 = vpop.permute.xlu0 %1283  ;;  %v1475_v28 = vsel %vm448_vm0, %v1474_v22, %v8742_v34  ;;  %v1106_v41 = vpop.permute.xlu1 %1105 }
 0x14a   :  { %v1287_v18 = vrot.slane %v1284_v47, 4 }
 0x14c   :  { %v1290_v26 = vsel %vm10426_vm1, %v1287_v18, %v1288_v17  ;;  %v1289_v30 = vsel %vm331_vm3, %v1287_v18, %v1284_v47  ;;  %v2764_v47 = vld [vmem:[%s10435_s20] sm:$0x88]  ;;  %v2646_v18 = vld [vmem:[%s10435_s20] sm:$0x44] }
 0x14d   :  { %v1376_v25 = vpop.permute.xlu0 %1375  ;;  %v1291_v35 = vsel %vm331_vm3, %v1290_v26, %v1286_v3  ;;  %v2765_v3 = vld [vmem:[%s10435_s20 + $0x8] sm:$0x88]  ;;  %v7400_v22 = vcombine.high %v2646_v18, %v2646_v18 }
 0x14e   :  { %v1379_v31 = vrot.slane %v1376_v25, 4  ;;  %v7408_v15 = vcombine.high %v2765_v3, %v2765_v3 }
 0x150   :  { %v1381_v40 = vsel %vm425_vm5, %v1379_v31, %v1376_v25  ;;  %v2798_v25 = vpack.i.b16 %v7408_v15, %v7408_v15 }
 0x151   :  { %v1104_v42 = vpop.permute.xlu0 %1103 }
 0x155   :  { %v1196_v58 = vpop.permute.xlu0 %1195 }
 0x200   :  { %v984_v49 = vpop.f32.mrf.mxu0  ;;  %v1025_v45 = vpop.f32.mrf.mxu1 }
 0x201   :  { %v985_v59 = vadd.f32 %v984_v49, %v839_v48  ;;  %v1026_v60 = vadd.f32 %v1025_v45, %v841_v37  ;;  %v1108_v49 = vrot.slane %v1106_v41, 4  ;;  %v1107_v37 = vrot.slane %v1104_v42, 4 }
 0x202   :  { %v986_v56 = vpop.f32.mrf.mxu0  ;;  %v1027_v57 = vpop.f32.mrf.mxu1  ;;  %v1382_v45 = vsel %vm10426_vm1, %v1379_v31, %v1380_v38 }
 0x203   :  { %v987_v5 = vadd.f32 %v986_v56, %v840_v50  ;;  %v1028_v61 = vadd.f32 %v1027_v57, %v842_v52  ;;  %v1383_v55 = vsel %vm425_vm5, %v1382_v45, %v1378_v24  ;;  %v1198_v57 = vpop.permute.xlu1 %1197 }
 0x204   :  { %v988_v62 = vpop.f32.mrf.mxu0  ;;  %v1029_v51 = vpop.f32.mrf.mxu1 }
 0x205   :  { %v8760_v53 = vpack.c.bf16 %v987_v5, %v985_v59  ;;  %v8762_v0 = vpack.c.bf16 %v1028_v61, %v1026_v60  ;;  %v1110_v59 = vsel %vm10426_vm1, %v1107_v37, %v1108_v49  ;;  %v1109_v61 = vsel %vm146_vm7, %v1107_v37, %v1104_v42 }
 0x206   :  { %v989_v44 = vpop.f32.mrf.mxu0  ;;  %v1030_v4 = vpop.f32.mrf.mxu1  ;;  %v1200_v62 = vrot.slane %v1198_v57, 4  ;;  %v1199_v51 = vrot.slane %v1196_v58, 4  ;;  %v1111_v63 = vsel %vm146_vm7, %v1110_v59, %v1106_v41  ;;  %v2667_v41 = vshrl.u32 %v7400_v22, 16  ;;  %v2175_v22 = vld [vmem:[%s10435_s20 + $0x8] sm:$0x11] }
 0x207   :  { %1048 = vst [vmem:[#allocation2 + $0x4] sm:$0xff] %v8760_v53  ;;  %1049 = vst [vmem:[#allocation2 + $0xc] sm:$0xff] %v8762_v0  ;;  %v1752_v39 = vmul.bf16 %v8762_v0, %v1747_v46  ;;  %v1751_v6 = vmul.bf16 %v8760_v53, %v1745_v2  ;;  %v1572_v12 = vmul.bf16 %v8762_v0, %v1567_v9 }
 0x208   :  { %v1571_v13 = vmul.bf16 %v8760_v53, %v1565_v8  ;;  %v1660_v10 = vmul.bf16 %v8762_v0, %v1655_v1  ;;  %v1659_v21 = vmul.bf16 %v8760_v53, %v1653_v16  ;;  %v1480_v27 = vmul.bf16 %v8762_v0, %v1475_v28  ;;  %v1795_v28 = vld [vmem:[%s10391_s2 + $0x8] sm:$0xff] }
 0x209   :  { %1759 = vrot.lane.b32.xlu1 %v1752_v39, %s10437_s3  ;;  %1757 = vrot.lane.b32.xlu0 %v1751_v6, %s10437_s3  ;;  %v1479_v29 = vmul.bf16 %v8760_v53, %v1473_v23  ;;  %v1201_v4 = vsel %vm241_vm8, %v1199_v51, %v1196_v58  ;;  %v1202_v32 = vsel %vm10426_vm1, %v1199_v51, %v1200_v62  ;;  %v1794_v23 = vld [vmem:[%s10391_s2] sm:$0xff] }
 0x20a   :  { %v1203_v7 = vsel %vm241_vm8, %v1202_v32, %v1198_v57  ;;  %v7405_v16 = vcombine.low %v2764_v47, %v2764_v47  ;;  %v2668_v37 = vpack.i.b16 %v2667_v41, %v2667_v41 }
 0x20c   :  { %v2777_v26 = vpack.i.b16 %v7405_v16, %v7405_v16  ;;  %v2673_v58 = vrot.slane %v2668_v37, %v8371_v19  ;;  %v2061_v37 = vld [vmem:[%s10435_s20 + $0x8] sm:$0x11] }
 0x20d   :  { %1579 = vrot.lane.b32.xlu0 %v1572_v12, %s10419_s29  ;;  %1577 = vrot.lane.b32.xlu1 %v1571_v13, %s10419_s29  ;;  %v2647_v12 = vld [vmem:[%s10435_s20 + $0x8] sm:$0x44]  ;;  %v7407_v13 = vcombine.low %v2765_v3, %v2765_v3 }
 0x20e   :  { %v8795_v33 = vld [vmem:[#allocation2 + $0x8] sm:$0xff]  ;;  %v1230_v36 = vld [vmem:[#allocation2] sm:$0xff]  ;;  %v1232_v48 = vld [vmem:[#allocation2 + $0x10] sm:$0xf]  ;;  %v7401_v1 = vcombine.low %v2647_v12, %v2647_v12 }
 0x20f   :  { %v1296_v34 = vmul.bf16 %v1291_v35, %v8795_v33  ;;  %v1295_v43 = vmul.bf16 %v1289_v30, %v1230_v36  ;;  %v1297_v50 = vmul.bf16 %v1288_v17, %v1232_v48  ;;  %v1387_v52 = vmul.bf16 %v1381_v40, %v1230_v36  ;;  %v1320_v56 = vld [vmem:[#allocation2 + $0x10] sm:$0xf]  ;;  %v2532_v48 = vld [vmem:[%s10435_s20] sm:$0x44] }
 0x210   :  { %v1388_v60 = vmul.bf16 %v1383_v55, %v8795_v33  ;;  %v1389_v5 = vmul.bf16 %v1380_v38, %v1320_v56  ;;  %v1116_v2 = vmul.bf16 %v8795_v33, %v1111_v63  ;;  %v1115_v44 = vmul.bf16 %v1230_v36, %v1109_v61  ;;  %v1052_v46 = vld [vmem:[#allocation2 + $0x10] sm:$0xf] }
 0x211   :  { %1667 = vrot.lane.b32.xlu1 %v1660_v10, %s10438_s23  ;;  %1665 = vrot.lane.b32.xlu0 %v1659_v21, %s10438_s23  ;;  %v1117_v39 = vmul.bf16 %v1108_v49, %v1052_v46  ;;  %v1207_v6 = vmul.bf16 %v1230_v36, %v1201_v4  ;;  %v1140_v8 = vld [vmem:[#allocation2 + $0x10] sm:$0xf]  ;;  %v1208_v9 = vmul.bf16 %v8795_v33, %v1203_v7  ;;  %v2533_v33 = vld [vmem:[%s10435_s20 + $0x8] sm:$0x44] }
 0x212   :  { %v1209_v11 = vmul.bf16 %v1200_v62, %v1140_v8  ;;  %v7406_v17 = vcombine.high %v2764_v47, %v2764_v47  ;;  %v7402_v10 = vcombine.high %v2647_v12, %v2647_v12  ;;  %v7399_v21 = vcombine.low %v2646_v18, %v2646_v18 }
 0x213   :  { %v2791_v24 = vpack.i.b16 %v7407_v13, %v7407_v13  ;;  %v2803_v36 = vrot.slane %v2798_v25, %v8368_v14  ;;  %v2782_v38 = vrot.slane %v2777_v26, %v8368_v14  ;;  %v7395_v45 = vcombine.low %v2533_v33, %v2533_v33 }
 0x214   :  { %v2683_v30 = vshrl.u32 %v7402_v10, 16  ;;  %v2659_v31 = vshrl.u32 %v7399_v21, 16  ;;  %v7396_v59 = vcombine.high %v2533_v33, %v2533_v33  ;;  %v7394_v62 = vcombine.high %v2532_v48, %v2532_v48 }
 0x215   :  { %1487 = vrot.lane.b32.xlu0 %v1480_v27, %s10421_s0  ;;  %1485 = vrot.lane.b32.xlu1 %v1479_v29, %s10421_s0  ;;  %v2784_v27 = vpack.i.b16 %v7406_v17, %v7406_v17  ;;  %v2675_v29 = vshrl.u32 %v7401_v1, 16  ;;  %v2796_v35 = vrot.slane %v2791_v24, %v8368_v14  ;;  %v2292_v17 = vld [vmem:[%s10435_s20] sm:$0x22]  ;;  %s10445_s0 = smov 113  }
 0x216   :  { %v2660_v40 = vpack.i.b16 %v2659_v31, %v2659_v31  ;;  %v2566_v32 = vpack.i.b16 %v7396_v59, %v7396_v59 }
 0x217   :  { %v2789_v42 = vrot.slane %v2784_v27, %v8368_v14  ;;  %v7410_v49 = vcombine.low %v2796_v35, %v2803_v36  ;;  %v7382_v35 = vcombine.high %v2292_v17, %v2292_v17  ;;  %v7377_v36 = vcombine.low %v2175_v22, %v2175_v22 }
 0x218   :  { %v2665_v57 = vrot.slane %v2660_v40, %v8371_v19 }
 0x219   :  { %1303 = vrot.lane.b32.xlu1 %v1296_v34, %s8226_s30  ;;  %1301 = vrot.lane.b32.xlu0 %v1295_v43, %s8226_s30  ;;  %v2676_v34 = vpack.i.b16 %v2675_v29, %v2675_v29  ;;  %v2684_v43 = vpack.i.b16 %v2683_v30, %v2683_v30  ;;  %v7381_v30 = vcombine.low %v2292_v17, %v2292_v17 }
 0x21a   :  { %v7403_v4 = vcombine.low %v2665_v57, %v2673_v58  ;;  %v2312_v40 = vpack.i.b16 %v7382_v35, %v7382_v35 }
 0x21b   :  { %v2681_v55 = vrot.slane %v2676_v34, %v8371_v19  ;;  %v2689_v56 = vrot.slane %v2684_v43, %v8371_v19  ;;  %v2305_v43 = vpack.i.b16 %v7381_v30, %v7381_v30 }
 0x21c   :  { %v2317_v58 = vrot.slane %v2312_v40, %v8427_v20 }
 0x21d   :  { %1305 = vrot.lane.b32.xlu0 %v1297_v50, %s8226_s30  ;;  %1393 = vrot.lane.b32.xlu1 %v1387_v52, %s10441_s24  ;;  %v2407_v50 = vld [vmem:[%s10435_s20 + $0x8] sm:$0x22]  ;;  %v7409_v52 = vcombine.low %v2782_v38, %v2789_v42  ;;  %v7404_v61 = vcombine.low %v2681_v55, %v2689_v56  ;;  %v2174_v38 = vld [vmem:[%s10435_s20] sm:$0x11]  ;;  %v2310_v57 = vrot.slane %v2305_v43, %v8427_v20 }
 0x21e   :  { %v7389_v51 = vcombine.low %v2407_v50, %v2407_v50  ;;  %v7390_v63 = vcombine.high %v2407_v50, %v2407_v50  ;;  %v7376_v55 = vcombine.high %v2174_v38, %v2174_v38  ;;  %v2060_v56 = vld [vmem:[%s10435_s20] sm:$0x11] }
 0x220   :  { %v2435_v7 = vshrl.u32 %v7389_v51, 16  ;;  %v2443_v8 = vshrl.u32 %v7390_v63, 16  ;;  %v7372_v51 = vcombine.high %v2061_v37, %v2061_v37  ;;  %v2879_v63 = vld [vmem:[%s10435_s20 + $0x8] sm:$0x88] }
 0x221   :  { %1395 = vrot.lane.b32.xlu0 %v1388_v60, %s10441_s24  ;;  %1397 = vrot.lane.b32.xlu1 %v1389_v5, %s10441_s24  ;;  %v2559_v60 = vpack.i.b16 %v7395_v45, %v7395_v45  ;;  %v7393_v5 = vcombine.low %v2532_v48, %v2532_v48  ;;  %v7378_v48 = vcombine.high %v2175_v22, %v2175_v22 }
 0x222   :  { %v2436_v15 = vpack.i.b16 %v2435_v7, %v2435_v7  ;;  %v2444_v16 = vpack.i.b16 %v2443_v8, %v2443_v8  ;;  %v2094_v7 = vpack.i.b16 %v7372_v51, %v7372_v51 }
 0x223   :  { %v2564_v46 = vrot.slane %v2559_v60, %v8371_v19  ;;  %v2211_v60 = vshrl.u32 %v7378_v48, 16  ;;  %v1582_v48 = vpop.permute.xlu1 %1581 }
 0x224   :  { %v2441_v24 = vrot.slane %v2436_v15, %v8427_v20  ;;  %v2449_v25 = vrot.slane %v2444_v16, %v8427_v20  ;;  %v2099_v17 = vrot.slane %v2094_v7, %v8447_v54 }
 0x225   :  { %1123 = vrot.lane.b32.xlu1 %v1116_v2, %s10442_s26  ;;  %1121 = vrot.lane.b32.xlu0 %v1115_v44, %s10442_s26  ;;  %v2406_v2 = vld [vmem:[%s10435_s20] sm:$0x22]  ;;  %v2293_v44 = vld [vmem:[%s10435_s20 + $0x8] sm:$0x22] }
 0x226   :  { %v7388_v3 = vcombine.high %v2406_v2, %v2406_v2  ;;  %v7383_v47 = vcombine.low %v2293_v44, %v2293_v44  ;;  %v7384_v21 = vcombine.high %v2293_v44, %v2293_v44  ;;  %v7392_v31 = vcombine.low %v2441_v24, %v2449_v25 }
 0x228   :  { %v2427_v10 = vshrl.u32 %v7388_v3, 16  ;;  %v2319_v26 = vpack.i.b16 %v7383_v47, %v7383_v47  ;;  %v2326_v29 = vpack.i.b16 %v7384_v21, %v7384_v21  ;;  %v7413_v3 = vcombine.low %v2879_v63, %v2879_v63  ;;  %v2878_v47 = vld [vmem:[%s10435_s20] sm:$0x88]  ;;  %s8233_s20 = smov 8  }
 0x229   :  { %1125 = vrot.lane.b32.xlu0 %v1117_v39, %s10442_s26  ;;  %1213 = vrot.lane.b32.xlu1 %v1207_v6, %s10443_s22  ;;  %v2545_v39 = vpack.i.b16 %v7393_v5, %v7393_v5  ;;  %v2552_v6 = vpack.i.b16 %v7394_v62, %v7394_v62  ;;  %v7371_v62 = vcombine.low %v2061_v37, %v2061_v37  ;;  %v1490_v37 = vpop.permute.xlu1 %1489 }
 0x22a   :  { %v2428_v27 = vpack.i.b16 %v2427_v10, %v2427_v10  ;;  %v2324_v33 = vrot.slane %v2319_v26, %v8427_v20  ;;  %v2331_v34 = vrot.slane %v2326_v29, %v8427_v20  ;;  %v7414_v21 = vcombine.high %v2879_v63, %v2879_v63 }
 0x22b   :  { %v2550_v12 = vrot.slane %v2545_v39, %v8371_v19  ;;  %v2557_v13 = vrot.slane %v2552_v6, %v8371_v19  ;;  %v2087_v6 = vpack.i.b16 %v7371_v62, %v7371_v62  ;;  %v2907_v22 = vshrl.u32 %v7413_v3, 16 }
 0x22c   :  { %v2433_v42 = vrot.slane %v2428_v27, %v8427_v20  ;;  %v7386_v50 = vcombine.low %v2324_v33, %v2331_v34  ;;  %v7412_v25 = vcombine.high %v2878_v47, %v2878_v47  ;;  %v2915_v27 = vshrl.u32 %v7414_v21, 16 }
 0x22d   :  { %1215 = vrot.lane.b32.xlu0 %v1208_v9, %s10443_s22  ;;  %1217 = vrot.lane.b32.xlu1 %v1209_v11, %s10443_s22  ;;  %v2571_v9 = vrot.slane %v2566_v32, %v8371_v19  ;;  %v7387_v11 = vcombine.low %v2406_v2, %v2406_v2  ;;  %v7385_v2 = vcombine.low %v2310_v57, %v2317_v58 }
 0x22e   :  { %v2092_v15 = vrot.slane %v2087_v6, %v8447_v54  ;;  %v2916_v35 = vpack.i.b16 %v2915_v27, %v2915_v27 }
 0x22f   :  { %v7398_v18 = vcombine.low %v2564_v46, %v2571_v9  ;;  %v2419_v1 = vshrl.u32 %v7387_v11, 16  ;;  %v7369_v46 = vcombine.low %v2060_v56, %v2060_v56  ;;  %v7370_v9 = vcombine.high %v2060_v56, %v2060_v56 }
 0x230   :  { %v7374_v26 = vcombine.low %v2092_v15, %v2099_v17 }
 0x231   :  { %1798 = vperm.xlu0 %7917, %v1794_v23   ;;  %1803 = vperm.xlu1 %7918, %v1795_v28   ;;  %v7397_v23 = vcombine.low %v2550_v12, %v2557_v13  ;;  %v2420_v28 = vpack.i.b16 %v2419_v1, %v2419_v1  ;;  %v2073_v11 = vpack.i.b16 %v7369_v46, %v7369_v46 }
 0x232   :  { %v2080_v1 = vpack.i.b16 %v7370_v9, %v7370_v9 }
 0x233   :  { %v2425_v41 = vrot.slane %v2420_v28, %v8427_v20  ;;  %v2908_v28 = vpack.i.b16 %v2907_v22, %v2907_v22 }
 0x234   :  { %v2085_v24 = vrot.slane %v2080_v1, %v8447_v54 }
 0x235   :  { %2816 = vrot.lane.b32.xlu0 %v7410_v49, %s10443_s22  ;;  %2814 = vrot.lane.b32.xlu1 %v7409_v52, %s10443_s22  ;;  %v2203_v49 = vshrl.u32 %v7377_v36, 16  ;;  %v7391_v45 = vcombine.low %v2425_v41, %v2433_v42  ;;  %v7375_v52 = vcombine.low %v2174_v38, %v2174_v38  ;;  %v2913_v33 = vrot.slane %v2908_v28, %v8368_v14 }
 0x236   :  { %v2921_v41 = vrot.slane %v2916_v35, %v8368_v14 }
 0x237   :  { %v2204_v59 = vpack.i.b16 %v2203_v49, %v2203_v49  ;;  %v2187_v5 = vshrl.u32 %v7375_v52, 16  ;;  %v1762_v49 = vpop.permute.xlu0 %1761 }
 0x238   :  { %v7416_v43 = vcombine.low %v2913_v33, %v2921_v41 }
 0x239   :  { %2702 = vrot.lane.b32.xlu0 %v7404_v61, %s8226_s30  ;;  %2700 = vrot.lane.b32.xlu1 %v7403_v4, %s8226_s30  ;;  %v2195_v61 = vshrl.u32 %v7376_v55, 16  ;;  %v2209_v44 = vrot.slane %v2204_v59, %v8447_v54  ;;  %v2212_v4 = vpack.i.b16 %v2211_v60, %v2211_v60  ;;  %v2188_v32 = vpack.i.b16 %v2187_v5, %v2187_v5 }
 0x23a   :  { %v1765_v55 = vrot.slane %v1762_v49, 4 }
 0x23b   :  { %v2196_v39 = vpack.i.b16 %v2195_v61, %v2195_v61  ;;  %v2217_v8 = vrot.slane %v2212_v4, %v8447_v54  ;;  %v2193_v12 = vrot.slane %v2188_v32, %v8447_v54  ;;  %v1585_v32 = vrot.slane %v1582_v48, 4 }
 0x23d   :  { %2584 = vrot.lane.b32.xlu0 %v7398_v18, %s10441_s24  ;;  %2582 = vrot.lane.b32.xlu1 %v7397_v23, %s10441_s24  ;;  %v2201_v13 = vrot.slane %v2196_v39, %v8447_v54  ;;  %v7380_v16 = vcombine.low %v2209_v44, %v2217_v8  ;;  %v2078_v18 = vrot.slane %v2073_v11, %v8447_v54 }
 0x23e   :  { %v7411_v23 = vcombine.low %v2878_v47, %v2878_v47 }
 0x23f   :  { %v7379_v10 = vcombine.low %v2193_v12, %v2201_v13  ;;  %v7373_v30 = vcombine.low %v2078_v18, %v2085_v24  ;;  %v1493_v13 = vrot.slane %v1490_v37, 4 }
 0x240   :  { %v2891_v29 = vshrl.u32 %v7411_v23, 16 }
 0x241   :  { %2462 = vrot.lane.b32.xlu0 %v7392_v31, %s10444_s28  ;;  %2460 = vrot.lane.b32.xlu1 %v7391_v45, %s10444_s28  ;;  %v2899_v31 = vshrl.u32 %v7412_v25, 16  ;;  %v1670_v45 = vpop.permute.xlu0 %1669 }
 0x242   :  { %v2892_v36 = vpack.i.b16 %v2891_v29, %v2891_v29  ;;  %v1673_v39 = vrot.slane %v1670_v45, 4 }
 0x243   :  { %v2900_v38 = vpack.i.b16 %v2899_v31, %v2899_v31 }
 0x244   :  { %v2897_v42 = vrot.slane %v2892_v36, %v8368_v14 }
 0x245   :  { %2344 = vrot.lane.b32.xlu0 %v7386_v50, %s10445_s0  ;;  %2342 = vrot.lane.b32.xlu1 %v7385_v2, %s10445_s0  ;;  %v2905_v34 = vrot.slane %v2900_v38, %v8368_v14 }
 0x247   :  { %v7415_v40 = vcombine.low %v2897_v42, %v2905_v34 }
 0x249   :  { %2230 = vrot.lane.b32.xlu0 %v7380_v16, %s10438_s23  ;;  %2228 = vrot.lane.b32.xlu1 %v7379_v10, %s10438_s23 }
 0x24d   :  { %2112 = vrot.lane.b32.xlu0 %v7374_v26, %s10437_s3  ;;  %2110 = vrot.lane.b32.xlu1 %v7373_v30, %s10437_s3 }
 0x251   :  { %2934 = vrot.lane.b32.xlu0 %v7416_v43, %s10442_s26  ;;  %2932 = vrot.lane.b32.xlu1 %v7415_v40, %s10442_s26 }
 0x27b   :  { %v1760_v50 = vpop.permute.xlu1 %1759  ;;  %v1758_v52 = vpop.permute.xlu0 %1757 }
 0x27c   :  { %v1764_v56 = vrot.slane %v1760_v50, 4  ;;  %v1763_v57 = vrot.slane %v1758_v52, 4 }
 0x27e   :  { %v1768_v58 = vsel %vm10426_vm1, %v1764_v56, %v1765_v55  ;;  %v1766_v59 = vsel %vm10426_vm1, %v1763_v57, %v1764_v56 }
 0x27f   :  { %v1769_v60 = vsel %vm146_vm7, %v1760_v50, %v1768_v58  ;;  %v1767_v5 = vsel %vm146_vm7, %v1758_v52, %v1766_v59  ;;  %v1578_v61 = vpop.permute.xlu1 %1577  ;;  %v1580_v62 = vpop.permute.xlu0 %1579 }
 0x280   :  { %v1583_v51 = vrot.slane %v1578_v61, 4  ;;  %v1584_v63 = vrot.slane %v1580_v62, 4  ;;  %v7358_v2 = vcombine.high %v1767_v5, %v1767_v5  ;;  %v7360_v44 = vcombine.high %v1769_v60, %v1769_v60 }
 0x281   :  { %v7357_v4 = vcombine.low %v1767_v5, %v1767_v5  ;;  %v7359_v46 = vcombine.low %v1769_v60, %v1769_v60 }
 0x282   :  { %7361 = vmatprep.subr.msk.bf16.mxu0 %vm10426_vm1, %v7358_v2  ;;  %7363 = vmatprep.subr.msk.bf16.mxu1 %vm10426_vm1, %v7360_v44  ;;  %v1586_v11 = vsel %vm10426_vm1, %v1583_v51, %v1584_v63  ;;  %v1588_v3 = vsel %vm10426_vm1, %v1584_v63, %v1585_v32 }
 0x283   :  { %v1668_v6 = vpop.permute.xlu1 %1667  ;;  %v1666_v7 = vpop.permute.xlu0 %1665  ;;  %v1905_v8 = vsel %vm10426_vm1, %v7357_v4, 0  ;;  %v1911_v9 = vsel %vm10426_vm1, %v7359_v46, 0  ;;  %v1587_v17 = vsel %vm331_vm3, %v1578_v61, %v1586_v11  ;;  %v1589_v18 = vsel %vm331_vm3, %v1580_v62, %v1588_v3 }
 0x284   :  { %v1672_v47 = vrot.slane %v1668_v6, 4  ;;  %v1671_v12 = vrot.slane %v1666_v7, 4  ;;  %1923 = vmatpush1.bf16.msra.mxu0 %v1905_v8  ;;  %1966 = vmatpush1.bf16.msra.mxu1 %v1911_v9 }
 0x286   :  { %v1676_v15 = vsel %vm10426_vm1, %v1672_v47, %v1673_v39  ;;  %v1674_v16 = vsel %vm10426_vm1, %v1671_v12, %v1672_v47 }
 0x287   :  { %v1677_v1 = vsel %vm241_vm8, %v1668_v6, %v1676_v15  ;;  %v1675_v10 = vsel %vm241_vm8, %v1666_v7, %v1674_v16  ;;  %v1486_v21 = vpop.permute.xlu1 %1485  ;;  %v1488_v22 = vpop.permute.xlu0 %1487 }
 0x288   :  { %v1491_v23 = vrot.slane %v1486_v21, 4  ;;  %v1492_v24 = vrot.slane %v1488_v22, 4  ;;  %v7354_v25 = vcombine.high %v1587_v17, %v1675_v10  ;;  %v7356_v26 = vcombine.high %v1589_v18, %v1677_v1 }
 0x289   :  { %v7353_v28 = vcombine.low %v1587_v17, %v1675_v10  ;;  %v7355_v27 = vcombine.low %v1589_v18, %v1677_v1 }
 0x28a   :  { %v1494_v29 = vsel %vm10426_vm1, %v1491_v23, %v1492_v24  ;;  %v1496_v30 = vsel %vm10426_vm1, %v1492_v24, %v1493_v13  ;;  %1924 = vmatprep.subr.bf16.mxu0 %v7354_v25  ;;  %1967 = vmatprep.subr.bf16.mxu1 %v7356_v26  ;;  %v7995_v25 = vld [vmem:[%s10390_s4] sm:$0xff]   ;;  %s8235_s4 = smov 121  }
 0x28b   :  { %v1495_v31 = vsel %vm425_vm5, %v1486_v21, %v1494_v29  ;;  %v1497_v33 = vsel %vm425_vm5, %v1488_v22, %v1496_v30  ;;  %v1304_v35 = vpop.permute.xlu1 %1303  ;;  %v1302_v36 = vpop.permute.xlu0 %1301  ;;  %1925 = vmatpush1.bf16.msra.mxu0 %v7353_v28  ;;  %1968 = vmatpush1.bf16.msra.mxu1 %v7355_v27  ;;  %v2763_v30 = vld [vmem:[#allocation2 + $0x38] sm:$0xf] }
 0x28c   :  { %v7350_v38 = vcombine.high %v8760_v53, %v1495_v31  ;;  %v7352_v41 = vcombine.high %v8762_v0, %v1497_v33  ;;  %v7349_v42 = vcombine.low %v8760_v53, %v1495_v31  ;;  %v7351_v34 = vcombine.low %v8762_v0, %v1497_v33  ;;  %v2760_v31 = vld [vmem:[#allocation2 + $0x14] sm:$0xf] }
 0x28d   :  { %v1308_v43 = vrot.slane %v1304_v35, 4  ;;  %v1307_v40 = vrot.slane %v1302_v36, 4 }
 0x28e   :  { %1926 = vmatprep.subr.bf16.mxu0 %v7350_v38  ;;  %1969 = vmatprep.subr.bf16.mxu1 %v7352_v41  ;;  %v2645_v38 = vld [vmem:[#allocation2 + $0x38] sm:$0xf]  ;;  %v2642_v41 = vld [vmem:[#allocation2 + $0x14] sm:$0xf] }
 0x28f   :  { %v1394_v48 = vpop.permute.xlu1 %1393  ;;  %v1306_v49 = vpop.permute.xlu0 %1305  ;;  %1927 = vmatpush1.bf16.msra.mxu0 %v7349_v42  ;;  %1970 = vmatpush1.bf16.msra.mxu1 %v7351_v34  ;;  %v1310_v45 = vsel %vm10426_vm1, %v1307_v40, %v1308_v43 }
 0x290   :  { %v1309_v37 = vrot.slane %v1306_v49, 4  ;;  %v1399_v55 = vrot.slane %v1394_v48, 4  ;;  %v1311_v59 = vsel %vm354_vm4, %v1302_v36, %v1310_v45  ;;  %v2528_v49 = vld [vmem:[#allocation2 + $0x14] sm:$0xf] }
 0x292   :  { %v1312_v56 = vsel %vm10426_vm1, %v1308_v43, %v1309_v37 }
 0x293   :  { %v1398_v50 = vpop.permute.xlu1 %1397  ;;  %v1396_v52 = vpop.permute.xlu0 %1395  ;;  %v1313_v60 = vsel %vm354_vm4, %v1304_v35, %v1312_v56 }
 0x294   :  { %v1401_v57 = vrot.slane %v1398_v50, 4  ;;  %v1400_v53 = vrot.slane %v1396_v52, 4 }
 0x296   :  { %v1402_v0 = vsel %vm10426_vm1, %v1399_v55, %v1400_v53  ;;  %v1404_v58 = vsel %vm10426_vm1, %v1400_v53, %v1401_v57 }
 0x297   :  { %v1403_v5 = vsel %vm448_vm0, %v1394_v48, %v1402_v0  ;;  %v1405_v61 = vsel %vm448_vm0, %v1396_v52, %v1404_v58  ;;  %v1124_v62 = vpop.permute.xlu1 %1123  ;;  %v1122_v51 = vpop.permute.xlu0 %1121  ;;  %v2531_v48 = vld [vmem:[#allocation2 + $0x38] sm:$0xf] }
 0x298   :  { %v7346_v63 = vcombine.high %v1311_v59, %v1403_v5  ;;  %v7348_v2 = vcombine.high %v1313_v60, %v1405_v61  ;;  %v7345_v44 = vcombine.low %v1311_v59, %v1403_v5  ;;  %v7347_v4 = vcombine.low %v1313_v60, %v1405_v61 }
 0x299   :  { %v1128_v46 = vrot.slane %v1124_v62, 4  ;;  %v1127_v32 = vrot.slane %v1122_v51, 4 }
 0x29a   :  { %1928 = vmatprep.subr.bf16.mxu0 %v7346_v63  ;;  %1971 = vmatprep.subr.bf16.mxu1 %v7348_v2 }
 0x29b   :  { %v1214_v39 = vpop.permute.xlu1 %1213  ;;  %v1126_v6 = vpop.permute.xlu0 %1125  ;;  %1929 = vmatpush1.bf16.msra.mxu0 %v7345_v44  ;;  %1972 = vmatpush1.bf16.msra.mxu1 %v7347_v4  ;;  %v1130_v8 = vsel %vm10426_vm1, %v1127_v32, %v1128_v46 }
 0x29c   :  { %v1129_v7 = vrot.slane %v1126_v6, 4  ;;  %v1219_v3 = vrot.slane %v1214_v39, 4  ;;  %v1131_v17 = vsel %vm170_vm6, %v1122_v51, %v1130_v8 }
 0x29e   :  { %v1132_v47 = vsel %vm10426_vm1, %v1128_v46, %v1129_v7 }
 0x29f   :  { %v1218_v9 = vpop.permute.xlu1 %1217  ;;  %v1216_v11 = vpop.permute.xlu0 %1215  ;;  %v1133_v18 = vsel %vm170_vm6, %v1124_v62, %v1132_v47 }
 0x2a0   :  { %v1221_v12 = vrot.slane %v1218_v9, 4  ;;  %v1220_v13 = vrot.slane %v1216_v11, 4 }
 0x2a2   :  { %v1222_v15 = vsel %vm10426_vm1, %v1219_v3, %v1220_v13  ;;  %v1224_v16 = vsel %vm10426_vm1, %v1220_v13, %v1221_v12 }
 0x2a3   :  { %v1223_v1 = vsel %vm264_vm2, %v1214_v39, %v1222_v15  ;;  %v1225_v10 = vsel %vm264_vm2, %v1216_v11, %v1224_v16 }
 0x2a4   :  { %v7342_v21 = vcombine.high %v1131_v17, %v1223_v1  ;;  %v7344_v22 = vcombine.high %v1133_v18, %v1225_v10  ;;  %v7341_v23 = vcombine.low %v1131_v17, %v1223_v1  ;;  %v7343_v24 = vcombine.low %v1133_v18, %v1225_v10 }
 0x2a6   :  { %1930 = vmatprep.subr.bf16.mxu0 %v7342_v21  ;;  %1973 = vmatprep.subr.bf16.mxu1 %v7344_v22 }
 0x2a7   :  { %1931 = vmatpush1.bf16.msra.mxu0 %v7341_v23  ;;  %1974 = vmatpush1.bf16.msra.mxu1 %v7343_v24 }
 0x2aa   :  { %7362 = vmatmul.mubr.msk.bf16.vlgmr.msra.gmra.mxu0 %vm10423_vm9, %v7995_v25  ;;  %7364 = vmatmul.mubr.msk.bf16.vlgmr.msra.gmra.mxu1 %vm10423_vm9, %v7995_v25  ;;  %vm5068_vm9 = vcmask 257024  }
 0x2ac   :  { %v1799_v26 = vpop.permute.xlu0 %1798  ;;  %v1804_v50 = vpop.permute.xlu1 %1803 }
 0x2b0   :  { %v2817_v28 = vpop.permute.xlu0 %2816  ;;  %v2815_v52 = vpop.permute.xlu1 %2814 }
 0x2b1   :  { %v2819_v27 = vrot.slane %v2817_v28, 4  ;;  %v2818_v57 = vrot.slane %v2815_v52, 4 }
 0x2b3   :  { %v2831_v33 = vmul.bf16 %v2819_v27, %v2763_v30  ;;  %v2828_v35 = vmul.bf16 %v2819_v27, %v2760_v31  ;;  %v2821_v53 = vsel %vm10426_vm1, %v2818_v57, %v2819_v27  ;;  %v8996_v51 = vsel %vm264_vm2, %v2818_v57, %v2815_v52 }
 0x2b4   :  { %v8972_v29 = vpop.permute.xlu0 %2702  ;;  %v2701_v55 = vpop.permute.xlu1 %2700  ;;  %v8999_v44 = vsel %vm264_vm2, %v2821_v53, %v2817_v28 }
 0x2b5   :  { %v2705_v36 = vrot.slane %v8972_v29, 4  ;;  %2848 = vrot.lane.b32.xlu0 %v2831_v33, %s10438_s23  ;;  %2842 = vrot.lane.b32.xlu1 %v2828_v35, %s10438_s23  ;;  %v2704_v59 = vrot.slane %v2701_v55, 4 }
 0x2b7   :  { %v2717_v42 = vmul.bf16 %v2705_v36, %v2645_v38  ;;  %v2714_v34 = vmul.bf16 %v2705_v36, %v2642_v41  ;;  %v9002_v4 = vsel %vm354_vm4, %v2704_v59, %v2701_v55  ;;  %v2707_v9 = vsel %vm10426_vm1, %v2704_v59, %v2705_v36 }
 0x2b8   :  { %v8977_v43 = vpop.permute.xlu0 %2584  ;;  %v8988_v56 = vpop.permute.xlu1 %2582 }
 0x2b9   :  { %v8980_v40 = vrot.slane %v8977_v43, 4  ;;  %2734 = vrot.lane.b32.xlu0 %v2717_v42, %s10445_s0  ;;  %2728 = vrot.lane.b32.xlu1 %v2714_v34, %s10445_s0  ;;  %v2586_v11 = vrot.slane %v8988_v56, 4 }
 0x2bb   :  { %v2599_v37 = vmul.bf16 %v8980_v40, %v2531_v48  ;;  %v2596_v45 = vmul.bf16 %v8980_v40, %v2528_v49  ;;  %v2589_v55 = vsel %vm10426_vm1, %v2586_v11, %v8980_v40 }
 0x2bc   :  { %v8991_v60 = vpop.permute.xlu1 %2460  ;;  %v8993_v5 = vpop.permute.xlu0 %2462 }
 0x2bd   :  { %2616 = vrot.lane.b32.xlu0 %v2599_v37, %s10444_s28  ;;  %2610 = vrot.lane.b32.xlu1 %v2596_v45, %s10444_s28  ;;  %v2464_v33 = vrot.slane %v8991_v60, 4  ;;  %v9030_v35 = vrot.slane %v8993_v5, 4  ;;  %v9059_v45 = vsel %vm354_vm4, %v2707_v9, %v8972_v29  ;;  %v9072_v29 = vsel %vm448_vm0, %v2586_v11, %v8988_v56 }
 0x2c0   :  { %v9012_v21 = vpop.permute.xlu1 %2342  ;;  %v9014_v22 = vpop.permute.xlu0 %2344 }
 0x2c1   :  { %v2346_v40 = vrot.slane %v9012_v21, 4 }
 0x2c4   :  { %v2231_v52 = vpop.permute.xlu0 %2230 }
 0x36a   :  { %v1950_v0 = vpop.f32.mrf.mxu0  ;;  %v1993_v58 = vpop.f32.mrf.mxu1 }
 0x36b   :  { %v1951_v61 = vadd.f32 %v1950_v0, %v1799_v26  ;;  %v1994_v62 = vadd.f32 %v1993_v58, %v1799_v26  ;;  %v2467_v0 = vsel %vm10426_vm1, %v2464_v33, %v9030_v35  ;;  %v9078_v58 = vrot.slane %v9014_v22, 4 }
 0x36c   :  { %v1952_v63 = vpop.f32.mrf.mxu0  ;;  %v1995_v2 = vpop.f32.mrf.mxu1 }
 0x36d   :  { %v2010_v46 = vmul.f32 -0.2, %v1951_v61  ;;  %v2012_v32 = vmul.f32 -0.2, %v1994_v62  ;;  %vm2002_vm10 = vcmp.ge.f32.partialorder %v1951_v61, 0.0  ;;  %vm2004_vm11 = vcmp.ge.f32.partialorder %v1994_v62, 0.0 }
 0x36e   :  { %v1953_v39 = vadd.f32 %v1952_v63, %v1799_v26  ;;  %v1996_v6 = vadd.f32 %v1995_v2, %v1799_v26  ;;  %v1954_v7 = vpop.f32.mrf.mxu0  ;;  %v1997_v8 = vpop.f32.mrf.mxu1  ;;  %v2349_v9 = vsel %vm10426_vm1, %v2346_v40, %v9078_v58 }
 0x36f   :  { %v1955_v3 = vadd.f32 %v1954_v7, %v1804_v50  ;;  %v1998_v47 = vadd.f32 %v1997_v8, %v1804_v50  ;;  %v9007_v17 = vsel %vm2002_vm10, %v1951_v61, %v2010_v46  ;;  %v9010_v18 = vsel %vm2004_vm11, %v1994_v62, %v2012_v32  ;;  %v2113_v8 = vpop.permute.xlu0 %2112 }
 0x370   :  { %vm2003_vm12 = vcmp.ge.f32.partialorder %v1953_v39, 0.0  ;;  %v2011_v12 = vmul.f32 -0.2, %v1953_v39  ;;  %vm2005_vm13 = vcmp.ge.f32.partialorder %v1996_v6, 0.0  ;;  %v2013_v13 = vmul.f32 -0.2, %v1996_v6  ;;  %v1956_v15 = vpop.f32.mrf.mxu0  ;;  %v1999_v16 = vpop.f32.mrf.mxu1 }
 0x371   :  { %v2014_v1 = vmul.f32 -0.2, %v1955_v3  ;;  %v2016_v10 = vmul.f32 -0.2, %v1998_v47  ;;  %v1957_v25 = vadd.f32 %v1956_v15, %v1804_v50  ;;  %v2000_v26 = vadd.f32 %v1999_v16, %v1804_v50  ;;  %v2229_v50 = vpop.permute.xlu1 %2228 }
 0x372   :  { %v9016_v23 = vsel %vm2003_vm12, %v1953_v39, %v2011_v12  ;;  %v9018_v24 = vsel %vm2005_vm13, %v1996_v6, %v2013_v13  ;;  %vm2006_vm14 = vcmp.ge.f32.partialorder %v1955_v3, 0.0  ;;  %vm2008_vm15 = vcmp.ge.f32.partialorder %v1998_v47, 0.0 }
 0x373   :  { %v9022_v28 = vpack.c.bf16 %v9016_v23, %v9007_v17  ;;  %v9026_v27 = vpack.c.bf16 %v9018_v24, %v9010_v18  ;;  %vm2007_vm10 = vcmp.ge.f32.partialorder %v1957_v25, 0.0  ;;  %v2015_v30 = vmul.f32 -0.2, %v1957_v25 }
 0x374   :  { %vm2009_vm11 = vcmp.ge.f32.partialorder %v2000_v26, 0.0  ;;  %v2017_v31 = vmul.f32 -0.2, %v2000_v26  ;;  %v9039_v41 = vsel %vm2006_vm14, %v1955_v3, %v2014_v1  ;;  %v9041_v42 = vsel %vm2008_vm15, %v1998_v47, %v2016_v10  ;;  %v2935_v10 = vpop.permute.xlu0 %2934 }
 0x375   :  { %2050 = vst [vmem:[#allocation2 + $0x4] sm:$0xff] %v9022_v28  ;;  %2051 = vst [vmem:[#allocation2 + $0xc] sm:$0xff] %v9026_v27  ;;  %v2827_v36 = vmul.bf16 %v9026_v27, %v8999_v44  ;;  %v2826_v38 = vmul.bf16 %v9022_v28, %v8996_v51  ;;  %v9043_v34 = vsel %vm2007_vm10, %v1957_v25, %v2015_v30  ;;  %v2111_v7 = vpop.permute.xlu1 %2110  ;;  %v2232_v11 = vrot.slane %v2229_v50, 4 }
 0x376   :  { %2522 = vst [vmem:[#allocation3 + $0x80] sm:$0xff] %v9022_v28  ;;  %v9045_v48 = vsel %vm2009_vm11, %v2000_v26, %v2017_v31  ;;  %v9049_v49 = vpack.c.bf16 %v9043_v34, %v9039_v41  ;;  %v2713_v57 = vmul.bf16 %v9026_v27, %v9059_v45  ;;  %v2712_v53 = vmul.bf16 %v9022_v28, %v9002_v4 }
 0x377   :  { %v9053_v37 = vpack.c.bf16 %v9045_v48, %v9041_v42  ;;  %2840 = vrot.lane.b32.xlu0 %v2827_v36, %s10438_s23  ;;  %2838 = vrot.lane.b32.xlu1 %v2826_v38, %s10438_s23  ;;  %v8219_v59 = vpack.c.bf16 %v9043_v34, %v9016_v23  ;;  %v8220_v61 = vpack.c.bf16 %v9041_v42, %v9010_v18  ;;  %v9108_v3 = vrot.slane %v2231_v52, 4 }
 0x378   :  { %2052 = vst [vmem:[#allocation2 + $0x28] sm:$0xff] %v9049_v49  ;;  %2524 = vst [vmem:[#allocation3 + $0x90] sm:$0xff] %v9049_v49  ;;  %v8221_v56 = vpack.c.bf16 %v9045_v48, %v9018_v24  ;;  %v9090_v62 = vsel %vm448_vm0, %v2589_v55, %v8977_v43  ;;  %v8222_v63 = vpack.c.bf16 %v9039_v41, %v9007_v17  ;;  %v2114_v15 = vrot.slane %v2111_v7, 4 }
 0x379   :  { %2053 = vst [vmem:[#allocation2 + $0x30] sm:$0xff] %v9053_v37  ;;  %v2594_v2 = vmul.bf16 %v9022_v28, %v9072_v29  ;;  %v2595_v46 = vmul.bf16 %v9026_v27, %v9090_v62  ;;  %v9100_v32 = vsel %vm425_vm5, %v2464_v33, %v8991_v60  ;;  %v9104_v39 = vsel %vm425_vm5, %v2467_v0, %v8993_v5  ;;  %v2933_v1 = vpop.permute.xlu1 %2932 }
 0x37a   :  { %v9116_v5 = vsel %vm331_vm3, %v2349_v9, %v9014_v22  ;;  %v2235_v13 = vsel %vm10426_vm1, %v2232_v11, %v9108_v3  ;;  %v9120_v16 = vrot.slane %v2113_v8, 4  ;;  %v2348_v22 = vsel %vm331_vm3, %v2346_v40, %v9012_v21 }
 0x37b   :  { %2726 = vrot.lane.b32.xlu0 %v2713_v57, %s10445_s0  ;;  %2724 = vrot.lane.b32.xlu1 %v2712_v53, %s10445_s0  ;;  %v9129_v30 = vsel %vm241_vm8, %v2235_v13, %v2231_v52  ;;  %v2936_v33 = vrot.slane %v2933_v1, 4  ;;  %v9133_v36 = vrot.slane %v2935_v10, 4  ;;  %v2234_v40 = vsel %vm241_vm8, %v2232_v11, %v2229_v50 }
 0x37c   :  { %v2168_v6 = vld [vmem:[#allocation2] sm:$0xff]  ;;  %v2169_v43 = vld [vmem:[#allocation2 + $0x8] sm:$0xff]  ;;  %v2402_v12 = vld [vmem:[#allocation2 + $0x10] sm:$0xf]  ;;  %v2117_v31 = vsel %vm10426_vm1, %v2114_v15, %v9120_v16  ;;  %v2829_v50 = vmul.bf16 %v9049_v49, %v8996_v51  ;;  %v2116_v11 = vsel %vm146_vm7, %v2114_v15, %v2111_v7  ;;  %v2597_v51 = vmul.bf16 %v9049_v49, %v9072_v29 }
 0x37d   :  { %v2472_v60 = vmul.bf16 %v9100_v32, %v2168_v6  ;;  %v2473_v47 = vmul.bf16 %v9104_v39, %v2169_v43  ;;  %v2474_v25 = vmul.bf16 %v9030_v35, %v2402_v12  ;;  %v2355_v26 = vmul.bf16 %v9116_v5, %v2169_v43  ;;  %v2288_v21 = vld [vmem:[#allocation2 + $0x10] sm:$0xf] }
 0x37e   :  { %v2241_v38 = vmul.bf16 %v9129_v30, %v2169_v43  ;;  %v2354_v55 = vmul.bf16 %v2348_v22, %v2168_v6  ;;  %v9139_v57 = vsel %vm146_vm7, %v2117_v31, %v2113_v8  ;;  %v2939_v52 = vsel %vm10426_vm1, %v2936_v33, %v9133_v36  ;;  %v2170_v9 = vld [vmem:[#allocation2 + $0x10] sm:$0xf] }
 0x37f   :  { %2606 = vrot.lane.b32.xlu1 %v2594_v2, %s10444_s28  ;;  %2608 = vrot.lane.b32.xlu0 %v2595_v46, %s10444_s28  ;;  %v2123_v53 = vmul.bf16 %v2169_v43, %v9139_v57  ;;  %v2356_v0 = vmul.bf16 %v9078_v58, %v2288_v21  ;;  %v9149_v2 = vsel %vm170_vm6, %v2939_v52, %v2935_v10  ;;  %v2057_v13 = vld [vmem:[#allocation2 + $0x24] sm:$0xff]  ;;  %vm3761_vm15 = vcmask 64512  }
 0x380   :  { %v2240_v46 = vmul.bf16 %v2234_v40, %v2168_v6  ;;  %v2945_v8 = vmul.bf16 %v9026_v27, %v9149_v2  ;;  %v2242_v43 = vmul.bf16 %v9108_v3, %v2170_v9  ;;  %v2715_v27 = vmul.bf16 %v9049_v49, %v9002_v4  ;;  %v2405_v15 = vld [vmem:[#allocation2 + $0x34] sm:$0xf] }
 0x381   :  { %v2938_v7 = vsel %vm170_vm6, %v2936_v33, %v2933_v1  ;;  %v2475_v4 = vmul.bf16 %v9100_v32, %v2057_v13  ;;  %v2830_v10 = vmul.bf16 %v9053_v37, %v8999_v44  ;;  %v2477_v29 = vmul.bf16 %v9030_v35, %v2405_v15 }
 0x382   :  { %v2716_v1 = vmul.bf16 %v9053_v37, %v9059_v45  ;;  %v2598_v32 = vmul.bf16 %v9053_v37, %v9090_v62  ;;  %v2243_v31 = vmul.bf16 %v2234_v40, %v2057_v13  ;;  %v2058_v45 = vld [vmem:[#allocation2 + $0x2c] sm:$0xff]  ;;  %vm3797_vm10 = vcmask 56320  }
 0x383   :  { %2484 = vrot.lane.b32.xlu1 %v2472_v60, %s10441_s24  ;;  %2486 = vrot.lane.b32.xlu0 %v2473_v47, %s10441_s24  ;;  %v2122_v60 = vmul.bf16 %v2168_v6, %v2116_v11  ;;  %v2056_v47 = vld [vmem:[#allocation2 + $0x10] sm:$0xf]  ;;  %v2944_v6 = vmul.bf16 %v9022_v28, %v2938_v7  ;;  %v2357_v28 = vmul.bf16 %v2348_v22, %v2057_v13  ;;  %v2173_v22 = vld [vmem:[#allocation2 + $0x34] sm:$0xf]  ;;  %vm10430_vm11 = vcmask 990208  }
 0x384   :  { %v2124_v12 = vmul.bf16 %v9120_v16, %v2056_v47  ;;  %v2476_v33 = vmul.bf16 %v9104_v39, %v2058_v45  ;;  %v2245_v62 = vmul.bf16 %v9108_v3, %v2173_v22  ;;  %v2244_v21 = vmul.bf16 %v9129_v30, %v2058_v45 }
 0x385   :  { %v2126_v39 = vmul.bf16 %v9139_v57, %v2058_v45  ;;  %v2947_v3 = vmul.bf16 %v9049_v49, %v2938_v7  ;;  %v3028_v49 = vld [vmem:[%s10391_s2] sm:$0xff]  ;;  %v8232_v57 = vmov 1  }
 0x386   :  { %7919 = vset.pattern.permute.xlu1 %v8232_v57  ;;  %7920 = vset.pattern.permute.xlu0 %v8232_v57 }
 0x387   :  { %2488 = vrot.lane.b32.xlu1 %v2474_v25, %s10441_s24  ;;  %2368 = vrot.lane.b32.xlu0 %v2355_v26, %s8226_s30  ;;  %v2291_v25 = vld [vmem:[#allocation2 + $0x34] sm:$0xf] }
 0x388   :  { %v2359_v44 = vmul.bf16 %v9078_v58, %v2291_v25  ;;  %v2874_v26 = vld [vmem:[#allocation2 + $0x14] sm:$0xf]  ;;  %v2125_v58 = vmul.bf16 %v2116_v11, %v2057_v13 }
 0x389   :  { %v2946_v35 = vmul.bf16 %v9133_v36, %v2874_v26 }
 0x38b   :  { %2366 = vrot.lane.b32.xlu1 %v2354_v55, %s8226_s30  ;;  %2254 = vrot.lane.b32.xlu0 %v2241_v38, %s10443_s22  ;;  %v2358_v38 = vmul.bf16 %v9116_v5, %v2058_v45  ;;  %v2059_v55 = vld [vmem:[#allocation2 + $0x34] sm:$0xf]  ;;  %v8028_v5 = vld [vmem:[%s10392_s5 + $0x4] ss:$8 sps:$4 sm:$0xff]  }
 0x38c   :  { %v2127_v52 = vmul.bf16 %v9120_v16, %v2059_v55  ;;  %v2948_v16 = vmul.bf16 %v9053_v37, %v9149_v2  ;;  %7455 = vmatprep.mubr.msk.bf16.mxu0 %vm264_vm2, %v8028_v5  ;;  %7456 = vmatprep.mubr.msk.bf16.mxu1 %vm264_vm2, %v8028_v5  ;;  %v3029_v37 = vld [vmem:[%s10391_s2 + $0x8] sm:$0xff] }
 0x38f   :  { %2370 = vrot.lane.b32.xlu1 %v2356_v0, %s8226_s30  ;;  %2136 = vrot.lane.b32.xlu0 %v2123_v53, %s10442_s26  ;;  %v2877_v53 = vld [vmem:[#allocation2 + $0x38] sm:$0xf]  ;;  %v9225_v0 = vpop.permute.xlu0 %2848 }
 0x390   :  { %v2949_v30 = vmul.bf16 %v9133_v36, %v2877_v53  ;;  %v2843_v36 = vpop.permute.xlu1 %2842 }
 0x393   :  { %2252 = vrot.lane.b32.xlu1 %v2240_v46, %s10443_s22  ;;  %2958 = vrot.lane.b32.xlu0 %v2945_v8, %s10437_s3  ;;  %v9227_v2 = vpop.permute.xlu0 %2734 }
 0x394   :  { %v2729_v40 = vpop.permute.xlu1 %2728 }
 0x397   :  { %2256 = vrot.lane.b32.xlu1 %v2242_v43, %s10443_s22  ;;  %2844 = vrot.lane.b32.xlu0 %v2829_v50, %s10438_s23  ;;  %v9229_v8 = vpop.permute.xlu0 %2616  ;;  %v2852_v50 = vrot.slane %v2843_v36, 4 }
 0x398   :  { %v2611_v46 = vpop.permute.xlu1 %2610 }
 0x39b   :  { %2134 = vrot.lane.b32.xlu1 %v2122_v60, %s10442_s26  ;;  %2730 = vrot.lane.b32.xlu0 %v2715_v27, %s10445_s0 }
 0x39f   :  { %2138 = vrot.lane.b32.xlu1 %v2124_v12, %s10442_s26  ;;  %2612 = vrot.lane.b32.xlu0 %v2597_v51, %s10444_s28 }
 0x3a3   :  { %2956 = vrot.lane.b32.xlu1 %v2944_v6, %s10437_s3  ;;  %2490 = vrot.lane.b32.xlu0 %v2475_v4, %s10441_s24  ;;  %v2738_v6 = vrot.slane %v2729_v40, 4 }
 0x3a7   :  { %2846 = vrot.lane.b32.xlu1 %v2830_v10, %s10438_s23  ;;  %2494 = vrot.lane.b32.xlu0 %v2477_v29, %s10441_s24  ;;  %s8237_s23 = smov 120  }
 0x3ab   :  { %2732 = vrot.lane.b32.xlu1 %v2716_v1, %s10445_s0  ;;  %2372 = vrot.lane.b32.xlu0 %v2357_v28, %s8226_s30 }
 0x3af   :  { %2614 = vrot.lane.b32.xlu1 %v2598_v32, %s10444_s28  ;;  %2376 = vrot.lane.b32.xlu0 %v2359_v44, %s8226_s30  ;;  %v2620_v44 = vrot.slane %v2611_v46, 4 }
 0x3b3   :  { %2960 = vrot.lane.b32.xlu1 %v2946_v35, %s10437_s3  ;;  %2258 = vrot.lane.b32.xlu0 %v2243_v31, %s10443_s22 }
 0x3b7   :  { %2492 = vrot.lane.b32.xlu1 %v2476_v33, %s10441_s24  ;;  %2262 = vrot.lane.b32.xlu0 %v2245_v62, %s10443_s22 }
 0x3bb   :  { %2374 = vrot.lane.b32.xlu1 %v2358_v38, %s8226_s30  ;;  %2140 = vrot.lane.b32.xlu0 %v2125_v58, %s10442_s26  ;;  %s8236_s30 = smov 119  }
 0x3bf   :  { %2260 = vrot.lane.b32.xlu1 %v2244_v21, %s10443_s22  ;;  %2144 = vrot.lane.b32.xlu0 %v2127_v52, %s10442_s26  ;;  %s10424_s22 = smov 9  }
 0x3c3   :  { %2142 = vrot.lane.b32.xlu1 %v2126_v39, %s10442_s26  ;;  %2962 = vrot.lane.b32.xlu0 %v2947_v3, %s10437_s3 }
 0x3c7   :  { %2964 = vrot.lane.b32.xlu1 %v2948_v16, %s10437_s3  ;;  %2966 = vrot.lane.b32.xlu0 %v2949_v30, %s10437_s3  ;;  %s8244_s3 = smov 124  }
 0x3cb   :  { %3032 = vperm.xlu1 %7919, %v3028_v49   ;;  %3037 = vperm.xlu0 %7920, %v3029_v37  }
 0x3e9   :  { %v2839_v9 = vpop.permute.xlu1 %2838  ;;  %v2841_v43 = vpop.permute.xlu0 %2840 }
 0x3ea   :  { %v2850_v11 = vrot.slane %v2839_v9, 4  ;;  %v2851_v60 = vrot.slane %v2841_v43, 4 }
 0x3ec   :  { %v2856_v27 = vsel %vm10426_vm1, %v2850_v11, %v2851_v60  ;;  %v2858_v47 = vsel %vm10426_vm1, %v2851_v60, %v2852_v50 }
 0x3ed   :  { %v9234_v12 = vsel %vm241_vm8, %v2839_v9, %v2856_v27  ;;  %v9237_v51 = vsel %vm241_vm8, %v2841_v43, %v2858_v47  ;;  %v2725_v13 = vpop.permute.xlu1 %2724  ;;  %v2727_v7 = vpop.permute.xlu0 %2726 }
 0x3ee   :  { %2868 = vst [vmem:[#allocation3 + $0xe0] sm:$0xff] %v9234_v12  ;;  %v2736_v4 = vrot.slane %v2725_v13, 4  ;;  %v2737_v15 = vrot.slane %v2727_v7, 4 }
 0x3f0   :  { %v2742_v10 = vsel %vm10426_vm1, %v2736_v4, %v2737_v15  ;;  %v2744_v29 = vsel %vm10426_vm1, %v2737_v15, %v2738_v6 }
 0x3f1   :  { %v9243_v1 = vsel %vm331_vm3, %v2725_v13, %v2742_v10  ;;  %v9246_v28 = vsel %vm331_vm3, %v2727_v7, %v2744_v29  ;;  %v2607_v25 = vpop.permute.xlu1 %2606  ;;  %v2609_v32 = vpop.permute.xlu0 %2608 }
 0x3f2   :  { %2754 = vst [vmem:[#allocation3 + $0xc0] sm:$0xff] %v9243_v1  ;;  %v2618_v26 = vrot.slane %v2607_v25, 4  ;;  %v2619_v35 = vrot.slane %v2609_v32, 4 }
 0x3f4   :  { %v2624_v31 = vsel %vm10426_vm1, %v2618_v26, %v2619_v35  ;;  %v2626_v45 = vsel %vm10426_vm1, %v2619_v35, %v2620_v44 }
 0x3f5   :  { %v9252_v22 = vsel %vm425_vm5, %v2607_v25, %v2624_v31  ;;  %v9255_v33 = vsel %vm425_vm5, %v2609_v32, %v2626_v45  ;;  %v2485_v62 = vpop.permute.xlu1 %2484  ;;  %v2487_v58 = vpop.permute.xlu0 %2486 }
 0x3f6   :  { %2636 = vst [vmem:[#allocation3 + $0xa0] sm:$0xff] %v9252_v22  ;;  %v2496_v38 = vrot.slane %v2485_v62, 4  ;;  %v2497_v55 = vrot.slane %v2487_v58, 4 }
 0x3f8   :  { %v2502_v21 = vsel %vm10426_vm1, %v2496_v38, %v2497_v55 }
 0x3f9   :  { %v9260_v52 = vsel %vm448_vm0, %v2485_v62, %v2502_v21  ;;  %v2489_v39 = vpop.permute.xlu1 %2488  ;;  %v2369_v3 = vpop.permute.xlu0 %2368 }
 0x3fa   :  { %2514 = vst [vmem:[#allocation3 + $0x60] sm:$0xff] %v9260_v52  ;;  %v2498_v53 = vrot.slane %v2489_v39, 4  ;;  %v2379_v57 = vrot.slane %v2369_v3, 4 }
 0x3fc   :  { %v2504_v5 = vsel %vm10426_vm1, %v2497_v55, %v2498_v53 }
 0x3fd   :  { %v9265_v16 = vsel %vm448_vm0, %v2487_v58, %v2504_v5  ;;  %v2367_v30 = vpop.permute.xlu1 %2366  ;;  %v2255_v49 = vpop.permute.xlu0 %2254 }
 0x3fe   :  { %v2378_v37 = vrot.slane %v2367_v30, 4  ;;  %v2265_v47 = vrot.slane %v2255_v49, 4 }
 0x400   :  { %v2384_v36 = vsel %vm10426_vm1, %v2378_v37, %v2379_v57 }
 0x401   :  { %v9269_v40 = vsel %vm354_vm4, %v2367_v30, %v2384_v36  ;;  %v2371_v46 = vpop.permute.xlu1 %2370  ;;  %v2137_v9 = vpop.permute.xlu0 %2136  ;;  %v2855_v36 = vrot.slane %v9225_v0, 4 }
 0x402   :  { %2396 = vst [vmem:[#allocation3 + $0x40] sm:$0xff] %v9269_v40  ;;  %v2380_v43 = vrot.slane %v2371_v46, 4  ;;  %v2147_v26 = vrot.slane %v2137_v9, 4 }
 0x404   :  { %v2386_v50 = vsel %vm10426_vm1, %v2379_v57, %v2380_v43 }
 0x405   :  { %v9274_v11 = vsel %vm354_vm4, %v2369_v3, %v2386_v50  ;;  %v2253_v60 = vpop.permute.xlu1 %2252  ;;  %v9276_v27 = vpop.permute.xlu0 %2958 }
 0x406   :  { %v2264_v13 = vrot.slane %v2253_v60, 4  ;;  %v2969_v53 = vrot.slane %v9276_v27, 4 }
 0x408   :  { %v2270_v7 = vsel %vm10426_vm1, %v2264_v13, %v2265_v47 }
 0x409   :  { %v9280_v6 = vsel %vm264_vm2, %v2253_v60, %v2270_v7  ;;  %v2257_v4 = vpop.permute.xlu1 %2256  ;;  %v2845_v15 = vpop.permute.xlu0 %2844  ;;  %v2741_v60 = vrot.slane %v9227_v2, 4 }
 0x40a   :  { %2282 = vst [vmem:[#allocation3 + $0x20] sm:$0xff] %v9280_v6  ;;  %v2266_v10 = vrot.slane %v2257_v4, 4  ;;  %v2853_v46 = vrot.slane %v2845_v15, 4 }
 0x40c   :  { %v2272_v29 = vsel %vm10426_vm1, %v2265_v47, %v2266_v10 }
 0x40d   :  { %v9285_v25 = vsel %vm264_vm2, %v2255_v49, %v2272_v29  ;;  %v2135_v32 = vpop.permute.xlu1 %2134  ;;  %v2731_v44 = vpop.permute.xlu0 %2730 }
 0x40e   :  { %v2146_v35 = vrot.slane %v2135_v32, 4  ;;  %v2739_v10 = vrot.slane %v2731_v44, 4 }
 0x410   :  { %v2152_v31 = vsel %vm10426_vm1, %v2146_v35, %v2147_v26 }
 0x411   :  { %v9289_v45 = vsel %vm170_vm6, %v2135_v32, %v2152_v31  ;;  %v2139_v62 = vpop.permute.xlu1 %2138  ;;  %v2613_v58 = vpop.permute.xlu0 %2612  ;;  %v2623_v31 = vrot.slane %v9229_v8, 4 }
 0x412   :  { %2164 = vst [vmem:[#allocation3] sm:$0xff] %v9289_v45  ;;  %v2148_v38 = vrot.slane %v2139_v62, 4 }
 0x414   :  { %v2154_v55 = vsel %vm10426_vm1, %v2147_v26, %v2148_v38 }
 0x415   :  { %v9294_v21 = vsel %vm170_vm6, %v2137_v9, %v2154_v55  ;;  %v2957_v39 = vpop.permute.xlu1 %2956  ;;  %v9296_v3 = vpop.permute.xlu0 %2490 }
 0x416   :  { %v2968_v5 = vrot.slane %v2957_v39, 4 }
 0x418   :  { %v2974_v30 = vsel %vm10426_vm1, %v2968_v5, %v2969_v53  ;;  %v2621_v5 = vrot.slane %v2613_v58, 4 }
 0x419   :  { %v9301_v49 = vsel %vm146_vm7, %v2957_v39, %v2974_v30  ;;  %v2847_v57 = vpop.permute.xlu1 %2846  ;;  %v9303_v37 = vpop.permute.xlu0 %2494 }
 0x41a   :  { %2986 = vst [vmem:[#allocation3 + $0x100] sm:$0xff] %v9301_v49  ;;  %v2854_v9 = vrot.slane %v2847_v57, 4 }
 0x41c   :  { %v2860_v43 = vsel %vm10426_vm1, %v2853_v46, %v2854_v9  ;;  %v2862_v50 = vsel %vm10426_vm1, %v2854_v9, %v2855_v36 }
 0x41d   :  { %v2861_v47 = vsel %vm241_vm8, %v2845_v15, %v2860_v43  ;;  %v2863_v13 = vsel %vm241_vm8, %v2847_v57, %v2862_v50  ;;  %v2733_v7 = vpop.permute.xlu1 %2732  ;;  %v9312_v4 = vpop.permute.xlu0 %2372 }
 0x41e   :  { %2870 = vst [vmem:[#allocation3 + $0xf0] sm:$0xff] %v2861_v47  ;;  %v2740_v0 = vrot.slane %v2733_v7, 4  ;;  %v7448_v29 = vcombine.high %v9234_v12, %v2861_v47  ;;  %v7449_v32 = vcombine.low %v9237_v51, %v2863_v13  ;;  %v7450_v26 = vcombine.high %v9237_v51, %v2863_v13 }
 0x41f   :  { %v7447_v35 = vcombine.low %v9234_v12, %v2861_v47 }
 0x420   :  { %v2746_v2 = vsel %vm10426_vm1, %v2739_v10, %v2740_v0  ;;  %v2748_v15 = vsel %vm10426_vm1, %v2740_v0, %v2741_v60  ;;  %3233 = vmatprep.subr.bf16.mxu0 %v7448_v29  ;;  %3276 = vmatprep.subr.bf16.mxu1 %v7450_v26  ;;  %v2499_v29 = vrot.slane %v9296_v3, 4 }
 0x421   :  { %v2747_v62 = vsel %vm331_vm3, %v2731_v44, %v2746_v2  ;;  %v2749_v38 = vsel %vm331_vm3, %v2733_v7, %v2748_v15  ;;  %v2615_v55 = vpop.permute.xlu1 %2614  ;;  %v2377_v39 = vpop.permute.xlu0 %2376  ;;  %3234 = vmatpush1.bf16.msra.mxu0 %v7447_v35  ;;  %3277 = vmatpush1.bf16.msra.mxu1 %v7449_v32  ;;  %v2501_v32 = vrot.slane %v9303_v37, 4 }
 0x422   :  { %2756 = vst [vmem:[#allocation3 + $0xd0] sm:$0xff] %v2747_v62  ;;  %v2622_v51 = vrot.slane %v2615_v55, 4  ;;  %v7444_v12 = vcombine.high %v9243_v1, %v2747_v62  ;;  %v7445_v30 = vcombine.low %v9246_v28, %v2749_v38  ;;  %v7446_v57 = vcombine.high %v9246_v28, %v2749_v38 }
 0x423   :  { %v7443_v8 = vcombine.low %v9243_v1, %v2747_v62  ;;  %v2383_v23 = vrot.slane %v2377_v39, 4 }
 0x424   :  { %v2628_v44 = vsel %vm10426_vm1, %v2621_v5, %v2622_v51  ;;  %v2630_v36 = vsel %vm10426_vm1, %v2622_v51, %v2623_v31  ;;  %3235 = vmatprep.subr.bf16.mxu0 %v7444_v12  ;;  %3278 = vmatprep.subr.bf16.mxu1 %v7446_v57 }
 0x425   :  { %v2629_v46 = vsel %vm425_vm5, %v2613_v58, %v2628_v44  ;;  %v2631_v9 = vsel %vm425_vm5, %v2615_v55, %v2630_v36  ;;  %v2961_v43 = vpop.permute.xlu1 %2960  ;;  %v2259_v50 = vpop.permute.xlu0 %2258  ;;  %3236 = vmatpush1.bf16.msra.mxu0 %v7443_v8  ;;  %3279 = vmatpush1.bf16.msra.mxu1 %v7445_v30 }
 0x426   :  { %2638 = vst [vmem:[#allocation3 + $0xb0] sm:$0xff] %v2629_v46  ;;  %v2970_v60 = vrot.slane %v2961_v43, 4  ;;  %v7440_v28 = vcombine.high %v9252_v22, %v2629_v46  ;;  %v7441_v1 = vcombine.low %v9255_v33, %v2631_v9  ;;  %v7442_v47 = vcombine.high %v9255_v33, %v2631_v9 }
 0x427   :  { %v7439_v13 = vcombine.low %v9252_v22, %v2629_v46  ;;  %v2267_v41 = vrot.slane %v2259_v50, 4 }
 0x428   :  { %v2976_v7 = vsel %vm10426_vm1, %v2969_v53, %v2970_v60  ;;  %3237 = vmatprep.subr.bf16.mxu0 %v7440_v28  ;;  %3280 = vmatprep.subr.bf16.mxu1 %v7442_v47 }
 0x429   :  { %v9338_v58 = vsel %vm146_vm7, %v9276_v27, %v2976_v7  ;;  %v2493_v10 = vpop.permute.xlu1 %2492  ;;  %v2263_v0 = vpop.permute.xlu0 %2262  ;;  %3238 = vmatpush1.bf16.msra.mxu0 %v7439_v13  ;;  %3281 = vmatpush1.bf16.msra.mxu1 %v7441_v1  ;;  %v2381_v27 = vrot.slane %v9312_v4, 4 }
 0x42a   :  { %v2500_v26 = vrot.slane %v2493_v10, 4  ;;  %3239 = vmatprep.subr.bf16.mxu0 %v8219_v59  ;;  %3282 = vmatprep.subr.bf16.mxu1 %v8221_v56  ;;  %v2269_v15 = vrot.slane %v2263_v0, 4 }
 0x42c   :  { %v2506_v22 = vsel %vm10426_vm1, %v2499_v29, %v2500_v26  ;;  %v2508_v33 = vsel %vm10426_vm1, %v2500_v26, %v2501_v32 }
 0x42d   :  { %v2507_v53 = vsel %vm448_vm0, %v9296_v3, %v2506_v22  ;;  %v2509_v37 = vsel %vm448_vm0, %v2493_v10, %v2508_v33  ;;  %v2375_v35 = vpop.permute.xlu1 %2374  ;;  %v2141_v2 = vpop.permute.xlu0 %2140  ;;  %3240 = vmatpush1.bf16.msra.mxu0 %v8222_v63  ;;  %3283 = vmatpush1.bf16.msra.mxu1 %v8220_v61 }
 0x42e   :  { %2516 = vst [vmem:[#allocation3 + $0x70] sm:$0xff] %v2507_v53  ;;  %v2382_v24 = vrot.slane %v2375_v35, 4  ;;  %v7432_v34 = vcombine.high %v9260_v52, %v2507_v53  ;;  %v7433_v48 = vcombine.low %v9265_v16, %v2509_v37  ;;  %v7434_v59 = vcombine.high %v9265_v16, %v2509_v37  ;;  %v8030_v37 = vld [vmem:[%s10392_s5] ss:$8 sps:$4 sm:$0xff]   ;;  %s8243_s5 = smov 125  }
 0x42f   :  { %v7431_v56 = vcombine.low %v9260_v52, %v2507_v53  ;;  %v2149_v39 = vrot.slane %v2141_v2, 4  ;;  %v8032_v53 = vld [vmem:[%s10393_s12 + $0xf8] sm:$0xff]  }
 0x430   :  { %v2388_v3 = vsel %vm10426_vm1, %v2381_v27, %v2382_v24  ;;  %v2390_v17 = vsel %vm10426_vm1, %v2382_v24, %v2383_v23  ;;  %3241 = vmatprep.subr.bf16.mxu0 %v7432_v34  ;;  %3284 = vmatprep.subr.bf16.mxu1 %v7434_v59  ;;  %v8031_v27 = vld [vmem:[%s10393_s12 + $0x78] sm:$0xff]   ;;  %v8037_v23 = vld [vmem:[%s10393_s12 + $0x30] sm:$0xff]   ;;  %v8039_v34 = vld [vmem:[%s10393_s12 + $0x68] sm:$0xff]  }
 0x431   :  { %v2389_v63 = vsel %vm354_vm4, %v9312_v4, %v2388_v3  ;;  %v2391_v18 = vsel %vm354_vm4, %v2375_v35, %v2390_v17  ;;  %v2261_v42 = vpop.permute.xlu1 %2260  ;;  %v2145_v61 = vpop.permute.xlu0 %2144  ;;  %3242 = vmatpush1.bf16.msra.mxu0 %v7431_v56  ;;  %3285 = vmatpush1.bf16.msra.mxu1 %v7433_v48  ;;  %v8035_v35 = vld [vmem:[%s10393_s12 + $0x70] sm:$0xff]   ;;  %v8040_v48 = vld [vmem:[%s10393_s12 + $0xe8] sm:$0xff]   ;;  %v8043_v3 = vld [vmem:[%s10393_s12 + $0x60] sm:$0xff]  }
 0x432   :  { %2398 = vst [vmem:[#allocation3 + $0x50] sm:$0xff] %v2389_v63  ;;  %v2268_v16 = vrot.slane %v2261_v42, 4  ;;  %v7428_v52 = vcombine.high %v9269_v40, %v2389_v63  ;;  %v7429_v31 = vcombine.low %v9274_v11, %v2391_v18  ;;  %v7430_v62 = vcombine.high %v9274_v11, %v2391_v18  ;;  %v8038_v24 = vld [vmem:[%s10393_s12 + $0xb0] sm:$0xff]   ;;  %v8041_v59 = vld [vmem:[%s10393_s12 + $0x28] sm:$0xff]   ;;  %v8044_v17 = vld [vmem:[%s10393_s12 + $0xe0] sm:$0xff]  }
 0x433   :  { %v7427_v38 = vcombine.low %v9269_v40, %v2389_v63  ;;  %v2151_v57 = vrot.slane %v2145_v61, 4  ;;  %v8042_v56 = vld [vmem:[%s10393_s12 + $0xa8] sm:$0xff]   ;;  %v8046_v63 = vld [vmem:[%s10393_s12 + $0xa0] sm:$0xff]   ;;  %v8047_v18 = vld [vmem:[%s10393_s12 + $0x58] sm:$0xff]  }
 0x434   :  { %v2274_v4 = vsel %vm10426_vm1, %v2267_v41, %v2268_v16  ;;  %v2276_v55 = vsel %vm10426_vm1, %v2268_v16, %v2269_v15  ;;  %3243 = vmatprep.subr.bf16.mxu0 %v7428_v52  ;;  %3286 = vmatprep.subr.bf16.mxu1 %v7430_v62  ;;  %v8045_v41 = vld [vmem:[%s10393_s12 + $0x20] sm:$0xff]   ;;  %v8049_v61 = vld [vmem:[%s10393_s12 + $0x18] sm:$0xff]   ;;  %v8051_v16 = vld [vmem:[%s10393_s12 + $0x50] sm:$0xff]  }
 0x435   :  { %v2275_v5 = vsel %vm264_vm2, %v2259_v50, %v2274_v4  ;;  %v2277_v51 = vsel %vm264_vm2, %v2261_v42, %v2276_v55  ;;  %v2143_v12 = vpop.permute.xlu1 %2142  ;;  %v2963_v30 = vpop.permute.xlu0 %2962  ;;  %3244 = vmatpush1.bf16.msra.mxu0 %v7427_v38  ;;  %3287 = vmatpush1.bf16.msra.mxu1 %v7429_v31  ;;  %v8048_v42 = vld [vmem:[%s10393_s12 + $0xd8] sm:$0xff]   ;;  %v8052_v52 = vld [vmem:[%s10393_s12 + $0xd0] sm:$0xff]   ;;  %v8055_v38 = vld [vmem:[%s10393_s12 + $0x48] sm:$0xff]  }
 0x436   :  { %2284 = vst [vmem:[#allocation3 + $0x30] sm:$0xff] %v2275_v5  ;;  %v2150_v8 = vrot.slane %v2143_v12, 4  ;;  %v7424_v40 = vcombine.high %v9280_v6, %v2275_v5  ;;  %v7425_v11 = vcombine.low %v9285_v25, %v2277_v51  ;;  %v7426_v44 = vcombine.high %v9285_v25, %v2277_v51  ;;  %v8050_v15 = vld [vmem:[%s10393_s12 + $0x98] sm:$0xff]   ;;  %v8053_v31 = vld [vmem:[%s10393_s12 + $0x10] sm:$0xff]   ;;  %v8056_v4 = vld [vmem:[%s10393_s12 + $0xc8] sm:$0xff]  }
 0x437   :  { %v7423_v36 = vcombine.low %v9280_v6, %v2275_v5  ;;  %v2971_v60 = vrot.slane %v2963_v30, 4  ;;  %v8054_v62 = vld [vmem:[%s10393_s12 + $0x90] sm:$0xff]   ;;  %v8057_v55 = vld [vmem:[%s10393_s12 + $0x8] sm:$0xff]   ;;  %v8059_v5 = vld [vmem:[%s10393_s12 + $0x40] sm:$0xff]  }
 0x438   :  { %v2156_v46 = vsel %vm10426_vm1, %v2149_v39, %v2150_v8  ;;  %v2158_v9 = vsel %vm10426_vm1, %v2150_v8, %v2151_v57  ;;  %3245 = vmatprep.subr.bf16.mxu0 %v7424_v40  ;;  %3288 = vmatprep.subr.bf16.mxu1 %v7426_v44  ;;  %v8058_v39 = vld [vmem:[%s10393_s12 + $0x88] sm:$0xff]   ;;  %v8060_v51 = vld [vmem:[%s10393_s12 + $0xc0] sm:$0xff]   ;;  %v9496_v57 = vld [vmem:[#allocation2 + $0x18] sm:$0xff] }
 0x439   :  { %v2157_v43 = vsel %vm170_vm6, %v2141_v2, %v2156_v46  ;;  %v2159_v50 = vsel %vm170_vm6, %v2143_v12, %v2158_v9  ;;  %v2965_v28 = vpop.permute.xlu1 %2964  ;;  %v2967_v1 = vpop.permute.xlu0 %2966  ;;  %3246 = vmatpush1.bf16.msra.mxu0 %v7423_v36  ;;  %3289 = vmatpush1.bf16.msra.mxu1 %v7425_v11  ;;  %v8036_v2 = vld [vmem:[%s10393_s12 + $0xf0] sm:$0xff]   ;;  %v8061_v12 = vld [vmem:[%s10393_s12] sm:$0xff]  }
 0x43a   :  { %2166 = vst [vmem:[#allocation3 + $0x10] sm:$0xff] %v2157_v43  ;;  %v2972_v47 = vrot.slane %v2965_v28, 4  ;;  %v2973_v13 = vrot.slane %v2967_v1, 4  ;;  %v7420_v6 = vcombine.high %v9289_v45, %v2157_v43  ;;  %v7421_v25 = vcombine.low %v9294_v21, %v2159_v50  ;;  %v3914_v8 = vld [vmem:[%s10394_s17] sm:$0x8] }
 0x43b   :  { %v7422_v7 = vcombine.high %v9294_v21, %v2159_v50  ;;  %v7419_v10 = vcombine.low %v9289_v45, %v2157_v43  ;;  %v3879_v40 = vld [vmem:[%s10394_s17] sm:$0x4]  ;;  %v3806_v11 = vld [vmem:[%s10394_s17] sm:$0x2]  ;;  %v3916_v44 = vpack.i.b16 %v3914_v8, %v3914_v8  ;;  %v3733_v43 = vld [vmem:[%s10394_s17] sm:$0x1] }
 0x43c   :  { %v2978_v0 = vsel %vm10426_vm1, %v2971_v60, %v2972_v47  ;;  %v2980_v29 = vsel %vm10426_vm1, %v2972_v47, %v2973_v13  ;;  %3247 = vmatprep.subr.bf16.mxu0 %v7420_v6  ;;  %v3881_v36 = vshrl.u32 %v3879_v40, 16  ;;  %v3808_v46 = vshrl.u32 %v3806_v11, 16  ;;  %v3845_v9 = vld [vmem:[%s10394_s17] sm:$0x4] }
 0x43d   :  { %v2979_v32 = vsel %vm146_vm7, %v2963_v30, %v2978_v0  ;;  %v2981_v26 = vsel %vm146_vm7, %v2965_v28, %v2980_v29  ;;  %3290 = vmatprep.subr.bf16.mxu1 %v7422_v7  ;;  %3248 = vmatpush1.bf16.msra.mxu0 %v7419_v10  ;;  %v8062_v30 = vld [vmem:[%s10393_s12 + $0x80] sm:$0xff]   ;;  %v3847_v50 = vpack.i.b16 %v3845_v9, %v3845_v9  ;;  %v3735_v60 = vshrl.u32 %v3733_v43, 16 }
 0x43e   :  { %2988 = vst [vmem:[#allocation3 + $0x110] sm:$0xff] %v2979_v32  ;;  %3291 = vmatpush1.bf16.msra.mxu1 %v7421_v25  ;;  %v7452_v22 = vcombine.high %v9301_v49, %v2979_v32  ;;  %v7453_v33 = vcombine.low %v9338_v58, %v2981_v26  ;;  %v7454_v21 = vcombine.high %v9338_v58, %v2981_v26  ;;  %v8033_v58 = vld [vmem:[%s10393_s12 + $0x38] sm:$0xff]   ;;  %v3770_v28 = vld [vmem:[%s10394_s17] sm:$0x2]  ;;  %v3697_v25 = vld [vmem:[%s10394_s17] sm:$0x1] }
 0x43f   :  { %v7451_v45 = vcombine.low %v9301_v49, %v2979_v32  ;;  %v8034_v49 = vld [vmem:[%s10393_s12 + $0xb8] sm:$0xff]   ;;  %v3921_v1 = vrot.slane %v3916_v44, %v8368_v14  ;;  %v3882_v47 = vpack.i.b16 %v3881_v36, %v3881_v36  ;;  %v3809_v13 = vpack.i.b16 %v3808_v46, %v3808_v46  ;;  %v3948_v10 = vld [vmem:[%s10394_s17] sm:$0x8] }
 0x440   :  { %3263 = vmatprep.subr.bf16.mxu0 %v7452_v22  ;;  %3306 = vmatprep.subr.bf16.mxu1 %v7454_v21  ;;  %v3772_v6 = vpack.i.b16 %v3770_v28, %v3770_v28  ;;  %v3852_v7 = vrot.slane %v3847_v50, %v8371_v19  ;;  %v3699_v0 = vpack.i.b16 %v3697_v25, %v3697_v25  ;;  %vm5223_vm1 = vcmask 23552  }
 0x441   :  { %3264 = vmatpush2.bf16.msra.mxu0 %v7451_v45  ;;  %v7497_v29 = vcombine.low %v3921_v1, %v3921_v1  ;;  %v3887_v32 = vrot.slane %v3882_v47, %v8371_v19  ;;  %v3814_v21 = vrot.slane %v3809_v13, %v8427_v20  ;;  %v3736_v45 = vpack.i.b16 %v3735_v60, %v3735_v60 }
 0x442   :  { %3307 = vmatpush2.bf16.msra.mxu1 %v7453_v33  ;;  %7709 = vmatprep.subr.bf16.mxu0 %v8031_v27  ;;  %v3777_v26 = vrot.slane %v3772_v6, %v8427_v20  ;;  %v7495_v22 = vcombine.low %v3852_v7, %v3852_v7  ;;  %v3950_v27 = vshrl.u32 %v3948_v10, 16 }
 0x443   :  { %7731 = vmatprep.subr.bf16.mxu1 %v8032_v53  ;;  %3925 = vrot.lane.b32.xlu1 %v7497_v29, %s8233_s20  ;;  %v7496_v33 = vcombine.low %v3887_v32, %v3887_v32 }
 0x444   :  { %3266 = vmatmul.mubr.bf16.vlgmr.msra.gmra.mxu0 %v8030_v37  ;;  %3856 = vrot.lane.b32.xlu0 %v7495_v22, %s10441_s24  ;;  %v7493_v53 = vcombine.low %v3777_v26, %v3777_v26 }
 0x445   :  { %3309 = vmatmul.mubr.bf16.vlgmr.msra.gmra.mxu1 %v8030_v37  ;;  %7710 = vmatpush3.bf16.msra.mxu0 %v8033_v58  ;;  %v3704_v37 = vrot.slane %v3699_v0, %v8447_v54  ;;  %v7494_v58 = vcombine.low %v3814_v21, %v3814_v21 }
 0x446   :  { %7732 = vmatpush3.bf16.msra.mxu1 %v8034_v49  ;;  %7711 = vmatprep.subr.bf16.mxu0 %v8035_v35  ;;  %v3741_v49 = vrot.slane %v3736_v45, %v8447_v54  ;;  %v3951_v35 = vpack.i.b16 %v3950_v27, %v3950_v27 }
 0x447   :  { %7733 = vmatprep.subr.bf16.mxu1 %v8036_v2  ;;  %3891 = vrot.lane.b32.xlu1 %v7496_v33, %s8234_s1  ;;  %v7491_v2 = vcombine.low %v3704_v37, %v3704_v37 }
 0x448   :  { %3781 = vrot.lane.b32.xlu0 %v7493_v53, %s8235_s4 }
 0x449   :  { %7712 = vmatpush3.bf16.msra.mxu0 %v8037_v23  ;;  %v7492_v23 = vcombine.low %v3741_v49, %v3741_v49 }
 0x44a   :  { %7734 = vmatpush3.bf16.msra.mxu1 %v8038_v24  ;;  %7713 = vmatprep.subr.bf16.mxu0 %v8039_v34  ;;  %v3956_v24 = vrot.slane %v3951_v35, %v8368_v14 }
 0x44b   :  { %7735 = vmatprep.subr.bf16.mxu1 %v8040_v48  ;;  %3818 = vrot.lane.b32.xlu1 %v7494_v58, %s10444_s28  ;;  %v3033_v48 = vpop.permute.xlu1 %3032 }
 0x44c   :  { %3708 = vrot.lane.b32.xlu0 %v7491_v2, %s8236_s30  ;;  %v7498_v34 = vcombine.low %v3956_v24, %v3956_v24 }
 0x44d   :  { %7714 = vmatpush3.bf16.msra.mxu0 %v8041_v59 }
 0x44e   :  { %7736 = vmatpush3.bf16.msra.mxu1 %v8042_v56  ;;  %7715 = vmatprep.subr.bf16.mxu0 %v8043_v3 }
 0x44f   :  { %7737 = vmatprep.subr.bf16.mxu1 %v8044_v17  ;;  %3745 = vrot.lane.b32.xlu1 %v7492_v23, %s8237_s23 }
 0x451   :  { %7716 = vmatpush3.bf16.msra.mxu0 %v8045_v41  ;;  %v3038_v41 = vpop.permute.xlu0 %3037 }
 0x452   :  { %7738 = vmatpush3.bf16.msra.mxu1 %v8046_v63  ;;  %7717 = vmatprep.subr.bf16.mxu0 %v8047_v18 }
 0x453   :  { %7739 = vmatprep.subr.bf16.mxu1 %v8048_v42  ;;  %3960 = vrot.lane.b32.xlu1 %v7498_v34, %s10424_s22 }
 0x455   :  { %7718 = vmatpush3.bf16.msra.mxu0 %v8049_v61 }
 0x456   :  { %7740 = vmatpush3.bf16.msra.mxu1 %v8050_v15  ;;  %7719 = vmatprep.subr.bf16.mxu0 %v8051_v16 }
 0x457   :  { %7741 = vmatprep.subr.bf16.mxu1 %v8052_v52 }
 0x459   :  { %7720 = vmatpush3.bf16.msra.mxu0 %v8053_v31 }
 0x45a   :  { %7742 = vmatpush3.bf16.msra.mxu1 %v8054_v62  ;;  %7721 = vmatprep.subr.bf16.mxu0 %v8055_v38 }
 0x45b   :  { %7743 = vmatprep.subr.bf16.mxu1 %v8056_v4 }
 0x45d   :  { %7722 = vmatpush3.bf16.msra.mxu0 %v8057_v55 }
 0x45e   :  { %7744 = vmatpush3.bf16.msra.mxu1 %v8058_v39  ;;  %7723 = vmatprep.subr.bf16.mxu0 %v8059_v5 }
 0x45f   :  { %7745 = vmatprep.subr.bf16.mxu1 %v8060_v51 }
 0x461   :  { %7724 = vmatpush3.bf16.msra.mxu0 %v8061_v12 }
 0x462   :  { %7746 = vmatpush3.bf16.msra.mxu1 %v8062_v30  ;;  %4105 = vmatprep.subr.bf16.mxu0 %v9496_v57 }
 0x4b5   :  { %v3926_v58 = vpop.permute.xlu1 %3925 }
 0x4b6   :  { %v3927_v35 = vrot.slane %v3926_v58, 4 }
 0x4b8   :  { %v3928_v24 = vsel %vm3761_vm15, %v3927_v35, %v3926_v58  ;;  %v4242_v35 = vld [vmem:[%s10394_s17] sm:$0x1] }
 0x4b9   :  { %v3892_v23 = vpop.permute.xlu1 %3891 }
 0x4ba   :  { %v3893_v34 = vrot.slane %v3892_v23, 4 }
 0x504   :  { %v3267_v59 = vpop.f32.mrf.mxu0 }
 0x505   :  { %v3310_v56 = vpop.f32.mrf.mxu1  ;;  %v3268_v3 = vadd.f32 %v3267_v59, %v3033_v48 }
 0x506   :  { %v3269_v17 = vpop.f32.mrf.mxu0  ;;  %v3311_v15 = vadd.f32 %v3310_v56, %v3033_v48  ;;  %v3857_v56 = vpop.permute.xlu0 %3856 }
 0x507   :  { %v3270_v63 = vadd.f32 %v3269_v17, %v3033_v48  ;;  %v3312_v18 = vpop.f32.mrf.mxu1  ;;  %vm3319_vm3 = vcmp.ge.f32.partialorder %v3268_v3, 0.0  ;;  %v3327_v31 = vmul.f32 -0.2, %v3268_v3  ;;  %v3894_v17 = vsel %vm3797_vm10, %v3893_v34, %v3892_v23 }
 0x508   :  { %v3313_v42 = vadd.f32 %v3312_v18, %v3033_v48  ;;  %v3271_v61 = vpop.f32.mrf.mxu0  ;;  %v3329_v8 = vmul.f32 -0.2, %v3311_v15  ;;  %vm3321_vm13 = vcmp.ge.f32.partialorder %v3311_v15, 0.0  ;;  %v4244_v23 = vshrl.u32 %v4242_v35, 16 }
 0x509   :  { %v3314_v16 = vpop.f32.mrf.mxu1  ;;  %v3272_v52 = vadd.f32 %v3271_v61, %v3038_v41  ;;  %vm3320_vm4 = vcmp.ge.f32.partialorder %v3270_v63, 0.0  ;;  %v3328_v4 = vmul.f32 -0.2, %v3270_v63  ;;  %v3335_v43 = vsel %vm3319_vm3, %v3268_v3, %v3327_v31 }
 0x50a   :  { %v3315_v62 = vadd.f32 %v3314_v16, %v3038_v41  ;;  %v3273_v38 = vpop.f32.mrf.mxu0  ;;  %v3330_v51 = vmul.f32 -0.2, %v3313_v42  ;;  %vm3322_vm8 = vcmp.ge.f32.partialorder %v3313_v42, 0.0  ;;  %v3337_v1 = vsel %vm3321_vm13, %v3311_v15, %v3329_v8 }
 0x50b   :  { %v3274_v55 = vadd.f32 %v3273_v38, %v3038_v41  ;;  %v3316_v39 = vpop.f32.mrf.mxu1  ;;  %vm3323_vm6 = vcmp.ge.f32.partialorder %v3272_v52, 0.0  ;;  %v3331_v5 = vmul.f32 -0.2, %v3272_v52  ;;  %v3336_v36 = vsel %vm3320_vm4, %v3270_v63, %v3328_v4 }
 0x50c   :  { %v3317_v12 = vadd.f32 %v3316_v39, %v3038_v41  ;;  %vm3325_vm7 = vcmp.ge.f32.partialorder %v3315_v62, 0.0  ;;  %v3333_v30 = vmul.f32 -0.2, %v3315_v62  ;;  %v3338_v60 = vsel %vm3322_vm8, %v3313_v42, %v3330_v51  ;;  %v3819_v42 = vpop.permute.xlu1 %3818 }
 0x50d   :  { %vm3324_vm12 = vcmp.ge.f32.partialorder %v3274_v55, 0.0  ;;  %v3332_v40 = vmul.f32 -0.2, %v3274_v55  ;;  %v3339_v44 = vsel %vm3323_vm6, %v3272_v52, %v3331_v5  ;;  %v3858_v41 = vrot.slane %v3857_v56, 4 }
 0x50e   :  { %vm3326_vm14 = vcmp.ge.f32.partialorder %v3317_v12, 0.0  ;;  %v3334_v11 = vmul.f32 -0.2, %v3317_v12  ;;  %v3341_v9 = vsel %vm3325_vm7, %v3315_v62, %v3333_v30  ;;  %v3343_v13 = vpack.c.bf16 %v3339_v44, %v3335_v43  ;;  %v3782_v62 = vpop.permute.xlu0 %3781 }
 0x50f   :  { %v3340_v46 = vsel %vm3324_vm12, %v3274_v55, %v3332_v40  ;;  %v3345_v6 = vpack.c.bf16 %v3341_v9, %v3337_v1  ;;  %v3820_v16 = vrot.slane %v3819_v42, 4  ;;  %v3859_v52 = vsel %vm448_vm0, %v3858_v41, %v3857_v56  ;;  %v8215_v41 = vld [vmem:[%s10391_s2 + $0x8] sm:$0xff] }
 0x510   :  { %v3344_v50 = vpack.c.bf16 %v3340_v46, %v3336_v36  ;;  %v3342_v28 = vsel %vm3326_vm14, %v3317_v12, %v3334_v11  ;;  %v3783_v39 = vrot.slane %v3782_v62, 4  ;;  %v3746_v51 = vpop.permute.xlu1 %3745  ;;  %vm10429_vm3 = vcmask 982016  }
 0x511   :  { %v3346_v47 = vpack.c.bf16 %v3342_v28, %v3338_v60  ;;  %v3821_v55 = vsel %vm425_vm5, %v3820_v16, %v3819_v42  ;;  %v3747_v8 = vrot.slane %v3746_v51, 4  ;;  %vm10428_vm4 = vcmask 973824  }
 0x512   :  { %3635 = vmatprep.mubr.bf16.mxu0 %v3344_v50  ;;  %v3785_v40 = vsel %vm10430_vm11, %v3783_v39, %v3782_v62  ;;  %v3709_v11 = vpop.permute.xlu0 %3708  ;;  %vm10427_vm6 = vcmask 72704   ;;  %v4245_v42 = vpack.i.b16 %v4244_v23, %v4244_v23  ;;  %vm4820_vm14 = vcmask 261120  }
 0x513   :  { %3676 = vmatprep.mubr.bf16.mxu1 %v3346_v47  ;;  %3636 = vmatmul.mubr.bf16.vlgmr.msra.gmra.mxu0 %v3343_v13  ;;  %v3749_v46 = vsel %vm10429_vm3, %v3747_v8, %v3746_v51  ;;  %v3710_v9 = vrot.slane %v3709_v11, 4 }
 0x514   :  { %3677 = vmatmul.mubr.bf16.vlgmr.msra.gmra.mxu1 %v3345_v6  ;;  %v3961_v43 = vpop.permute.xlu1 %3960 }
 0x515   :  { %v3962_v28 = vrot.slane %v3961_v43, 4  ;;  %v3712_v1 = vsel %vm10428_vm4, %v3710_v9, %v3709_v11 }
 0x517   :  { %v3963_v6 = vsel %vm10427_vm6, %v3962_v28, %v3961_v43 }
 0x5d3   :  { %v7725_v25 = vpop.f32.mrf.mxu0 }
 0x5d4   :  { %v7747_v7 = vpop.f32.mrf.mxu1 }
 0x5d5   :  { %v7726_v10 = vpop.f32.mrf.mxu0 }
 0x5d6   :  { %v7727_v0 = vadd.f32 %v7726_v10, %v7725_v25  ;;  %v7748_v29 = vpop.f32.mrf.mxu1 }
 0x5d7   :  { %v7749_v32 = vadd.f32 %v7748_v29, %v7747_v7  ;;  %v7728_v26 = vpop.f32.mrf.mxu0  ;;  %v9572_v29 = vld [vmem:[%s10391_s2 + $0x18] sm:$0xff] }
 0x5d8   :  { %v7750_v22 = vpop.f32.mrf.mxu1 }
 0x5d9   :  { %v3679_v33 = vadd.f32 %v7749_v32, %v7727_v0  ;;  %v7729_v21 = vpop.f32.mrf.mxu0  ;;  %v8072_v0 = vld [vmem:[%s10395_s6 + $0x4] ss:$8 sps:$4 sm:$0xff]   ;;  %v9577_v32 = vld [vmem:[%s10391_s2 + $0x10] sm:$0xff] }
 0x5da   :  { %v7730_v45 = vadd.f32 %v7729_v21, %v7728_v26  ;;  %v7751_v27 = vpop.f32.mrf.mxu1  ;;  %7512 = vmatprep.mubr.msk.bf16.mxu0 %vm264_vm2, %v8072_v0  ;;  %v4513_v26 = vld [vmem:[%s10394_s17] sm:$0x8]  ;;  %v4347_v21 = vld [vmem:[%s10394_s17] sm:$0x2] }
 0x5db   :  { %v7695_v53 = vpack.c.bf16 %v3679_v33, %v3679_v33  ;;  %v7752_v37 = vadd.f32 %v7751_v27, %v7750_v22  ;;  %v8239_v22 = vmov 2   ;;  %v4515_v33 = vpack.i.b16 %v4513_v26, %v4513_v26  ;;  %v4295_v27 = vld [vmem:[%s10394_s17] sm:$0x2] }
 0x5dc   :  { %7922 = vset.pattern.permute.xlu1 %v8239_v22  ;;  %7921 = vset.pattern.permute.xlu0 %v8239_v22  ;;  %v4297_v58 = vpack.i.b16 %v4295_v27, %v4295_v27 }
 0x5dd   :  { %3693 = vst [vmem:[#allocation2 + $0x18] sm:$0xf] %v7695_v53  ;;  %v3682_v49 = vadd.f32 %v7752_v37, %v7730_v45  ;;  %v4460_v45 = vld [vmem:[%s10394_s17] sm:$0x4]  ;;  %v4349_v53 = vshrl.u32 %v4347_v21, 16 }
 0x5de   :  { %v4462_v37 = vshrl.u32 %v4460_v45, 16  ;;  %v4302_v56 = vrot.slane %v4297_v58, %v8427_v20 }
 0x5df   :  { %v7696_v2 = vpack.c.bf16 %v3682_v49, %v3682_v49  ;;  %v4408_v49 = vld [vmem:[%s10394_s17] sm:$0x4]  ;;  %v4350_v34 = vpack.i.b16 %v4349_v53, %v4349_v53 }
 0x5e1   :  { %3694 = vst [vmem:[#allocation2 + $0x3c] sm:$0xf] %v7696_v2  ;;  %v4520_v2 = vrot.slane %v4515_v33, %v8368_v14 }
 0x5e4   :  { %v3839_v48 = vld [vmem:[#allocation2 + $0x18] sm:$0xf] }
 0x5e5   :  { %v3843_v59 = vld [vmem:[#allocation2 + $0x18] sm:$0xff]  ;;  %3841 = vst [vmem:[#allocation3 + $0x80] sm:$0xf] %v3839_v48  ;;  %v4463_v48 = vpack.i.b16 %v4462_v37, %v4462_v37 }
 0x5e6   :  { %v3930_v3 = vmul.bf16 %v3928_v24, %v3843_v59  ;;  %v3896_v15 = vmul.bf16 %v3894_v17, %v3843_v59  ;;  %v3861_v31 = vmul.bf16 %v3859_v52, %v3843_v59  ;;  %v3804_v4 = vld [vmem:[#allocation2 + $0x14] sm:$0xff]  ;;  %v3965_v25 = vmul.bf16 %v3963_v6, %v3843_v59 }
 0x5e7   :  { %v3823_v5 = vmul.bf16 %v3821_v55, %v3804_v4  ;;  %v3787_v44 = vmul.bf16 %v3804_v4, %v3785_v40  ;;  %v3751_v50 = vmul.bf16 %v3804_v4, %v3749_v46  ;;  %v3714_v13 = vmul.bf16 %v3804_v4, %v3712_v1 }
 0x5e8   :  { %v3840_v63 = vld [vmem:[#allocation2 + $0x3c] sm:$0xf]  ;;  %3934 = vrot.lane.b32.xlu0 %v3930_v3, %s8237_s23  ;;  %v7524_v59 = vcombine.low %v4520_v2, %v4520_v2  ;;  %v4410_v3 = vpack.i.b16 %v4408_v49, %v4408_v49  ;;  %v4250_v4 = vrot.slane %v4245_v42, %v8447_v54 }
 0x5e9   :  { %v3947_v18 = vld [vmem:[#allocation2 + $0x3c] sm:$0xff]  ;;  %3842 = vst [vmem:[#allocation3 + $0x90] sm:$0xf] %v3840_v63  ;;  %v4355_v63 = vrot.slane %v4350_v34, %v8427_v20 }
 0x5ea   :  { %v3931_v61 = vmul.bf16 %v3947_v18, %v3928_v24  ;;  %v3897_v38 = vmul.bf16 %v3947_v18, %v3894_v17  ;;  %v3862_v12 = vmul.bf16 %v3947_v18, %v3859_v52  ;;  %v3732_v30 = vld [vmem:[#allocation2 + $0x38] sm:$0xff]  ;;  %v3966_v10 = vmul.bf16 %v3963_v6, %v3947_v18  ;;  %v4565_v24 = vld [vmem:[%s10394_s17] sm:$0x8] }
 0x5eb   :  { %v3824_v36 = vmul.bf16 %v3821_v55, %v3732_v30  ;;  %v3788_v60 = vmul.bf16 %v3785_v40, %v3732_v30  ;;  %v3752_v47 = vmul.bf16 %v3749_v46, %v3732_v30  ;;  %v3715_v7 = vmul.bf16 %v3732_v30, %v3712_v1  ;;  %v8214_v17 = vld [vmem:[%s10391_s2] sm:$0xff] }
 0x5ec   :  { %3936 = vrot.lane.b32.xlu1 %v3931_v61, %s8237_s23  ;;  %3900 = vrot.lane.b32.xlu0 %v3896_v15, %s8235_s4  ;;  %v4468_v18 = vrot.slane %v4463_v48, %v8371_v19  ;;  %v4190_v61 = vld [vmem:[%s10394_s17] sm:$0x1]  ;;  %v4567_v15 = vshrl.u32 %v4565_v24, 16  ;;  %v7521_v16 = vcombine.low %v4355_v63, %v4355_v63  ;;  %v7520_v52 = vcombine.low %v4302_v56, %v4302_v56 }
 0x5ed   :  { %v4192_v62 = vpack.i.b16 %v4190_v61, %v4190_v61 }
 0x5ee   :  { %v4568_v55 = vpack.i.b16 %v4567_v15, %v4567_v15 }
 0x5ef   :  { %v4197_v51 = vrot.slane %v4192_v62, %v8447_v54 }
 0x5f0   :  { %3902 = vrot.lane.b32.xlu1 %v3897_v38, %s8235_s4  ;;  %3865 = vrot.lane.b32.xlu0 %v3861_v31, %s10444_s28  ;;  %v4415_v31 = vrot.slane %v4410_v3, %v8371_v19  ;;  %v7523_v38 = vcombine.low %v4468_v18, %v4468_v18  ;;  %v8066_v61 = vld [vmem:[#allocation3 + $0x80] ss:$16 sps:$4 sm:$0xff]  }
 0x5f1   :  { %v7518_v30 = vcombine.low %v4197_v51, %v4197_v51 }
 0x5f2   :  { %v7522_v39 = vcombine.low %v4415_v31, %v4415_v31 }
 0x5f4   :  { %3867 = vrot.lane.b32.xlu1 %v3862_v12, %s10444_s28  ;;  %3827 = vrot.lane.b32.xlu0 %v3823_v5, %s10441_s24  ;;  %v7519_v5 = vcombine.low %v4250_v4, %v4250_v4  ;;  %v4573_v12 = vrot.slane %v4568_v55, %v8368_v14 }
 0x5f6   :  { %v7525_v8 = vcombine.low %v4573_v12, %v4573_v12 }
 0x5f8   :  { %3829 = vrot.lane.b32.xlu1 %v3824_v36, %s10441_s24  ;;  %3791 = vrot.lane.b32.xlu0 %v3787_v44, %s8234_s1 }
 0x5fc   :  { %3793 = vrot.lane.b32.xlu1 %v3788_v60, %s8234_s1  ;;  %3755 = vrot.lane.b32.xlu0 %v3751_v50, %s8233_s20 }
 0x600   :  { %3757 = vrot.lane.b32.xlu1 %v3752_v47, %s8233_s20  ;;  %3718 = vrot.lane.b32.xlu0 %v3714_v13, %s10424_s22 }
 0x604   :  { %3720 = vrot.lane.b32.xlu1 %v3715_v7, %s10424_s22  ;;  %3969 = vrot.lane.b32.xlu0 %v3965_v25, %s8236_s30 }
 0x608   :  { %3971 = vrot.lane.b32.xlu1 %v3966_v10, %s8236_s30  ;;  %4019 = vperm.xlu0 %7921, %v9577_v32  }
 0x60c   :  { %4024 = vperm.xlu1 %7922, %v9572_v29   ;;  %4014 = vperm.xlu0 %7921, %v8215_v41  }
 0x610   :  { %4009 = vperm.xlu1 %7922, %v8214_v17   ;;  %4359 = vrot.lane.b32.xlu0 %v7521_v16, %s10444_s28 }
 0x614   :  { %4524 = vrot.lane.b32.xlu1 %v7524_v59, %s8233_s20  ;;  %4306 = vrot.lane.b32.xlu0 %v7520_v52, %s8235_s4 }
 0x618   :  { %4472 = vrot.lane.b32.xlu1 %v7523_v38, %s8234_s1  ;;  %4254 = vrot.lane.b32.xlu0 %v7519_v5, %s8237_s23 }
 0x61c   :  { %4419 = vrot.lane.b32.xlu1 %v7522_v39, %s10441_s24  ;;  %4577 = vrot.lane.b32.xlu0 %v7525_v8, %s10424_s22 }
 0x620   :  { %4201 = vrot.lane.b32.xlu1 %v7518_v30, %s8236_s30 }
 0x65a   :  { %v3935_v40 = vpop.permute.xlu0 %3934 }
 0x65b   :  { %v3938_v11 = vrot.slane %v3935_v40, 4 }
 0x65d   :  { %v3940_v44 = vsel %vm10429_vm3, %v3935_v40, %v3938_v11  ;;  %v8074_v40 = vld [vmem:[%s10395_s6] ss:$8 sps:$4 sm:$0xff]   ;;  %v8075_v11 = vld [vmem:[%s10395_s6 + $0x14] ss:$8 sps:$4 sm:$0xff]  }
 0x65e   :  { %3944 = vst [vmem:[#allocation3 + $0xe0] sm:$0xf] %v3940_v44  ;;  %v3937_v36 = vpop.permute.xlu1 %3936  ;;  %v3901_v46 = vpop.permute.xlu0 %3900  ;;  %v8077_v44 = vld [vmem:[%s10395_s6 + $0x10] ss:$8 sps:$4 sm:$0xff]  }
 0x65f   :  { %v3939_v9 = vrot.slane %v3937_v36, 4  ;;  %v3904_v43 = vrot.slane %v3901_v46, 4 }
 0x661   :  { %v3941_v50 = vsel %vm10429_vm3, %v3937_v36, %v3939_v9  ;;  %v3906_v60 = vsel %vm10430_vm11, %v3901_v46, %v3904_v43 }
 0x662   :  { %3945 = vst [vmem:[#allocation3 + $0xf0] sm:$0xf] %v3941_v50  ;;  %3910 = vst [vmem:[#allocation3 + $0xc0] sm:$0xf] %v3906_v60  ;;  %v3903_v28 = vpop.permute.xlu1 %3902  ;;  %v3866_v1 = vpop.permute.xlu0 %3865 }
 0x663   :  { %v3905_v47 = vrot.slane %v3903_v28, 4  ;;  %v3869_v13 = vrot.slane %v3866_v1, 4 }
 0x665   :  { %v3907_v6 = vsel %vm10430_vm11, %v3903_v28, %v3905_v47  ;;  %v3871_v25 = vsel %vm425_vm5, %v3866_v1, %v3869_v13 }
 0x666   :  { %3911 = vst [vmem:[#allocation3 + $0xd0] sm:$0xf] %v3907_v6  ;;  %3875 = vst [vmem:[#allocation3 + $0xa0] sm:$0xf] %v3871_v25  ;;  %v3868_v7 = vpop.permute.xlu1 %3867  ;;  %v3828_v10 = vpop.permute.xlu0 %3827 }
 0x667   :  { %v3870_v0 = vrot.slane %v3868_v7, 4  ;;  %v3831_v26 = vrot.slane %v3828_v10, 4 }
 0x669   :  { %v3872_v22 = vsel %vm425_vm5, %v3868_v7, %v3870_v0  ;;  %v3833_v33 = vsel %vm448_vm0, %v3828_v10, %v3831_v26  ;;  %v8063_v21 = vld [vmem:[#allocation3 + $0xe0] ss:$16 sps:$4 sm:$0xff]  }
 0x66a   :  { %3876 = vst [vmem:[#allocation3 + $0xb0] sm:$0xf] %v3872_v22  ;;  %3837 = vst [vmem:[#allocation3 + $0x60] sm:$0xf] %v3833_v33  ;;  %v3830_v45 = vpop.permute.xlu1 %3829  ;;  %v3792_v27 = vpop.permute.xlu0 %3791  ;;  %4106 = vmatpush1.bf16.msra.mxu0 %v8063_v21 }
 0x66b   :  { %v3832_v53 = vrot.slane %v3830_v45, 4  ;;  %v3795_v37 = vrot.slane %v3792_v27, 4  ;;  %4107 = vmatprep.subr.bf16.mxu0 %v9496_v57 }
 0x66d   :  { %v3834_v58 = vsel %vm448_vm0, %v3830_v45, %v3832_v53  ;;  %v3798_v49 = vsel %vm3797_vm10, %v3792_v27, %v3795_v37  ;;  %v8064_v35 = vld [vmem:[#allocation3 + $0xc0] ss:$16 sps:$4 sm:$0xff]  }
 0x66e   :  { %3838 = vst [vmem:[#allocation3 + $0x70] sm:$0xf] %v3834_v58  ;;  %3802 = vst [vmem:[#allocation3 + $0x40] sm:$0xf] %v3798_v49  ;;  %v3794_v2 = vpop.permute.xlu1 %3793  ;;  %v3756_v23 = vpop.permute.xlu0 %3755  ;;  %4108 = vmatpush1.bf16.msra.mxu0 %v8064_v35 }
 0x66f   :  { %v3796_v24 = vrot.slane %v3794_v2, 4  ;;  %v3759_v34 = vrot.slane %v3756_v23, 4  ;;  %4109 = vmatprep.subr.bf16.mxu0 %v9496_v57 }
 0x671   :  { %v3799_v48 = vsel %vm3797_vm10, %v3794_v2, %v3796_v24  ;;  %v3762_v59 = vsel %vm3761_vm15, %v3756_v23, %v3759_v34  ;;  %v8065_v56 = vld [vmem:[#allocation3 + $0xa0] ss:$16 sps:$4 sm:$0xff]  }
 0x672   :  { %3803 = vst [vmem:[#allocation3 + $0x50] sm:$0xf] %v3799_v48  ;;  %3766 = vst [vmem:[#allocation3 + $0x20] sm:$0xf] %v3762_v59  ;;  %v3758_v3 = vpop.permute.xlu1 %3757  ;;  %v3719_v17 = vpop.permute.xlu0 %3718  ;;  %4110 = vmatpush1.bf16.msra.mxu0 %v8065_v56 }
 0x673   :  { %v3760_v41 = vrot.slane %v3758_v3, 4  ;;  %v3722_v63 = vrot.slane %v3719_v17, 4  ;;  %4111 = vmatprep.subr.bf16.mxu0 %v9496_v57 }
 0x675   :  { %v3763_v18 = vsel %vm3761_vm15, %v3758_v3, %v3760_v41  ;;  %v3725_v42 = vsel %vm10427_vm6, %v3719_v17, %v3722_v63  ;;  %v8067_v4 = vld [vmem:[#allocation3 + $0x60] ss:$16 sps:$4 sm:$0xff]  }
 0x676   :  { %3767 = vst [vmem:[#allocation3 + $0x30] sm:$0xf] %v3763_v18  ;;  %3729 = vst [vmem:[#allocation3] sm:$0xf] %v3725_v42  ;;  %v3721_v15 = vpop.permute.xlu1 %3720  ;;  %v3970_v16 = vpop.permute.xlu0 %3969  ;;  %4112 = vmatpush1.bf16.msra.mxu0 %v8066_v61 }
 0x677   :  { %v3723_v52 = vrot.slane %v3721_v15, 4  ;;  %v3973_v31 = vrot.slane %v3970_v16, 4  ;;  %4113 = vmatprep.subr.bf16.mxu0 %v9496_v57 }
 0x679   :  { %v3726_v62 = vsel %vm10427_vm6, %v3721_v15, %v3723_v52  ;;  %v3975_v38 = vsel %vm10428_vm4, %v3970_v16, %v3973_v31  ;;  %v8068_v51 = vld [vmem:[#allocation3 + $0x40] ss:$16 sps:$4 sm:$0xff]  }
 0x67a   :  { %3730 = vst [vmem:[#allocation3 + $0x10] sm:$0xf] %v3726_v62  ;;  %3979 = vst [vmem:[#allocation3 + $0x100] sm:$0xf] %v3975_v38  ;;  %v3972_v55 = vpop.permute.xlu1 %3971  ;;  %4114 = vmatpush1.bf16.msra.mxu0 %v8067_v4 }
 0x67b   :  { %v3974_v39 = vrot.slane %v3972_v55, 4  ;;  %4115 = vmatprep.subr.bf16.mxu0 %v9496_v57 }
 0x67d   :  { %v3976_v5 = vsel %vm10428_vm4, %v3972_v55, %v3974_v39  ;;  %v8069_v12 = vld [vmem:[#allocation3 + $0x20] ss:$16 sps:$4 sm:$0xff]  }
 0x67e   :  { %3980 = vst [vmem:[#allocation3 + $0x110] sm:$0xf] %v3976_v5  ;;  %4116 = vmatpush1.bf16.msra.mxu0 %v8068_v51 }
 0x67f   :  { %4117 = vmatprep.subr.bf16.mxu0 %v9496_v57 }
 0x681   :  { %v8070_v30 = vld [vmem:[#allocation3] ss:$16 sps:$4 sm:$0xff]  }
 0x682   :  { %4118 = vmatpush1.bf16.msra.mxu0 %v8069_v12 }
 0x683   :  { %4119 = vmatprep.subr.bf16.mxu0 %v9496_v57 }
 0x685   :  { %v8071_v8 = vld [vmem:[#allocation3 + $0x100] ss:$16 sps:$4 sm:$0xff]  }
 0x686   :  { %4120 = vmatpush1.bf16.msra.mxu0 %v8070_v30 }
 0x687   :  { %4135 = vmatprep.subr.bf16.mxu0 %v9496_v57  ;;  %v4025_v36 = vpop.permute.xlu1 %4024  ;;  %v4020_v57 = vpop.permute.xlu0 %4019 }
 0x68a   :  { %4136 = vmatpush2.bf16.msra.mxu0 %v8071_v8 }
 0x68b   :  { %v4010_v46 = vpop.permute.xlu1 %4009  ;;  %v4015_v28 = vpop.permute.xlu0 %4014 }
 0x68d   :  { %4138 = vmatmul.mubr.bf16.vlgmr.msra.gmra.mxu0 %v8074_v40 }
 0x68e   :  { %7513 = vmatprep.mubr.msk.bf16.mxu0 %vm264_vm2, %v8075_v11 }
 0x68f   :  { %v4525_v10 = vpop.permute.xlu1 %4524  ;;  %v4360_v53 = vpop.permute.xlu0 %4359 }
 0x690   :  { %v4526_v26 = vrot.slane %v4525_v10, 4  ;;  %v4361_v49 = vrot.slane %v4360_v53, 4 }
 0x692   :  { %v4527_v58 = vsel %vm3761_vm15, %v4526_v26, %v4525_v10  ;;  %v4362_v17 = vsel %vm425_vm5, %v4361_v49, %v4360_v53 }
 0x693   :  { %v4473_v59 = vpop.permute.xlu1 %4472  ;;  %v4307_v16 = vpop.permute.xlu0 %4306 }
 0x694   :  { %v4474_v41 = vrot.slane %v4473_v59, 4  ;;  %v4308_v38 = vrot.slane %v4307_v16, 4 }
 0x695   :  { %4146 = vmatmul.mubr.bf16.gmra.mxu0 %v8077_v44 }
 0x696   :  { %v4475_v62 = vsel %vm3797_vm10, %v4474_v41, %v4473_v59  ;;  %v4309_v12 = vsel %vm10430_vm11, %v4308_v38, %v4307_v16  ;;  %v8096_v41 = vld [vmem:[%s10396_s7 + $0x4] ss:$12 sps:$4 sm:$0xff]   ;;  %v4659_v16 = vld [vmem:[%s10391_s2 + $0x8] sm:$0xff] }
 0x697   :  { %v4420_v39 = vpop.permute.xlu1 %4419  ;;  %v4255_v10 = vpop.permute.xlu0 %4254  ;;  %4859 = vmatprep.mubr.bf16.mxu1 %v8096_v41 }
 0x698   :  { %v4421_v30 = vrot.slane %v4420_v39, 4 }
 0x69a   :  { %v4422_v44 = vsel %vm448_vm0, %v4421_v30, %v4420_v39 }
 0x74d   :  { %v4139_v9 = vpop.f32.mrf.mxu0 }
 0x74e   :  { %v4140_v43 = vadd.f32 %v4139_v9, %v4010_v46 }
 0x74f   :  { %v4141_v50 = vpop.f32.mrf.mxu0 }
 0x750   :  { %vm4154_vm7 = vcmp.ge.f32.partialorder %v4140_v43, 0.0  ;;  %v4158_v60 = vmul.f32 -0.2, %v4140_v43 }
 0x751   :  { %v4142_v1 = vpop.f32.mrf.mxu0 }
 0x752   :  { %v4162_v47 = vsel %vm4154_vm7, %v4140_v43, %v4158_v60  ;;  %v4143_v13 = vadd.f32 %v4142_v1, %v4015_v28 }
 0x753   :  { %v7697_v6 = vpack.c.bf16 %v4162_v47, %v4162_v47  ;;  %v4144_v25 = vpop.f32.mrf.mxu0 }
 0x754   :  { %vm4155_vm8 = vcmp.ge.f32.partialorder %v4143_v13, 0.0  ;;  %v4159_v7 = vmul.f32 -0.2, %v4143_v13 }
 0x755   :  { %4182 = vst [vmem:[#allocation2 + $0x18] sm:$0xf] %v7697_v6  ;;  %v4147_v0 = vpop.f32.mrf.mxu0 }
 0x756   :  { %v4163_v22 = vsel %vm4155_vm8, %v4143_v13, %v4159_v7  ;;  %v4148_v33 = vadd.f32 %v4147_v0, %v4020_v57  ;;  %v4256_v0 = vrot.slane %v4255_v10, 4 }
 0x757   :  { %v7698_v21 = vpack.c.bf16 %v4163_v22, %v4163_v22  ;;  %v4149_v45 = vpop.f32.mrf.mxu0 }
 0x758   :  { %vm4156_vm12 = vcmp.ge.f32.partialorder %v4148_v33, 0.0  ;;  %v4160_v27 = vmul.f32 -0.2, %v4148_v33 }
 0x759   :  { %4183 = vst [vmem:[#allocation2 + $0x3c] sm:$0xf] %v7698_v21  ;;  %v4150_v37 = vpop.f32.mrf.mxu0  ;;  %v4202_v21 = vpop.permute.xlu1 %4201 }
 0x75a   :  { %v4164_v35 = vsel %vm4156_vm12, %v4148_v33, %v4160_v27  ;;  %v4151_v2 = vadd.f32 %v4150_v37, %v4025_v36  ;;  %v4257_v33 = vsel %vm10429_vm3, %v4256_v0, %v4255_v10  ;;  %v4203_v53 = vrot.slane %v4202_v21, 4 }
 0x75b   :  { %v7699_v23 = vpack.c.bf16 %v4164_v35, %v4164_v35  ;;  %v4152_v24 = vpop.f32.mrf.mxu0  ;;  %v4578_v35 = vpop.permute.xlu0 %4577 }
 0x75c   :  { %vm4157_vm13 = vcmp.ge.f32.partialorder %v4151_v2, 0.0  ;;  %v4161_v34 = vmul.f32 -0.2, %v4151_v2  ;;  %v9662_v48 = vld [vmem:[#allocation2 + $0x18] sm:$0xff]  ;;  %v4204_v49 = vsel %vm10428_vm4, %v4203_v53, %v4202_v21  ;;  %v4579_v24 = vrot.slane %v4578_v35, 4 }
 0x75d   :  { %4184 = vst [vmem:[#allocation2 + $0x60] sm:$0xf] %v7699_v23  ;;  %v4529_v56 = vmul.bf16 %v4527_v58, %v9662_v48  ;;  %v4396_v3 = vld [vmem:[#allocation2 + $0x18] sm:$0xf]  ;;  %v4477_v51 = vmul.bf16 %v9662_v48, %v4475_v62  ;;  %v4424_v57 = vmul.bf16 %v9662_v48, %v4422_v44 }
 0x75e   :  { %v4165_v63 = vsel %vm4157_vm13, %v4151_v2, %v4161_v34  ;;  %v9666_v18 = vld [vmem:[#allocation2 + $0x14] sm:$0xff]  ;;  %4400 = vst [vmem:[#allocation3 + $0x100] sm:$0xf] %v4396_v3 }
 0x75f   :  { %v7700_v42 = vpack.c.bf16 %v4165_v63, %v4165_v63  ;;  %4537 = vrot.lane.b32.xlu1 %v4529_v56, %s8237_s23  ;;  %v4364_v31 = vmul.bf16 %v4362_v17, %v9666_v18  ;;  %v4311_v11 = vmul.bf16 %v9666_v18, %v4309_v12  ;;  %v4206_v59 = vmul.bf16 %v9666_v18, %v4204_v49 }
 0x760   :  { %v9669_v61 = vld [vmem:[#allocation2 + $0x3c] sm:$0xff]  ;;  %v4580_v56 = vsel %vm10427_vm6, %v4579_v24, %v4578_v35 }
 0x761   :  { %v4397_v15 = vld [vmem:[#allocation2 + $0x3c] sm:$0xf]  ;;  %4185 = vst [vmem:[#allocation2 + $0x84] sm:$0xf] %v7700_v42  ;;  %v4530_v52 = vmul.bf16 %v4527_v58, %v9669_v61  ;;  %v4478_v40 = vmul.bf16 %v9669_v61, %v4475_v62  ;;  %v4425_v9 = vmul.bf16 %v9669_v61, %v4422_v44  ;;  %v4583_v42 = vmul.bf16 %v4580_v56, %v9669_v61 }
 0x762   :  { %4401 = vst [vmem:[#allocation3 + $0x110] sm:$0xf] %v4397_v15  ;;  %v9674_v4 = vld [vmem:[#allocation2 + $0x38] sm:$0xff]  ;;  %v9731_v15 = vld [vmem:[%s10391_s2] sm:$0xff] }
 0x763   :  { %4539 = vrot.lane.b32.xlu0 %v4530_v52, %s8237_s23  ;;  %4372 = vrot.lane.b32.xlu1 %v4364_v31, %s10441_s24  ;;  %v4365_v5 = vmul.bf16 %v4362_v17, %v9674_v4  ;;  %v4312_v36 = vmul.bf16 %v9674_v4, %v4309_v12  ;;  %v4260_v2 = vmul.bf16 %v9674_v4, %v4257_v33  ;;  %v8240_v52 = vmov 3  }
 0x764   :  { %v4398_v55 = vld [vmem:[#allocation2 + $0x60] sm:$0xf]  ;;  %v4207_v3 = vmul.bf16 %v9674_v4, %v4204_v49  ;;  %7923 = vset.pattern.permute.xlu1 %v8240_v52  ;;  %7924 = vset.pattern.permute.xlu0 %v8240_v52 }
 0x765   :  { %4402 = vst [vmem:[#allocation3 + $0x120] sm:$0xf] %v4398_v55  ;;  %v4511_v46 = vld [vmem:[#allocation2 + $0x60] sm:$0xff] }
 0x766   :  { %v4531_v43 = vmul.bf16 %v4527_v58, %v4511_v46  ;;  %v4345_v60 = vld [vmem:[#allocation2 + $0x5c] sm:$0xff]  ;;  %v4479_v6 = vmul.bf16 %v4511_v46, %v4475_v62  ;;  %v4426_v22 = vmul.bf16 %v4511_v46, %v4422_v44 }
 0x767   :  { %4374 = vrot.lane.b32.xlu0 %v4365_v5, %s10441_s24  ;;  %4485 = vrot.lane.b32.xlu1 %v4477_v51, %s8235_s4  ;;  %v4366_v1 = vmul.bf16 %v4362_v17, %v4345_v60  ;;  %v4313_v7 = vmul.bf16 %v4345_v60, %v4309_v12  ;;  %v4261_v27 = vmul.bf16 %v4345_v60, %v4257_v33 }
 0x768   :  { %v4399_v8 = vld [vmem:[#allocation2 + $0x84] sm:$0xf]  ;;  %v4208_v23 = vmul.bf16 %v4345_v60, %v4204_v49 }
 0x769   :  { %4403 = vst [vmem:[#allocation3 + $0x130] sm:$0xf] %v4399_v8  ;;  %v4512_v50 = vld [vmem:[#allocation2 + $0x84] sm:$0xff] }
 0x76a   :  { %v4532_v28 = vmul.bf16 %v4527_v58, %v4512_v50  ;;  %v4346_v47 = vld [vmem:[#allocation2 + $0x80] sm:$0xff]  ;;  %v4480_v25 = vmul.bf16 %v4512_v50, %v4475_v62  ;;  %v4427_v45 = vmul.bf16 %v4512_v50, %v4422_v44  ;;  %v4259_v58 = vmul.bf16 %v9666_v18, %v4257_v33 }
 0x76b   :  { %4487 = vrot.lane.b32.xlu0 %v4478_v40, %s8235_s4  ;;  %4319 = vrot.lane.b32.xlu1 %v4311_v11, %s8234_s1  ;;  %v4367_v13 = vmul.bf16 %v4362_v17, %v4346_v47  ;;  %v4314_v26 = vmul.bf16 %v4346_v47, %v4309_v12  ;;  %v4262_v37 = vmul.bf16 %v4346_v47, %v4257_v33 }
 0x76c   :  { %v4209_v34 = vmul.bf16 %v4346_v47, %v4204_v49  ;;  %v4584_v17 = vmul.bf16 %v4580_v56, %v4511_v46  ;;  %v4585_v63 = vmul.bf16 %v4580_v56, %v4512_v50  ;;  %v4582_v18 = vmul.bf16 %v4580_v56, %v9662_v48  ;;  %v8104_v48 = vld [vmem:[%s10397_s13 + $0x38] sm:$0xff]  }
 0x76d   :  { %7837 = vmatprep.subr.bf16.mxu0 %v8104_v48 }
 0x76e   :  { %7838 = vmatpush3.bf16.msra.mxu0 %v8104_v48 }
 0x76f   :  { %4321 = vrot.lane.b32.xlu0 %v4312_v36, %s8234_s1  ;;  %4432 = vrot.lane.b32.xlu1 %v4424_v57, %s10444_s28 }
 0x773   :  { %4434 = vrot.lane.b32.xlu0 %v4425_v9, %s10444_s28  ;;  %4541 = vrot.lane.b32.xlu1 %v4531_v43, %s8237_s23 }
 0x777   :  { %4543 = vrot.lane.b32.xlu0 %v4532_v28, %s8237_s23  ;;  %4376 = vrot.lane.b32.xlu1 %v4366_v1, %s10441_s24 }
 0x77b   :  { %4378 = vrot.lane.b32.xlu0 %v4367_v13, %s10441_s24  ;;  %4489 = vrot.lane.b32.xlu1 %v4479_v6, %s8235_s4 }
 0x77f   :  { %4491 = vrot.lane.b32.xlu0 %v4480_v25, %s8235_s4  ;;  %4323 = vrot.lane.b32.xlu1 %v4313_v7, %s8234_s1 }
 0x783   :  { %4325 = vrot.lane.b32.xlu0 %v4314_v26, %s8234_s1  ;;  %4436 = vrot.lane.b32.xlu1 %v4426_v22, %s10444_s28 }
 0x787   :  { %4438 = vrot.lane.b32.xlu0 %v4427_v45, %s10444_s28  ;;  %4271 = vrot.lane.b32.xlu1 %v4261_v27, %s8233_s20 }
 0x78b   :  { %4273 = vrot.lane.b32.xlu0 %v4262_v37, %s8233_s20  ;;  %4267 = vrot.lane.b32.xlu1 %v4259_v58, %s8233_s20 }
 0x78f   :  { %4269 = vrot.lane.b32.xlu0 %v4260_v2, %s8233_s20  ;;  %4218 = vrot.lane.b32.xlu1 %v4208_v23, %s10424_s22 }
 0x793   :  { %4220 = vrot.lane.b32.xlu0 %v4209_v34, %s10424_s22  ;;  %4214 = vrot.lane.b32.xlu1 %v4206_v59, %s10424_s22 }
 0x797   :  { %4216 = vrot.lane.b32.xlu0 %v4207_v3, %s10424_s22  ;;  %4594 = vrot.lane.b32.xlu1 %v4584_v17, %s8236_s30 }
 0x79b   :  { %4596 = vrot.lane.b32.xlu0 %v4585_v63, %s8236_s30  ;;  %4590 = vrot.lane.b32.xlu1 %v4582_v18, %s8236_s30 }
 0x79f   :  { %4592 = vrot.lane.b32.xlu0 %v4583_v42, %s8236_s30  ;;  %4664 = vperm.xlu1 %7923, %v9731_v15  }
 0x7a3   :  { %4669 = vperm.xlu0 %7924, %v4659_v16   ;;  %4674 = vperm.xlu1 %7923, %v9577_v32  }
 0x7a7   :  { %4679 = vperm.xlu1 %7923, %v9572_v29  }
 0x7d1   :  { %v4538_v61 = vpop.permute.xlu1 %4537 }
 0x7d2   :  { %v4545_v31 = vrot.slane %v4538_v61, 4 }
 0x7d4   :  { %v4549_v62 = vsel %vm10429_vm3, %v4538_v61, %v4545_v31 }
 0x7d5   :  { %4557 = vst [vmem:[#allocation3 + $0x1c0] sm:$0xf] %v4549_v62  ;;  %v4373_v38 = vpop.permute.xlu1 %4372  ;;  %v4540_v4 = vpop.permute.xlu0 %4539 }
 0x7d6   :  { %v4380_v55 = vrot.slane %v4373_v38, 4  ;;  %v4546_v39 = vrot.slane %v4540_v4, 4 }
 0x7d8   :  { %v4384_v5 = vsel %vm448_vm0, %v4373_v38, %v4380_v55  ;;  %v4550_v51 = vsel %vm10429_vm3, %v4540_v4, %v4546_v39 }
 0x7d9   :  { %4392 = vst [vmem:[#allocation3 + $0xc0] sm:$0xf] %v4384_v5  ;;  %4558 = vst [vmem:[#allocation3 + $0x1d0] sm:$0xf] %v4550_v51  ;;  %v4486_v12 = vpop.permute.xlu1 %4485  ;;  %v4375_v30 = vpop.permute.xlu0 %4374 }
 0x7da   :  { %v4493_v32 = vrot.slane %v4486_v12, 4  ;;  %v4381_v8 = vrot.slane %v4375_v30, 4 }
 0x7dc   :  { %v4497_v29 = vsel %vm10430_vm11, %v4486_v12, %v4493_v32  ;;  %v4385_v40 = vsel %vm448_vm0, %v4375_v30, %v4381_v8 }
 0x7dd   :  { %4505 = vst [vmem:[#allocation3 + $0x180] sm:$0xf] %v4497_v29  ;;  %4393 = vst [vmem:[#allocation3 + $0xd0] sm:$0xf] %v4385_v40  ;;  %v4320_v11 = vpop.permute.xlu1 %4319  ;;  %v4488_v44 = vpop.permute.xlu0 %4487 }
 0x7de   :  { %v4327_v36 = vrot.slane %v4320_v11, 4  ;;  %v4494_v57 = vrot.slane %v4488_v44, 4 }
 0x7e0   :  { %v4331_v46 = vsel %vm3797_vm10, %v4320_v11, %v4327_v36  ;;  %v4498_v9 = vsel %vm10430_vm11, %v4488_v44, %v4494_v57  ;;  %v8080_v62 = vld [vmem:[#allocation3 + $0x1c0] ss:$16 sps:$4 sm:$0xff]  }
 0x7e1   :  { %4339 = vst [vmem:[#allocation3 + $0x80] sm:$0xf] %v4331_v46  ;;  %4506 = vst [vmem:[#allocation3 + $0x190] sm:$0xf] %v4498_v9  ;;  %v4433_v43 = vpop.permute.xlu1 %4432  ;;  %v4322_v50 = vpop.permute.xlu0 %4321 }
 0x7e2   :  { %v4440_v60 = vrot.slane %v4433_v43, 4  ;;  %v4328_v28 = vrot.slane %v4322_v50, 4 }
 0x7e4   :  { %v4444_v1 = vsel %vm425_vm5, %v4433_v43, %v4440_v60  ;;  %v4332_v47 = vsel %vm3797_vm10, %v4322_v50, %v4328_v28  ;;  %v8081_v55 = vld [vmem:[#allocation3 + $0xc0] ss:$16 sps:$4 sm:$0xff]  }
 0x7e5   :  { %4452 = vst [vmem:[#allocation3 + $0x140] sm:$0xf] %v4444_v1  ;;  %4340 = vst [vmem:[#allocation3 + $0x90] sm:$0xf] %v4332_v47  ;;  %v4542_v13 = vpop.permute.xlu1 %4541  ;;  %v4435_v6 = vpop.permute.xlu0 %4434 }
 0x7e6   :  { %v4547_v25 = vrot.slane %v4542_v13, 4  ;;  %v4441_v7 = vrot.slane %v4435_v6, 4 }
 0x7e8   :  { %v4551_v10 = vsel %vm10429_vm3, %v4542_v13, %v4547_v25  ;;  %v4445_v0 = vsel %vm425_vm5, %v4435_v6, %v4441_v7  ;;  %v8084_v57 = vld [vmem:[#allocation3 + $0x180] ss:$16 sps:$4 sm:$0xff]  }
 0x7e9   :  { %4559 = vst [vmem:[#allocation3 + $0x1e0] sm:$0xf] %v4551_v10  ;;  %4453 = vst [vmem:[#allocation3 + $0x150] sm:$0xf] %v4445_v0  ;;  %v4377_v26 = vpop.permute.xlu1 %4376  ;;  %v4544_v22 = vpop.permute.xlu0 %4543 }
 0x7ea   :  { %v4382_v33 = vrot.slane %v4377_v26, 4  ;;  %v4548_v21 = vrot.slane %v4544_v22, 4 }
 0x7ec   :  { %v4386_v45 = vsel %vm448_vm0, %v4377_v26, %v4382_v33  ;;  %v4552_v27 = vsel %vm10429_vm3, %v4544_v22, %v4548_v21  ;;  %v8085_v43 = vld [vmem:[#allocation3 + $0x80] ss:$16 sps:$4 sm:$0xff]  }
 0x7ed   :  { %4394 = vst [vmem:[#allocation3 + $0xe0] sm:$0xf] %v4386_v45  ;;  %4560 = vst [vmem:[#allocation3 + $0x1f0] sm:$0xf] %v4552_v27  ;;  %v4490_v53 = vpop.permute.xlu1 %4489  ;;  %v4379_v37 = vpop.permute.xlu0 %4378 }
 0x7ee   :  { %v4495_v58 = vrot.slane %v4490_v53, 4  ;;  %v4383_v49 = vrot.slane %v4379_v37, 4 }
 0x7f0   :  { %v4499_v35 = vsel %vm10430_vm11, %v4490_v53, %v4495_v58  ;;  %v4387_v2 = vsel %vm448_vm0, %v4379_v37, %v4383_v49  ;;  %v8088_v22 = vld [vmem:[#allocation3 + $0x140] ss:$16 sps:$4 sm:$0xff]  }
 0x7f1   :  { %4507 = vst [vmem:[#allocation3 + $0x1a0] sm:$0xf] %v4499_v35  ;;  %4395 = vst [vmem:[#allocation3 + $0xf0] sm:$0xf] %v4387_v2  ;;  %v4324_v23 = vpop.permute.xlu1 %4323  ;;  %v4492_v24 = vpop.permute.xlu0 %4491  ;;  %v8090_v49 = vld [vmem:[#allocation3 + $0x120] ss:$16 sps:$4 sm:$0xff]  }
 0x7f2   :  { %v4329_v34 = vrot.slane %v4324_v23, 4  ;;  %v4496_v59 = vrot.slane %v4492_v24, 4 }
 0x7f4   :  { %v4333_v56 = vsel %vm3797_vm10, %v4324_v23, %v4329_v34  ;;  %v4500_v3 = vsel %vm10430_vm11, %v4492_v24, %v4496_v59  ;;  %v8078_v17 = vld [vmem:[#allocation3 + $0x1e0] ss:$16 sps:$4 sm:$0xff]  }
 0x7f5   :  { %4341 = vst [vmem:[#allocation3 + $0xa0] sm:$0xf] %v4333_v56  ;;  %4508 = vst [vmem:[#allocation3 + $0x1b0] sm:$0xf] %v4500_v3  ;;  %v4437_v41 = vpop.permute.xlu1 %4436  ;;  %v4326_v63 = vpop.permute.xlu0 %4325  ;;  %7753 = vmatprep.subr.bf16.mxu1 %v8078_v17  ;;  %v8092_v56 = vld [vmem:[#allocation3 + $0x100] ss:$16 sps:$4 sm:$0xff]  }
 0x7f6   :  { %v4442_v18 = vrot.slane %v4437_v41, 4  ;;  %v4330_v42 = vrot.slane %v4326_v63, 4 }
 0x7f8   :  { %v4446_v16 = vsel %vm425_vm5, %v4437_v41, %v4442_v18  ;;  %v4334_v52 = vsel %vm3797_vm10, %v4326_v63, %v4330_v42  ;;  %v8079_v48 = vld [vmem:[#allocation3 + $0xe0] ss:$16 sps:$4 sm:$0xff]   ;;  %v8099_v18 = vld [vmem:[%s10396_s7 + $0x1c] ss:$12 sps:$4 sm:$0xff]  }
 0x7f9   :  { %4454 = vst [vmem:[#allocation3 + $0x160] sm:$0xf] %v4446_v16  ;;  %4342 = vst [vmem:[#allocation3 + $0xb0] sm:$0xf] %v4334_v52  ;;  %v4272_v61 = vpop.permute.xlu1 %4271  ;;  %v4439_v31 = vpop.permute.xlu0 %4438  ;;  %7754 = vmatpush3.bf16.msra.mxu1 %v8079_v48  ;;  %v8094_v63 = vld [vmem:[%s10396_s7] ss:$12 sps:$4 sm:$0xff]  }
 0x7fa   :  { %v4277_v38 = vrot.slane %v4272_v61, 4  ;;  %v4443_v4 = vrot.slane %v4439_v31, 4  ;;  %7755 = vmatprep.subr.bf16.mxu1 %v8080_v62  ;;  %v8101_v52 = vld [vmem:[%s10396_s7 + $0x18] ss:$12 sps:$4 sm:$0xff]   ;;  %v8102_v48 = vld [vmem:[%s10396_s7 + $0x8] ss:$12 sps:$4 sm:$0xff]  }
 0x7fb   :  { %v8106_v62 = vld [vmem:[%s10397_s13 + $0x28] sm:$0xff]  }
 0x7fc   :  { %v4281_v39 = vsel %vm3761_vm15, %v4272_v61, %v4277_v38  ;;  %v4447_v5 = vsel %vm425_vm5, %v4439_v31, %v4443_v4  ;;  %v8082_v51 = vld [vmem:[#allocation3 + $0x1a0] ss:$16 sps:$4 sm:$0xff]   ;;  %v8108_v4 = vld [vmem:[%s10397_s13 + $0x18] sm:$0xff]  }
 0x7fd   :  { %4289 = vst [vmem:[#allocation3 + $0x60] sm:$0xf] %v4281_v39  ;;  %4455 = vst [vmem:[#allocation3 + $0x170] sm:$0xf] %v4447_v5  ;;  %v4268_v12 = vpop.permute.xlu1 %4267  ;;  %v4274_v30 = vpop.permute.xlu0 %4273  ;;  %7756 = vmatpush3.bf16.msra.mxu1 %v8081_v55  ;;  %v8103_v61 = vld [vmem:[%s10396_s7 + $0x20] ss:$12 sps:$4 sm:$0xff]  }
 0x7fe   :  { %v4275_v32 = vrot.slane %v4268_v12, 4  ;;  %v4278_v8 = vrot.slane %v4274_v30, 4  ;;  %7757 = vmatprep.subr.bf16.mxu1 %v8082_v51  ;;  %v8105_v31 = vld [vmem:[%s10397_s13 + $0x30] sm:$0xff]   ;;  %v8107_v38 = vld [vmem:[%s10397_s13 + $0x20] sm:$0xff]   ;;  %v8110_v39 = vld [vmem:[%s10397_s13 + $0x8] sm:$0xff]   ;;  %s8242_s7 = smov 3  }
 0x7ff   :  { %7839 = vmatprep.subr.bf16.mxu0 %v8105_v31  ;;  %v8109_v55 = vld [vmem:[%s10397_s13 + $0x10] sm:$0xff]   ;;  %v8111_v5 = vld [vmem:[%s10397_s13] sm:$0xff]   ;;  %s8246_s13 = smov 123  }
 0x800   :  { %v4279_v29 = vsel %vm3761_vm15, %v4268_v12, %v4275_v32  ;;  %v4282_v40 = vsel %vm3761_vm15, %v4274_v30, %v4278_v8  ;;  %v8083_v11 = vld [vmem:[#allocation3 + $0xa0] ss:$16 sps:$4 sm:$0xff]   ;;  %7840 = vmatpush3.bf16.msra.mxu0 %v8105_v31 }
 0x801   :  { %4287 = vst [vmem:[#allocation3 + $0x40] sm:$0xf] %v4279_v29  ;;  %4290 = vst [vmem:[#allocation3 + $0x70] sm:$0xf] %v4282_v40  ;;  %v4219_v44 = vpop.permute.xlu1 %4218  ;;  %v4270_v36 = vpop.permute.xlu0 %4269  ;;  %7758 = vmatpush3.bf16.msra.mxu1 %v8083_v11  ;;  %7841 = vmatprep.subr.bf16.mxu0 %v8106_v62  ;;  %v5240_v51 = vld [vmem:[%s10398_s18] sm:$0x2] }
 0x802   :  { %v4224_v46 = vrot.slane %v4219_v44, 4  ;;  %v4276_v9 = vrot.slane %v4270_v36, 4  ;;  %7759 = vmatprep.subr.bf16.mxu1 %v8084_v57  ;;  %v5386_v12 = vld [vmem:[%s10398_s18] sm:$0x8]  ;;  %v5186_v30 = vld [vmem:[%s10398_s18] sm:$0x2] }
 0x803   :  { %v5242_v32 = vshrl.u32 %v5240_v51, 16  ;;  %v5388_v8 = vpack.i.b16 %v5386_v12, %v5386_v12  ;;  %v5188_v29 = vpack.i.b16 %v5186_v30, %v5186_v30  ;;  %v5343_v40 = vld [vmem:[%s10398_s18] sm:$0x4]  ;;  %v5131_v11 = vld [vmem:[%s10398_s18] sm:$0x1] }
 0x804   :  { %v4228_v50 = vsel %vm10427_vm6, %v4219_v44, %v4224_v46  ;;  %v4280_v60 = vsel %vm3761_vm15, %v4270_v36, %v4276_v9  ;;  %v8086_v28 = vld [vmem:[#allocation3 + $0x160] ss:$16 sps:$4 sm:$0xff]   ;;  %7842 = vmatpush3.bf16.msra.mxu0 %v8106_v62  ;;  %v5345_v44 = vshrl.u32 %v5343_v40, 16  ;;  %v5133_v36 = vshrl.u32 %v5131_v11, 16 }
 0x805   :  { %4236 = vst [vmem:[#allocation3 + $0x20] sm:$0xf] %v4228_v50  ;;  %4288 = vst [vmem:[#allocation3 + $0x50] sm:$0xf] %v4280_v60  ;;  %v4215_v1 = vpop.permute.xlu1 %4214  ;;  %v4221_v47 = vpop.permute.xlu0 %4220  ;;  %7760 = vmatpush3.bf16.msra.mxu1 %v8085_v43  ;;  %7843 = vmatprep.subr.bf16.mxu0 %v8107_v38  ;;  %v5301_v57 = vld [vmem:[%s10398_s18] sm:$0x4]  ;;  %v5243_v46 = vpack.i.b16 %v5242_v32, %v5242_v32  ;;  %v5393_v9 = vrot.slane %v5388_v8, %v8368_v14 }
 0x806   :  { %v4222_v13 = vrot.slane %v4215_v1, 4  ;;  %v4225_v6 = vrot.slane %v4221_v47, 4  ;;  %7761 = vmatprep.subr.bf16.mxu1 %v8086_v28  ;;  %v5303_v43 = vpack.i.b16 %v5301_v57, %v5301_v57  ;;  %v5428_v50 = vld [vmem:[%s10398_s18] sm:$0x8]  ;;  %v5346_v60 = vpack.i.b16 %v5345_v44, %v5345_v44 }
 0x807   :  { %v5430_v28 = vshrl.u32 %v5428_v50, 16 }
 0x808   :  { %v4226_v25 = vsel %vm10427_vm6, %v4215_v1, %v4222_v13  ;;  %v4229_v7 = vsel %vm10427_vm6, %v4221_v47, %v4225_v6  ;;  %v8087_v10 = vld [vmem:[#allocation3 + $0x60] ss:$16 sps:$4 sm:$0xff]   ;;  %7844 = vmatpush3.bf16.msra.mxu0 %v8107_v38  ;;  %v5248_v1 = vrot.slane %v5243_v46, %v8427_v20  ;;  %v7570_v47 = vcombine.low %v5393_v9, %v5393_v9 }
 0x809   :  { %4234 = vst [vmem:[#allocation3] sm:$0xf] %v4226_v25  ;;  %4237 = vst [vmem:[#allocation3 + $0x30] sm:$0xf] %v4229_v7  ;;  %v4595_v0 = vpop.permute.xlu1 %4594  ;;  %v4217_v26 = vpop.permute.xlu0 %4216  ;;  %7762 = vmatpush3.bf16.msra.mxu1 %v8087_v10  ;;  %7845 = vmatprep.subr.bf16.mxu0 %v8108_v4  ;;  %v5193_v13 = vrot.slane %v5188_v29, %v8427_v20  ;;  %v5134_v6 = vpack.i.b16 %v5133_v36, %v5133_v36  ;;  %v5077_v7 = vld [vmem:[%s10398_s18] sm:$0x1] }
 0x80a   :  { %v4600_v33 = vrot.slane %v4595_v0, 4  ;;  %v4223_v21 = vrot.slane %v4217_v26, 4  ;;  %7763 = vmatprep.subr.bf16.mxu1 %v8088_v22  ;;  %v5351_v25 = vrot.slane %v5346_v60, %v8371_v19  ;;  %v7567_v10 = vcombine.low %v5248_v1, %v5248_v1  ;;  %5397 = vrot.lane.b32.xlu1 %v7570_v47, %s8241_s27 }
 0x80c   :  { %v4604_v45 = vsel %vm10428_vm4, %v4595_v0, %v4600_v33  ;;  %v4227_v27 = vsel %vm10427_vm6, %v4217_v26, %v4223_v21  ;;  %v8089_v53 = vld [vmem:[#allocation3 + $0x40] ss:$16 sps:$4 sm:$0xff]   ;;  %7846 = vmatpush3.bf16.msra.mxu0 %v8108_v4  ;;  %v5308_v0 = vrot.slane %v5303_v43, %v8371_v19  ;;  %v5431_v26 = vpack.i.b16 %v5430_v28, %v5430_v28 }
 0x80d   :  { %4612 = vst [vmem:[#allocation3 + $0x220] sm:$0xf] %v4604_v45  ;;  %4235 = vst [vmem:[#allocation3 + $0x10] sm:$0xf] %v4227_v27  ;;  %v4591_v37 = vpop.permute.xlu1 %4590  ;;  %v4597_v58 = vpop.permute.xlu0 %4596  ;;  %7764 = vmatpush3.bf16.msra.mxu1 %v8089_v53  ;;  %7847 = vmatprep.subr.bf16.mxu0 %v8109_v55  ;;  %v7569_v22 = vcombine.low %v5351_v25, %v5351_v25  ;;  %v7566_v33 = vcombine.low %v5193_v13, %v5193_v13  ;;  %vm5169_vm6 = vcmask 31744  }
 0x80e   :  { %v4598_v35 = vrot.slane %v4591_v37, 4  ;;  %v4601_v2 = vrot.slane %v4597_v58, 4  ;;  %7765 = vmatprep.subr.bf16.mxu1 %v8090_v49  ;;  %5252 = vrot.lane.b32.xlu0 %v7567_v10, %s10444_s28  ;;  %v5139_v21 = vrot.slane %v5134_v6, %v8447_v54  ;;  %v5079_v45 = vpack.i.b16 %v5077_v7, %v5077_v7 }
 0x80f   :  { %5355 = vrot.lane.b32.xlu1 %v7569_v22, %s8242_s7  ;;  %v7568_v27 = vcombine.low %v5308_v0, %v5308_v0  ;;  %v5436_v53 = vrot.slane %v5431_v26, %v8368_v14 }
 0x810   :  { %v4602_v23 = vsel %vm10428_vm4, %v4591_v37, %v4598_v35  ;;  %v4605_v24 = vsel %vm10428_vm4, %v4597_v58, %v4601_v2  ;;  %v8091_v34 = vld [vmem:[#allocation3 + $0x20] ss:$16 sps:$4 sm:$0xff]   ;;  %7848 = vmatpush3.bf16.msra.mxu0 %v8109_v55  ;;  %v7565_v37 = vcombine.low %v5139_v21, %v5139_v21  ;;  %v5084_v58 = vrot.slane %v5079_v45, %v8447_v54 }
 0x811   :  { %4610 = vst [vmem:[#allocation3 + $0x200] sm:$0xf] %v4602_v23  ;;  %4613 = vst [vmem:[#allocation3 + $0x230] sm:$0xf] %v4605_v24  ;;  %v4593_v59 = vpop.permute.xlu0 %4592  ;;  %7766 = vmatpush3.bf16.msra.mxu1 %v8091_v34  ;;  %7849 = vmatprep.subr.bf16.mxu0 %v8110_v39  ;;  %v7571_v49 = vcombine.low %v5436_v53, %v5436_v53 }
 0x812   :  { %v4599_v3 = vrot.slane %v4593_v59, 4  ;;  %7767 = vmatprep.subr.bf16.mxu1 %v8092_v56  ;;  %5197 = vrot.lane.b32.xlu0 %v7566_v33, %s8243_s5  ;;  %v7564_v35 = vcombine.low %v5084_v58, %v5084_v58 }
 0x813   :  { %5312 = vrot.lane.b32.xlu1 %v7568_v27, %s10441_s24 }
 0x814   :  { %v4603_v17 = vsel %vm10428_vm4, %v4593_v59, %v4599_v3  ;;  %v8093_v41 = vld [vmem:[#allocation3] ss:$16 sps:$4 sm:$0xff]   ;;  %7850 = vmatpush3.bf16.msra.mxu0 %v8110_v39  ;;  %vm5114_vm4 = vcmask 39936  }
 0x815   :  { %4611 = vst [vmem:[#allocation3 + $0x210] sm:$0xf] %v4603_v17  ;;  %7768 = vmatpush3.bf16.msra.mxu1 %v8093_v41  ;;  %7851 = vmatprep.subr.bf16.mxu0 %v8111_v5 }
 0x816   :  { %5143 = vrot.lane.b32.xlu0 %v7565_v37, %s8244_s3 }
 0x817   :  { %5440 = vrot.lane.b32.xlu1 %v7571_v49, %s8245_s16 }
 0x818   :  { %v8097_v42 = vld [vmem:[#allocation3 + $0x220] ss:$16 sps:$4 sm:$0xff]   ;;  %4860 = vmatmul.mubr.bf16.vlgmr.msra.gmra.mxu1 %v8094_v63  ;;  %7852 = vmatpush3.bf16.msra.mxu0 %v8111_v5 }
 0x819   :  { %7829 = vmatprep.subr.bf16.mxu1 %v8097_v42  ;;  %4867 = vmatprep.mubr.bf16.mxu1 %v8099_v18 }
 0x81a   :  { %7830 = vmatpush3.bf16.msra.mxu1 %v8097_v42  ;;  %5088 = vrot.lane.b32.xlu0 %v7564_v35, %s8246_s13  ;;  %v4665_v34 = vpop.permute.xlu1 %4664 }
 0x81c   :  { %v8098_v16 = vld [vmem:[#allocation3 + $0x200] ss:$16 sps:$4 sm:$0xff]  }
 0x81d   :  { %7831 = vmatprep.subr.bf16.mxu1 %v8098_v16 }
 0x81e   :  { %7832 = vmatpush3.bf16.msra.mxu1 %v8098_v16  ;;  %v4675_v17 = vpop.permute.xlu1 %4674  ;;  %v4670_v31 = vpop.permute.xlu0 %4669 }
 0x820   :  { %4868 = vmatmul.mubr.bf16.gmra.mxu1 %v8101_v52 }
 0x821   :  { %7833 = vmatprep.mubr.msk.bf16.mxu1 %vm4820_vm14, %v8102_v48 }
 0x822   :  { %v4680_v38 = vpop.permute.xlu1 %4679 }
 0x828   :  { %7834 = vmatmul.mubr.msk.bf16.vlgmr.msra.gmra.mxu1 %vm4820_vm14, %v8103_v61 }
 0x87c   :  { %v5398_v58 = vpop.permute.xlu1 %5397 }
 0x880   :  { %v5253_v47 = vpop.permute.xlu0 %5252 }
 0x881   :  { %v5254_v6 = vrot.slane %v5253_v47, 4 }
 0x883   :  { %v5255_v26 = vsel %vm425_vm5, %v5254_v6, %v5253_v47 }
 0x884   :  { %v5198_v21 = vpop.permute.xlu0 %5197 }
 0x885   :  { %v5199_v27 = vrot.slane %v5198_v21, 4 }
 0x8d8   :  { %v7769_v2 = vpop.f32.mrf.mxu1 }
 0x8da   :  { %v7770_v23 = vpop.f32.mrf.mxu1 }
 0x8db   :  { %v7771_v63 = vadd.f32 %v7770_v23, %v7769_v2 }
 0x8dc   :  { %v7772_v24 = vpop.f32.mrf.mxu1 }
 0x8dd   :  { %v4862_v48 = vadd.f32 %v7771_v63, %v4665_v34 }
 0x8de   :  { %v7773_v59 = vpop.f32.mrf.mxu1 }
 0x8df   :  { %v7774_v61 = vadd.f32 %v7773_v59, %v7772_v24 }
 0x8e0   :  { %v7775_v56 = vpop.f32.mrf.mxu1 }
 0x8e1   :  { %v4865_v12 = vadd.f32 %v7774_v61, %v4670_v31 }
 0x8e2   :  { %v7776_v3 = vpop.f32.mrf.mxu1 }
 0x8e3   :  { %v7777_v18 = vadd.f32 %v7776_v3, %v7775_v56  ;;  %v5144_v56 = vpop.permute.xlu0 %5143 }
 0x8e4   :  { %v7778_v41 = vpop.f32.mrf.mxu1 }
 0x8e5   :  { %v4870_v62 = vadd.f32 %v7777_v18, %v4675_v17  ;;  %v5356_v18 = vpop.permute.xlu1 %5355 }
 0x8e6   :  { %v7779_v42 = vpop.f32.mrf.mxu1 }
 0x8e7   :  { %v7780_v16 = vadd.f32 %v7779_v42, %v7778_v41  ;;  %v5145_v41 = vrot.slane %v5144_v56, 4 }
 0x8e8   :  { %v7835_v52 = vpop.f32.mrf.mxu1 }
 0x8e9   :  { %v4873_v55 = vadd.f32 %v7780_v16, %v4680_v38  ;;  %v4919_v5 = vadd.f32 %v7835_v52, %v4870_v62  ;;  %v5313_v38 = vpop.permute.xlu1 %5312 }
 0x8ea   :  { %v4910_v4 = vpop.f32.mrf.mxu1 }
 0x8eb   :  { %v4911_v39 = vadd.f32 %v4910_v4, %v4862_v48  ;;  %v4931_v11 = vmul.f32 -0.2, %v4919_v5  ;;  %vm4927_vm12 = vcmp.ge.f32.partialorder %v4919_v5, 0.0 }
 0x8ec   :  { %v7836_v51 = vpop.f32.mrf.mxu1 }
 0x8ed   :  { %v4922_v30 = vadd.f32 %v7836_v51, %v4873_v55  ;;  %v4929_v8 = vmul.f32 -0.2, %v4911_v39  ;;  %vm4925_vm8 = vcmp.ge.f32.partialorder %v4911_v39, 0.0  ;;  %v4935_v9 = vsel %vm4927_vm12, %v4919_v5, %v4931_v11 }
 0x8ee   :  { %v4913_v32 = vpop.f32.mrf.mxu1  ;;  %vm5091_vm12 = vcmask 1006592  }
 0x8ef   :  { %vm4928_vm7 = vcmp.ge.f32.partialorder %v4922_v30, 0.0  ;;  %v4932_v29 = vmul.f32 -0.2, %v4922_v30  ;;  %v4914_v40 = vadd.f32 %v4913_v32, %v4865_v12  ;;  %v4933_v57 = vsel %vm4925_vm8, %v4911_v39, %v4929_v8 }
 0x8f0   :  { %vm5146_vm8 = vcmask 1014784  }
 0x8f1   :  { %vm4926_vm13 = vcmp.ge.f32.partialorder %v4914_v40, 0.0  ;;  %v4930_v44 = vmul.f32 -0.2, %v4914_v40  ;;  %v4936_v36 = vsel %vm4928_vm7, %v4922_v30, %v4932_v29  ;;  %vm5200_vm7 = vcmask 1022976  }
 0x8f2   :  { %v4938_v50 = vpack.c.bf16 %v4936_v36, %v4935_v9  ;;  %v5201_v24 = vsel %vm5200_vm7, %v5199_v27, %v5198_v21  ;;  %v5147_v52 = vsel %vm5146_vm8, %v5145_v41, %v5144_v56  ;;  %v5848_v41 = vld [vmem:[%s10398_s18] sm:$0x2] }
 0x8f3   :  { %v4934_v46 = vsel %vm4926_vm13, %v4914_v40, %v4930_v44  ;;  %vm8248_vm13 = vmmov 0  }
 0x8f4   :  { %v4937_v43 = vpack.c.bf16 %v4934_v46, %v4933_v57 }
 0x8f6   :  { %7853 = vmatprep.mubr.bf16.mxu0 %v4937_v43  ;;  %v5089_v43 = vpop.permute.xlu0 %5088 }
 0x8f7   :  { %7854 = vmatmul.mubr.bf16.vlgmr.msra.gmra.mxu0 %v4938_v50 }
 0x9b7   :  { %v7855_v60 = vpop.f32.mrf.mxu0 }
 0x9b8   :  { %v7703_v28 = vpack.c.bf16 %v7855_v60, %v7855_v60 }
 0x9b9   :  { %v5037_v1 = vpop.f32.mrf.mxu0 }
 0x9ba   :  { %5071 = vst.msk [vmem:[#allocation2 + $0x68] sm:$0xf] %vm5068_vm9, %v7703_v28  ;;  %v7701_v13 = vpack.c.bf16 %v5037_v1, %v5037_v1  ;;  %v5090_v28 = vrot.slane %v5089_v43, 4 }
 0x9bb   :  { %v7856_v25 = vpop.f32.mrf.mxu0 }
 0x9bc   :  { %5069 = vst.msk [vmem:[#allocation2 + $0x20] sm:$0xf] %vm5068_vm9, %v7701_v13  ;;  %v7704_v7 = vpack.c.bf16 %v7856_v25, %v7856_v25  ;;  %v5092_v6 = vsel %vm5091_vm12, %v5090_v28, %v5089_v43 }
 0x9bd   :  { %v5040_v10 = vpop.f32.mrf.mxu0 }
 0x9be   :  { %5072 = vst.msk [vmem:[#allocation2 + $0x8c] sm:$0xf] %vm5068_vm9, %v7704_v7  ;;  %v7702_v0 = vpack.c.bf16 %v5040_v10, %v5040_v10 }
 0x9c0   :  { %5070 = vst.msk [vmem:[#allocation2 + $0x44] sm:$0xf] %vm5068_vm9, %v7702_v0 }
 0x9c1   :  { %v5291_v22 = vld [vmem:[#allocation2 + $0x68] sm:$0xf] }
 0x9c2   :  { %v9857_v33 = vld [vmem:[#allocation2 + $0x64] sm:$0xff]  ;;  %5295 = vst.msk [vmem:[#allocation3 + $0x120] sm:$0xf] %vm5068_vm9, %v5291_v22  ;;  %v5441_v22 = vpop.permute.xlu1 %5440 }
 0x9c3   :  { %v5259_v45 = vmul.bf16 %v5255_v26, %v9857_v33  ;;  %v5289_v53 = vld [vmem:[#allocation2 + $0x20] sm:$0xf]  ;;  %v5384_v37 = vld [vmem:[#allocation2 + $0x68] sm:$0xf]  ;;  %v5205_v17 = vmul.bf16 %v9857_v33, %v5201_v24  ;;  %v5151_v31 = vmul.bf16 %v9857_v33, %v5147_v52  ;;  %v5096_v10 = vmul.bf16 %v9857_v33, %v5092_v6 }
 0x9c4   :  { %5293 = vst.msk [vmem:[#allocation3 + $0x100] sm:$0xf] %vm5068_vm9, %v5289_v53  ;;  %v5402_v23 = vmul.bf16 %v5398_v58, %v5384_v37  ;;  %v5341_v63 = vld [vmem:[#allocation2 + $0x68] sm:$0xf]  ;;  %v5236_v5 = vld [vmem:[#allocation2 + $0x1c] sm:$0xff]  ;;  %v8247_v33 = vmov 0.0  }
 0x9c5   :  { %5269 = vrot.lane.b32.xlu0 %v5259_v45, %s10441_s24  ;;  %v5292_v49 = vld [vmem:[#allocation2 + $0x8c] sm:$0xf]  ;;  %v5360_v16 = vmul.bf16 %v5356_v18, %v5341_v63  ;;  %v5299_v62 = vld [vmem:[#allocation2 + $0x68] sm:$0xf]  ;;  %v5257_v12 = vmul.bf16 %v5255_v26, %v5236_v5  ;;  %v5382_v32 = vld [vmem:[#allocation2 + $0x20] sm:$0xf]  ;;  %v5203_v44 = vmul.bf16 %v5236_v5, %v5201_v24  ;;  %v5149_v60 = vmul.bf16 %v5236_v5, %v5147_v52 }
 0x9c6   :  { %v9863_v35 = vld [vmem:[#allocation2 + $0x88] sm:$0xff]  ;;  %5296 = vst.msk [vmem:[#allocation3 + $0x130] sm:$0xf] %vm5068_vm9, %v5292_v49  ;;  %v5317_v55 = vmul.bf16 %v5313_v38, %v5299_v62  ;;  %v5400_v29 = vmul.bf16 %v5398_v58, %v5382_v32  ;;  %v5339_v36 = vld [vmem:[#allocation2 + $0x20] sm:$0xf]  ;;  %7857 = vmatprep.subr.bf16.mxu0 %v8247_v33  ;;  %7861 = vmatprep.mubr.msk.bf16.mxu0 %vm8248_vm13, %v8247_v33 }
 0x9c7   :  { %v5260_v2 = vmul.bf16 %v5255_v26, %v9863_v35  ;;  %v5290_v34 = vld [vmem:[#allocation2 + $0x44] sm:$0xf]  ;;  %v5385_v59 = vld [vmem:[#allocation2 + $0x8c] sm:$0xf]  ;;  %v5206_v42 = vmul.bf16 %v9863_v35, %v5201_v24  ;;  %v5152_v4 = vmul.bf16 %v9863_v35, %v5147_v52  ;;  %v5358_v46 = vmul.bf16 %v5356_v18, %v5339_v36  ;;  %v5297_v1 = vld [vmem:[#allocation2 + $0x20] sm:$0xf] }
 0x9c8   :  { %5294 = vst.msk [vmem:[#allocation3 + $0x110] sm:$0xf] %vm5068_vm9, %v5290_v34  ;;  %v5403_v3 = vmul.bf16 %v5398_v58, %v5385_v59  ;;  %v5342_v48 = vld [vmem:[#allocation2 + $0x8c] sm:$0xf]  ;;  %v5237_v30 = vld [vmem:[#allocation2 + $0x40] sm:$0xff]  ;;  %v5315_v13 = vmul.bf16 %v5313_v38, %v5297_v1  ;;  %v5097_v0 = vmul.bf16 %v9863_v35, %v5092_v6  ;;  %v8249_v59 = vmov 4  }
 0x9c9   :  { %5271 = vrot.lane.b32.xlu1 %v5260_v2, %s10441_s24  ;;  %5412 = vrot.lane.b32.xlu0 %v5402_v23, %s8244_s3  ;;  %v5361_v61 = vmul.bf16 %v5356_v18, %v5342_v48  ;;  %v5300_v39 = vld [vmem:[#allocation2 + $0x8c] sm:$0xf]  ;;  %v5258_v8 = vmul.bf16 %v5255_v26, %v5237_v30  ;;  %v5383_v40 = vld [vmem:[#allocation2 + $0x44] sm:$0xf]  ;;  %v5204_v57 = vmul.bf16 %v5237_v30, %v5201_v24  ;;  %v5426_v21 = vld [vmem:[#allocation2 + $0x68] sm:$0xf] }
 0x9ca   :  { %v5318_v51 = vmul.bf16 %v5313_v38, %v5300_v39  ;;  %v5401_v11 = vmul.bf16 %v5398_v58, %v5383_v40  ;;  %v5340_v9 = vld [vmem:[#allocation2 + $0x44] sm:$0xf]  ;;  %v5150_v47 = vmul.bf16 %v5237_v30, %v5147_v52  ;;  %v5094_v26 = vmul.bf16 %v5236_v5, %v5092_v6  ;;  %v5427_v53 = vld [vmem:[#allocation2 + $0x8c] sm:$0xf]  ;;  %v5424_v37 = vld [vmem:[#allocation2 + $0x20] sm:$0xf]  ;;  %7925 = vset.pattern.permute.xlu0 %v8249_v59 }
 0x9cb   :  { %v5359_v50 = vmul.bf16 %v5356_v18, %v5340_v9  ;;  %v5298_v25 = vld [vmem:[#allocation2 + $0x44] sm:$0xf]  ;;  %v5095_v45 = vmul.bf16 %v5237_v30, %v5092_v6  ;;  %v5445_v27 = vmul.bf16 %v5441_v22, %v5426_v21  ;;  %v5446_v58 = vmul.bf16 %v5441_v22, %v5427_v53  ;;  %v5944_v24 = vld [vmem:[%s10398_s18] sm:$0x8]  ;;  %v5915_v34 = vld [vmem:[%s10398_s18] sm:$0x4]  ;;  %7926 = vset.pattern.permute.xlu1 %v8249_v59 }
 0x9cc   :  { %v5316_v7 = vmul.bf16 %v5313_v38, %v5298_v25  ;;  %v5443_v49 = vmul.bf16 %v5441_v22, %v5424_v37  ;;  %v8131_v35 = vld [vmem:[%s10399_s8 + $0x4] ss:$12 sps:$4 sm:$0xff]   ;;  %v5946_v56 = vpack.i.b16 %v5944_v24, %v5944_v24  ;;  %v5850_v18 = vshrl.u32 %v5848_v41, 16 }
 0x9cd   :  { %5414 = vrot.lane.b32.xlu1 %v5403_v3, %s8244_s3  ;;  %5215 = vrot.lane.b32.xlu0 %v5205_v17, %s8242_s7  ;;  %v5425_v2 = vld [vmem:[#allocation2 + $0x44] sm:$0xf]  ;;  %v5917_v3 = vshrl.u32 %v5915_v34, 16  ;;  %v5887_v17 = vld [vmem:[%s10398_s18] sm:$0x4] }
 0x9ce   :  { %5677 = vmatprep.mubr.bf16.mxu1 %v8131_v35  ;;  %v5444_v23 = vmul.bf16 %v5441_v22, %v5425_v2  ;;  %v5889_v63 = vpack.i.b16 %v5887_v17, %v5887_v17  ;;  %v5951_v52 = vrot.slane %v5946_v56, %v8368_v14  ;;  %v5851_v62 = vpack.i.b16 %v5850_v18, %v5850_v18 }
 0x9cf   :  { %v5918_v48 = vpack.i.b16 %v5917_v3, %v5917_v3 }
 0x9d0   :  { %v5856_v30 = vrot.slane %v5851_v62, %v8427_v20 }
 0x9d1   :  { %5217 = vrot.lane.b32.xlu1 %v5206_v42, %s8242_s7  ;;  %5370 = vrot.lane.b32.xlu0 %v5360_v16, %s8243_s5  ;;  %v5814_v42 = vld [vmem:[%s10398_s18] sm:$0x2]  ;;  %v5779_v16 = vld [vmem:[%s10398_s18] sm:$0x1]  ;;  %v5923_v39 = vrot.slane %v5918_v48, %v8371_v19 }
 0x9d2   :  { %v5816_v38 = vpack.i.b16 %v5814_v42, %v5814_v42 }
 0x9d3   :  { %v7601_v32 = vcombine.low %v5923_v39, %v5923_v39 }
 0x9d5   :  { %5372 = vrot.lane.b32.xlu1 %v5361_v61, %s8243_s5  ;;  %5161 = vrot.lane.b32.xlu0 %v5151_v31, %s8241_s27  ;;  %v5781_v61 = vshrl.u32 %v5779_v16, 16  ;;  %v5972_v31 = vld [vmem:[%s10398_s18] sm:$0x8] }
 0x9d7   :  { %v5782_v5 = vpack.i.b16 %v5781_v61, %v5781_v61 }
 0x9d9   :  { %5163 = vrot.lane.b32.xlu1 %v5152_v4, %s8241_s27  ;;  %5327 = vrot.lane.b32.xlu0 %v5317_v55, %s10444_s28  ;;  %v8216_v4 = vld [vmem:[%s10391_s2 + $0x8] sm:$0xff]  ;;  %v7602_v55 = vcombine.low %v5951_v52, %v5951_v52 }
 0x9dd   :  { %5329 = vrot.lane.b32.xlu1 %v5318_v51, %s10444_s28  ;;  %5265 = vrot.lane.b32.xlu0 %v5257_v12, %s10441_s24  ;;  %v5745_v51 = vld [vmem:[%s10398_s18] sm:$0x1]  ;;  %v5974_v12 = vshrl.u32 %v5972_v31, 16 }
 0x9de   :  { %v5747_v40 = vpack.i.b16 %v5745_v51, %v5745_v51 }
 0x9df   :  { %v5975_v36 = vpack.i.b16 %v5974_v12, %v5974_v12 }
 0x9e1   :  { %5267 = vrot.lane.b32.xlu1 %v5258_v8, %s10441_s24  ;;  %5408 = vrot.lane.b32.xlu0 %v5400_v29, %s8244_s3  ;;  %v5821_v29 = vrot.slane %v5816_v38, %v8427_v20  ;;  %v5980_v43 = vrot.slane %v5975_v36, %v8368_v14 }
 0x9e5   :  { %5410 = vrot.lane.b32.xlu1 %v5401_v11, %s8244_s3  ;;  %5211 = vrot.lane.b32.xlu0 %v5203_v44, %s8242_s7  ;;  %v7599_v11 = vcombine.low %v5856_v30, %v5856_v30  ;;  %v5787_v44 = vrot.slane %v5782_v5, %v8447_v54 }
 0x9e7   :  { %v7597_v9 = vcombine.low %v5787_v44, %v5787_v44 }
 0x9e9   :  { %5213 = vrot.lane.b32.xlu1 %v5204_v57, %s8242_s7  ;;  %5366 = vrot.lane.b32.xlu0 %v5358_v46, %s8243_s5  ;;  %v5752_v57 = vrot.slane %v5747_v40, %v8447_v54  ;;  %v7598_v46 = vcombine.low %v5821_v29, %v5821_v29 }
 0x9ed   :  { %5368 = vrot.lane.b32.xlu1 %v5359_v50, %s8243_s5  ;;  %5157 = vrot.lane.b32.xlu0 %v5149_v60, %s8241_s27  ;;  %v7596_v50 = vcombine.low %v5752_v57, %v5752_v57  ;;  %v7603_v60 = vcombine.low %v5980_v43, %v5980_v43 }
 0x9f1   :  { %5159 = vrot.lane.b32.xlu1 %v5150_v47, %s8241_s27  ;;  %5323 = vrot.lane.b32.xlu0 %v5315_v13, %s10444_s28 }
 0x9f5   :  { %5325 = vrot.lane.b32.xlu1 %v5316_v7, %s10444_s28  ;;  %5106 = vrot.lane.b32.xlu0 %v5096_v10, %s8245_s16 }
 0x9f9   :  { %5108 = vrot.lane.b32.xlu1 %v5097_v0, %s8245_s16  ;;  %5102 = vrot.lane.b32.xlu0 %v5094_v26, %s8245_s16 }
 0x9fd   :  { %5104 = vrot.lane.b32.xlu1 %v5095_v45, %s8245_s16  ;;  %5455 = vrot.lane.b32.xlu0 %v5445_v27, %s8246_s13 }
 0xa01   :  { %5457 = vrot.lane.b32.xlu1 %v5446_v58, %s8246_s13  ;;  %5451 = vrot.lane.b32.xlu0 %v5443_v49, %s8246_s13 }
 0xa05   :  { %5453 = vrot.lane.b32.xlu1 %v5444_v23, %s8246_s13  ;;  %5511 = vperm.xlu0 %7925, %v9731_v15   ;;  %v5894_v15 = vrot.slane %v5889_v63, %v8371_v19 }
 0xa07   :  { %v7600_v8 = vcombine.low %v5894_v15, %v5894_v15 }
 0xa09   :  { %5516 = vperm.xlu1 %7926, %v8216_v4   ;;  %5927 = vrot.lane.b32.xlu0 %v7601_v32, %s8242_s7 }
 0xa0d   :  { %5955 = vrot.lane.b32.xlu1 %v7602_v55, %s8241_s27  ;;  %5860 = vrot.lane.b32.xlu0 %v7599_v11, %s10444_s28 }
 0xa11   :  { %5898 = vrot.lane.b32.xlu1 %v7600_v8, %s10441_s24  ;;  %5791 = vrot.lane.b32.xlu0 %v7597_v9, %s8244_s3 }
 0xa15   :  { %5825 = vrot.lane.b32.xlu1 %v7598_v46, %s8243_s5  ;;  %5984 = vrot.lane.b32.xlu0 %v7603_v60, %s8245_s16 }
 0xa19   :  { %5756 = vrot.lane.b32.xlu1 %v7596_v50, %s8246_s13 }
 0xa37   :  { %v5270_v28 = vpop.permute.xlu0 %5269 }
 0xa38   :  { %v5275_v1 = vrot.slane %v5270_v28, 4 }
 0xa3a   :  { %v5279_v47 = vsel %vm448_vm0, %v5270_v28, %v5275_v1 }
 0xa3b   :  { %5287 = vst.msk [vmem:[#allocation3 + $0xe0] sm:$0xf] %vm5068_vm9, %v5279_v47  ;;  %v5272_v13 = vpop.permute.xlu1 %5271  ;;  %v5413_v6 = vpop.permute.xlu0 %5412 }
 0xa3c   :  { %v5276_v25 = vrot.slane %v5272_v13, 4  ;;  %5422 = vst.msk [vmem:[#allocation3 + $0x1e0] sm:$0xf] %vm5068_vm9, %v5413_v6 }
 0xa3e   :  { %v5280_v7 = vsel %vm448_vm0, %v5272_v13, %v5276_v25 }
 0xa3f   :  { %5288 = vst.msk [vmem:[#allocation3 + $0xf0] sm:$0xf] %vm5068_vm9, %v5280_v7  ;;  %v5415_v10 = vpop.permute.xlu1 %5414  ;;  %v5216_v0 = vpop.permute.xlu0 %5215 }
 0xa40   :  { %5423 = vst.msk [vmem:[#allocation3 + $0x1f0] sm:$0xf] %vm5068_vm9, %v5415_v10  ;;  %v5221_v26 = vrot.slane %v5216_v0, 4 }
 0xa42   :  { %v5226_v22 = vsel %vm5223_vm1, %v5216_v0, %v5221_v26 }
 0xa43   :  { %5234 = vst.msk [vmem:[#allocation3 + $0xa0] sm:$0xf] %vm5068_vm9, %v5226_v22  ;;  %v5218_v21 = vpop.permute.xlu1 %5217  ;;  %v5371_v45 = vpop.permute.xlu0 %5370 }
 0xa44   :  { %v5222_v27 = vrot.slane %v5218_v21, 4  ;;  %5380 = vst.msk [vmem:[#allocation3 + $0x1a0] sm:$0xf] %vm5068_vm9, %v5371_v45 }
 0xa46   :  { %v5227_v53 = vsel %vm5223_vm1, %v5218_v21, %v5222_v27  ;;  %v8113_v2 = vld [vmem:[#allocation3 + $0xe0] ss:$16 sps:$4 sm:$0xff]  }
 0xa47   :  { %5235 = vst.msk [vmem:[#allocation3 + $0xb0] sm:$0xf] %vm5068_vm9, %v5227_v53  ;;  %v5373_v37 = vpop.permute.xlu1 %5372  ;;  %v5162_v58 = vpop.permute.xlu0 %5161  ;;  %v8112_v49 = vld [vmem:[#allocation3 + $0x1e0] ss:$16 sps:$4 sm:$0xff]  }
 0xa48   :  { %5381 = vst.msk [vmem:[#allocation3 + $0x1b0] sm:$0xf] %vm5068_vm9, %v5373_v37  ;;  %v5167_v35 = vrot.slane %v5162_v58, 4  ;;  %7795 = vmatprep.subr.bf16.mxu1 %v8112_v49  ;;  %v8124_v27 = vld [vmem:[#allocation3 + $0x120] ss:$16 sps:$4 sm:$0xff]  }
 0xa49   :  { %7796 = vmatpush3.bf16.msra.mxu1 %v8113_v2  ;;  %v8126_v2 = vld [vmem:[#allocation3 + $0x100] ss:$16 sps:$4 sm:$0xff]  }
 0xa4a   :  { %v5172_v23 = vsel %vm5169_vm6, %v5162_v58, %v5167_v35 }
 0xa4b   :  { %5180 = vst.msk [vmem:[#allocation3 + $0x60] sm:$0xf] %vm5068_vm9, %v5172_v23  ;;  %v5164_v24 = vpop.permute.xlu1 %5163  ;;  %v5328_v34 = vpop.permute.xlu0 %5327 }
 0xa4c   :  { %v5168_v59 = vrot.slane %v5164_v24, 4  ;;  %5337 = vst.msk [vmem:[#allocation3 + $0x160] sm:$0xf] %vm5068_vm9, %v5328_v34 }
 0xa4e   :  { %v5173_v56 = vsel %vm5169_vm6, %v5164_v24, %v5168_v59  ;;  %v8117_v44 = vld [vmem:[#allocation3 + $0xa0] ss:$16 sps:$4 sm:$0xff]  }
 0xa4f   :  { %5181 = vst.msk [vmem:[#allocation3 + $0x70] sm:$0xf] %vm5068_vm9, %v5173_v56  ;;  %v5330_v3 = vpop.permute.xlu1 %5329  ;;  %v5266_v17 = vpop.permute.xlu0 %5265  ;;  %v8116_v32 = vld [vmem:[#allocation3 + $0x1a0] ss:$16 sps:$4 sm:$0xff]   ;;  %v8133_v56 = vld [vmem:[%s10399_s8 + $0x8] ss:$12 sps:$4 sm:$0xff]  }
 0xa50   :  { %5338 = vst.msk [vmem:[#allocation3 + $0x170] sm:$0xf] %vm5068_vm9, %v5330_v3  ;;  %v5273_v41 = vrot.slane %v5266_v17, 4  ;;  %v8129_v24 = vld [vmem:[%s10399_s8] ss:$12 sps:$4 sm:$0xff]  }
 0xa51   :  { %v10016_v3 = vld [vmem:[#allocation2 + $0x48] sm:$0xff] }
 0xa52   :  { %v5277_v63 = vsel %vm448_vm0, %v5266_v17, %v5273_v41 }
 0xa53   :  { %5285 = vst.msk [vmem:[#allocation3 + $0xc0] sm:$0xf] %vm5068_vm9, %v5277_v63  ;;  %v5268_v18 = vpop.permute.xlu1 %5267  ;;  %v5409_v42 = vpop.permute.xlu0 %5408 }
 0xa54   :  { %v5274_v16 = vrot.slane %v5268_v18, 4  ;;  %5420 = vst.msk [vmem:[#allocation3 + $0x1c0] sm:$0xf] %vm5068_vm9, %v5409_v42 }
 0xa56   :  { %v5278_v52 = vsel %vm448_vm0, %v5268_v18, %v5274_v16  ;;  %v8121_v25 = vld [vmem:[#allocation3 + $0x60] ss:$16 sps:$4 sm:$0xff]  }
 0xa57   :  { %5286 = vst.msk [vmem:[#allocation3 + $0xd0] sm:$0xf] %vm5068_vm9, %v5278_v52  ;;  %v5411_v48 = vpop.permute.xlu1 %5410  ;;  %v5212_v61 = vpop.permute.xlu0 %5211  ;;  %v8120_v60 = vld [vmem:[#allocation3 + $0x160] ss:$16 sps:$4 sm:$0xff]  }
 0xa58   :  { %5421 = vst.msk [vmem:[#allocation3 + $0x1d0] sm:$0xf] %vm5068_vm9, %v5411_v48  ;;  %v5219_v31 = vrot.slane %v5212_v61, 4 }
 0xa5a   :  { %v5224_v15 = vsel %vm5223_vm1, %v5212_v61, %v5219_v31 }
 0xa5b   :  { %5232 = vst.msk [vmem:[#allocation3 + $0x80] sm:$0xf] %vm5068_vm9, %v5224_v15  ;;  %v5214_v62 = vpop.permute.xlu1 %5213  ;;  %v5367_v38 = vpop.permute.xlu0 %5366 }
 0xa5c   :  { %v5220_v4 = vrot.slane %v5214_v62, 4  ;;  %5378 = vst.msk [vmem:[#allocation3 + $0x180] sm:$0xf] %vm5068_vm9, %v5367_v38 }
 0xa5e   :  { %v5225_v55 = vsel %vm5223_vm1, %v5214_v62, %v5220_v4  ;;  %v8115_v30 = vld [vmem:[#allocation3 + $0xc0] ss:$16 sps:$4 sm:$0xff]  }
 0xa5f   :  { %5233 = vst.msk [vmem:[#allocation3 + $0x90] sm:$0xf] %vm5068_vm9, %v5225_v55  ;;  %v5369_v39 = vpop.permute.xlu1 %5368  ;;  %v5158_v5 = vpop.permute.xlu0 %5157  ;;  %v8114_v51 = vld [vmem:[#allocation3 + $0x1c0] ss:$16 sps:$4 sm:$0xff]  }
 0xa60   :  { %5379 = vst.msk [vmem:[#allocation3 + $0x190] sm:$0xf] %vm5068_vm9, %v5369_v39  ;;  %v5165_v12 = vrot.slane %v5158_v5, 4  ;;  %7797 = vmatprep.subr.bf16.mxu1 %v8114_v51 }
 0xa61   :  { %7798 = vmatpush3.bf16.msra.mxu1 %v8115_v30 }
 0xa62   :  { %v5170_v8 = vsel %vm5169_vm6, %v5158_v5, %v5165_v12  ;;  %7799 = vmatprep.subr.bf16.mxu1 %v8116_v32 }
 0xa63   :  { %5178 = vst.msk [vmem:[#allocation3 + $0x40] sm:$0xf] %vm5068_vm9, %v5170_v8  ;;  %v5160_v29 = vpop.permute.xlu1 %5159  ;;  %v5324_v40 = vpop.permute.xlu0 %5323 }
 0xa64   :  { %v5166_v11 = vrot.slane %v5160_v29, 4  ;;  %5335 = vst.msk [vmem:[#allocation3 + $0x140] sm:$0xf] %vm5068_vm9, %v5324_v40 }
 0xa65   :  { %7800 = vmatpush3.bf16.msra.mxu1 %v8117_v44 }
 0xa66   :  { %v5171_v36 = vsel %vm5169_vm6, %v5160_v29, %v5166_v11  ;;  %v8119_v50 = vld [vmem:[#allocation3 + $0x80] ss:$16 sps:$4 sm:$0xff]  }
 0xa67   :  { %5179 = vst.msk [vmem:[#allocation3 + $0x50] sm:$0xf] %vm5068_vm9, %v5171_v36  ;;  %v5326_v57 = vpop.permute.xlu1 %5325  ;;  %v5107_v46 = vpop.permute.xlu0 %5106  ;;  %v8118_v9 = vld [vmem:[#allocation3 + $0x180] ss:$16 sps:$4 sm:$0xff]  }
 0xa68   :  { %5336 = vst.msk [vmem:[#allocation3 + $0x150] sm:$0xf] %vm5068_vm9, %v5326_v57  ;;  %v5112_v43 = vrot.slane %v5107_v46, 4  ;;  %7801 = vmatprep.subr.bf16.mxu1 %v8118_v9 }
 0xa69   :  { %7802 = vmatpush3.bf16.msra.mxu1 %v8119_v50 }
 0xa6a   :  { %v5117_v28 = vsel %vm5114_vm4, %v5107_v46, %v5112_v43  ;;  %7803 = vmatprep.subr.bf16.mxu1 %v8120_v60 }
 0xa6b   :  { %5125 = vst.msk [vmem:[#allocation3 + $0x20] sm:$0xf] %vm5068_vm9, %v5117_v28  ;;  %v5109_v1 = vpop.permute.xlu1 %5108  ;;  %v5103_v47 = vpop.permute.xlu0 %5102 }
 0xa6c   :  { %v5113_v13 = vrot.slane %v5109_v1, 4  ;;  %v5110_v6 = vrot.slane %v5103_v47, 4 }
 0xa6d   :  { %7804 = vmatpush3.bf16.msra.mxu1 %v8121_v25 }
 0xa6e   :  { %v5118_v7 = vsel %vm5114_vm4, %v5109_v1, %v5113_v13  ;;  %v5115_v10 = vsel %vm5114_vm4, %v5103_v47, %v5110_v6  ;;  %v8123_v45 = vld [vmem:[#allocation3 + $0x40] ss:$16 sps:$4 sm:$0xff]  }
 0xa6f   :  { %5126 = vst.msk [vmem:[#allocation3 + $0x30] sm:$0xf] %vm5068_vm9, %v5118_v7  ;;  %5123 = vst.msk [vmem:[#allocation3] sm:$0xf] %vm5068_vm9, %v5115_v10  ;;  %v5105_v0 = vpop.permute.xlu1 %5104  ;;  %v5456_v26 = vpop.permute.xlu0 %5455  ;;  %v8122_v22 = vld [vmem:[#allocation3 + $0x140] ss:$16 sps:$4 sm:$0xff]  }
 0xa70   :  { %v5111_v21 = vrot.slane %v5105_v0, 4  ;;  %5465 = vst.msk [vmem:[#allocation3 + $0x220] sm:$0xf] %vm5068_vm9, %v5456_v26  ;;  %7805 = vmatprep.subr.bf16.mxu1 %v8122_v22 }
 0xa71   :  { %7806 = vmatpush3.bf16.msra.mxu1 %v8123_v45 }
 0xa72   :  { %v5116_v53 = vsel %vm5114_vm4, %v5105_v0, %v5111_v21  ;;  %7807 = vmatprep.subr.bf16.mxu1 %v8124_v27 }
 0xa73   :  { %5124 = vst.msk [vmem:[#allocation3 + $0x10] sm:$0xf] %vm5068_vm9, %v5116_v53  ;;  %v5458_v37 = vpop.permute.xlu1 %5457  ;;  %v5452_v58 = vpop.permute.xlu0 %5451 }
 0xa74   :  { %5466 = vst.msk [vmem:[#allocation3 + $0x230] sm:$0xf] %vm5068_vm9, %v5458_v37  ;;  %5463 = vst.msk [vmem:[#allocation3 + $0x200] sm:$0xf] %vm5068_vm9, %v5452_v58 }
 0xa76   :  { %v8125_v49 = vld [vmem:[#allocation3 + $0x20] ss:$16 sps:$4 sm:$0xff]  }
 0xa77   :  { %v5454_v35 = vpop.permute.xlu1 %5453  ;;  %7808 = vmatpush3.bf16.msra.mxu1 %v8125_v49 }
 0xa78   :  { %5464 = vst.msk [vmem:[#allocation3 + $0x210] sm:$0xf] %vm5068_vm9, %v5454_v35  ;;  %7809 = vmatprep.subr.bf16.mxu1 %v8126_v2 }
 0xa7a   :  { %v8127_v23 = vld [vmem:[#allocation3] ss:$16 sps:$4 sm:$0xff]  }
 0xa7b   :  { %v8128_v34 = vld [vmem:[#allocation3 + $0x220] ss:$16 sps:$4 sm:$0xff]   ;;  %7810 = vmatpush3.bf16.msra.mxu1 %v8127_v23 }
 0xa7c   :  { %7858 = vmatpush3.bf16.msra.mxu0 %v8128_v34  ;;  %7865 = vmatprep.subr.bf16.mxu1 %v8247_v33 }
 0xa7d   :  { %7859 = vmatprep.subr.bf16.mxu0 %v8247_v33 }
 0xa7e   :  { %5678 = vmatmul.mubr.bf16.vlgmr.msra.gmra.mxu1 %v8129_v24 }
 0xa7f   :  { %v8132_v59 = vld [vmem:[#allocation3 + $0x200] ss:$16 sps:$4 sm:$0xff]   ;;  %7869 = vmatprep.mubr.msk.bf16.mxu1 %vm8248_vm13, %v8247_v33 }
 0xa80   :  { %7860 = vmatpush3.bf16.msra.mxu0 %v8132_v59  ;;  %v5512_v63 = vpop.permute.xlu0 %5511 }
 0xa81   :  { %6097 = vmatprep.subr.bf16.mxu0 %v10016_v3 }
 0xa83   :  { %7862 = vmatmul.mubr.msk.bf16.vlgmr.msra.gmra.mxu0 %vm4820_vm14, %v8133_v56 }
 0xa84   :  { %v5517_v62 = vpop.permute.xlu1 %5516  ;;  %v5928_v40 = vpop.permute.xlu0 %5927 }
 0xa88   :  { %v5956_v29 = vpop.permute.xlu1 %5955  ;;  %v5861_v43 = vpop.permute.xlu0 %5860 }
 0xa89   :  { %v5862_v1 = vrot.slane %v5861_v43, 4 }
 0xa8b   :  { %v5863_v0 = vsel %vm425_vm5, %v5862_v1, %v5861_v43 }
 0xa8c   :  { %v5899_v46 = vpop.permute.xlu1 %5898  ;;  %v5792_v21 = vpop.permute.xlu0 %5791 }
 0xa8d   :  { %v5793_v37 = vrot.slane %v5792_v21, 4 }
 0xa8f   :  { %v5794_v23 = vsel %vm5146_vm8, %v5793_v37, %v5792_v21 }
 0xa90   :  { %v5826_v25 = vpop.permute.xlu1 %5825 }
 0xa91   :  { %v5827_v26 = vrot.slane %v5826_v25, 4 }
 0xa93   :  { %v5828_v53 = vsel %vm5200_vm7, %v5827_v26, %v5826_v25 }
 0xa94   :  { %v5757_v49 = vpop.permute.xlu1 %5756 }
 0xa95   :  { %v5758_v24 = vrot.slane %v5757_v49, 4 }
 0xa97   :  { %v5759_v56 = vsel %vm5091_vm12, %v5758_v24, %v5757_v49  ;;  %v8146_v24 = vld [vmem:[%s10401_s14 + $0x8] sm:$0xff]  }
 0xa98   :  { %7866 = vmatpush3.bf16.msra.mxu1 %v8146_v24 }
 0xa99   :  { %7867 = vmatprep.subr.bf16.mxu1 %v8247_v33 }
 0xb3e   :  { %v7811_v17 = vpop.f32.mrf.mxu1 }
 0xb40   :  { %v7812_v41 = vpop.f32.mrf.mxu1 }
 0xb41   :  { %v7813_v18 = vadd.f32 %v7812_v41, %v7811_v17 }
 0xb42   :  { %v7814_v42 = vpop.f32.mrf.mxu1 }
 0xb43   :  { %v5680_v16 = vadd.f32 %v7813_v18, %v5512_v63  ;;  %v5720_v52 = vpop.f32.mrf.mxu0  ;;  %v5985_v18 = vpop.permute.xlu0 %5984 }
 0xb44   :  { %v7815_v48 = vpop.f32.mrf.mxu1 }
 0xb45   :  { %v5721_v61 = vadd.f32 %v5720_v52, %v5680_v16  ;;  %v7816_v31 = vadd.f32 %v7815_v48, %v7814_v42  ;;  %v7863_v15 = vpop.f32.mrf.mxu0 }
 0xb46   :  { %v6020_v15 = vld [vmem:[%s10391_s2 + $0x8] sm:$0xff] }
 0xb47   :  { %vm5727_vm3 = vcmp.ge.f32.partialorder %v5721_v61, 0.0  ;;  %v5729_v38 = vmul.f32 -0.2, %v5721_v61  ;;  %v5683_v4 = vadd.f32 %v7816_v31, %v5517_v62  ;;  %v5723_v55 = vpop.f32.mrf.mxu0  ;;  %v10051_v31 = vld [vmem:[%s10391_s2] sm:$0xff]  ;;  %v8250_v62 = vmov 5  }
 0xb48   :  { %7927 = vset.pattern.permute.xlu1 %v8250_v62  ;;  %7928 = vset.pattern.permute.xlu0 %v8250_v62 }
 0xb49   :  { %v5731_v39 = vsel %vm5727_vm3, %v5721_v61, %v5729_v38  ;;  %v5724_v5 = vadd.f32 %v5723_v55, %v5683_v4  ;;  %v7864_v51 = vpop.f32.mrf.mxu0  ;;  %v8143_v61 = vld [vmem:[%s10400_s9 + $0x4] ss:$8 sps:$4 sm:$0xff]   ;;  %vm10448_vm3 = vcmask 982016  }
 0xb4a   :  { %v7705_v12 = vpack.c.bf16 %v5731_v39, %v5731_v39  ;;  %7615 = vmatprep.mubr.msk.bf16.mxu0 %vm264_vm2, %v8143_v61  ;;  %v6251_v61 = vld [vmem:[%s10394_s17] sm:$0x1] }
 0xb4b   :  { %vm5728_vm11 = vcmp.ge.f32.partialorder %v5724_v5, 0.0  ;;  %v5730_v30 = vmul.f32 -0.2, %v5724_v5 }
 0xb4c   :  { %5741 = vst.msk [vmem:[#allocation2 + $0x20] sm:$0xf] %vm5068_vm9, %v7705_v12 }
 0xb4d   :  { %v5732_v32 = vsel %vm5728_vm11, %v5724_v5, %v5730_v30  ;;  %vm10447_vm11 = vcmask 990208  }
 0xb4e   :  { %v7706_v8 = vpack.c.bf16 %v5732_v32, %v5732_v32  ;;  %vm10453_vm7 = vmmov %vm10447_vm11 }
 0xb4f   :  { %vm10454_vm8 = vmmov %vm10453_vm7 }
 0xb50   :  { %5742 = vst.msk [vmem:[#allocation2 + $0x44] sm:$0xf] %vm5068_vm9, %v7706_v8 }
 0xb53   :  { %v5942_v11 = vld [vmem:[#allocation2 + $0x20] sm:$0xf] }
 0xb54   :  { %v5958_v44 = vmul.bf16 %v5956_v29, %v5942_v11  ;;  %v5881_v36 = vld [vmem:[#allocation2 + $0x20] sm:$0xf] }
 0xb55   :  { %v5913_v57 = vld [vmem:[#allocation2 + $0x20] sm:$0xf]  ;;  %5883 = vst.msk [vmem:[#allocation3 + $0x80] sm:$0xf] %vm5068_vm9, %v5881_v36 }
 0xb56   :  { %5962 = vrot.lane.b32.xlu1 %v5958_v44, %s8244_s3  ;;  %v5930_v9 = vmul.bf16 %v5928_v40, %v5913_v57  ;;  %v5885_v28 = vld [vmem:[#allocation2 + $0x20] sm:$0xf] }
 0xb57   :  { %v5943_v50 = vld [vmem:[#allocation2 + $0x44] sm:$0xf]  ;;  %v5901_v6 = vmul.bf16 %v5899_v46, %v5885_v28  ;;  %v5846_v10 = vld [vmem:[#allocation2 + $0x1c] sm:$0xff] }
 0xb58   :  { %v5882_v60 = vld [vmem:[#allocation2 + $0x44] sm:$0xf]  ;;  %v5959_v47 = vmul.bf16 %v5956_v29, %v5943_v50  ;;  %v5865_v45 = vmul.bf16 %v5863_v0, %v5846_v10  ;;  %v5830_v35 = vmul.bf16 %v5846_v10, %v5828_v53  ;;  %v5796_v34 = vmul.bf16 %v5846_v10, %v5794_v23  ;;  %v5970_v63 = vld [vmem:[#allocation2 + $0x20] sm:$0xf] }
 0xb59   :  { %5884 = vst.msk [vmem:[#allocation3 + $0x90] sm:$0xf] %vm5068_vm9, %v5882_v60  ;;  %v5914_v13 = vld [vmem:[#allocation2 + $0x44] sm:$0xf]  ;;  %v5761_v17 = vmul.bf16 %v5846_v10, %v5759_v56  ;;  %v5987_v42 = vmul.bf16 %v5985_v18, %v5970_v63 }
 0xb5a   :  { %5934 = vrot.lane.b32.xlu1 %v5930_v9, %s8243_s5  ;;  %5964 = vrot.lane.b32.xlu0 %v5959_v47, %s8244_s3  ;;  %v5931_v7 = vmul.bf16 %v5928_v40, %v5914_v13  ;;  %v5886_v22 = vld [vmem:[#allocation2 + $0x44] sm:$0xf] }
 0xb5b   :  { %v5902_v27 = vmul.bf16 %v5899_v46, %v5886_v22  ;;  %v5847_v58 = vld [vmem:[#allocation2 + $0x40] sm:$0xff] }
 0xb5c   :  { %v5866_v2 = vmul.bf16 %v5863_v0, %v5847_v58  ;;  %v5831_v59 = vmul.bf16 %v5847_v58, %v5828_v53  ;;  %v5797_v41 = vmul.bf16 %v5847_v58, %v5794_v23  ;;  %v5762_v16 = vmul.bf16 %v5847_v58, %v5759_v56  ;;  %v5971_v52 = vld [vmem:[#allocation2 + $0x44] sm:$0xf]  ;;  %v8145_v23 = vld [vmem:[%s10400_s9] ss:$8 sps:$4 sm:$0xff]  }
 0xb5d   :  { %v5988_v48 = vmul.bf16 %v5985_v18, %v5971_v52  ;;  %v6393_v56 = vld [vmem:[%s10394_s17] sm:$0x4] }
 0xb5e   :  { %5905 = vrot.lane.b32.xlu1 %v5901_v6, %s10444_s28  ;;  %5936 = vrot.lane.b32.xlu0 %v5931_v7, %s8243_s5  ;;  %v6395_v63 = vshrl.u32 %v6393_v56, 16 }
 0xb60   :  { %v8137_v7 = vld [vmem:[#allocation3 + $0x80] ss:$16 sps:$4 sm:$0xff]  }
 0xb62   :  { %5869 = vrot.lane.b32.xlu1 %v5865_v45, %s10441_s24  ;;  %5907 = vrot.lane.b32.xlu0 %v5902_v27, %s10444_s28 }
 0xb66   :  { %5834 = vrot.lane.b32.xlu1 %v5830_v35, %s8242_s7  ;;  %5871 = vrot.lane.b32.xlu0 %v5866_v2, %s10441_s24 }
 0xb6a   :  { %5800 = vrot.lane.b32.xlu1 %v5796_v34, %s8241_s27  ;;  %5836 = vrot.lane.b32.xlu0 %v5831_v59, %s8242_s7  ;;  %v8147_v34 = vld [vmem:[%s10401_s14] sm:$0xff]  }
 0xb6b   :  { %7868 = vmatpush3.bf16.msra.mxu1 %v8147_v34  ;;  %v6428_v59 = vld [vmem:[%s10394_s17] sm:$0x8] }
 0xb6c   :  { %6583 = vmatprep.subr.bf16.mxu1 %v10016_v3 }
 0xb6e   :  { %5765 = vrot.lane.b32.xlu1 %v5761_v17, %s8245_s16  ;;  %5802 = vrot.lane.b32.xlu0 %v5797_v41, %s8241_s27  ;;  %v6359_v17 = vld [vmem:[%s10394_s17] sm:$0x4]  ;;  %v6430_v41 = vpack.i.b16 %v6428_v59, %v6428_v59 }
 0xb6f   :  { %v6361_v18 = vpack.i.b16 %v6359_v17, %v6359_v17 }
 0xb70   :  { %v6435_v62 = vrot.slane %v6430_v41, %v8368_v14 }
 0xb72   :  { %5991 = vrot.lane.b32.xlu1 %v5987_v42, %s8246_s13  ;;  %5767 = vrot.lane.b32.xlu0 %v5762_v16, %s8245_s16  ;;  %v6320_v42 = vld [vmem:[%s10394_s17] sm:$0x2] }
 0xb73   :  { %v6286_v16 = vld [vmem:[%s10394_s17] sm:$0x2]  ;;  %v6322_v52 = vshrl.u32 %v6320_v42, 16 }
 0xb76   :  { %5993 = vrot.lane.b32.xlu0 %v5988_v48, %s8246_s13  ;;  %6023 = vperm.xlu1 %7927, %v10051_v31   ;;  %v6288_v48 = vpack.i.b16 %v6286_v16, %v6286_v16 }
 0xb7a   :  { %6028 = vperm.xlu0 %7928, %v6020_v15   ;;  %v6217_v15 = vld [vmem:[%s10394_s17] sm:$0x1] }
 0xbc8   :  { %v5963_v38 = vpop.permute.xlu1 %5962 }
 0xbc9   :  { %5968 = vst.msk [vmem:[#allocation3 + $0xe0] sm:$0xf] %vm5068_vm9, %v5963_v38  ;;  %v6396_v38 = vpack.i.b16 %v6395_v63, %v6395_v63 }
 0xbcc   :  { %v5935_v4 = vpop.permute.xlu1 %5934  ;;  %v5965_v55 = vpop.permute.xlu0 %5964 }
 0xbcd   :  { %5940 = vst.msk [vmem:[#allocation3 + $0xc0] sm:$0xf] %vm5068_vm9, %v5935_v4  ;;  %5969 = vst.msk [vmem:[#allocation3 + $0xf0] sm:$0xf] %vm5068_vm9, %v5965_v55  ;;  %v6366_v4 = vrot.slane %v6361_v18, %v8371_v19  ;;  %v6253_v55 = vshrl.u32 %v6251_v61, 16 }
 0xbd0   :  { %v5906_v39 = vpop.permute.xlu1 %5905  ;;  %v5937_v5 = vpop.permute.xlu0 %5936 }
 0xbd1   :  { %5911 = vst.msk [vmem:[#allocation3 + $0xa0] sm:$0xf] %vm5068_vm9, %v5906_v39  ;;  %5941 = vst.msk [vmem:[#allocation3 + $0xd0] sm:$0xf] %vm5068_vm9, %v5937_v5  ;;  %v6462_v39 = vld [vmem:[%s10394_s17] sm:$0x8]  ;;  %v6323_v5 = vpack.i.b16 %v6322_v52, %v6322_v52 }
 0xbd4   :  { %v5870_v51 = vpop.permute.xlu1 %5869  ;;  %v5908_v30 = vpop.permute.xlu0 %5907  ;;  %v8134_v32 = vld [vmem:[#allocation3 + $0xe0] ss:$16 sps:$4 sm:$0xff]  }
 0xbd5   :  { %v5873_v12 = vrot.slane %v5870_v51, 4  ;;  %5912 = vst.msk [vmem:[#allocation3 + $0xb0] sm:$0xf] %vm5068_vm9, %v5908_v30  ;;  %6098 = vmatpush1.bf16.msra.mxu0 %v8134_v32  ;;  %v7627_v30 = vcombine.low %v6435_v62, %v6435_v62  ;;  %v6401_v32 = vrot.slane %v6396_v38, %v8371_v19 }
 0xbd6   :  { %6099 = vmatprep.subr.bf16.mxu0 %v10016_v3 }
 0xbd7   :  { %v5875_v8 = vsel %vm448_vm0, %v5870_v51, %v5873_v12  ;;  %v6293_v51 = vrot.slane %v6288_v48, %v8427_v20  ;;  %v6219_v12 = vpack.i.b16 %v6217_v15, %v6217_v15  ;;  %6439 = vrot.lane.b32.xlu1 %v7627_v30, %s8233_s20 }
 0xbd8   :  { %5879 = vst.msk [vmem:[#allocation3 + $0x60] sm:$0xf] %vm5068_vm9, %v5875_v8  ;;  %v5835_v29 = vpop.permute.xlu1 %5834  ;;  %v5872_v11 = vpop.permute.xlu0 %5871  ;;  %v8135_v44 = vld [vmem:[#allocation3 + $0xc0] ss:$16 sps:$4 sm:$0xff]   ;;  %v7625_v8 = vcombine.low %v6366_v4, %v6366_v4 }
 0xbd9   :  { %v5838_v40 = vrot.slane %v5835_v29, 4  ;;  %v5874_v36 = vrot.slane %v5872_v11, 4  ;;  %6100 = vmatpush1.bf16.msra.mxu0 %v8135_v44  ;;  %v7626_v44 = vcombine.low %v6401_v32, %v6401_v32 }
 0xbda   :  { %6101 = vmatprep.subr.bf16.mxu0 %v10016_v3  ;;  %6370 = vrot.lane.b32.xlu0 %v7625_v8, %s10441_s24 }
 0xbdb   :  { %v5840_v57 = vsel %vm5223_vm1, %v5835_v29, %v5838_v40  ;;  %v5876_v46 = vsel %vm448_vm0, %v5872_v11, %v5874_v36  ;;  %v6328_v29 = vrot.slane %v6323_v5, %v8427_v20  ;;  %v6254_v40 = vpack.i.b16 %v6253_v55, %v6253_v55  ;;  %6405 = vrot.lane.b32.xlu1 %v7626_v44, %s8234_s1 }
 0xbdc   :  { %5844 = vst.msk [vmem:[#allocation3 + $0x40] sm:$0xf] %vm5068_vm9, %v5840_v57  ;;  %v5801_v9 = vpop.permute.xlu1 %5800  ;;  %5880 = vst.msk [vmem:[#allocation3 + $0x70] sm:$0xf] %vm5068_vm9, %v5876_v46  ;;  %v5837_v50 = vpop.permute.xlu0 %5836  ;;  %v8136_v60 = vld [vmem:[#allocation3 + $0xa0] ss:$16 sps:$4 sm:$0xff]   ;;  %v7623_v36 = vcombine.low %v6293_v51, %v6293_v51  ;;  %v6224_v57 = vrot.slane %v6219_v12, %v8447_v54 }
 0xbdd   :  { %v5804_v43 = vrot.slane %v5801_v9, 4  ;;  %v5839_v28 = vrot.slane %v5837_v50, 4  ;;  %6102 = vmatpush1.bf16.msra.mxu0 %v8136_v60  ;;  %v6464_v11 = vshrl.u32 %v6462_v39, 16 }
 0xbde   :  { %6103 = vmatprep.subr.bf16.mxu0 %v10016_v3  ;;  %6297 = vrot.lane.b32.xlu0 %v7623_v36, %s8235_s4 }
 0xbdf   :  { %v5806_v1 = vsel %vm5169_vm6, %v5801_v9, %v5804_v43  ;;  %v5841_v47 = vsel %vm5223_vm1, %v5837_v50, %v5839_v28  ;;  %v6465_v46 = vpack.i.b16 %v6464_v11, %v6464_v11  ;;  %v7624_v9 = vcombine.low %v6328_v29, %v6328_v29 }
 0xbe0   :  { %5810 = vst.msk [vmem:[#allocation3 + $0x20] sm:$0xf] %vm5068_vm9, %v5806_v1  ;;  %v5766_v13 = vpop.permute.xlu1 %5765  ;;  %5845 = vst.msk [vmem:[#allocation3 + $0x50] sm:$0xf] %vm5068_vm9, %v5841_v47  ;;  %v5803_v25 = vpop.permute.xlu0 %5802  ;;  %v6259_v43 = vrot.slane %v6254_v40, %v8447_v54  ;;  %v7621_v50 = vcombine.low %v6224_v57, %v6224_v57 }
 0xbe1   :  { %v5769_v6 = vrot.slane %v5766_v13, 4  ;;  %v5805_v10 = vrot.slane %v5803_v25, 4  ;;  %6104 = vmatpush1.bf16.msra.mxu0 %v8137_v7  ;;  %6332 = vrot.lane.b32.xlu1 %v7624_v9, %s10444_s28  ;;  %v6470_v28 = vrot.slane %v6465_v46, %v8368_v14 }
 0xbe2   :  { %6105 = vmatprep.subr.bf16.mxu0 %v10016_v3  ;;  %v7622_v60 = vcombine.low %v6259_v43, %v6259_v43  ;;  %6228 = vrot.lane.b32.xlu0 %v7621_v50, %s8236_s30 }
 0xbe3   :  { %v5771_v0 = vsel %vm5114_vm4, %v5766_v13, %v5769_v6  ;;  %v5807_v26 = vsel %vm5169_vm6, %v5803_v25, %v5805_v10  ;;  %v8138_v21 = vld [vmem:[#allocation3 + $0x60] ss:$16 sps:$4 sm:$0xff]   ;;  %v7628_v1 = vcombine.low %v6470_v28, %v6470_v28  ;;  %vm10450_vm6 = vcmask 72704  }
 0xbe4   :  { %5775 = vst.msk [vmem:[#allocation3] sm:$0xf] %vm5068_vm9, %v5771_v0  ;;  %v5992_v22 = vpop.permute.xlu1 %5991  ;;  %5811 = vst.msk [vmem:[#allocation3 + $0x30] sm:$0xf] %vm5068_vm9, %v5807_v26  ;;  %v5768_v45 = vpop.permute.xlu0 %5767 }
 0xbe5   :  { %5997 = vst.msk [vmem:[#allocation3 + $0x100] sm:$0xf] %vm5068_vm9, %v5992_v22  ;;  %v5770_v27 = vrot.slane %v5768_v45, 4  ;;  %6106 = vmatpush1.bf16.msra.mxu0 %v8138_v21  ;;  %6263 = vrot.lane.b32.xlu1 %v7622_v60, %s8237_s23  ;;  %vm10455_vm12 = vmmov %vm10450_vm6 }
 0xbe6   :  { %6107 = vmatprep.subr.bf16.mxu0 %v10016_v3 }
 0xbe7   :  { %v5772_v53 = vsel %vm5114_vm4, %v5768_v45, %v5770_v27  ;;  %v8139_v37 = vld [vmem:[#allocation3 + $0x40] ss:$16 sps:$4 sm:$0xff]   ;;  %vm10449_vm4 = vcmask 973824  }
 0xbe8   :  { %5776 = vst.msk [vmem:[#allocation3 + $0x10] sm:$0xf] %vm5068_vm9, %v5772_v53  ;;  %v5994_v58 = vpop.permute.xlu0 %5993 }
 0xbe9   :  { %5998 = vst.msk [vmem:[#allocation3 + $0x110] sm:$0xf] %vm5068_vm9, %v5994_v58  ;;  %6108 = vmatpush1.bf16.msra.mxu0 %v8139_v37  ;;  %6474 = vrot.lane.b32.xlu1 %v7628_v1, %s10446_s21 }
 0xbea   :  { %6109 = vmatprep.subr.bf16.mxu0 %v10016_v3 }
 0xbeb   :  { %v8140_v49 = vld [vmem:[#allocation3 + $0x20] ss:$16 sps:$4 sm:$0xff]  }
 0xbed   :  { %6110 = vmatpush1.bf16.msra.mxu0 %v8140_v49 }
 0xbee   :  { %6111 = vmatprep.subr.bf16.mxu0 %v10016_v3 }
 0xbef   :  { %v8141_v35 = vld [vmem:[#allocation3] ss:$16 sps:$4 sm:$0xff]  }
 0xbf0   :  { %v8142_v2 = vld [vmem:[#allocation3 + $0x100] ss:$16 sps:$4 sm:$0xff]  }
 0xbf1   :  { %6112 = vmatpush1.bf16.msra.mxu0 %v8141_v35  ;;  %v6024_v47 = vpop.permute.xlu1 %6023 }
 0xbf2   :  { %6127 = vmatprep.subr.bf16.mxu0 %v10016_v3 }
 0xbf5   :  { %6128 = vmatpush2.bf16.msra.mxu0 %v8142_v2  ;;  %v6029_v7 = vpop.permute.xlu0 %6028 }
 0xbf6   :  { %7873 = vmatprep.subr.bf16.mxu0 %v8247_v33 }
 0xbf8   :  { %6130 = vmatmul.mubr.bf16.vlgmr.msra.gmra.mxu0 %v8145_v23 }
 0xbf9   :  { %7883 = vmatprep.mubr.msk.bf16.mxu0 %vm8248_vm13, %v8247_v33  ;;  %vm10456_vm13 = vmmov %vm10450_vm6 }
 0xc49   :  { %v6440_v49 = vpop.permute.xlu1 %6439 }
 0xc4a   :  { %v6441_v23 = vrot.slane %v6440_v49, 4 }
 0xc4c   :  { %v6442_v56 = vsel %vm3761_vm15, %v6441_v23, %v6440_v49  ;;  %v6371_v18 = vpop.permute.xlu0 %6370  ;;  %v6733_v49 = vld [vmem:[%s10394_s17] sm:$0x4]  ;;  %v6705_v23 = vld [vmem:[%s10394_s17] sm:$0x2] }
 0xc4d   :  { %v6406_v59 = vpop.permute.xlu1 %6405  ;;  %v6372_v52 = vrot.slane %v6371_v18, 4 }
 0xc4e   :  { %v6407_v17 = vrot.slane %v6406_v59, 4 }
 0xc4f   :  { %v6373_v55 = vsel %vm448_vm0, %v6372_v52, %v6371_v18  ;;  %v6707_v52 = vshrl.u32 %v6705_v23, 16 }
 0xc50   :  { %v6408_v16 = vsel %vm3797_vm10, %v6407_v17, %v6406_v59  ;;  %v6298_v5 = vpop.permute.xlu0 %6297  ;;  %v6629_v17 = vld [vmem:[%s10394_s17] sm:$0x1] }
 0xc51   :  { %v6299_v32 = vrot.slane %v6298_v5, 4  ;;  %v6631_v18 = vpack.i.b16 %v6629_v17, %v6629_v17 }
 0xc53   :  { %v6333_v62 = vpop.permute.xlu1 %6332  ;;  %v6300_v36 = vsel %vm10447_vm11, %v6299_v32, %v6298_v5 }
 0xc54   :  { %v6334_v4 = vrot.slane %v6333_v62, 4  ;;  %v6229_v57 = vpop.permute.xlu0 %6228 }
 0xc55   :  { %v6230_v50 = vrot.slane %v6229_v57, 4 }
 0xc56   :  { %v6335_v12 = vsel %vm425_vm5, %v6334_v4, %v6333_v62  ;;  %v6636_v4 = vrot.slane %v6631_v18, %v8447_v54 }
 0xc57   :  { %v6264_v29 = vpop.permute.xlu1 %6263 }
 0xc58   :  { %v6265_v44 = vrot.slane %v6264_v29, 4 }
 0xc5a   :  { %v6266_v43 = vsel %vm10448_vm3, %v6265_v44, %v6264_v29 }
 0xc5b   :  { %v6475_v60 = vpop.permute.xlu1 %6474 }
 0xcb8   :  { %v6131_v13 = vpop.f32.mrf.mxu0 }
 0xcb9   :  { %v6132_v6 = vadd.f32 %v6131_v13, %v6024_v47  ;;  %v6476_v47 = vrot.slane %v6475_v60, 4  ;;  %v6231_v13 = vsel %vm10449_vm4, %v6230_v50, %v6229_v57 }
 0xcba   :  { %v6133_v25 = vpop.f32.mrf.mxu0 }
 0xcbb   :  { %v6140_v0 = vmul.f32 -0.2, %v6132_v6  ;;  %vm6138_vm1 = vcmp.ge.f32.partialorder %v6132_v6, 0.0 }
 0xcbc   :  { %v6134_v10 = vpop.f32.mrf.mxu0 }
 0xcbd   :  { %v6135_v26 = vadd.f32 %v6134_v10, %v6029_v7  ;;  %v6142_v45 = vsel %vm6138_vm1, %v6132_v6, %v6140_v0  ;;  %v6477_v7 = vsel %vm10450_vm6, %v6476_v47, %v6475_v60  ;;  %vm10457_vm1 = vmmov %vm10449_vm4 }
 0xcbe   :  { %v6136_v22 = vpop.f32.mrf.mxu0  ;;  %vm10460_vm4 = vmmov %vm10453_vm7 }
 0xcbf   :  { %vm6139_vm9 = vcmp.ge.f32.partialorder %v6135_v26, 0.0  ;;  %v6141_v21 = vmul.f32 -0.2, %v6135_v26  ;;  %v10171_v22 = vld [vmem:[%s10402_s10] sm:$0xff] }
 0xcc1   :  { %v6143_v27 = vsel %vm6139_vm9, %v6135_v26, %v6141_v21  ;;  %v7630_v21 = vcombine.high %v10171_v22, %v10171_v22  ;;  %vm10458_vm9 = vmmov %vm10457_vm1 }
 0xcc2   :  { %v6144_v53 = vpack.c.bf16 %v6143_v27, %v6142_v45  ;;  %v6809_v45 = vld [vmem:[%s10394_s17] sm:$0x8]  ;;  %v6758_v27 = vld [vmem:[%s10394_s17] sm:$0x4] }
 0xcc4   :  { %7870 = vmatmul.mubr.msk.bf16.vlgmr.msra.gmra.mxu1 %vm4820_vm14, %v6144_v53  ;;  %v8251_v53 = vmov 6  }
 0xcc5   :  { %7640 = vmatprep.mubr.msk.bf16.mxu1 %vm264_vm2, %v7630_v21  ;;  %7929 = vset.pattern.permute.xlu0 %v8251_v53  ;;  %vm10451_vm2 = vmmov %vm10448_vm3 }
 0xcc6   :  { %vm10452_vm14 = vmmov %vm10451_vm2 }
 0xcc7   :  { %vm10459_vm3 = vmmov %vm10450_vm6 }
 0xcc8   :  { %vm10461_vm6 = vmmov %vm10451_vm2 }
 0xd84   :  { %v6198_v37 = vpop.f32.mrf.mxu1 }
 0xd85   :  { %v7707_v58 = vpack.c.bf16 %v6198_v37, %v6198_v37  ;;  %v6811_v37 = vshrl.u32 %v6809_v45, 16 }
 0xd86   :  { %v7871_v35 = vpop.f32.mrf.mxu1 }
 0xd87   :  { %6213 = vst [vmem:[#allocation2 + $0x18] sm:$0xf] %v7707_v58  ;;  %v6760_v58 = vshrl.u32 %v6758_v27, 16  ;;  %v6784_v35 = vld [vmem:[%s10394_s17] sm:$0x8] }
 0xd88   :  { %v6201_v2 = vpop.f32.mrf.mxu1 }
 0xd89   :  { %v7708_v24 = vpack.c.bf16 %v6201_v2, %v6201_v2  ;;  %v6786_v2 = vpack.i.b16 %v6784_v35, %v6784_v35  ;;  %v6761_v59 = vpack.i.b16 %v6760_v58, %v6760_v58 }
 0xd8a   :  { %v7872_v34 = vpop.f32.mrf.mxu1 }
 0xd8b   :  { %6214 = vst [vmem:[#allocation2 + $0x3c] sm:$0xf] %v7708_v24  ;;  %v6680_v24 = vld [vmem:[%s10394_s17] sm:$0x2]  ;;  %v6812_v34 = vpack.i.b16 %v6811_v37, %v6811_v37 }
 0xd8e   :  { %v6460_v41 = vld [vmem:[#allocation2 + $0x18] sm:$0xff] }
 0xd8f   :  { %v6353_v63 = vld [vmem:[#allocation2 + $0x18] sm:$0xf]  ;;  %v6444_v42 = vmul.bf16 %v6460_v41, %v6442_v56  ;;  %v6410_v38 = vmul.bf16 %v6460_v41, %v6408_v16  ;;  %v6375_v51 = vmul.bf16 %v6460_v41, %v6373_v55  ;;  %v6479_v0 = vmul.bf16 %v6477_v7, %v6460_v41 }
 0xd90   :  { %6355 = vst [vmem:[#allocation3 + $0x80] sm:$0xf] %v6353_v63  ;;  %v6249_v30 = vld [vmem:[#allocation2 + $0x14] sm:$0xff]  ;;  %v6735_v41 = vpack.i.b16 %v6733_v49, %v6733_v49  ;;  %v6791_v63 = vrot.slane %v6786_v2, %v8368_v14 }
 0xd91   :  { %6448 = vrot.lane.b32.xlu0 %v6444_v42, %s8237_s23  ;;  %v6337_v11 = vmul.bf16 %v6335_v12, %v6249_v30  ;;  %v6302_v9 = vmul.bf16 %v6300_v36, %v6249_v30  ;;  %v6268_v1 = vmul.bf16 %v6266_v43, %v6249_v30  ;;  %v6233_v25 = vmul.bf16 %v6249_v30, %v6231_v13 }
 0xd92   :  { %v6461_v48 = vld [vmem:[#allocation2 + $0x3c] sm:$0xff]  ;;  %v6817_v42 = vrot.slane %v6812_v34, %v8368_v14  ;;  %v6740_v14 = vrot.slane %v6735_v41, %v8371_v19 }
 0xd93   :  { %v6354_v61 = vld [vmem:[#allocation2 + $0x3c] sm:$0xf]  ;;  %v6445_v15 = vmul.bf16 %v6461_v48, %v6442_v56  ;;  %v6411_v39 = vmul.bf16 %v6461_v48, %v6408_v16  ;;  %v6376_v8 = vmul.bf16 %v6461_v48, %v6373_v55  ;;  %v6480_v26 = vmul.bf16 %v6477_v7, %v6461_v48 }
 0xd94   :  { %6356 = vst [vmem:[#allocation3 + $0x90] sm:$0xf] %v6354_v61  ;;  %v6216_v40 = vld [vmem:[#allocation2 + $0x38] sm:$0xff]  ;;  %v6682_v56 = vpack.i.b16 %v6680_v24, %v6680_v24  ;;  %v6766_v16 = vrot.slane %v6761_v59, %v8371_v19  ;;  %v7647_v61 = vcombine.low %v6791_v63, %v6791_v63  ;;  %v7648_v62 = vcombine.low %v6817_v42, %v6817_v42 }
 0xd95   :  { %6450 = vrot.lane.b32.xlu1 %v6445_v15, %s8237_s23  ;;  %6414 = vrot.lane.b32.xlu0 %v6410_v38, %s8235_s4  ;;  %v6338_v46 = vmul.bf16 %v6335_v12, %v6216_v40  ;;  %v6303_v28 = vmul.bf16 %v6300_v36, %v6216_v40  ;;  %v6269_v6 = vmul.bf16 %v6266_v43, %v6216_v40  ;;  %v6654_v15 = vld [vmem:[%s10394_s17] sm:$0x1] }
 0xd96   :  { %v6234_v10 = vmul.bf16 %v6231_v13, %v6216_v40  ;;  %v6687_v48 = vrot.slane %v6682_v56, %v8427_v20  ;;  %v7646_v55 = vcombine.low %v6766_v16, %v6766_v16  ;;  %v6656_v5 = vshrl.u32 %v6654_v15, 16 }
 0xd97   :  { %v7645_v12 = vcombine.low %v6740_v14, %v6740_v14 }
 0xd98   :  { %v7643_v38 = vcombine.low %v6687_v48, %v6687_v48  ;;  %v6657_v32 = vpack.i.b16 %v6656_v5, %v6656_v5 }
 0xd99   :  { %6416 = vrot.lane.b32.xlu1 %v6411_v39, %s8235_s4  ;;  %6379 = vrot.lane.b32.xlu0 %v6375_v51, %s10444_s28  ;;  %v6708_v39 = vpack.i.b16 %v6707_v52, %v6707_v52  ;;  %v7641_v51 = vcombine.low %v6636_v4, %v6636_v4 }
 0xd9a   :  { %v6662_v29 = vrot.slane %v6657_v32, %v8447_v54 }
 0xd9b   :  { %v6713_v30 = vrot.slane %v6708_v39, %v8427_v20  ;;  %v8151_v16 = vld [vmem:[#allocation3 + $0x80] ss:$16 sps:$4 sm:$0xff]  }
 0xd9c   :  { %v7642_v19 = vcombine.low %v6662_v29, %v6662_v29 }
 0xd9d   :  { %6381 = vrot.lane.b32.xlu1 %v6376_v8, %s10444_s28  ;;  %6341 = vrot.lane.b32.xlu0 %v6337_v11, %s10441_s24  ;;  %v7644_v8 = vcombine.low %v6713_v30, %v6713_v30 }
 0xda1   :  { %6343 = vrot.lane.b32.xlu1 %v6338_v46, %s10441_s24  ;;  %6306 = vrot.lane.b32.xlu0 %v6302_v9, %s8234_s1 }
 0xda5   :  { %6308 = vrot.lane.b32.xlu1 %v6303_v28, %s8234_s1  ;;  %6272 = vrot.lane.b32.xlu0 %v6268_v1, %s8233_s20 }
 0xda9   :  { %6274 = vrot.lane.b32.xlu1 %v6269_v6, %s8233_s20  ;;  %6237 = vrot.lane.b32.xlu0 %v6233_v25, %s10446_s21 }
 0xdad   :  { %6239 = vrot.lane.b32.xlu1 %v6234_v10, %s10446_s21  ;;  %6483 = vrot.lane.b32.xlu0 %v6479_v0, %s8236_s30 }
 0xdb1   :  { %6485 = vrot.lane.b32.xlu1 %v6480_v26, %s8236_s30  ;;  %6517 = vperm.xlu0 %7929, %v10051_v31  }
 0xdb5   :  { %6795 = vrot.lane.b32.xlu0 %v7647_v61, %s8233_s20  ;;  %6821 = vrot.lane.b32.xlu1 %v7648_v62, %s10446_s21 }
 0xdb9   :  { %6691 = vrot.lane.b32.xlu0 %v7643_v38, %s8235_s4  ;;  %6770 = vrot.lane.b32.xlu1 %v7646_v55, %s8234_s1 }
 0xdbd   :  { %6640 = vrot.lane.b32.xlu0 %v7641_v51, %s8236_s30  ;;  %6744 = vrot.lane.b32.xlu1 %v7645_v12, %s10441_s24 }
 0xdc1   :  { %6717 = vrot.lane.b32.xlu1 %v7644_v8, %s10444_s28  ;;  %v7629_v8 = vcombine.low %v10171_v22, %v10171_v22 }
 0xdc5   :  { %6666 = vrot.lane.b32.xlu1 %v7642_v19, %s8237_s23 }
 0xe03   :  { %v6449_v40 = vpop.permute.xlu0 %6448 }
 0xe04   :  { %v6452_v11 = vrot.slane %v6449_v40, 4 }
 0xe06   :  { %v6454_v44 = vsel %vm10451_vm2, %v6449_v40, %v6452_v11  ;;  %vm10462_vm2 = vmmov %vm10457_vm1 }
 0xe07   :  { %v6451_v36 = vpop.permute.xlu1 %6450  ;;  %6458 = vst [vmem:[#allocation3 + $0xe0] sm:$0xf] %v6454_v44  ;;  %v6415_v57 = vpop.permute.xlu0 %6414 }
 0xe08   :  { %v6453_v20 = vrot.slane %v6451_v36, 4  ;;  %v6418_v46 = vrot.slane %v6415_v57, 4 }
 0xe0a   :  { %v6455_v9 = vsel %vm10452_vm14, %v6451_v36, %v6453_v20  ;;  %v6420_v43 = vsel %vm10453_vm7, %v6415_v57, %v6418_v46  ;;  %vm10463_vm14 = vmmov %vm10460_vm4 }
 0xe0b   :  { %6459 = vst [vmem:[#allocation3 + $0xf0] sm:$0xf] %v6455_v9  ;;  %v6417_v54 = vpop.permute.xlu1 %6416  ;;  %6424 = vst [vmem:[#allocation3 + $0xc0] sm:$0xf] %v6420_v43  ;;  %v6380_v60 = vpop.permute.xlu0 %6379 }
 0xe0c   :  { %v6419_v50 = vrot.slane %v6417_v54, 4  ;;  %v6383_v28 = vrot.slane %v6380_v60, 4  ;;  %vm10464_vm7 = vmmov %vm10457_vm1 }
 0xe0e   :  { %v6421_v1 = vsel %vm10454_vm8, %v6417_v54, %v6419_v50  ;;  %v6385_v47 = vsel %vm425_vm5, %v6380_v60, %v6383_v28  ;;  %vm10465_vm8 = vmmov %vm10461_vm6 }
 0xe0f   :  { %6425 = vst [vmem:[#allocation3 + $0xd0] sm:$0xf] %v6421_v1  ;;  %v6382_v13 = vpop.permute.xlu1 %6381  ;;  %6389 = vst [vmem:[#allocation3 + $0xa0] sm:$0xf] %v6385_v47  ;;  %v6342_v25 = vpop.permute.xlu0 %6341 }
 0xe10   :  { %v6384_v6 = vrot.slane %v6382_v13, 4  ;;  %v6345_v7 = vrot.slane %v6342_v25, 4 }
 0xe12   :  { %v6386_v10 = vsel %vm425_vm5, %v6382_v13, %v6384_v6  ;;  %v8148_v0 = vld [vmem:[#allocation3 + $0xe0] ss:$16 sps:$4 sm:$0xff]   ;;  %v6347_v26 = vsel %vm448_vm0, %v6342_v25, %v6345_v7 }
 0xe13   :  { %6390 = vst [vmem:[#allocation3 + $0xb0] sm:$0xf] %v6386_v10  ;;  %v6344_v21 = vpop.permute.xlu1 %6343  ;;  %6351 = vst [vmem:[#allocation3 + $0x60] sm:$0xf] %v6347_v26  ;;  %v6307_v27 = vpop.permute.xlu0 %6306  ;;  %6584 = vmatpush1.bf16.msra.mxu1 %v8148_v0 }
 0xe14   :  { %v6346_v45 = vrot.slane %v6344_v21, 4  ;;  %v6310_v53 = vrot.slane %v6307_v27, 4  ;;  %6585 = vmatprep.subr.bf16.mxu1 %v10016_v3 }
 0xe16   :  { %v6348_v37 = vsel %vm448_vm0, %v6344_v21, %v6346_v45  ;;  %v8149_v58 = vld [vmem:[#allocation3 + $0xc0] ss:$16 sps:$4 sm:$0xff]   ;;  %v6312_v49 = vsel %vm3797_vm10, %v6307_v27, %v6310_v53 }
 0xe17   :  { %6352 = vst [vmem:[#allocation3 + $0x70] sm:$0xf] %v6348_v37  ;;  %v6309_v35 = vpop.permute.xlu1 %6308  ;;  %6316 = vst [vmem:[#allocation3 + $0x40] sm:$0xf] %v6312_v49  ;;  %v6273_v23 = vpop.permute.xlu0 %6272  ;;  %6586 = vmatpush1.bf16.msra.mxu1 %v8149_v58 }
 0xe18   :  { %v6311_v2 = vrot.slane %v6309_v35, 4  ;;  %v6276_v24 = vrot.slane %v6273_v23, 4  ;;  %6587 = vmatprep.subr.bf16.mxu1 %v10016_v3 }
 0xe1a   :  { %v6313_v34 = vsel %vm3797_vm10, %v6309_v35, %v6311_v2  ;;  %v8150_v59 = vld [vmem:[#allocation3 + $0xa0] ss:$16 sps:$4 sm:$0xff]   ;;  %v6278_v56 = vsel %vm3761_vm15, %v6273_v23, %v6276_v24 }
 0xe1b   :  { %6317 = vst [vmem:[#allocation3 + $0x50] sm:$0xf] %v6313_v34  ;;  %v6275_v17 = vpop.permute.xlu1 %6274  ;;  %6282 = vst [vmem:[#allocation3 + $0x20] sm:$0xf] %v6278_v56  ;;  %v6238_v63 = vpop.permute.xlu0 %6237  ;;  %6588 = vmatpush1.bf16.msra.mxu1 %v8150_v59 }
 0xe1c   :  { %v6277_v41 = vrot.slane %v6275_v17, 4  ;;  %v6241_v18 = vrot.slane %v6238_v63, 4  ;;  %6589 = vmatprep.subr.bf16.mxu1 %v10016_v3 }
 0xe1e   :  { %v6279_v42 = vsel %vm3761_vm15, %v6275_v17, %v6277_v41  ;;  %v6243_v52 = vsel %vm10455_vm12, %v6238_v63, %v6241_v18  ;;  %v8152_v4 = vld [vmem:[#allocation3 + $0x60] ss:$16 sps:$4 sm:$0xff]   ;;  %vm10467_vm12 = vmmov %vm10459_vm3 }
 0xe1f   :  { %6283 = vst [vmem:[#allocation3 + $0x30] sm:$0xf] %v6279_v42  ;;  %v6240_v48 = vpop.permute.xlu1 %6239  ;;  %6247 = vst [vmem:[#allocation3] sm:$0xf] %v6243_v52  ;;  %v6484_v15 = vpop.permute.xlu0 %6483  ;;  %6590 = vmatpush1.bf16.msra.mxu1 %v8151_v16  ;;  %v8252_v42 = vmov 7  }
 0xe20   :  { %v6242_v61 = vrot.slane %v6240_v48, 4  ;;  %v6487_v62 = vrot.slane %v6484_v15, 4  ;;  %6591 = vmatprep.subr.bf16.mxu1 %v10016_v3  ;;  %7930 = vset.pattern.permute.xlu0 %v8252_v42  ;;  %v8164_v16 = vld [vmem:[%s10403_s15 + $0xe0] ss:$16 sps:$4 sm:$0xff]   ;;  %v8166_v52 = vld [vmem:[%s10403_s15 + $0xe4] ss:$16 sps:$4 sm:$0xff]  }
 0xe21   :  { %v8209_v42 = vld [vmem:[%s10403_s15 + $0x8] ss:$16 sps:$4 sm:$0xff]  }
 0xe22   :  { %v6244_v38 = vsel %vm10456_vm13, %v6240_v48, %v6242_v61  ;;  %v6489_v55 = vsel %vm10457_vm1, %v6484_v15, %v6487_v62  ;;  %v8153_v51 = vld [vmem:[#allocation3 + $0x40] ss:$16 sps:$4 sm:$0xff]   ;;  %v8172_v48 = vld [vmem:[%s10403_s15 + $0xc4] ss:$16 sps:$4 sm:$0xff]  }
 0xe23   :  { %6248 = vst [vmem:[#allocation3 + $0x10] sm:$0xf] %v6244_v38  ;;  %v6486_v14 = vpop.permute.xlu1 %6485  ;;  %6493 = vst [vmem:[#allocation3 + $0x100] sm:$0xf] %v6489_v55  ;;  %6592 = vmatpush1.bf16.msra.mxu1 %v8152_v4  ;;  %v8170_v61 = vld [vmem:[%s10403_s15 + $0xc0] ss:$16 sps:$4 sm:$0xff]  }
 0xe24   :  { %v6488_v39 = vrot.slane %v6486_v14, 4  ;;  %6593 = vmatprep.subr.bf16.mxu1 %v10016_v3  ;;  %v8178_v15 = vld [vmem:[%s10403_s15 + $0xa4] ss:$16 sps:$4 sm:$0xff]   ;;  %v8182_v38 = vld [vmem:[%s10403_s15 + $0x80] ss:$16 sps:$4 sm:$0xff]  }
 0xe25   :  { %v8184_v62 = vld [vmem:[%s10403_s15 + $0x84] ss:$16 sps:$4 sm:$0xff]   ;;  %v8188_v55 = vld [vmem:[%s10403_s15 + $0x60] ss:$16 sps:$4 sm:$0xff]  }
 0xe26   :  { %v6490_v5 = vsel %vm10458_vm9, %v6486_v14, %v6488_v39  ;;  %v8154_v12 = vld [vmem:[#allocation3 + $0x20] ss:$16 sps:$4 sm:$0xff]   ;;  %v8190_v4 = vld [vmem:[%s10403_s15 + $0x64] ss:$16 sps:$4 sm:$0xff]  }
 0xe27   :  { %6494 = vst [vmem:[#allocation3 + $0x110] sm:$0xf] %v6490_v5  ;;  %6594 = vmatpush1.bf16.msra.mxu1 %v8153_v51  ;;  %v6822_v29 = vpop.permute.xlu1 %6821  ;;  %v8196_v14 = vld [vmem:[%s10403_s15 + $0x44] ss:$16 sps:$4 sm:$0xff]   ;;  %v8194_v39 = vld [vmem:[%s10403_s15 + $0x40] ss:$16 sps:$4 sm:$0xff]  }
 0xe28   :  { %6595 = vmatprep.subr.bf16.mxu1 %v10016_v3  ;;  %v6823_v60 = vrot.slane %v6822_v29, 4 }
 0xe2a   :  { %v8155_v30 = vld [vmem:[#allocation3] ss:$16 sps:$4 sm:$0xff]   ;;  %v6824_v7 = vsel %vm10459_vm3, %v6823_v60, %v6822_v29 }
 0xe2b   :  { %6596 = vmatpush1.bf16.msra.mxu1 %v8154_v12  ;;  %v6771_v11 = vpop.permute.xlu1 %6770 }
 0xe2c   :  { %6597 = vmatprep.subr.bf16.mxu1 %v10016_v3  ;;  %v6518_v19 = vpop.permute.xlu0 %6517  ;;  %v6772_v22 = vrot.slane %v6771_v11, 4 }
 0xe2e   :  { %v8156_v32 = vld [vmem:[#allocation3 + $0x100] ss:$16 sps:$4 sm:$0xff]  }
 0xe2f   :  { %6598 = vmatpush1.bf16.msra.mxu1 %v8155_v30  ;;  %v6745_v54 = vpop.permute.xlu1 %6744 }
 0xe30   :  { %6613 = vmatprep.subr.bf16.mxu1 %v10016_v3  ;;  %v6796_v50 = vpop.permute.xlu0 %6795  ;;  %v6746_v47 = vrot.slane %v6745_v54, 4 }
 0xe31   :  { %v6797_v13 = vrot.slane %v6796_v50, 4 }
 0xe32   :  { %v6747_v26 = vsel %vm448_vm0, %v6746_v47, %v6745_v54 }
 0xe33   :  { %6614 = vmatpush2.bf16.msra.mxu1 %v8156_v32  ;;  %v6718_v28 = vpop.permute.xlu1 %6717  ;;  %v6798_v21 = vsel %vm3761_vm15, %v6797_v13, %v6796_v50 }
 0xe34   :  { %v6692_v1 = vpop.permute.xlu0 %6691  ;;  %v6719_v45 = vrot.slane %v6718_v28, 4  ;;  %7119 = vmatprep.subr.bf16.mxu1 %v8166_v52 }
 0xe35   :  { %v6693_v27 = vrot.slane %v6692_v1, 4 }
 0xe36   :  { %6616 = vmatmul.mubr.bf16.vlgmr.msra.gmra.mxu1 %v7629_v8  ;;  %v6720_v2 = vsel %vm425_vm5, %v6719_v45, %v6718_v28  ;;  %v8175_v45 = vld [vmem:[%s10403_s15 + $0xcc] ss:$16 sps:$4 sm:$0xff]  }
 0xe37   :  { %7151 = vmatprep.mubr.bf16.mxu1 %v10016_v3  ;;  %v6773_v3 = vsel %vm3797_vm10, %v6772_v22, %v6771_v11  ;;  %v6667_v53 = vpop.permute.xlu1 %6666  ;;  %v6694_v23 = vsel %vm10460_vm4, %v6693_v27, %v6692_v1  ;;  %7120 = vmatpush1.bf16.msra.mxu1 %v8164_v16  ;;  %v8218_v27 = vld [vmem:[#allocation2 + $0x48] sm:$0xff] }
 0xe38   :  { %v6641_v37 = vpop.permute.xlu0 %6640  ;;  %v6668_v24 = vrot.slane %v6667_v53, 4  ;;  %7121 = vmatprep.subr.bf16.mxu1 %v8172_v48 }
 0xe39   :  { %v6642_v34 = vrot.slane %v6641_v37, 4 }
 0xe3a   :  { %v6669_v17 = vsel %vm10461_vm6, %v6668_v24, %v6667_v53  ;;  %v8181_v53 = vld [vmem:[%s10403_s15 + $0xac] ss:$16 sps:$4 sm:$0xff]   ;;  %v8197_v24 = vld [vmem:[%s10403_s15 + $0x48] ss:$16 sps:$4 sm:$0xff]  }
 0xe3b   :  { %v6643_v41 = vsel %vm10462_vm2, %v6642_v34, %v6641_v37  ;;  %7122 = vmatpush1.bf16.msra.mxu1 %v8170_v61  ;;  %v8179_v37 = vld [vmem:[%s10403_s15 + $0xa8] ss:$16 sps:$4 sm:$0xff]   ;;  %v8202_v34 = vld [vmem:[%s10403_s15 + $0x24] ss:$16 sps:$4 sm:$0xff]  }
 0xe3c   :  { %7123 = vmatprep.subr.bf16.mxu1 %v8178_v15 }
 0xef6   :  { %v6617_v40 = vpop.f32.mrf.mxu1 }
 0xef7   :  { %v6618_v44 = vadd.f32 %v6617_v40, %v6518_v19 }
 0xef8   :  { %v6619_v36 = vpop.f32.mrf.mxu1 }
 0xef9   :  { %vm6623_vm11 = vcmp.ge.f32.partialorder %v6618_v44, 0.0  ;;  %v6624_v20 = vmul.f32 -0.2, %v6618_v44 }
 0xefa   :  { %v6620_v57 = vpop.f32.mrf.mxu1 }
 0xefb   :  { %v6625_v46 = vsel %vm6623_vm11, %v6618_v44, %v6624_v20 }
 0xefc   :  { %v6626_v9 = vpack.c.bf16 %v6625_v46, %v6625_v46  ;;  %v6621_v43 = vpop.f32.mrf.mxu1 }
 0xefe   :  { %6627 = vst [vmem:[#allocation2 + $0x18] sm:$0xf] %v6626_v9 }
 0xf05   :  { %v6732_v6 = vld [vmem:[#allocation2 + $0x18] sm:$0xff] }
 0xf06   :  { %v6730_v25 = vld [vmem:[#allocation2 + $0x18] sm:$0xf]  ;;  %v6826_v10 = vmul.bf16 %v6824_v7, %v6732_v6  ;;  %v6775_v0 = vmul.bf16 %v6773_v3, %v6732_v6  ;;  %v6749_v58 = vmul.bf16 %v6747_v26, %v6732_v6  ;;  %v6800_v49 = vmul.bf16 %v6798_v21, %v6732_v6  ;;  %v6834_v26 = vld [vmem:[%s10404_s11] sm:$0xf] }
 0xf07   :  { %6731 = vst [vmem:[#allocation3 + $0x40] sm:$0xf] %v6730_v25  ;;  %v6704_v35 = vld [vmem:[#allocation2 + $0x14] sm:$0xff] }
 0xf08   :  { %6828 = vrot.lane.b32.xlu0 %v6826_v10, %s8236_s30  ;;  %6777 = vrot.lane.b32.xlu1 %v6775_v0, %s8235_s4  ;;  %v6722_v59 = vmul.bf16 %v6720_v2, %v6704_v35  ;;  %v6696_v56 = vmul.bf16 %v6704_v35, %v6694_v23  ;;  %v6671_v63 = vmul.bf16 %v6704_v35, %v6669_v17  ;;  %v8169_v10 = vld [vmem:[%s10403_s15 + $0xec] ss:$16 sps:$4 sm:$0xff]   ;;  %v8167_v21 = vld [vmem:[%s10403_s15 + $0xe8] ss:$16 sps:$4 sm:$0xff]  }
 0xf09   :  { %v6645_v18 = vmul.bf16 %v6704_v35, %v6643_v41  ;;  %v8193_v35 = vld [vmem:[%s10403_s15 + $0x6c] ss:$16 sps:$4 sm:$0xff]   ;;  %v8191_v2 = vld [vmem:[%s10403_s15 + $0x68] ss:$16 sps:$4 sm:$0xff]   ;;  %v8208_v41 = vld [vmem:[%s10403_s15 + $0x4] ss:$16 sps:$4 sm:$0xff]  }
 0xf0a   :  { %v8199_v23 = vld [vmem:[%s10403_s15 + $0x4c] ss:$16 sps:$4 sm:$0xff]   ;;  %v8203_v17 = vld [vmem:[%s10403_s15 + $0x28] ss:$16 sps:$4 sm:$0xff]  }
 0xf0c   :  { %6751 = vrot.lane.b32.xlu1 %v6749_v58, %s10444_s28  ;;  %6802 = vrot.lane.b32.xlu0 %v6800_v49, %s8237_s23  ;;  %v8187_v58 = vld [vmem:[%s10403_s15 + $0x8c] ss:$16 sps:$4 sm:$0xff]   ;;  %v8185_v49 = vld [vmem:[%s10403_s15 + $0x88] ss:$16 sps:$4 sm:$0xff]  }
 0xf10   :  { %6724 = vrot.lane.b32.xlu1 %v6722_v59, %s10441_s24  ;;  %6698 = vrot.lane.b32.xlu0 %v6696_v56, %s8234_s1  ;;  %v8205_v59 = vld [vmem:[%s10403_s15 + $0x2c] ss:$16 sps:$4 sm:$0xff]   ;;  %v8200_v56 = vld [vmem:[%s10403_s15 + $0x20] ss:$16 sps:$4 sm:$0xff]  }
 0xf14   :  { %6673 = vrot.lane.b32.xlu1 %v6671_v63, %s8233_s20  ;;  %6647 = vrot.lane.b32.xlu0 %v6645_v18, %s10446_s21  ;;  %v8211_v63 = vld [vmem:[%s10403_s15 + $0xc] ss:$16 sps:$4 sm:$0xff]   ;;  %v8206_v18 = vld [vmem:[%s10403_s15] ss:$16 sps:$4 sm:$0xff]  }
 0xf18   :  { %6847 = vperm.xlu0 %7930, %v10051_v31   ;;  %v8176_v31 = vld [vmem:[%s10403_s15 + $0xa0] ss:$16 sps:$4 sm:$0xff]  }
 0xf19   :  { %7124 = vmatpush1.bf16.msra.mxu1 %v8176_v31 }
 0xf1a   :  { %7125 = vmatprep.subr.bf16.mxu1 %v8184_v62 }
 0xf1d   :  { %7126 = vmatpush1.bf16.msra.mxu1 %v8182_v38 }
 0xf1e   :  { %7127 = vmatprep.subr.bf16.mxu1 %v8190_v4 }
 0xf21   :  { %7128 = vmatpush1.bf16.msra.mxu1 %v8188_v55 }
 0xf22   :  { %7129 = vmatprep.subr.bf16.mxu1 %v8196_v14 }
 0xf25   :  { %7130 = vmatpush1.bf16.msra.mxu1 %v8194_v39 }
 0xf26   :  { %7131 = vmatprep.subr.bf16.mxu1 %v8202_v34 }
 0xf29   :  { %7132 = vmatpush1.bf16.msra.mxu1 %v8200_v56 }
 0xf2a   :  { %7133 = vmatprep.subr.bf16.mxu1 %v8208_v41 }
 0xf2d   :  { %7134 = vmatpush1.bf16.msra.mxu1 %v8206_v18 }
 0xf7a   :  { %v6778_v5 = vpop.permute.xlu1 %6777  ;;  %v6829_v51 = vpop.permute.xlu0 %6828 }
 0xf7b   :  { %v6779_v12 = vrot.slane %v6778_v5, 4  ;;  %v6830_v30 = vrot.slane %v6829_v51, 4 }
 0xf7d   :  { %v6780_v32 = vsel %vm10463_vm14, %v6778_v5, %v6779_v12  ;;  %v6831_v8 = vsel %vm10464_vm7, %v6829_v51, %v6830_v30 }
 0xf7e   :  { %6782 = vst [vmem:[#allocation3 + $0x60] sm:$0xf] %v6780_v32  ;;  %6833 = vst [vmem:[#allocation3 + $0x80] sm:$0xf] %v6831_v8  ;;  %v6752_v29 = vpop.permute.xlu1 %6751  ;;  %v6803_v19 = vpop.permute.xlu0 %6802 }
 0xf7f   :  { %v6753_v40 = vrot.slane %v6752_v29, 4  ;;  %v6804_v11 = vrot.slane %v6803_v19, 4 }
 0xf81   :  { %v6754_v44 = vsel %vm425_vm5, %v6752_v29, %v6753_v40  ;;  %v6805_v36 = vsel %vm10465_vm8, %v6803_v19, %v6804_v11  ;;  %vm10466_vm5 = vcmask 1043456  }
 0xf82   :  { %6756 = vst [vmem:[#allocation3 + $0x50] sm:$0xf] %v6754_v44  ;;  %6807 = vst [vmem:[#allocation3 + $0x70] sm:$0xf] %v6805_v36  ;;  %v6725_v20 = vpop.permute.xlu1 %6724  ;;  %v6699_v57 = vpop.permute.xlu0 %6698 }
 0xf83   :  { %v6726_v46 = vrot.slane %v6725_v20, 4  ;;  %v6700_v9 = vrot.slane %v6699_v57, 4 }
 0xf85   :  { %v6727_v43 = vsel %vm448_vm0, %v6725_v20, %v6726_v46  ;;  %v6701_v54 = vsel %vm3797_vm10, %v6699_v57, %v6700_v9  ;;  %v8159_v50 = vld [vmem:[#allocation3 + $0x80] ss:$0 sps:$4 sm:$0xff]   ;;  %vm10468_vm0 = vcmask 588800  }
 0xf86   :  { %6729 = vst [vmem:[#allocation3 + $0x30] sm:$0xf] %v6727_v43  ;;  %6703 = vst [vmem:[#allocation3 + $0x20] sm:$0xf] %v6701_v54  ;;  %v6674_v22 = vpop.permute.xlu1 %6673  ;;  %v6648_v60 = vpop.permute.xlu0 %6647  ;;  %v6881_v3 = vsel %vm10466_vm5, %v8159_v50, 0 }
 0xf87   :  { %v6675_v28 = vrot.slane %v6674_v22, 4  ;;  %v6649_v1 = vrot.slane %v6648_v60, 4  ;;  %7874 = vmatpush3.bf16.msra.mxu0 %v6881_v3 }
 0xf88   :  { %7875 = vmatprep.subr.bf16.mxu0 %v8247_v33 }
 0xf89   :  { %v6676_v47 = vsel %vm3761_vm15, %v6674_v22, %v6675_v28  ;;  %v6650_v13 = vsel %vm10467_vm12, %v6648_v60, %v6649_v1  ;;  %v8160_v6 = vld [vmem:[#allocation3 + $0x60] ss:$16 sps:$4 sm:$0xff]  }
 0xf8a   :  { %6678 = vst [vmem:[#allocation3 + $0x10] sm:$0xf] %v6676_v47  ;;  %6652 = vst [vmem:[#allocation3] sm:$0xf] %v6650_v13  ;;  %v8161_v25 = vld [vmem:[#allocation3 + $0x40] ss:$16 sps:$4 sm:$0xff]  }
 0xf8b   :  { %7876 = vmatpush3.bf16.msra.mxu0 %v8160_v6 }
 0xf8c   :  { %7877 = vmatprep.subr.bf16.mxu0 %v8247_v33 }
 0xf8d   :  { %v8162_v7 = vld [vmem:[#allocation3 + $0x20] ss:$16 sps:$4 sm:$0xff]  }
 0xf8f   :  { %7878 = vmatpush3.bf16.msra.mxu0 %v8161_v25 }
 0xf90   :  { %7879 = vmatprep.subr.bf16.mxu0 %v8247_v33 }
 0xf91   :  { %v8163_v0 = vld [vmem:[#allocation3] ss:$16 sps:$4 sm:$0xff]  }
 0xf93   :  { %7880 = vmatpush3.bf16.msra.mxu0 %v8162_v7  ;;  %v6848_v16 = vpop.permute.xlu0 %6847 }
 0xf94   :  { %7881 = vmatprep.subr.bf16.mxu0 %v8247_v33  ;;  %v8173_v33 = vld [vmem:[%s10403_s15 + $0xc8] ss:$16 sps:$4 sm:$0xff]  }
 0xf97   :  { %7882 = vmatpush3.bf16.msra.mxu0 %v8163_v0 }
 0xf98   :  { %7160 = vmatprep.subr.bf16.mxu0 %v8169_v10 }
 0xf9a   :  { %7884 = vmatmul.mubr.msk.bf16.vlgmr.msra.gmra.mxu0 %vm10468_vm0, %v6834_v26 }
 0xf9b   :  { %7161 = vmatpush1.bf16.msra.mxu0 %v8167_v21  ;;  %7192 = vmatprep.mubr.bf16.mxu0 %v8218_v27 }
 0xf9c   :  { %7162 = vmatprep.subr.bf16.mxu0 %v8175_v45 }
 0xf9f   :  { %7163 = vmatpush1.bf16.msra.mxu0 %v8173_v33 }
 0xfa0   :  { %7164 = vmatprep.subr.bf16.mxu0 %v8181_v53 }
 0xfa3   :  { %7165 = vmatpush1.bf16.msra.mxu0 %v8179_v37 }
 0xfa4   :  { %7166 = vmatprep.subr.bf16.mxu0 %v8187_v58 }
 0xfa7   :  { %7167 = vmatpush1.bf16.msra.mxu0 %v8185_v49 }
 0xfa8   :  { %7168 = vmatprep.subr.bf16.mxu0 %v8193_v35 }
 0xfab   :  { %7169 = vmatpush1.bf16.msra.mxu0 %v8191_v2 }
 0xfac   :  { %7170 = vmatprep.subr.bf16.mxu0 %v8199_v23 }
 0xfaf   :  { %7171 = vmatpush1.bf16.msra.mxu0 %v8197_v24 }
 0xfb0   :  { %7172 = vmatprep.subr.bf16.mxu0 %v8205_v59 }
 0xfb3   :  { %7173 = vmatpush1.bf16.msra.mxu0 %v8203_v17 }
 0xfb4   :  { %7174 = vmatprep.subr.bf16.mxu0 %v8211_v63 }
 0xfb7   :  { %7175 = vmatpush1.bf16.msra.mxu0 %v8209_v42 }
0x105a   :  { %v6917_v52 = vpop.f32.mrf.mxu0 }
0x105b   :  { %v6918_v48 = vadd.f32 %v6917_v52, %v6848_v16 }
0x105c   :  { %v7885_v61 = vpop.f32.mrf.mxu0 }
0x105d   :  { %vm6923_vm15 = vcmp.ge.f32.partialorder %v6918_v48, 0.0  ;;  %v6924_v15 = vmul.f32 -0.2, %v6918_v48 }
0x105e   :  { %v6920_v31 = vpop.f32.mrf.mxu0 }
0x105f   :  { %v6925_v62 = vsel %vm6923_vm15, %v6918_v48, %v6924_v15 }
0x1060   :  { %v6926_v38 = vpack.c.bf16 %v6925_v62, %v6925_v62  ;;  %v7886_v4 = vpop.f32.mrf.mxu0 }
0x1062   :  { %7152 = vmatmul.mubr.bf16.vlgmr.msra.gmra.mxu1 %v6926_v38  ;;  %7193 = vmatmul.mubr.bf16.vlgmr.msra.gmra.mxu0 %v6926_v38 }
0x1122   :  { %v7153_v55 = vpop.f32.mrf.mxu1  ;;  %v7194_v14 = vpop.f32.mrf.mxu0 }
0x1123   :  { %v7201_v39 = vpack.c.bf16 %v7153_v55, %v7153_v55  ;;  %v7203_v5 = vpack.c.bf16 %v7194_v14, %v7194_v14 }
0x1124   :  { %v7155_v51 = vpop.f32.mrf.mxu1  ;;  %v7196_v12 = vpop.f32.mrf.mxu0 }
0x1125   :  { %v7205_v30 = vunpack.c.l.bf16 %v7201_v39  ;;  %v7209_v32 = vunpack.c.l.bf16 %v7203_v5  ;;  %v7202_v8 = vpack.c.bf16 %v7155_v51, %v7155_v51  ;;  %v7204_v29 = vpack.c.bf16 %v7196_v12, %v7196_v12 }
0x1126   :  { %v7157_v19 = vpop.f32.mrf.mxu1  ;;  %v7198_v40 = vpop.f32.mrf.mxu0 }
0x1127   :  { %7207 = vst [vmem:[%s10405_s19] sm:$0xff] %v7205_v30  ;;  %7687 = vst [vmem:[%s10405_s19 + $0x10] sm:$0xff] %v7209_v32  ;;  %v7206_v11 = vunpack.c.l.bf16 %v7202_v8  ;;  %v7210_v44 = vunpack.c.l.bf16 %v7204_v29 }
0x1128   :  { %v7158_v36 = vpop.f32.mrf.mxu1  ;;  %v7199_v20 = vpop.f32.mrf.mxu0 }
0x1129   :  { %7208 = vst [vmem:[%s10405_s19 + $0x8] sm:$0xff] %v7206_v11  ;;  %7688 = vst [vmem:[%s10405_s19 + $0x18] sm:$0xff] %v7210_v44 }

</bundles_post_ra>
